<compile_context>
chip_gen: v6e
topology: v6e:2x2x1
jax: 0.10.0
libtpu: 0.0.40
codegen_flags: <defaults>
</compile_context>

<pallas_src>
import functools

import jax
import jax.numpy as jnp
from jax.experimental import pallas as pl
from jax.experimental.pallas import tpu as pltpu


def _cde_kernel(x0_ref, dx_ref, wmlp_ref, wio_ref, sel_ref, bias_ref, out_ref,
                *, T, F, H, E):
    """Batch-on-lanes CDE encoder. All activation tensors are (dim, tile)."""
    HF = H * F
    bf16, f32 = jnp.bfloat16, jnp.float32

    # --- static slices of the packed parameter blocks (loaded once, resident) ---
    w1t = wmlp_ref[0:H, :]                         # (H, H)   = W1^T   (bf16)
    w2t = wmlp_ref[H:2 * H, :]                     # (H, H)
    w3t = wmlp_ref[2 * H:3 * H, :]                 # (H, H)
    w4t = wmlp_ref[3 * H:3 * H + HF, :]            # (HF, H)  = W4^T
    wot = wmlp_ref[3 * H + HF:3 * H + HF + E, :]   # (E, H)   = Wout^T
    wit = wio_ref[0:H, :]                          # (H, F)   = Winit^T (f32)
    rpt = wio_ref[H:H + HF, :]                     # (HF, F)  replication matrix (f32)
    sel = sel_ref[...]                             # (H, HF)  group-sum matrix   (f32)

    # Biases pre-broadcast to (out_dim, tile) in the wrapper -> plain adds below.
    b_init = bias_ref[0:H, :]
    b1 = bias_ref[H:2 * H, :]
    b2 = bias_ref[2 * H:3 * H, :]
    b3 = bias_ref[3 * H:4 * H, :]
    b4 = bias_ref[4 * H:4 * H + HF, :]
    b_out = bias_ref[4 * H + HF:4 * H + HF + E, :]

    x0 = x0_ref[...]                                                    # (F, tile) f32
    z = jnp.dot(wit, x0, preferred_element_type=f32) + b_init           # (H, tile) f32

    # Time loop fully unrolled (T-1 fixed steps) so MXU / EUP(tanh) / VPU work
    # from adjacent steps can interleave.
    for t in range(T - 1):
        dx = dx_ref[t * F:(t + 1) * F, :]                               # (F, tile) f32, static slice
        h = jnp.maximum(
            jnp.dot(w1t, z.astype(bf16), preferred_element_type=f32) + b1, 0.0)
        h = jnp.maximum(
            jnp.dot(w2t, h.astype(bf16), preferred_element_type=f32) + b2, 0.0)
        h = jnp.maximum(
            jnp.dot(w3t, h.astype(bf16), preferred_element_type=f32) + b3, 0.0)
        f = jnp.tanh(
            jnp.dot(w4t, h.astype(bf16), preferred_element_type=f32) + b4)  # (HF, tile) f32
        # dz[h, n] = sum_i f[h*F+i, n] * dx[i, n]  via two small f32 matmuls
        # (avoids an in-kernel (HF, tile) -> (H, F, tile) reshape).
        dx_rep = jnp.dot(rpt, dx, preferred_element_type=f32)          # (HF, tile)
        dz = jnp.dot(sel, f * dx_rep, preferred_element_type=f32)      # (H, tile)
        z = z + dz

    # Lane-dense (E, tile) store; wrapper transposes back to (N, E).
    out_ref[...] = jnp.dot(wot, z.astype(bf16), preferred_element_type=f32) + b_out


def cde_encode(x_flat, params, *, tile=256):
    """x_flat: (N, T, F) float32 -> tokens (N, E) float32."""
    N, T, F = x_flat.shape
    H = params["w1"].shape[0]
    E = params["w_out"].shape[1]
    HF = H * F
    f32, bf16 = jnp.float32, jnp.bfloat16

    # Batch lives on the 128-lane axis; pad N up to a multiple of `tile`.
    # (v7x note: at production sizes pick `tile` so N_pad // tile is even so both
    #  TensorCores get grid work; padded tail columns are sliced off below.)
    N_pad = pl.cdiv(N, tile) * tile
    pad = N_pad - N

    # "Batch on lanes" input layout, with time deltas precomputed in plain JAX.
    dx = x_flat[:, 1:, :] - x_flat[:, :-1, :]                                  # (N, T-1, F)
    x0_t = jnp.pad(x_flat[:, 0, :].T, ((0, 0), (0, pad))).astype(f32)          # (F, N_pad)
    dx_t = jnp.pad(dx.reshape(N, (T - 1) * F).T, ((0, 0), (0, pad))).astype(f32)  # ((T-1)*F, N_pad)

    # Constant helper matrices for the dz contraction.
    rep_t = jnp.tile(jnp.eye(F, dtype=f32), (H, 1))                            # (HF, F): row h*F+i = e_i
    sel_t = jnp.kron(jnp.eye(H, dtype=f32), jnp.ones((1, F), f32))             # (H, HF): per-h group sum

    # Pack parameters: one bf16 pack for the MXU operands (transposed MLP/out
    # weights), one f32 pack for init/replication, biases pre-broadcast to the
    # lane width (hoists all broadcasts out of the kernel's time loop).
    w_mlp = jnp.concatenate(
        [params["w1"].T, params["w2"].T, params["w3"].T,
         params["w4"].T, params["w_out"].T], axis=0).astype(bf16)              # (3H+HF+E, H)
    w_io = jnp.concatenate([params["w_init"].T, rep_t], axis=0).astype(f32)    # (H+HF, F)
    bias = jnp.concatenate(
        [jnp.broadcast_to(params[k].T, (params[k].shape[1], tile))
         for k in ("b_init", "b1", "b2", "b3", "b4", "b_out")],
        axis=0).astype(f32)                                                    # (4H+HF+E, tile)

    kernel = functools.partial(_cde_kernel, T=T, F=F, H=H, E=E)

    out_t = pl.pallas_call(
        kernel,
        out_shape=jax.ShapeDtypeStruct((E, N_pad), f32),
        grid_spec=pltpu.PrefetchScalarGridSpec(
            num_scalar_prefetch=0,
            grid=(N_pad // tile,),
            in_specs=[
                pl.BlockSpec((F, tile), lambda i: (0, i)),             # x0 (batch on lanes)
                pl.BlockSpec(((T - 1) * F, tile), lambda i: (0, i)),   # flattened dx
                pl.BlockSpec(w_mlp.shape, lambda i: (0, 0)),           # packed bf16 weights
                pl.BlockSpec(w_io.shape, lambda i: (0, 0)),            # w_init + rep (f32)
                pl.BlockSpec(sel_t.shape, lambda i: (0, 0)),           # sel (f32)
                pl.BlockSpec(bias.shape, lambda i: (0, 0)),            # pre-broadcast biases
            ],
            out_specs=pl.BlockSpec((E, tile), lambda i: (0, i)),       # lane-dense output
        ),
        compiler_params=pltpu.CompilerParams(
            dimension_semantics=("parallel",),
            vmem_limit_bytes=32 * 1024 * 1024,   # generous headroom; actual use is a few MiB
        ),
    )(x0_t, dx_t, w_mlp, w_io, sel_t, bias)

    return out_t[:, :N].T                                              # (N, E)


def init_params(key, F, H, E):
    ks = jax.random.split(key, 12)

    def lin(kw, kb, d_in, d_out):
        scale = 1.0 / jnp.sqrt(jnp.float32(d_in))
        w = jax.random.uniform(kw, (d_in, d_out), jnp.float32, -scale, scale)
        b = jax.random.uniform(kb, (1, d_out), jnp.float32, -scale, scale)
        return w, b

    p = {}
    p["w_init"], p["b_init"] = lin(ks[0], ks[1], F, H)
    p["w1"], p["b1"] = lin(ks[2], ks[3], H, H)
    p["w2"], p["b2"] = lin(ks[4], ks[5], H, H)
    p["w3"], p["b3"] = lin(ks[6], ks[7], H, H)
    p["w4"], p["b4"] = lin(ks[8], ks[9], H, H * F)
    p["w_out"], p["b_out"] = lin(ks[10], ks[11], H, E)
    return p


def cde_encode_ref(x_flat, params):
    """Pure-JAX reference mirroring the kernel numerics (bf16 MXU operands for
    the MLP/output weights, f32 accumulation, f32 dz path & elementwise math)."""
    N, T, F = x_flat.shape
    H = params["w1"].shape[0]
    bf16, f32 = jnp.bfloat16, jnp.float32

    def mm_bf16(a, w):
        return jnp.dot(a.astype(bf16), w.astype(bf16), preferred_element_type=f32)

    z = jnp.dot(x_flat[:, 0, :], params["w_init"],
                preferred_element_type=f32) + params["b_init"]
    for t in range(T - 1):
        dx = x_flat[:, t + 1, :] - x_flat[:, t, :]
        h = jnp.maximum(mm_bf16(z, params["w1"]) + params["b1"], 0.0)
        h = jnp.maximum(mm_bf16(h, params["w2"]) + params["b2"], 0.0)
        h = jnp.maximum(mm_bf16(h, params["w3"]) + params["b3"], 0.0)
        f = jnp.tanh(mm_bf16(h, params["w4"]) + params["b4"]).reshape(N, H, F)
        z = z + jnp.einsum("nhf,nf->nh", f, dx)
    return mm_bf16(z, params["w_out"]) + params["b_out"]


if __name__ == "__main__":
    # Small shapes: batch=2, agents=8, seq=8, trajectory_feature_dim=8,
    # motion_encoder_hidden_dim=32, trajectory_embedding_dim=16.
    B, A, T, F = 2, 8, 8, 8
    H, E = 32, 16

    key = jax.random.PRNGKey(0)
    k_x, k_rg, k_tl, k_p = jax.random.split(key, 4)

    agent_trajectories = jax.random.normal(k_x, (B, A, T, F), jnp.float32)
    road_graph = jax.random.normal(k_rg, (B, 16, 8), jnp.float32)         # unused by forward
    traffic_light_state = jax.random.normal(k_tl, (B, 4), jnp.float32)    # unused by forward
    # TODO(synk): reference Encoder.forward never consumes road_graph /
    # traffic_light_state and has no return statement; we return the motion-encoder tokens.

    params = init_params(k_p, F, H, E)

    x_flat = agent_trajectories.reshape(B * A, T, F)      # glue reshape in plain JAX
    tokens = cde_encode(x_flat, params, tile=256)
    tokens = jax.block_until_ready(tokens)

    ref = cde_encode_ref(x_flat, params)
    assert tokens.shape == (B * A, E)
    # Tolerance covers bf16 rounding of MXU operands (accumulation stays f32).
    assert jnp.allclose(tokens, ref, atol=5e-3, rtol=5e-3), "mismatch vs pure-JAX reference"

    print("KERNEL_OK")
</pallas_src>

<mosaic_0001>
module attributes {stable_mosaic.version = 11 : i64} {
  func.func @_cde_kernel(%arg0: i32, %arg1: memref<8x256xf32, #tpu.memory_space<vmem>>, %arg2: memref<56x256xf32, #tpu.memory_space<vmem>>, %arg3: memref<368x32xbf16, #tpu.memory_space<vmem>>, %arg4: memref<288x8xf32, #tpu.memory_space<vmem>>, %arg5: memref<32x256xf32, #tpu.memory_space<vmem>>, %arg6: memref<400x256xf32, #tpu.memory_space<vmem>>, %arg7: memref<16x256xf32, #tpu.memory_space<vmem>>) attributes {dimension_semantics = [#tpu.dimension_semantics<parallel>], iteration_bounds = array<i64: 1>, scalar_prefetch = 0 : i64, scratch_operands = 0 : i64, tpu.core_type = #tpu.core_type<tc>, window_params = [{transform_indices = @transform_0, window_bounds = array<i64: 8, 256>}, {transform_indices = @transform_1, window_bounds = array<i64: 56, 256>}, {pipeline_mode = #tpu.pipeline_mode<synchronous>, transform_indices = @transform_2, window_bounds = array<i64: 368, 32>}, {pipeline_mode = #tpu.pipeline_mode<synchronous>, transform_indices = @transform_3, window_bounds = array<i64: 288, 8>}, {pipeline_mode = #tpu.pipeline_mode<synchronous>, transform_indices = @transform_4, window_bounds = array<i64: 32, 256>}, {pipeline_mode = #tpu.pipeline_mode<synchronous>, transform_indices = @transform_5, window_bounds = array<i64: 400, 256>}, {transform_indices = @transform_6, window_bounds = array<i64: 16, 256>}]} {
    %c0 = arith.constant 0 : index
    %c0_0 = arith.constant 0 : index
    %0 = vector.load %arg3[%c0, %c0_0] : memref<368x32xbf16, #tpu.memory_space<vmem>>, vector<32x32xbf16>
    %c32 = arith.constant 32 : index
    %c0_1 = arith.constant 0 : index
    %1 = vector.load %arg3[%c32, %c0_1] : memref<368x32xbf16, #tpu.memory_space<vmem>>, vector<32x32xbf16>
    %c64 = arith.constant 64 : index
    %c0_2 = arith.constant 0 : index
    %2 = vector.load %arg3[%c64, %c0_2] : memref<368x32xbf16, #tpu.memory_space<vmem>>, vector<32x32xbf16>
    %c96 = arith.constant 96 : index
    %c0_3 = arith.constant 0 : index
    %3 = vector.load %arg3[%c96, %c0_3] : memref<368x32xbf16, #tpu.memory_space<vmem>>, vector<256x32xbf16>
    %c352 = arith.constant 352 : index
    %c0_4 = arith.constant 0 : index
    %4 = vector.load %arg3[%c352, %c0_4] : memref<368x32xbf16, #tpu.memory_space<vmem>>, vector<16x32xbf16>
    %c0_5 = arith.constant 0 : index
    %c0_6 = arith.constant 0 : index
    %5 = vector.load %arg4[%c0_5, %c0_6] : memref<288x8xf32, #tpu.memory_space<vmem>>, vector<32x8xf32>
    %c32_7 = arith.constant 32 : index
    %c0_8 = arith.constant 0 : index
    %6 = vector.load %arg4[%c32_7, %c0_8] : memref<288x8xf32, #tpu.memory_space<vmem>>, vector<256x8xf32>
    %c0_9 = arith.constant 0 : index
    %c0_10 = arith.constant 0 : index
    %7 = vector.load %arg5[%c0_9, %c0_10] : memref<32x256xf32, #tpu.memory_space<vmem>>, vector<32x256xf32>
    %c0_11 = arith.constant 0 : index
    %c0_12 = arith.constant 0 : index
    %8 = vector.load %arg6[%c0_11, %c0_12] : memref<400x256xf32, #tpu.memory_space<vmem>>, vector<32x256xf32>
    %c32_13 = arith.constant 32 : index
    %c0_14 = arith.constant 0 : index
    %9 = vector.load %arg6[%c32_13, %c0_14] : memref<400x256xf32, #tpu.memory_space<vmem>>, vector<32x256xf32>
    %c64_15 = arith.constant 64 : index
    %c0_16 = arith.constant 0 : index
    %10 = vector.load %arg6[%c64_15, %c0_16] : memref<400x256xf32, #tpu.memory_space<vmem>>, vector<32x256xf32>
    %c96_17 = arith.constant 96 : index
    %c0_18 = arith.constant 0 : index
    %11 = vector.load %arg6[%c96_17, %c0_18] : memref<400x256xf32, #tpu.memory_space<vmem>>, vector<32x256xf32>
    %c128 = arith.constant 128 : index
    %c0_19 = arith.constant 0 : index
    %12 = vector.load %arg6[%c128, %c0_19] : memref<400x256xf32, #tpu.memory_space<vmem>>, vector<256x256xf32>
    %c384 = arith.constant 384 : index
    %c0_20 = arith.constant 0 : index
    %13 = vector.load %arg6[%c384, %c0_20] : memref<400x256xf32, #tpu.memory_space<vmem>>, vector<16x256xf32>
    %c0_21 = arith.constant 0 : index
    %c0_22 = arith.constant 0 : index
    %14 = vector.load %arg1[%c0_21, %c0_22] : memref<8x256xf32, #tpu.memory_space<vmem>>, vector<8x256xf32>
    %cst = arith.constant dense<0.000000e+00> : vector<32x256xf32>
    %15 = tpu.matmul %5, %14, %cst {dimension_numbers = #tpu.dot_dimension_numbers<[1], [0], [0], [1], [0, 0, 1, 1], [], []>} : vector<32x8xf32>, vector<8x256xf32>, vector<32x256xf32> -> vector<32x256xf32>
    %16 = arith.addf %15, %8 : vector<32x256xf32>
    %c0_23 = arith.constant 0 : index
    %c0_24 = arith.constant 0 : index
    %17 = vector.load %arg2[%c0_23, %c0_24] : memref<56x256xf32, #tpu.memory_space<vmem>>, vector<8x256xf32>
    %18 = arith.truncf %16 : vector<32x256xf32> to vector<32x256xbf16>
    %cst_25 = arith.constant dense<0.000000e+00> : vector<32x256xf32>
    %19 = tpu.matmul %0, %18, %cst_25 {dimension_numbers = #tpu.dot_dimension_numbers<[1], [0], [0], [1], [0, 0, 1, 1], [], []>} : vector<32x32xbf16>, vector<32x256xbf16>, vector<32x256xf32> -> vector<32x256xf32>
    %20 = arith.addf %19, %9 : vector<32x256xf32>
    %cst_26 = arith.constant 0.000000e+00 : f32
    %21 = vector.broadcast %cst_26 : f32 to vector<32x256xf32>
    %22 = arith.maximumf %20, %21 : vector<32x256xf32>
    %23 = arith.truncf %22 : vector<32x256xf32> to vector<32x256xbf16>
    %cst_27 = arith.constant dense<0.000000e+00> : vector<32x256xf32>
    %24 = tpu.matmul %1, %23, %cst_27 {dimension_numbers = #tpu.dot_dimension_numbers<[1], [0], [0], [1], [0, 0, 1, 1], [], []>} : vector<32x32xbf16>, vector<32x256xbf16>, vector<32x256xf32> -> vector<32x256xf32>
    %25 = arith.addf %24, %10 : vector<32x256xf32>
    %cst_28 = arith.constant 0.000000e+00 : f32
    %26 = vector.broadcast %cst_28 : f32 to vector<32x256xf32>
    %27 = arith.maximumf %25, %26 : vector<32x256xf32>
    %28 = arith.truncf %27 : vector<32x256xf32> to vector<32x256xbf16>
    %cst_29 = arith.constant dense<0.000000e+00> : vector<32x256xf32>
    %29 = tpu.matmul %2, %28, %cst_29 {dimension_numbers = #tpu.dot_dimension_numbers<[1], [0], [0], [1], [0, 0, 1, 1], [], []>} : vector<32x32xbf16>, vector<32x256xbf16>, vector<32x256xf32> -> vector<32x256xf32>
    %30 = arith.addf %29, %11 : vector<32x256xf32>
    %cst_30 = arith.constant 0.000000e+00 : f32
    %31 = vector.broadcast %cst_30 : f32 to vector<32x256xf32>
    %32 = arith.maximumf %30, %31 : vector<32x256xf32>
    %33 = arith.truncf %32 : vector<32x256xf32> to vector<32x256xbf16>
    %cst_31 = arith.constant dense<0.000000e+00> : vector<256x256xf32>
    %34 = tpu.matmul %3, %33, %cst_31 {dimension_numbers = #tpu.dot_dimension_numbers<[1], [0], [0], [1], [0, 0, 1, 1], [], []>} : vector<256x32xbf16>, vector<32x256xbf16>, vector<256x256xf32> -> vector<256x256xf32>
    %35 = arith.addf %34, %12 : vector<256x256xf32>
    %36 = math.tanh %35 : vector<256x256xf32>
    %cst_32 = arith.constant dense<0.000000e+00> : vector<256x256xf32>
    %37 = tpu.matmul %6, %17, %cst_32 {dimension_numbers = #tpu.dot_dimension_numbers<[1], [0], [0], [1], [0, 0, 1, 1], [], []>} : vector<256x8xf32>, vector<8x256xf32>, vector<256x256xf32> -> vector<256x256xf32>
    %38 = arith.mulf %36, %37 : vector<256x256xf32>
    %cst_33 = arith.constant dense<0.000000e+00> : vector<32x256xf32>
    %39 = tpu.matmul %7, %38, %cst_33 {dimension_numbers = #tpu.dot_dimension_numbers<[1], [0], [0], [1], [0, 0, 1, 1], [], []>} : vector<32x256xf32>, vector<256x256xf32>, vector<32x256xf32> -> vector<32x256xf32>
    %40 = arith.addf %16, %39 : vector<32x256xf32>
    %c8 = arith.constant 8 : index
    %c0_34 = arith.constant 0 : index
    %41 = vector.load %arg2[%c8, %c0_34] : memref<56x256xf32, #tpu.memory_space<vmem>>, vector<8x256xf32>
    %42 = arith.truncf %40 : vector<32x256xf32> to vector<32x256xbf16>
    %cst_35 = arith.constant dense<0.000000e+00> : vector<32x256xf32>
    %43 = tpu.matmul %0, %42, %cst_35 {dimension_numbers = #tpu.dot_dimension_numbers<[1], [0], [0], [1], [0, 0, 1, 1], [], []>} : vector<32x32xbf16>, vector<32x256xbf16>, vector<32x256xf32> -> vector<32x256xf32>
    %44 = arith.addf %43, %9 : vector<32x256xf32>
    %cst_36 = arith.constant 0.000000e+00 : f32
    %45 = vector.broadcast %cst_36 : f32 to vector<32x256xf32>
    %46 = arith.maximumf %44, %45 : vector<32x256xf32>
    %47 = arith.truncf %46 : vector<32x256xf32> to vector<32x256xbf16>
    %cst_37 = arith.constant dense<0.000000e+00> : vector<32x256xf32>
    %48 = tpu.matmul %1, %47, %cst_37 {dimension_numbers = #tpu.dot_dimension_numbers<[1], [0], [0], [1], [0, 0, 1, 1], [], []>} : vector<32x32xbf16>, vector<32x256xbf16>, vector<32x256xf32> -> vector<32x256xf32>
    %49 = arith.addf %48, %10 : vector<32x256xf32>
    %cst_38 = arith.constant 0.000000e+00 : f32
    %50 = vector.broadcast %cst_38 : f32 to vector<32x256xf32>
    %51 = arith.maximumf %49, %50 : vector<32x256xf32>
    %52 = arith.truncf %51 : vector<32x256xf32> to vector<32x256xbf16>
    %cst_39 = arith.constant dense<0.000000e+00> : vector<32x256xf32>
    %53 = tpu.matmul %2, %52, %cst_39 {dimension_numbers = #tpu.dot_dimension_numbers<[1], [0], [0], [1], [0, 0, 1, 1], [], []>} : vector<32x32xbf16>, vector<32x256xbf16>, vector<32x256xf32> -> vector<32x256xf32>
    %54 = arith.addf %53, %11 : vector<32x256xf32>
    %cst_40 = arith.constant 0.000000e+00 : f32
    %55 = vector.broadcast %cst_40 : f32 to vector<32x256xf32>
    %56 = arith.maximumf %54, %55 : vector<32x256xf32>
    %57 = arith.truncf %56 : vector<32x256xf32> to vector<32x256xbf16>
    %cst_41 = arith.constant dense<0.000000e+00> : vector<256x256xf32>
    %58 = tpu.matmul %3, %57, %cst_41 {dimension_numbers = #tpu.dot_dimension_numbers<[1], [0], [0], [1], [0, 0, 1, 1], [], []>} : vector<256x32xbf16>, vector<32x256xbf16>, vector<256x256xf32> -> vector<256x256xf32>
    %59 = arith.addf %58, %12 : vector<256x256xf32>
    %60 = math.tanh %59 : vector<256x256xf32>
    %cst_42 = arith.constant dense<0.000000e+00> : vector<256x256xf32>
    %61 = tpu.matmul %6, %41, %cst_42 {dimension_numbers = #tpu.dot_dimension_numbers<[1], [0], [0], [1], [0, 0, 1, 1], [], []>} : vector<256x8xf32>, vector<8x256xf32>, vector<256x256xf32> -> vector<256x256xf32>
    %62 = arith.mulf %60, %61 : vector<256x256xf32>
    %cst_43 = arith.constant dense<0.000000e+00> : vector<32x256xf32>
    %63 = tpu.matmul %7, %62, %cst_43 {dimension_numbers = #tpu.dot_dimension_numbers<[1], [0], [0], [1], [0, 0, 1, 1], [], []>} : vector<32x256xf32>, vector<256x256xf32>, vector<32x256xf32> -> vector<32x256xf32>
    %64 = arith.addf %40, %63 : vector<32x256xf32>
    %c16 = arith.constant 16 : index
    %c0_44 = arith.constant 0 : index
    %65 = vector.load %arg2[%c16, %c0_44] : memref<56x256xf32, #tpu.memory_space<vmem>>, vector<8x256xf32>
    %66 = arith.truncf %64 : vector<32x256xf32> to vector<32x256xbf16>
    %cst_45 = arith.constant dense<0.000000e+00> : vector<32x256xf32>
    %67 = tpu.matmul %0, %66, %cst_45 {dimension_numbers = #tpu.dot_dimension_numbers<[1], [0], [0], [1], [0, 0, 1, 1], [], []>} : vector<32x32xbf16>, vector<32x256xbf16>, vector<32x256xf32> -> vector<32x256xf32>
    %68 = arith.addf %67, %9 : vector<32x256xf32>
    %cst_46 = arith.constant 0.000000e+00 : f32
    %69 = vector.broadcast %cst_46 : f32 to vector<32x256xf32>
    %70 = arith.maximumf %68, %69 : vector<32x256xf32>
    %71 = arith.truncf %70 : vector<32x256xf32> to vector<32x256xbf16>
    %cst_47 = arith.constant dense<0.000000e+00> : vector<32x256xf32>
    %72 = tpu.matmul %1, %71, %cst_47 {dimension_numbers = #tpu.dot_dimension_numbers<[1], [0], [0], [1], [0, 0, 1, 1], [], []>} : vector<32x32xbf16>, vector<32x256xbf16>, vector<32x256xf32> -> vector<32x256xf32>
    %73 = arith.addf %72, %10 : vector<32x256xf32>
    %cst_48 = arith.constant 0.000000e+00 : f32
    %74 = vector.broadcast %cst_48 : f32 to vector<32x256xf32>
    %75 = arith.maximumf %73, %74 : vector<32x256xf32>
    %76 = arith.truncf %75 : vector<32x256xf32> to vector<32x256xbf16>
    %cst_49 = arith.constant dense<0.000000e+00> : vector<32x256xf32>
    %77 = tpu.matmul %2, %76, %cst_49 {dimension_numbers = #tpu.dot_dimension_numbers<[1], [0], [0], [1], [0, 0, 1, 1], [], []>} : vector<32x32xbf16>, vector<32x256xbf16>, vector<32x256xf32> -> vector<32x256xf32>
    %78 = arith.addf %77, %11 : vector<32x256xf32>
    %cst_50 = arith.constant 0.000000e+00 : f32
    %79 = vector.broadcast %cst_50 : f32 to vector<32x256xf32>
    %80 = arith.maximumf %78, %79 : vector<32x256xf32>
    %81 = arith.truncf %80 : vector<32x256xf32> to vector<32x256xbf16>
    %cst_51 = arith.constant dense<0.000000e+00> : vector<256x256xf32>
    %82 = tpu.matmul %3, %81, %cst_51 {dimension_numbers = #tpu.dot_dimension_numbers<[1], [0], [0], [1], [0, 0, 1, 1], [], []>} : vector<256x32xbf16>, vector<32x256xbf16>, vector<256x256xf32> -> vector<256x256xf32>
    %83 = arith.addf %82, %12 : vector<256x256xf32>
    %84 = math.tanh %83 : vector<256x256xf32>
    %cst_52 = arith.constant dense<0.000000e+00> : vector<256x256xf32>
    %85 = tpu.matmul %6, %65, %cst_52 {dimension_numbers = #tpu.dot_dimension_numbers<[1], [0], [0], [1], [0, 0, 1, 1], [], []>} : vector<256x8xf32>, vector<8x256xf32>, vector<256x256xf32> -> vector<256x256xf32>
    %86 = arith.mulf %84, %85 : vector<256x256xf32>
    %cst_53 = arith.constant dense<0.000000e+00> : vector<32x256xf32>
    %87 = tpu.matmul %7, %86, %cst_53 {dimension_numbers = #tpu.dot_dimension_numbers<[1], [0], [0], [1], [0, 0, 1, 1], [], []>} : vector<32x256xf32>, vector<256x256xf32>, vector<32x256xf32> -> vector<32x256xf32>
    %88 = arith.addf %64, %87 : vector<32x256xf32>
    %c24 = arith.constant 24 : index
    %c0_54 = arith.constant 0 : index
    %89 = vector.load %arg2[%c24, %c0_54] : memref<56x256xf32, #tpu.memory_space<vmem>>, vector<8x256xf32>
    %90 = arith.truncf %88 : vector<32x256xf32> to vector<32x256xbf16>
    %cst_55 = arith.constant dense<0.000000e+00> : vector<32x256xf32>
    %91 = tpu.matmul %0, %90, %cst_55 {dimension_numbers = #tpu.dot_dimension_numbers<[1], [0], [0], [1], [0, 0, 1, 1], [], []>} : vector<32x32xbf16>, vector<32x256xbf16>, vector<32x256xf32> -> vector<32x256xf32>
    %92 = arith.addf %91, %9 : vector<32x256xf32>
    %cst_56 = arith.constant 0.000000e+00 : f32
    %93 = vector.broadcast %cst_56 : f32 to vector<32x256xf32>
    %94 = arith.maximumf %92, %93 : vector<32x256xf32>
    %95 = arith.truncf %94 : vector<32x256xf32> to vector<32x256xbf16>
    %cst_57 = arith.constant dense<0.000000e+00> : vector<32x256xf32>
    %96 = tpu.matmul %1, %95, %cst_57 {dimension_numbers = #tpu.dot_dimension_numbers<[1], [0], [0], [1], [0, 0, 1, 1], [], []>} : vector<32x32xbf16>, vector<32x256xbf16>, vector<32x256xf32> -> vector<32x256xf32>
    %97 = arith.addf %96, %10 : vector<32x256xf32>
    %cst_58 = arith.constant 0.000000e+00 : f32
    %98 = vector.broadcast %cst_58 : f32 to vector<32x256xf32>
    %99 = arith.maximumf %97, %98 : vector<32x256xf32>
    %100 = arith.truncf %99 : vector<32x256xf32> to vector<32x256xbf16>
    %cst_59 = arith.constant dense<0.000000e+00> : vector<32x256xf32>
    %101 = tpu.matmul %2, %100, %cst_59 {dimension_numbers = #tpu.dot_dimension_numbers<[1], [0], [0], [1], [0, 0, 1, 1], [], []>} : vector<32x32xbf16>, vector<32x256xbf16>, vector<32x256xf32> -> vector<32x256xf32>
    %102 = arith.addf %101, %11 : vector<32x256xf32>
    %cst_60 = arith.constant 0.000000e+00 : f32
    %103 = vector.broadcast %cst_60 : f32 to vector<32x256xf32>
    %104 = arith.maximumf %102, %103 : vector<32x256xf32>
    %105 = arith.truncf %104 : vector<32x256xf32> to vector<32x256xbf16>
    %cst_61 = arith.constant dense<0.000000e+00> : vector<256x256xf32>
    %106 = tpu.matmul %3, %105, %cst_61 {dimension_numbers = #tpu.dot_dimension_numbers<[1], [0], [0], [1], [0, 0, 1, 1], [], []>} : vector<256x32xbf16>, vector<32x256xbf16>, vector<256x256xf32> -> vector<256x256xf32>
    %107 = arith.addf %106, %12 : vector<256x256xf32>
    %108 = math.tanh %107 : vector<256x256xf32>
    %cst_62 = arith.constant dense<0.000000e+00> : vector<256x256xf32>
    %109 = tpu.matmul %6, %89, %cst_62 {dimension_numbers = #tpu.dot_dimension_numbers<[1], [0], [0], [1], [0, 0, 1, 1], [], []>} : vector<256x8xf32>, vector<8x256xf32>, vector<256x256xf32> -> vector<256x256xf32>
    %110 = arith.mulf %108, %109 : vector<256x256xf32>
    %cst_63 = arith.constant dense<0.000000e+00> : vector<32x256xf32>
    %111 = tpu.matmul %7, %110, %cst_63 {dimension_numbers = #tpu.dot_dimension_numbers<[1], [0], [0], [1], [0, 0, 1, 1], [], []>} : vector<32x256xf32>, vector<256x256xf32>, vector<32x256xf32> -> vector<32x256xf32>
    %112 = arith.addf %88, %111 : vector<32x256xf32>
    %c32_64 = arith.constant 32 : index
    %c0_65 = arith.constant 0 : index
    %113 = vector.load %arg2[%c32_64, %c0_65] : memref<56x256xf32, #tpu.memory_space<vmem>>, vector<8x256xf32>
    %114 = arith.truncf %112 : vector<32x256xf32> to vector<32x256xbf16>
    %cst_66 = arith.constant dense<0.000000e+00> : vector<32x256xf32>
    %115 = tpu.matmul %0, %114, %cst_66 {dimension_numbers = #tpu.dot_dimension_numbers<[1], [0], [0], [1], [0, 0, 1, 1], [], []>} : vector<32x32xbf16>, vector<32x256xbf16>, vector<32x256xf32> -> vector<32x256xf32>
    %116 = arith.addf %115, %9 : vector<32x256xf32>
    %cst_67 = arith.constant 0.000000e+00 : f32
    %117 = vector.broadcast %cst_67 : f32 to vector<32x256xf32>
    %118 = arith.maximumf %116, %117 : vector<32x256xf32>
    %119 = arith.truncf %118 : vector<32x256xf32> to vector<32x256xbf16>
    %cst_68 = arith.constant dense<0.000000e+00> : vector<32x256xf32>
    %120 = tpu.matmul %1, %119, %cst_68 {dimension_numbers = #tpu.dot_dimension_numbers<[1], [0], [0], [1], [0, 0, 1, 1], [], []>} : vector<32x32xbf16>, vector<32x256xbf16>, vector<32x256xf32> -> vector<32x256xf32>
    %121 = arith.addf %120, %10 : vector<32x256xf32>
    %cst_69 = arith.constant 0.000000e+00 : f32
    %122 = vector.broadcast %cst_69 : f32 to vector<32x256xf32>
    %123 = arith.maximumf %121, %122 : vector<32x256xf32>
    %124 = arith.truncf %123 : vector<32x256xf32> to vector<32x256xbf16>
    %cst_70 = arith.constant dense<0.000000e+00> : vector<32x256xf32>
    %125 = tpu.matmul %2, %124, %cst_70 {dimension_numbers = #tpu.dot_dimension_numbers<[1], [0], [0], [1], [0, 0, 1, 1], [], []>} : vector<32x32xbf16>, vector<32x256xbf16>, vector<32x256xf32> -> vector<32x256xf32>
    %126 = arith.addf %125, %11 : vector<32x256xf32>
    %cst_71 = arith.constant 0.000000e+00 : f32
    %127 = vector.broadcast %cst_71 : f32 to vector<32x256xf32>
    %128 = arith.maximumf %126, %127 : vector<32x256xf32>
    %129 = arith.truncf %128 : vector<32x256xf32> to vector<32x256xbf16>
    %cst_72 = arith.constant dense<0.000000e+00> : vector<256x256xf32>
    %130 = tpu.matmul %3, %129, %cst_72 {dimension_numbers = #tpu.dot_dimension_numbers<[1], [0], [0], [1], [0, 0, 1, 1], [], []>} : vector<256x32xbf16>, vector<32x256xbf16>, vector<256x256xf32> -> vector<256x256xf32>
    %131 = arith.addf %130, %12 : vector<256x256xf32>
    %132 = math.tanh %131 : vector<256x256xf32>
    %cst_73 = arith.constant dense<0.000000e+00> : vector<256x256xf32>
    %133 = tpu.matmul %6, %113, %cst_73 {dimension_numbers = #tpu.dot_dimension_numbers<[1], [0], [0], [1], [0, 0, 1, 1], [], []>} : vector<256x8xf32>, vector<8x256xf32>, vector<256x256xf32> -> vector<256x256xf32>
    %134 = arith.mulf %132, %133 : vector<256x256xf32>
    %cst_74 = arith.constant dense<0.000000e+00> : vector<32x256xf32>
    %135 = tpu.matmul %7, %134, %cst_74 {dimension_numbers = #tpu.dot_dimension_numbers<[1], [0], [0], [1], [0, 0, 1, 1], [], []>} : vector<32x256xf32>, vector<256x256xf32>, vector<32x256xf32> -> vector<32x256xf32>
    %136 = arith.addf %112, %135 : vector<32x256xf32>
    %c40 = arith.constant 40 : index
    %c0_75 = arith.constant 0 : index
    %137 = vector.load %arg2[%c40, %c0_75] : memref<56x256xf32, #tpu.memory_space<vmem>>, vector<8x256xf32>
    %138 = arith.truncf %136 : vector<32x256xf32> to vector<32x256xbf16>
    %cst_76 = arith.constant dense<0.000000e+00> : vector<32x256xf32>
    %139 = tpu.matmul %0, %138, %cst_76 {dimension_numbers = #tpu.dot_dimension_numbers<[1], [0], [0], [1], [0, 0, 1, 1], [], []>} : vector<32x32xbf16>, vector<32x256xbf16>, vector<32x256xf32> -> vector<32x256xf32>
    %140 = arith.addf %139, %9 : vector<32x256xf32>
    %cst_77 = arith.constant 0.000000e+00 : f32
    %141 = vector.broadcast %cst_77 : f32 to vector<32x256xf32>
    %142 = arith.maximumf %140, %141 : vector<32x256xf32>
    %143 = arith.truncf %142 : vector<32x256xf32> to vector<32x256xbf16>
    %cst_78 = arith.constant dense<0.000000e+00> : vector<32x256xf32>
    %144 = tpu.matmul %1, %143, %cst_78 {dimension_numbers = #tpu.dot_dimension_numbers<[1], [0], [0], [1], [0, 0, 1, 1], [], []>} : vector<32x32xbf16>, vector<32x256xbf16>, vector<32x256xf32> -> vector<32x256xf32>
    %145 = arith.addf %144, %10 : vector<32x256xf32>
    %cst_79 = arith.constant 0.000000e+00 : f32
    %146 = vector.broadcast %cst_79 : f32 to vector<32x256xf32>
    %147 = arith.maximumf %145, %146 : vector<32x256xf32>
    %148 = arith.truncf %147 : vector<32x256xf32> to vector<32x256xbf16>
    %cst_80 = arith.constant dense<0.000000e+00> : vector<32x256xf32>
    %149 = tpu.matmul %2, %148, %cst_80 {dimension_numbers = #tpu.dot_dimension_numbers<[1], [0], [0], [1], [0, 0, 1, 1], [], []>} : vector<32x32xbf16>, vector<32x256xbf16>, vector<32x256xf32> -> vector<32x256xf32>
    %150 = arith.addf %149, %11 : vector<32x256xf32>
    %cst_81 = arith.constant 0.000000e+00 : f32
    %151 = vector.broadcast %cst_81 : f32 to vector<32x256xf32>
    %152 = arith.maximumf %150, %151 : vector<32x256xf32>
    %153 = arith.truncf %152 : vector<32x256xf32> to vector<32x256xbf16>
    %cst_82 = arith.constant dense<0.000000e+00> : vector<256x256xf32>
    %154 = tpu.matmul %3, %153, %cst_82 {dimension_numbers = #tpu.dot_dimension_numbers<[1], [0], [0], [1], [0, 0, 1, 1], [], []>} : vector<256x32xbf16>, vector<32x256xbf16>, vector<256x256xf32> -> vector<256x256xf32>
    %155 = arith.addf %154, %12 : vector<256x256xf32>
    %156 = math.tanh %155 : vector<256x256xf32>
    %cst_83 = arith.constant dense<0.000000e+00> : vector<256x256xf32>
    %157 = tpu.matmul %6, %137, %cst_83 {dimension_numbers = #tpu.dot_dimension_numbers<[1], [0], [0], [1], [0, 0, 1, 1], [], []>} : vector<256x8xf32>, vector<8x256xf32>, vector<256x256xf32> -> vector<256x256xf32>
    %158 = arith.mulf %156, %157 : vector<256x256xf32>
    %cst_84 = arith.constant dense<0.000000e+00> : vector<32x256xf32>
    %159 = tpu.matmul %7, %158, %cst_84 {dimension_numbers = #tpu.dot_dimension_numbers<[1], [0], [0], [1], [0, 0, 1, 1], [], []>} : vector<32x256xf32>, vector<256x256xf32>, vector<32x256xf32> -> vector<32x256xf32>
    %160 = arith.addf %136, %159 : vector<32x256xf32>
    %c48 = arith.constant 48 : index
    %c0_85 = arith.constant 0 : index
    %161 = vector.load %arg2[%c48, %c0_85] : memref<56x256xf32, #tpu.memory_space<vmem>>, vector<8x256xf32>
    %162 = arith.truncf %160 : vector<32x256xf32> to vector<32x256xbf16>
    %cst_86 = arith.constant dense<0.000000e+00> : vector<32x256xf32>
    %163 = tpu.matmul %0, %162, %cst_86 {dimension_numbers = #tpu.dot_dimension_numbers<[1], [0], [0], [1], [0, 0, 1, 1], [], []>} : vector<32x32xbf16>, vector<32x256xbf16>, vector<32x256xf32> -> vector<32x256xf32>
    %164 = arith.addf %163, %9 : vector<32x256xf32>
    %cst_87 = arith.constant 0.000000e+00 : f32
    %165 = vector.broadcast %cst_87 : f32 to vector<32x256xf32>
    %166 = arith.maximumf %164, %165 : vector<32x256xf32>
    %167 = arith.truncf %166 : vector<32x256xf32> to vector<32x256xbf16>
    %cst_88 = arith.constant dense<0.000000e+00> : vector<32x256xf32>
    %168 = tpu.matmul %1, %167, %cst_88 {dimension_numbers = #tpu.dot_dimension_numbers<[1], [0], [0], [1], [0, 0, 1, 1], [], []>} : vector<32x32xbf16>, vector<32x256xbf16>, vector<32x256xf32> -> vector<32x256xf32>
    %169 = arith.addf %168, %10 : vector<32x256xf32>
    %cst_89 = arith.constant 0.000000e+00 : f32
    %170 = vector.broadcast %cst_89 : f32 to vector<32x256xf32>
    %171 = arith.maximumf %169, %170 : vector<32x256xf32>
    %172 = arith.truncf %171 : vector<32x256xf32> to vector<32x256xbf16>
    %cst_90 = arith.constant dense<0.000000e+00> : vector<32x256xf32>
    %173 = tpu.matmul %2, %172, %cst_90 {dimension_numbers = #tpu.dot_dimension_numbers<[1], [0], [0], [1], [0, 0, 1, 1], [], []>} : vector<32x32xbf16>, vector<32x256xbf16>, vector<32x256xf32> -> vector<32x256xf32>
    %174 = arith.addf %173, %11 : vector<32x256xf32>
    %cst_91 = arith.constant 0.000000e+00 : f32
    %175 = vector.broadcast %cst_91 : f32 to vector<32x256xf32>
    %176 = arith.maximumf %174, %175 : vector<32x256xf32>
    %177 = arith.truncf %176 : vector<32x256xf32> to vector<32x256xbf16>
    %cst_92 = arith.constant dense<0.000000e+00> : vector<256x256xf32>
    %178 = tpu.matmul %3, %177, %cst_92 {dimension_numbers = #tpu.dot_dimension_numbers<[1], [0], [0], [1], [0, 0, 1, 1], [], []>} : vector<256x32xbf16>, vector<32x256xbf16>, vector<256x256xf32> -> vector<256x256xf32>
    %179 = arith.addf %178, %12 : vector<256x256xf32>
    %180 = math.tanh %179 : vector<256x256xf32>
    %cst_93 = arith.constant dense<0.000000e+00> : vector<256x256xf32>
    %181 = tpu.matmul %6, %161, %cst_93 {dimension_numbers = #tpu.dot_dimension_numbers<[1], [0], [0], [1], [0, 0, 1, 1], [], []>} : vector<256x8xf32>, vector<8x256xf32>, vector<256x256xf32> -> vector<256x256xf32>
    %182 = arith.mulf %180, %181 : vector<256x256xf32>
    %cst_94 = arith.constant dense<0.000000e+00> : vector<32x256xf32>
    %183 = tpu.matmul %7, %182, %cst_94 {dimension_numbers = #tpu.dot_dimension_numbers<[1], [0], [0], [1], [0, 0, 1, 1], [], []>} : vector<32x256xf32>, vector<256x256xf32>, vector<32x256xf32> -> vector<32x256xf32>
    %184 = arith.addf %160, %183 : vector<32x256xf32>
    %185 = arith.truncf %184 : vector<32x256xf32> to vector<32x256xbf16>
    %cst_95 = arith.constant dense<0.000000e+00> : vector<16x256xf32>
    %186 = tpu.matmul %4, %185, %cst_95 {dimension_numbers = #tpu.dot_dimension_numbers<[1], [0], [0], [1], [0, 0, 1, 1], [], []>} : vector<16x32xbf16>, vector<32x256xbf16>, vector<16x256xf32> -> vector<16x256xf32>
    %187 = arith.addf %186, %13 : vector<16x256xf32>
    %c0_96 = arith.constant 0 : index
    %c0_97 = arith.constant 0 : index
    %188 = vector.load %arg7[%c0_96, %c0_97] : memref<16x256xf32, #tpu.memory_space<vmem>>, vector<16x256xf32>
    tpu.vector_store %arg7[%c0_96, %c0_97], %187 {strides = array<i32>} : memref<16x256xf32, #tpu.memory_space<vmem>>, vector<16x256xf32>,
    return
  }
  func.func @transform_0(%arg0: i32) -> (i32, i32) {
    %c0_i32 = arith.constant 0 : i32
    %c0_i32_0 = arith.constant 0 : i32
    return %c0_i32, %arg0 : i32, i32
  }
  func.func @transform_1(%arg0: i32) -> (i32, i32) {
    %c0_i32 = arith.constant 0 : i32
    %c0_i32_0 = arith.constant 0 : i32
    return %c0_i32, %arg0 : i32, i32
  }
  func.func @transform_2(%arg0: i32) -> (i32, i32) {
    %c0_i32 = arith.constant 0 : i32
    %c0_i32_0 = arith.constant 0 : i32
    %c0_i32_1 = arith.constant 0 : i32
    return %c0_i32, %c0_i32_0 : i32, i32
  }
  func.func @transform_3(%arg0: i32) -> (i32, i32) {
    %c0_i32 = arith.constant 0 : i32
    %c0_i32_0 = arith.constant 0 : i32
    %c0_i32_1 = arith.constant 0 : i32
    return %c0_i32, %c0_i32_0 : i32, i32
  }
  func.func @transform_4(%arg0: i32) -> (i32, i32) {
    %c0_i32 = arith.constant 0 : i32
    %c0_i32_0 = arith.constant 0 : i32
    %c0_i32_1 = arith.constant 0 : i32
    return %c0_i32, %c0_i32_0 : i32, i32
  }
  func.func @transform_5(%arg0: i32) -> (i32, i32) {
    %c0_i32 = arith.constant 0 : i32
    %c0_i32_0 = arith.constant 0 : i32
    %c0_i32_1 = arith.constant 0 : i32
    return %c0_i32, %c0_i32_0 : i32, i32
  }
  func.func @transform_6(%arg0: i32) -> (i32, i32) {
    %c0_i32 = arith.constant 0 : i32
    %c0_i32_0 = arith.constant 0 : i32
    return %c0_i32, %arg0 : i32, i32
  }
}

</mosaic_0001>

<bundles_post_ra>
// kernel: tpu_custom_call.1
= control target key start
LH: loop header
LB: loop body
LE: loop exit
PB: predicated region body
PF: predicated region fallthrough
CT: control target
= control target key end

     0   :  { %11 = vsyncpa [#allocation3], 0  ;;  %s13621_s0 = inlined_call_operand.vmem [shape: f32[8,256], index: 0, kind: input, shape index: {}]   ;;  %s13622_s1 = inlined_call_operand.vmem [shape: f32[56,256], index: 1, kind: input, shape index: {}]   ;;  %s13623_s2 = inlined_call_operand.vmem [shape: bf16[368,32], index: 2, kind: input, shape index: {}]   ;;  %s13624_s3 = inlined_call_operand.vmem [shape: f32[288,8], index: 3, kind: input, shape index: {}]   ;;  %s13625_s4 = inlined_call_operand.vmem [shape: f32[32,256], index: 4, kind: input, shape index: {}]   ;;  %s13626_s5 = inlined_call_operand.hbm [shape: f32[400,256], index: 5, kind: input, shape index: {}]   ;;  %s13627_s6 = inlined_call_operand.hbm [shape: f32[16,256], index: 6, kind: output, shape index: {}]  }
   0x1   :  { %12 = vsyncpa [#allocation4], 0  ;;  %s9089_s21 = smov [#allocation2]  }
   0x2   :  { %s28_s22 = sshll.u32 %s9089_s21, 4  ;;  %s29_s22 = int_to_ptr.vmem [resolvable:$true] %s28_s22 }
   0x3   :  { %s9053_s23 = scalar_lea.vmem %s29_s22, 12800  ;;  %p9058_p1 = scmp.lt.s32.totalorder %s29_s22, %s29_s22 }
   0x4   :  { %p9054_p0 = scmp.ne.s32.totalorder %s29_s22, %s9053_s23  ;;  %p9059_p2 = scmp.lt.s32.totalorder %s9053_s23, %s9053_s23 }
   0x6   :  { %p9060_p3 = por %p9059_p2, %p9058_p1 }
   0x8   :  { %p9061_p4 = pnand %p9060_p3, %p9054_p0 }
   0xa   :  { %9064 = shalt.err (!%p9061_p4)
}
   0xb   :  { %s9090_s24 = smov 256   ;;  %s9091_s25 = smov 16  }
   0xc   :  { %34 = dma.hbm_to_vmem [thread:$0]  %s13626_s5, 12800, %s29_s22, [#allocation3], %s9090_s24, %s9090_s24, %s9091_s25  }
   0xd   :  { %9085 = dma.done.wait [#allocation3], 12800  }
   0xe   :  { %9086 = vsyncadd [#allocation3], 4294954496  ;;  %v13628_v0 = vmov 0.0   ;;  %v230_v1 = vld [vmem:[%s13621_s0 + $0x8] sm:$0xff]  ;;  %v229_v2 = vld [vmem:[%s13621_s0] sm:$0xff]  ;;  %vm231_vm0 = vcmask 64512  }
   0xf   :  { %308 = vmatprep.mubr.f32.mxu0 %v13628_v0  ;;  %v85_v3 = vld [vmem:[%s13624_s3] sm:$0xff]  ;;  %274 = vmatprep.subr.mxu0 %v230_v1  ;;  %v86_v4 = vld [vmem:[%s13624_s3 + $0x8] sm:$0xff]  ;;  %v87_v5 = vld [vmem:[%s13624_s3 + $0x10] sm:$0xff]  ;;  %v13630_v7 = vmov 0   ;;  %vm349_vm1 = vcmask 261120   ;;  %s9094_s16 = smov [#allocation5]  }
  0x10   :  { %275 = vmatpush1.msra.mxu0 %v229_v2  ;;  %v88_v6 = vld [vmem:[%s13624_s3 + $0x18] sm:$0xff]  ;;  %388 = vmatprep.mubr.bf16.mxu1 %v13630_v7  ;;  %v135_v14 = vld [vmem:[#allocation2 + $0x30] sm:$0xff]  ;;  %v134_v16 = vld [vmem:[#allocation2 + $0x28] sm:$0xff]  ;;  %s6802_s17 = sshll.u32 %s9094_s16, 4  ;;  %s6803_s17 = int_to_ptr.vmem [resolvable:$true] %s6802_s17 }
  0x11   :  { %6814 = vmatmul.mubr.msk.f32.vlgmr.msra.gmra.mxu0 %vm231_vm0, %v85_v3  ;;  %v132_v15 = vld [vmem:[#allocation2 + $0x18] sm:$0xff]  ;;  %v133_v19 = vld [vmem:[#allocation2 + $0x20] sm:$0xff]  ;;  %v130_v20 = vld [vmem:[#allocation2 + $0x8] sm:$0xff]  ;;  %p9070_p6 = scmp.lt.s32.totalorder %s6803_s17, %s6803_s17 }
  0x12   :  { %314 = vmatprep.mubr.f32.mxu0 %v13628_v0  ;;  %v136_v18 = vld [vmem:[#allocation2 + $0x38] sm:$0xff]  ;;  %v131_v23 = vld [vmem:[#allocation2 + $0x10] sm:$0xff]  ;;  %v129_v28 = vld [vmem:[#allocation2] sm:$0xff] }
  0x13   :  { %v7226_v36 = vld [vmem:[%s13623_s2] sm:$0xff]   ;;  %v7227_v37 = vld [vmem:[%s13623_s2 + $0x8] sm:$0xff]   ;;  %v140_v43 = vld [vmem:[#allocation2 + $0x58] sm:$0xff] }
  0x14   :  { %v142_v44 = vld [vmem:[#allocation2 + $0x68] sm:$0xff]  ;;  %v143_v46 = vld [vmem:[#allocation2 + $0x70] sm:$0xff]  ;;  %v141_v47 = vld [vmem:[#allocation2 + $0x60] sm:$0xff] }
  0x15   :  { %6815 = vmatmul.mubr.msk.f32.gmra.mxu0 %vm231_vm0, %v86_v4  ;;  %v138_v48 = vld [vmem:[#allocation2 + $0x48] sm:$0xff]  ;;  %v144_v50 = vld [vmem:[#allocation2 + $0x78] sm:$0xff]  ;;  %v139_v51 = vld [vmem:[#allocation2 + $0x50] sm:$0xff] }
  0x16   :  { %320 = vmatprep.mubr.f32.mxu0 %v13628_v0  ;;  %v137_v57 = vld [vmem:[#allocation2 + $0x40] sm:$0xff] }
  0x19   :  { %6816 = vmatmul.mubr.msk.f32.gmra.mxu0 %vm231_vm0, %v87_v5 }
  0x1a   :  { %326 = vmatprep.mubr.f32.mxu0 %v13628_v0 }
  0x1d   :  { %6817 = vmatmul.mubr.msk.f32.gmra.mxu0 %vm231_vm0, %v88_v6 }
  0x1e   :  { %469 = vmatprep.mubr.bf16.mxu0 %v13630_v7 }
  0xd1   :  { %v310_v8 = vpop.f32.mrf.mxu0 }
  0xd2   :  { %v9184_v34 = vadd.f32 %v310_v8, %v129_v28  ;;  %v149_v28 = vld [vmem:[#allocation2 + $0xa0] sm:$0xff] }
  0xd3   :  { %v312_v9 = vpop.f32.mrf.mxu0 }
  0xd4   :  { %v9174_v29 = vadd.f32 %v312_v9, %v130_v20  ;;  %13705 = vst [vmem:[#allocation15_spill] sm:$0xff] %v9184_v34  ;;  %v150_v20 = vld [vmem:[#allocation2 + $0xa8] sm:$0xff] }
  0xd5   :  { %v316_v10 = vpop.f32.mrf.mxu0 }
  0xd6   :  { %13703 = vst [vmem:[#allocation13_spill] sm:$0xff] %v9174_v29  ;;  %v9178_v31 = vadd.f32 %v316_v10, %v131_v23  ;;  %v151_v23 = vld [vmem:[#allocation2 + $0xb0] sm:$0xff] }
  0xd7   :  { %v318_v11 = vpop.f32.mrf.mxu0 }
  0xd8   :  { %v9166_v24 = vadd.f32 %v318_v11, %v132_v15  ;;  %13704 = vst [vmem:[#allocation14_spill] sm:$0xff] %v9178_v31  ;;  %v335_v35 = vpack.c.bf16 %v9178_v31, %v9184_v34 }
  0xd9   :  { %v322_v12 = vpop.f32.mrf.mxu0 }
  0xda   :  { %13699 = vst [vmem:[#allocation9_spill] sm:$0xff] %v9166_v24  ;;  %v9172_v27 = vadd.f32 %v322_v12, %v133_v19  ;;  %v336_v33 = vpack.c.bf16 %v9166_v24, %v9174_v29  ;;  %v7228_v12 = vld [vmem:[%s13623_s2 + $0x10] sm:$0xff]   ;;  %v148_v19 = vld [vmem:[#allocation2 + $0x98] sm:$0xff] }
  0xdb   :  { %v324_v13 = vpop.f32.mrf.mxu0 }
  0xdc   :  { %v9168_v25 = vadd.f32 %v324_v13, %v134_v16  ;;  %13702 = vst [vmem:[#allocation12_spill] sm:$0xff] %v9172_v27  ;;  %v7229_v13 = vld [vmem:[%s13623_s2 + $0x18] sm:$0xff]  }
  0xdd   :  { %v328_v17 = vpop.f32.mrf.mxu0 }
  0xde   :  { %v9164_v21 = vadd.f32 %v328_v17, %v135_v14  ;;  %13700 = vst [vmem:[#allocation10_spill] sm:$0xff] %v9168_v25 }
  0xdf   :  { %v330_v22 = vpop.f32.mrf.mxu0 }
  0xe0   :  { %13698 = vst [vmem:[#allocation8_spill] sm:$0xff] %v9164_v21  ;;  %v9170_v26 = vadd.f32 %v330_v22, %v136_v18  ;;  %v337_v32 = vpack.c.bf16 %v9164_v21, %v9172_v27 }
  0xe2   :  { %13701 = vst [vmem:[#allocation11_spill] sm:$0xff] %v9170_v26  ;;  %v338_v30 = vpack.c.bf16 %v9170_v26, %v9168_v25 }
  0xe4   :  { %368 = vmatprep.subr.bf16.mxu1 %v338_v30  ;;  %v146_v30 = vld [vmem:[#allocation2 + $0x88] sm:$0xff] }
  0xe5   :  { %369 = vmatpush1.bf16.msra.mxu1 %v337_v32 }
  0xe6   :  { %370 = vmatprep.subr.bf16.mxu1 %v336_v33  ;;  %v152_v33 = vld [vmem:[#allocation2 + $0xb8] sm:$0xff] }
  0xe9   :  { %371 = vmatpush1.bf16.msra.mxu1 %v335_v35  ;;  %v147_v35 = vld [vmem:[#allocation2 + $0x90] sm:$0xff] }
  0xec   :  { %6820 = vmatmul.mubr.msk.bf16.vlgmr.msra.gmra.mxu1 %vm349_vm1, %v7226_v36 }
  0xed   :  { %398 = vmatprep.mubr.bf16.mxu1 %v13630_v7 }
  0xf4   :  { %6821 = vmatmul.mubr.msk.bf16.gmra.mxu1 %vm349_vm1, %v7227_v37 }
  0xf5   :  { %550 = vmatprep.mubr.bf16.mxu1 %v13630_v7 }
 0x1ac   :  { %v390_v38 = vpop.f32.mrf.mxu1 }
 0x1ad   :  { %v391_v2 = vadd.f32 %v390_v38, %v137_v57 }
 0x1ae   :  { %v392_v39 = vpop.f32.mrf.mxu1 }
 0x1af   :  { %v393_v58 = vadd.f32 %v392_v39, %v138_v48  ;;  %v409_v10 = vmax.f32 %v391_v2, 0.0  ;;  %v92_v2 = vld [vmem:[%s13624_s3 + $0x38] sm:$0xff] }
 0x1b0   :  { %v394_v40 = vpop.f32.mrf.mxu1 }
 0x1b1   :  { %v395_v60 = vadd.f32 %v394_v40, %v139_v51  ;;  %v410_v4 = vmax.f32 %v393_v58, 0.0  ;;  %v7230_v58 = vld [vmem:[%s13623_s2 + $0x20] sm:$0xff]  }
 0x1b2   :  { %v396_v41 = vpop.f32.mrf.mxu1 }
 0x1b3   :  { %v397_v52 = vadd.f32 %v396_v41, %v140_v43  ;;  %v411_v6 = vmax.f32 %v395_v60, 0.0  ;;  %v145_v41 = vld [vmem:[#allocation2 + $0x80] sm:$0xff]  ;;  %v334_v60 = vld [vmem:[%s13622_s1 + $0x8] sm:$0xff] }
 0x1b4   :  { %v400_v42 = vpop.f32.mrf.mxu1 }
 0x1b5   :  { %v401_v55 = vadd.f32 %v400_v42, %v141_v47  ;;  %v412_v62 = vmax.f32 %v397_v52, 0.0  ;;  %v417_v11 = vpack.c.bf16 %v411_v6, %v409_v10  ;;  %v96_v6 = vld [vmem:[%s13624_s3 + $0x58] sm:$0xff]  ;;  %v99_v10 = vld [vmem:[%s13624_s3 + $0x70] sm:$0xff] }
 0x1b6   :  { %v402_v45 = vpop.f32.mrf.mxu1 }
 0x1b7   :  { %v403_v53 = vadd.f32 %v402_v45, %v142_v44  ;;  %v413_v3 = vmax.f32 %v401_v55, 0.0  ;;  %v418_v9 = vpack.c.bf16 %v412_v62, %v410_v4  ;;  %v89_v62 = vld [vmem:[%s13624_s3 + $0x20] sm:$0xff]  ;;  %v94_v4 = vld [vmem:[%s13624_s3 + $0x48] sm:$0xff] }
 0x1b8   :  { %v404_v49 = vpop.f32.mrf.mxu1 }
 0x1b9   :  { %v405_v54 = vadd.f32 %v404_v49, %v143_v46  ;;  %v414_v63 = vmax.f32 %v403_v53, 0.0 }
 0x1ba   :  { %v406_v56 = vpop.f32.mrf.mxu1 }
 0x1bb   :  { %v407_v59 = vadd.f32 %v406_v56, %v144_v50  ;;  %v415_v61 = vmax.f32 %v405_v54, 0.0 }
 0x1bd   :  { %v416_v1 = vmax.f32 %v407_v59, 0.0  ;;  %v419_v8 = vpack.c.bf16 %v415_v61, %v413_v3  ;;  %v7231_v59 = vld [vmem:[%s13623_s2 + $0x28] sm:$0xff]   ;;  %v333_v61 = vld [vmem:[%s13622_s1] sm:$0xff] }
 0x1be   :  { %v93_v3 = vld [vmem:[%s13624_s3 + $0x40] sm:$0xff] }
 0x1bf   :  { %v420_v5 = vpack.c.bf16 %v416_v1, %v414_v63  ;;  %v90_v63 = vld [vmem:[%s13624_s3 + $0x28] sm:$0xff]  ;;  %v91_v1 = vld [vmem:[%s13624_s3 + $0x30] sm:$0xff] }
 0x1c1   :  { %449 = vmatprep.subr.bf16.mxu0 %v420_v5  ;;  %v95_v5 = vld [vmem:[%s13624_s3 + $0x50] sm:$0xff] }
 0x1c2   :  { %450 = vmatpush1.bf16.msra.mxu0 %v419_v8  ;;  %v97_v8 = vld [vmem:[%s13624_s3 + $0x60] sm:$0xff] }
 0x1c3   :  { %451 = vmatprep.subr.bf16.mxu0 %v418_v9  ;;  %v98_v9 = vld [vmem:[%s13624_s3 + $0x68] sm:$0xff] }
 0x1c6   :  { %452 = vmatpush1.bf16.msra.mxu0 %v417_v11  ;;  %v100_v11 = vld [vmem:[%s13624_s3 + $0x78] sm:$0xff] }
 0x1c9   :  { %6824 = vmatmul.mubr.msk.bf16.vlgmr.msra.gmra.mxu0 %vm349_vm1, %v7228_v12  ;;  %v101_v12 = vld [vmem:[%s13624_s3 + $0x80] sm:$0xff] }
 0x1ca   :  { %479 = vmatprep.mubr.bf16.mxu0 %v13630_v7 }
 0x1d1   :  { %6825 = vmatmul.mubr.msk.bf16.gmra.mxu0 %vm349_vm1, %v7229_v13  ;;  %v102_v13 = vld [vmem:[%s13624_s3 + $0x88] sm:$0xff] }
 0x1d2   :  { %743 = vmatprep.mubr.bf16.mxu0 %v13630_v7 }
 0x289   :  { %v471_v14 = vpop.f32.mrf.mxu0 }
 0x28a   :  { %v472_v49 = vadd.f32 %v471_v14, %v145_v41  ;;  %v103_v14 = vld [vmem:[%s13624_s3 + $0x90] sm:$0xff] }
 0x28b   :  { %v473_v15 = vpop.f32.mrf.mxu0  ;;  %v159_v41 = vld [vmem:[#allocation2 + $0xf0] sm:$0xff] }
 0x28c   :  { %v474_v42 = vadd.f32 %v473_v15, %v146_v30  ;;  %v490_v56 = vmax.f32 %v472_v49, 0.0  ;;  %v104_v15 = vld [vmem:[%s13624_s3 + $0x98] sm:$0xff] }
 0x28d   :  { %v475_v16 = vpop.f32.mrf.mxu0 }
 0x28e   :  { %v476_v44 = vadd.f32 %v475_v16, %v147_v35  ;;  %v491_v51 = vmax.f32 %v474_v42, 0.0  ;;  %v105_v16 = vld [vmem:[%s13624_s3 + $0xa0] sm:$0xff] }
 0x28f   :  { %v477_v17 = vpop.f32.mrf.mxu0  ;;  %v157_v42 = vld [vmem:[#allocation2 + $0xe0] sm:$0xff] }
 0x290   :  { %v478_v36 = vadd.f32 %v477_v17, %v148_v19  ;;  %v492_v53 = vmax.f32 %v476_v44, 0.0  ;;  %v106_v17 = vld [vmem:[%s13624_s3 + $0xa8] sm:$0xff]  ;;  %v108_v19 = vld [vmem:[%s13624_s3 + $0xb8] sm:$0xff] }
 0x291   :  { %v481_v18 = vpop.f32.mrf.mxu0 }
 0x292   :  { %v482_v39 = vadd.f32 %v481_v18, %v149_v28  ;;  %v493_v46 = vmax.f32 %v478_v36, 0.0  ;;  %v498_v57 = vpack.c.bf16 %v492_v53, %v490_v56  ;;  %v107_v18 = vld [vmem:[%s13624_s3 + $0xb0] sm:$0xff]  ;;  %v113_v36 = vld [vmem:[%s13624_s3 + $0xe0] sm:$0xff] }
 0x293   :  { %v483_v22 = vpop.f32.mrf.mxu0  ;;  %v153_v53 = vld [vmem:[#allocation2 + $0xc0] sm:$0xff]  ;;  %v115_v56 = vld [vmem:[%s13624_s3 + $0xf0] sm:$0xff] }
 0x294   :  { %v484_v37 = vadd.f32 %v483_v22, %v150_v20  ;;  %v494_v50 = vmax.f32 %v482_v39, 0.0  ;;  %v499_v55 = vpack.c.bf16 %v493_v46, %v491_v51  ;;  %v109_v20 = vld [vmem:[%s13624_s3 + $0xc0] sm:$0xff]  ;;  %v110_v22 = vld [vmem:[%s13624_s3 + $0xc8] sm:$0xff]  ;;  %v155_v46 = vld [vmem:[#allocation2 + $0xd0] sm:$0xff] }
 0x295   :  { %v485_v32 = vpop.f32.mrf.mxu0  ;;  %v158_v39 = vld [vmem:[#allocation2 + $0xe8] sm:$0xff] }
 0x296   :  { %v486_v38 = vadd.f32 %v485_v32, %v151_v23  ;;  %v495_v47 = vmax.f32 %v484_v37, 0.0  ;;  %v111_v23 = vld [vmem:[%s13624_s3 + $0xd0] sm:$0xff] }
 0x297   :  { %v487_v40 = vpop.f32.mrf.mxu0 }
 0x298   :  { %v488_v43 = vadd.f32 %v487_v40, %v152_v33  ;;  %v496_v45 = vmax.f32 %v486_v38, 0.0  ;;  %v112_v33 = vld [vmem:[%s13624_s3 + $0xd8] sm:$0xff] }
 0x299   :  { %v156_v38 = vld [vmem:[#allocation2 + $0xd8] sm:$0xff] }
 0x29a   :  { %v497_v48 = vmax.f32 %v488_v43, 0.0  ;;  %v500_v54 = vpack.c.bf16 %v496_v45, %v494_v50  ;;  %v154_v43 = vld [vmem:[#allocation2 + $0xc8] sm:$0xff]  ;;  %v160_v45 = vld [vmem:[#allocation2 + $0xf8] sm:$0xff] }
 0x29b   :  { %v114_v50 = vld [vmem:[%s13624_s3 + $0xe8] sm:$0xff] }
 0x29c   :  { %v501_v52 = vpack.c.bf16 %v497_v48, %v495_v47 }
 0x29e   :  { %530 = vmatprep.subr.bf16.mxu1 %v501_v52 }
 0x29f   :  { %531 = vmatpush1.bf16.msra.mxu1 %v500_v54 }
 0x2a0   :  { %532 = vmatprep.subr.bf16.mxu1 %v499_v55 }
 0x2a3   :  { %533 = vmatpush1.bf16.msra.mxu1 %v498_v57 }
 0x2a4   :  { %1094 = vmatprep.subr.mxu1 %v334_v60 }
 0x2a6   :  { %6828 = vmatmul.mubr.msk.bf16.vlgmr.msra.gmra.mxu1 %vm349_vm1, %v7230_v58 }
 0x2a7   :  { %560 = vmatprep.mubr.bf16.mxu1 %v13630_v7  ;;  %1095 = vmatpush1.msra.mxu1 %v333_v61 }
 0x2ae   :  { %6829 = vmatmul.mubr.msk.bf16.gmra.mxu1 %vm349_vm1, %v7231_v59 }
 0x2af   :  { %1128 = vmatprep.mubr.f32.mxu1 %v13628_v0 }
 0x2b6   :  { %6862 = vmatmul.mubr.msk.f32.vlgmr.msra.gmra.mxu1 %vm231_vm0, %v89_v62 }
 0x2b7   :  { %1134 = vmatprep.mubr.f32.mxu1 %v13628_v0 }
 0x2ba   :  { %6863 = vmatmul.mubr.msk.f32.gmra.mxu1 %vm231_vm0, %v90_v63 }
 0x2bb   :  { %1140 = vmatprep.mubr.f32.mxu1 %v13628_v0 }
 0x2be   :  { %6864 = vmatmul.mubr.msk.f32.gmra.mxu1 %vm231_vm0, %v91_v1 }
 0x2bf   :  { %1146 = vmatprep.mubr.f32.mxu1 %v13628_v0 }
 0x2c2   :  { %6865 = vmatmul.mubr.msk.f32.gmra.mxu1 %vm231_vm0, %v92_v2 }
 0x2c3   :  { %1152 = vmatprep.mubr.f32.mxu1 %v13628_v0 }
 0x2c6   :  { %6866 = vmatmul.mubr.msk.f32.gmra.mxu1 %vm231_vm0, %v93_v3 }
 0x2c7   :  { %1158 = vmatprep.mubr.f32.mxu1 %v13628_v0 }
 0x2ca   :  { %6867 = vmatmul.mubr.msk.f32.gmra.mxu1 %vm231_vm0, %v94_v4 }
 0x2cb   :  { %1164 = vmatprep.mubr.f32.mxu1 %v13628_v0 }
 0x2ce   :  { %6868 = vmatmul.mubr.msk.f32.gmra.mxu1 %vm231_vm0, %v95_v5 }
 0x2cf   :  { %1170 = vmatprep.mubr.f32.mxu1 %v13628_v0 }
 0x2d2   :  { %6869 = vmatmul.mubr.msk.f32.gmra.mxu1 %vm231_vm0, %v96_v6  ;;  %v116_v6 = vld [vmem:[%s13624_s3 + $0xf8] sm:$0xff] }
 0x2d3   :  { %1176 = vmatprep.mubr.f32.mxu1 %v13628_v0 }
 0x2d6   :  { %6870 = vmatmul.mubr.msk.f32.gmra.mxu1 %vm231_vm0, %v97_v8 }
 0x2d7   :  { %1182 = vmatprep.mubr.f32.mxu1 %v13628_v0 }
 0x2da   :  { %6871 = vmatmul.mubr.msk.f32.gmra.mxu1 %vm231_vm0, %v98_v9  ;;  %v117_v9 = vld [vmem:[%s13624_s3 + $0x100] sm:$0xff] }
 0x2db   :  { %1188 = vmatprep.mubr.f32.mxu1 %v13628_v0 }
 0x2de   :  { %6872 = vmatmul.mubr.msk.f32.gmra.mxu1 %vm231_vm0, %v99_v10 }
 0x2df   :  { %1194 = vmatprep.mubr.f32.mxu1 %v13628_v0 }
 0x2e2   :  { %6873 = vmatmul.mubr.msk.f32.gmra.mxu1 %vm231_vm0, %v100_v11  ;;  %v7232_v11 = vld [vmem:[%s13623_s2 + $0x30] sm:$0xff]  }
 0x2e3   :  { %1200 = vmatprep.mubr.f32.mxu1 %v13628_v0 }
 0x2e6   :  { %6874 = vmatmul.mubr.msk.f32.gmra.mxu1 %vm231_vm0, %v101_v12  ;;  %v118_v12 = vld [vmem:[%s13624_s3 + $0x108] sm:$0xff] }
 0x2e7   :  { %1206 = vmatprep.mubr.f32.mxu1 %v13628_v0 }
 0x2ea   :  { %6875 = vmatmul.mubr.msk.f32.gmra.mxu1 %vm231_vm0, %v102_v13  ;;  %v119_v13 = vld [vmem:[%s13624_s3 + $0x110] sm:$0xff] }
 0x2eb   :  { %1212 = vmatprep.mubr.f32.mxu1 %v13628_v0 }
 0x2ee   :  { %6876 = vmatmul.mubr.msk.f32.gmra.mxu1 %vm231_vm0, %v103_v14  ;;  %v7233_v14 = vld [vmem:[%s13623_s2 + $0x38] sm:$0xff]  }
 0x2ef   :  { %1218 = vmatprep.mubr.f32.mxu1 %v13628_v0 }
 0x2f2   :  { %6877 = vmatmul.mubr.msk.f32.gmra.mxu1 %vm231_vm0, %v104_v15  ;;  %v120_v15 = vld [vmem:[%s13624_s3 + $0x118] sm:$0xff] }
 0x2f3   :  { %1224 = vmatprep.mubr.f32.mxu1 %v13628_v0 }
 0x2f6   :  { %6878 = vmatmul.mubr.msk.f32.gmra.mxu1 %vm231_vm0, %v105_v16  ;;  %v7234_v16 = vld [vmem:[%s13623_s2 + $0x40] sm:$0xff]  }
 0x2f7   :  { %1230 = vmatprep.mubr.f32.mxu1 %v13628_v0 }
 0x2fa   :  { %6879 = vmatmul.mubr.msk.f32.gmra.mxu1 %vm231_vm0, %v106_v17  ;;  %v7235_v17 = vld [vmem:[%s13623_s2 + $0x48] sm:$0xff]  }
 0x2fb   :  { %1236 = vmatprep.mubr.f32.mxu1 %v13628_v0 }
 0x2fe   :  { %6880 = vmatmul.mubr.msk.f32.gmra.mxu1 %vm231_vm0, %v107_v18  ;;  %v7236_v18 = vld [vmem:[%s13623_s2 + $0x50] sm:$0xff]  }
 0x2ff   :  { %1242 = vmatprep.mubr.f32.mxu1 %v13628_v0 }
 0x302   :  { %6881 = vmatmul.mubr.msk.f32.gmra.mxu1 %vm231_vm0, %v108_v19  ;;  %v7237_v19 = vld [vmem:[%s13623_s2 + $0x58] sm:$0xff]  }
 0x303   :  { %1248 = vmatprep.mubr.f32.mxu1 %v13628_v0 }
 0x306   :  { %6882 = vmatmul.mubr.msk.f32.gmra.mxu1 %vm231_vm0, %v109_v20  ;;  %v7238_v20 = vld [vmem:[%s13623_s2 + $0x60] sm:$0xff]  }
 0x307   :  { %1254 = vmatprep.mubr.f32.mxu1 %v13628_v0 }
 0x30a   :  { %6883 = vmatmul.mubr.msk.f32.gmra.mxu1 %vm231_vm0, %v110_v22  ;;  %v7239_v22 = vld [vmem:[%s13623_s2 + $0x68] sm:$0xff]  }
 0x30b   :  { %1260 = vmatprep.mubr.f32.mxu1 %v13628_v0 }
 0x30e   :  { %6884 = vmatmul.mubr.msk.f32.gmra.mxu1 %vm231_vm0, %v111_v23  ;;  %v7240_v23 = vld [vmem:[%s13623_s2 + $0x70] sm:$0xff]  }
 0x30f   :  { %1266 = vmatprep.mubr.f32.mxu1 %v13628_v0 }
 0x312   :  { %6885 = vmatmul.mubr.msk.f32.gmra.mxu1 %vm231_vm0, %v112_v33  ;;  %v7243_v33 = vld [vmem:[%s13623_s2 + $0x88] sm:$0xff]  }
 0x313   :  { %1272 = vmatprep.mubr.f32.mxu1 %v13628_v0 }
 0x316   :  { %6886 = vmatmul.mubr.msk.f32.gmra.mxu1 %vm231_vm0, %v113_v36 }
 0x317   :  { %1278 = vmatprep.mubr.f32.mxu1 %v13628_v0 }
 0x31a   :  { %6887 = vmatmul.mubr.msk.f32.gmra.mxu1 %vm231_vm0, %v114_v50 }
 0x31b   :  { %1284 = vmatprep.mubr.f32.mxu1 %v13628_v0 }
 0x31e   :  { %6888 = vmatmul.mubr.msk.f32.gmra.mxu1 %vm231_vm0, %v115_v56 }
 0x31f   :  { %1290 = vmatprep.mubr.f32.mxu1 %v13628_v0 }
 0x322   :  { %6889 = vmatmul.mubr.msk.f32.gmra.mxu1 %vm231_vm0, %v116_v6 }
 0x323   :  { %1296 = vmatprep.mubr.f32.mxu1 %v13628_v0 }
 0x326   :  { %6890 = vmatmul.mubr.msk.f32.gmra.mxu1 %vm231_vm0, %v117_v9 }
 0x327   :  { %1302 = vmatprep.mubr.f32.mxu1 %v13628_v0 }
 0x32a   :  { %6891 = vmatmul.mubr.msk.f32.gmra.mxu1 %vm231_vm0, %v118_v12 }
 0x32b   :  { %1308 = vmatprep.mubr.f32.mxu1 %v13628_v0 }
 0x32e   :  { %6892 = vmatmul.mubr.msk.f32.gmra.mxu1 %vm231_vm0, %v119_v13 }
 0x32f   :  { %1314 = vmatprep.mubr.f32.mxu1 %v13628_v0 }
 0x332   :  { %6893 = vmatmul.mubr.msk.f32.gmra.mxu1 %vm231_vm0, %v120_v15 }
 0x333   :  { %1520 = vmatprep.mubr.bf16.mxu1 %v13630_v7 }
 0x366   :  { %v552_v28 = vpop.f32.mrf.mxu1 }
 0x367   :  { %v553_v62 = vadd.f32 %v552_v28, %v153_v53  ;;  %v7241_v28 = vld [vmem:[%s13623_s2 + $0x78] sm:$0xff]  }
 0x368   :  { %v554_v30 = vpop.f32.mrf.mxu1 }
 0x369   :  { %v555_v54 = vadd.f32 %v554_v30, %v154_v43  ;;  %v571_v8 = vmax.f32 %v553_v62, 0.0  ;;  %v7242_v30 = vld [vmem:[%s13623_s2 + $0x80] sm:$0xff]  }
 0x36a   :  { %v556_v32 = vpop.f32.mrf.mxu1  ;;  %v7246_v43 = vld [vmem:[%s13623_s2 + $0xa0] sm:$0xff]  }
 0x36b   :  { %v557_v57 = vadd.f32 %v556_v32, %v155_v46  ;;  %v572_v1 = vmax.f32 %v555_v54, 0.0  ;;  %v7247_v46 = vld [vmem:[%s13623_s2 + $0xa8] sm:$0xff]  }
 0x36c   :  { %v558_v35 = vpop.f32.mrf.mxu1 }
 0x36d   :  { %v559_v47 = vadd.f32 %v558_v35, %v156_v38  ;;  %v573_v3 = vmax.f32 %v557_v57, 0.0 }
 0x36e   :  { %v562_v37 = vpop.f32.mrf.mxu1 }
 0x36f   :  { %v563_v51 = vadd.f32 %v562_v37, %v157_v42  ;;  %v574_v59 = vmax.f32 %v559_v47, 0.0  ;;  %v579_v10 = vpack.c.bf16 %v573_v3, %v571_v8  ;;  %v7244_v37 = vld [vmem:[%s13623_s2 + $0x90] sm:$0xff]  }
 0x370   :  { %v564_v40 = vpop.f32.mrf.mxu1 }
 0x371   :  { %v565_v48 = vadd.f32 %v564_v40, %v158_v39  ;;  %v575_v63 = vmax.f32 %v563_v51, 0.0  ;;  %v580_v5 = vpack.c.bf16 %v574_v59, %v572_v1  ;;  %v7245_v40 = vld [vmem:[%s13623_s2 + $0x98] sm:$0xff]  }
 0x372   :  { %v566_v44 = vpop.f32.mrf.mxu1 }
 0x373   :  { %v567_v49 = vadd.f32 %v566_v44, %v159_v41  ;;  %v576_v60 = vmax.f32 %v565_v48, 0.0 }
 0x374   :  { %v568_v52 = vpop.f32.mrf.mxu1 }
 0x375   :  { %v569_v55 = vadd.f32 %v568_v52, %v160_v45  ;;  %v577_v58 = vmax.f32 %v567_v49, 0.0 }
 0x376   :  { %v9439_v32 = vpop.f32.mrf.mxu1 }
 0x377   :  { %v578_v61 = vmax.f32 %v569_v55, 0.0  ;;  %v581_v4 = vpack.c.bf16 %v577_v58, %v575_v63  ;;  %13706 = vst [vmem:[#allocation16_spill] sm:$0xff] %v9439_v32 }
 0x378   :  { %v9444_v35 = vpop.f32.mrf.mxu1 }
 0x379   :  { %v582_v2 = vpack.c.bf16 %v578_v61, %v576_v60  ;;  %13707 = vst [vmem:[#allocation17_spill] sm:$0xff] %v9444_v35 }
 0x37a   :  { %v9448_v36 = vpop.f32.mrf.mxu1 }
 0x37b   :  { %723 = vmatprep.subr.bf16.mxu0 %v582_v2  ;;  %13708 = vst [vmem:[#allocation18_spill] sm:$0xff] %v9448_v36  ;;  %v190_v36 = vld [vmem:[#allocation2 + $0x1e8] sm:$0xff] }
 0x37c   :  { %724 = vmatpush1.bf16.msra.mxu0 %v581_v4  ;;  %v9453_v38 = vpop.f32.mrf.mxu1 }
 0x37d   :  { %725 = vmatprep.subr.bf16.mxu0 %v580_v5  ;;  %13709 = vst [vmem:[#allocation19_spill] sm:$0xff] %v9453_v38  ;;  %v191_v38 = vld [vmem:[#allocation2 + $0x1f0] sm:$0xff] }
 0x37e   :  { %v9457_v39 = vpop.f32.mrf.mxu1 }
 0x37f   :  { %13710 = vst [vmem:[#allocation20_spill] sm:$0xff] %v9457_v39 }
 0x380   :  { %726 = vmatpush1.bf16.msra.mxu0 %v579_v10  ;;  %v9462_v41 = vpop.f32.mrf.mxu1 }
 0x381   :  { %13711 = vst [vmem:[#allocation21_spill] sm:$0xff] %v9462_v41 }
 0x382   :  { %v9466_v42 = vpop.f32.mrf.mxu1 }
 0x383   :  { %6846 = vmatmul.mubr.msk.bf16.vlgmr.msra.gmra.mxu0 %vm349_vm1, %v7232_v11  ;;  %13712 = vst [vmem:[#allocation22_spill] sm:$0xff] %v9466_v42  ;;  %v188_v42 = vld [vmem:[#allocation2 + $0x1d8] sm:$0xff] }
 0x384   :  { %753 = vmatprep.mubr.bf16.mxu0 %v13630_v7  ;;  %v9471_v44 = vpop.f32.mrf.mxu1 }
 0x385   :  { %13713 = vst [vmem:[#allocation23_spill] sm:$0xff] %v9471_v44 }
 0x386   :  { %v9475_v45 = vpop.f32.mrf.mxu1 }
 0x387   :  { %13714 = vst [vmem:[#allocation24_spill] sm:$0xff] %v9475_v45  ;;  %v192_v45 = vld [vmem:[#allocation2 + $0x1f8] sm:$0xff] }
 0x388   :  { %v9480_v47 = vpop.f32.mrf.mxu1 }
 0x389   :  { %13715 = vst [vmem:[#allocation25_spill] sm:$0xff] %v9480_v47  ;;  %v187_v47 = vld [vmem:[#allocation2 + $0x1d0] sm:$0xff] }
 0x38a   :  { %v9483_v48 = vpop.f32.mrf.mxu1 }
 0x38b   :  { %6847 = vmatmul.mubr.msk.bf16.gmra.mxu0 %vm349_vm1, %v7233_v14  ;;  %13716 = vst [vmem:[#allocation26_spill] sm:$0xff] %v9483_v48  ;;  %v186_v48 = vld [vmem:[#allocation2 + $0x1c8] sm:$0xff] }
 0x38c   :  { %763 = vmatprep.mubr.bf16.mxu0 %v13630_v7  ;;  %v9485_v49 = vpop.f32.mrf.mxu1 }
 0x38d   :  { %13717 = vst [vmem:[#allocation27_spill] sm:$0xff] %v9485_v49 }
 0x38e   :  { %v9487_v50 = vpop.f32.mrf.mxu1 }
 0x38f   :  { %13718 = vst [vmem:[#allocation28_spill] sm:$0xff] %v9487_v50 }
 0x390   :  { %v9489_v51 = vpop.f32.mrf.mxu1 }
 0x391   :  { %13719 = vst [vmem:[#allocation29_spill] sm:$0xff] %v9489_v51  ;;  %v185_v51 = vld [vmem:[#allocation2 + $0x1c0] sm:$0xff] }
 0x392   :  { %v9491_v52 = vpop.f32.mrf.mxu1 }
 0x393   :  { %6848 = vmatmul.mubr.msk.bf16.gmra.mxu0 %vm349_vm1, %v7234_v16  ;;  %13720 = vst [vmem:[#allocation30_spill] sm:$0xff] %v9491_v52 }
 0x394   :  { %773 = vmatprep.mubr.bf16.mxu0 %v13630_v7  ;;  %v9493_v53 = vpop.f32.mrf.mxu1 }
 0x395   :  { %13721 = vst [vmem:[#allocation31_spill] sm:$0xff] %v9493_v53  ;;  %v184_v53 = vld [vmem:[#allocation2 + $0x1b8] sm:$0xff] }
 0x396   :  { %v9495_v54 = vpop.f32.mrf.mxu1 }
 0x397   :  { %13722 = vst [vmem:[#allocation32_spill] sm:$0xff] %v9495_v54 }
 0x398   :  { %v9497_v55 = vpop.f32.mrf.mxu1 }
 0x399   :  { %13723 = vst [vmem:[#allocation33_spill] sm:$0xff] %v9497_v55  ;;  %v182_v55 = vld [vmem:[#allocation2 + $0x1a8] sm:$0xff] }
 0x39a   :  { %v9499_v56 = vpop.f32.mrf.mxu1 }
 0x39b   :  { %6849 = vmatmul.mubr.msk.bf16.gmra.mxu0 %vm349_vm1, %v7235_v17  ;;  %13724 = vst [vmem:[#allocation34_spill] sm:$0xff] %v9499_v56 }
 0x39c   :  { %783 = vmatprep.mubr.bf16.mxu0 %v13630_v7  ;;  %v9501_v57 = vpop.f32.mrf.mxu1 }
 0x39e   :  { %v9503_v58 = vpop.f32.mrf.mxu1 }
 0x3a0   :  { %v9505_v59 = vpop.f32.mrf.mxu1 }
 0x3a2   :  { %v9507_v60 = vpop.f32.mrf.mxu1 }
 0x3a3   :  { %6850 = vmatmul.mubr.msk.bf16.gmra.mxu0 %vm349_vm1, %v7236_v18 }
 0x3a4   :  { %793 = vmatprep.mubr.bf16.mxu0 %v13630_v7  ;;  %v9509_v61 = vpop.f32.mrf.mxu1 }
 0x3a6   :  { %v9511_v62 = vpop.f32.mrf.mxu1 }
 0x3a8   :  { %v9513_v63 = vpop.f32.mrf.mxu1 }
 0x3aa   :  { %v9515_v1 = vpop.f32.mrf.mxu1 }
 0x3ab   :  { %6851 = vmatmul.mubr.msk.bf16.gmra.mxu0 %vm349_vm1, %v7237_v19 }
 0x3ac   :  { %803 = vmatprep.mubr.bf16.mxu0 %v13630_v7  ;;  %v9517_v2 = vpop.f32.mrf.mxu1 }
 0x3ae   :  { %v9523_v5 = vpop.f32.mrf.mxu1 }
 0x3b0   :  { %v9529_v9 = vpop.f32.mrf.mxu1 }
 0x3b2   :  { %v9535_v12 = vpop.f32.mrf.mxu1 }
 0x3b3   :  { %6852 = vmatmul.mubr.msk.bf16.gmra.mxu0 %vm349_vm1, %v7238_v20 }
 0x3b4   :  { %813 = vmatprep.mubr.bf16.mxu0 %v13630_v7  ;;  %v9541_v15 = vpop.f32.mrf.mxu1 }
 0x3b6   :  { %v9547_v18 = vpop.f32.mrf.mxu1 }
 0x3b7   :  { %13725 = vst [vmem:[#allocation35_spill] sm:$0xff] %v9547_v18  ;;  %v122_v18 = vld [vmem:[%s13625_s4 + $0x8] sm:$0xff] }
 0x3bb   :  { %6853 = vmatmul.mubr.msk.bf16.gmra.mxu0 %vm349_vm1, %v7239_v22  ;;  %v9553_v22 = vpop.f32.mrf.mxu1 }
 0x3bc   :  { %823 = vmatprep.mubr.bf16.mxu0 %v13630_v7  ;;  %13726 = vst [vmem:[#allocation36_spill] sm:$0xff] %v9553_v22 }
 0x3c3   :  { %6854 = vmatmul.mubr.msk.bf16.gmra.mxu0 %vm349_vm1, %v7240_v23 }
 0x3c4   :  { %833 = vmatprep.mubr.bf16.mxu0 %v13630_v7 }
 0x3cb   :  { %6855 = vmatmul.mubr.msk.bf16.gmra.mxu0 %vm349_vm1, %v7241_v28 }
 0x3cc   :  { %843 = vmatprep.mubr.bf16.mxu0 %v13630_v7 }
 0x3d3   :  { %6856 = vmatmul.mubr.msk.bf16.gmra.mxu0 %vm349_vm1, %v7242_v30  ;;  %v9559_v30 = vpop.f32.mrf.mxu1 }
 0x3d4   :  { %853 = vmatprep.mubr.bf16.mxu0 %v13630_v7  ;;  %13727 = vst [vmem:[#allocation37_spill] sm:$0xff] %v9559_v30 }
 0x3db   :  { %6857 = vmatmul.mubr.msk.bf16.gmra.mxu0 %vm349_vm1, %v7243_v33 }
 0x3dc   :  { %863 = vmatprep.mubr.bf16.mxu0 %v13630_v7 }
 0x3e3   :  { %6858 = vmatmul.mubr.msk.bf16.gmra.mxu0 %vm349_vm1, %v7244_v37 }
 0x3e4   :  { %873 = vmatprep.mubr.bf16.mxu0 %v13630_v7 }
 0x3eb   :  { %6859 = vmatmul.mubr.msk.bf16.gmra.mxu0 %vm349_vm1, %v7245_v40  ;;  %v9565_v40 = vpop.f32.mrf.mxu1 }
 0x3ec   :  { %883 = vmatprep.mubr.bf16.mxu0 %v13630_v7  ;;  %13728 = vst [vmem:[#allocation38_spill] sm:$0xff] %v9565_v40 }
 0x3ed   :  { %v9571_v0 = vpop.f32.mrf.mxu1 }
 0x3ee   :  { %13729 = vst [vmem:[#allocation39_spill] sm:$0xff] %v9571_v0 }
 0x3ef   :  { %v9577_v31 = vpop.f32.mrf.mxu1 }
 0x3f0   :  { %13730 = vst [vmem:[#allocation40_spill] sm:$0xff] %v9577_v31 }
 0x3f1   :  { %v9579_v26 = vpop.f32.mrf.mxu1 }
 0x3f2   :  { %13731 = vst [vmem:[#allocation41_spill] sm:$0xff] %v9579_v26 }
 0x3f3   :  { %6860 = vmatmul.mubr.msk.bf16.gmra.mxu0 %vm349_vm1, %v7246_v43  ;;  %v9581_v21 = vpop.f32.mrf.mxu1 }
 0x3f4   :  { %893 = vmatprep.mubr.bf16.mxu0 %v13630_v7  ;;  %13732 = vst [vmem:[#allocation42_spill] sm:$0xff] %v9581_v21  ;;  %v189_v21 = vld [vmem:[#allocation2 + $0x1e0] sm:$0xff] }
 0x3f5   :  { %v9586_v40 = vpop.f32.mrf.mxu1 }
 0x3f6   :  { %13733 = vst [vmem:[#allocation43_spill] sm:$0xff] %v9586_v40 }
 0x3f7   :  { %v9588_v31 = vpop.f32.mrf.mxu1 }
 0x3f8   :  { %13734 = vst [vmem:[#allocation44_spill] sm:$0xff] %v9588_v31 }
 0x3f9   :  { %v9590_v39 = vpop.f32.mrf.mxu1 }
 0x3fa   :  { %13735 = vst [vmem:[#allocation45_spill] sm:$0xff] %v9590_v39 }
 0x3fb   :  { %6861 = vmatmul.mubr.msk.bf16.gmra.mxu0 %vm349_vm1, %v7247_v46  ;;  %v9592_v50 = vpop.f32.mrf.mxu1 }
 0x3fc   :  { %1449 = vmatprep.mubr.f32.mxu0 %v122_v18  ;;  %13736 = vst [vmem:[#allocation46_spill] sm:$0xff] %v9592_v50  ;;  %v215_v50 = vld [vmem:[#allocation2 + $0x2b0] sm:$0xff] }
 0x443   :  { %v9519_v3 = vpop.f32.mrf.mxu0 }
 0x445   :  { %v9521_v4 = vpop.f32.mrf.mxu0 }
 0x447   :  { %v9525_v6 = vpop.f32.mrf.mxu0 }
 0x449   :  { %v9527_v8 = vpop.f32.mrf.mxu0 }
 0x44b   :  { %v9531_v10 = vpop.f32.mrf.mxu0 }
 0x44d   :  { %v9533_v11 = vpop.f32.mrf.mxu0 }
 0x44f   :  { %v9537_v13 = vpop.f32.mrf.mxu0 }
 0x451   :  { %v9539_v14 = vpop.f32.mrf.mxu0 }
 0x453   :  { %v9543_v16 = vpop.f32.mrf.mxu0 }
 0x455   :  { %v9545_v17 = vpop.f32.mrf.mxu0 }
 0x457   :  { %v9549_v19 = vpop.f32.mrf.mxu0 }
 0x459   :  { %v9551_v20 = vpop.f32.mrf.mxu0 }
 0x45b   :  { %v9555_v23 = vpop.f32.mrf.mxu0 }
 0x45d   :  { %v9557_v28 = vpop.f32.mrf.mxu0 }
 0x45f   :  { %v9561_v33 = vpop.f32.mrf.mxu0 }
 0x461   :  { %v9563_v37 = vpop.f32.mrf.mxu0 }
 0x463   :  { %v9567_v43 = vpop.f32.mrf.mxu0 }
 0x465   :  { %v9569_v46 = vpop.f32.mrf.mxu0 }
 0x467   :  { %v9573_v7 = vpop.f32.mrf.mxu0 }
 0x469   :  { %v9575_v34 = vpop.f32.mrf.mxu0 }
 0x46b   :  { %v795_v29 = vpop.f32.mrf.mxu0 }
 0x46d   :  { %v797_v27 = vpop.f32.mrf.mxu0 }
 0x46f   :  { %v799_v25 = vpop.f32.mrf.mxu0 }
 0x471   :  { %v801_v24 = vpop.f32.mrf.mxu0 }
 0x473   :  { %v805_v22 = vpop.f32.mrf.mxu0 }
 0x474   :  { %v806_v56 = vadd.f32 %v805_v22, %v185_v51 }
 0x475   :  { %v807_v30 = vpop.f32.mrf.mxu0 }
 0x477   :  { %v809_v0 = vpop.f32.mrf.mxu0 }
 0x478   :  { %v810_v54 = vadd.f32 %v809_v0, %v187_v47  ;;  %v178_v47 = vld [vmem:[#allocation2 + $0x188] sm:$0xff] }
 0x479   :  { %v811_v32 = vpop.f32.mrf.mxu0 }
 0x47a   :  { %v812_v31 = vadd.f32 %v811_v32, %v188_v42  ;;  %v180_v32 = vld [vmem:[#allocation2 + $0x198] sm:$0xff]  ;;  %v179_v42 = vld [vmem:[#allocation2 + $0x190] sm:$0xff] }
 0x47b   :  { %v815_v35 = vpop.f32.mrf.mxu0  ;;  %v792_v22 = vadd.f32 %v9575_v34, %v180_v32  ;;  %v173_v34 = vld [vmem:[#allocation2 + $0x160] sm:$0xff] }
 0x47c   :  { %v816_v49 = vadd.f32 %v815_v35, %v189_v21  ;;  %v9598_v21 = vpop.f32.mrf.mxu1  ;;  %v181_v35 = vld [vmem:[#allocation2 + $0x1a0] sm:$0xff]  ;;  %v776_v32 = vadd.f32 %v9555_v23, %v173_v34 }
 0x47d   :  { %v817_v26 = vpop.f32.mrf.mxu0  ;;  %13737 = vst [vmem:[#allocation47_spill] sm:$0xff] %v9598_v21 }
 0x47e   :  { %v818_v41 = vadd.f32 %v817_v26, %v190_v36  ;;  %v183_v26 = vld [vmem:[#allocation2 + $0x1b0] sm:$0xff]  ;;  %v808_v36 = vadd.f32 %v807_v30, %v186_v48  ;;  %v796_v48 = vadd.f32 %v795_v29, %v181_v35  ;;  %v174_v29 = vld [vmem:[#allocation2 + $0x168] sm:$0xff] }
 0x47f   :  { %v819_v44 = vpop.f32.mrf.mxu0 }
 0x480   :  { %v820_v18 = vadd.f32 %v819_v44, %v191_v38  ;;  %7249 = vtanh.f32 %v818_v41  ;;  %v802_v44 = vadd.f32 %v801_v24, %v184_v53  ;;  %v800_v41 = vadd.f32 %v799_v25, %v183_v26  ;;  %v176_v24 = vld [vmem:[#allocation2 + $0x178] sm:$0xff]  ;;  %v175_v53 = vld [vmem:[#allocation2 + $0x170] sm:$0xff] }
 0x481   :  { %v821_v40 = vpop.f32.mrf.mxu0  ;;  %v790_v25 = vadd.f32 %v9573_v7, %v179_v42  ;;  %v782_v30 = vadd.f32 %v9563_v37, %v176_v24 }
 0x482   :  { %v822_v52 = vadd.f32 %v821_v40, %v192_v45  ;;  %7251 = vtanh.f32 %v820_v18  ;;  %v798_v45 = vadd.f32 %v797_v27, %v182_v55  ;;  %v788_v27 = vadd.f32 %v9569_v46, %v178_v47  ;;  %v172_v40 = vld [vmem:[#allocation2 + $0x158] sm:$0xff] }
 0x483   :  { %v9594_v39 = vpop.f32.mrf.mxu0  ;;  %v780_v18 = vadd.f32 %v9561_v33, %v175_v53  ;;  %v772_v33 = vadd.f32 %v9551_v20, %v172_v40  ;;  %v164_v40 = vld [vmem:[#allocation2 + $0x118] sm:$0xff] }
 0x484   :  { %7253 = vtanh.f32 %v822_v52  ;;  %v177_v52 = vld [vmem:[#allocation2 + $0x180] sm:$0xff] }
 0x485   :  { %7255 = vtanh.f32 %v816_v49  ;;  %v9596_v38 = vpop.f32.mrf.mxu0  ;;  %v9604_v49 = vpop.f32.mrf.mxu1 }
 0x486   :  { %7257 = vtanh.f32 %v812_v31  ;;  %13738 = vst [vmem:[#allocation48_spill] sm:$0xff] %v9604_v49 }
 0x487   :  { %7259 = vtanh.f32 %v810_v54  ;;  %v9600_v0 = vpop.f32.mrf.mxu0  ;;  %v786_v54 = vadd.f32 %v9567_v43, %v177_v52  ;;  %v778_v43 = vadd.f32 %v9557_v28, %v174_v29  ;;  %v168_v52 = vld [vmem:[#allocation2 + $0x138] sm:$0xff]  ;;  %v166_v29 = vld [vmem:[#allocation2 + $0x128] sm:$0xff] }
 0x488   :  { %7261 = vtanh.f32 %v808_v36  ;;  %v171_v36 = vld [vmem:[#allocation2 + $0x150] sm:$0xff] }
 0x489   :  { %7263 = vtanh.f32 %v806_v56  ;;  %v9602_v51 = vpop.f32.mrf.mxu0  ;;  %v9614_v56 = vpop.f32.mrf.mxu1  ;;  %v770_v28 = vadd.f32 %v9549_v19, %v171_v36  ;;  %v163_v36 = vld [vmem:[#allocation2 + $0x110] sm:$0xff] }
 0x48a   :  { %7265 = vtanh.f32 %v802_v44  ;;  %v170_v44 = vld [vmem:[#allocation2 + $0x148] sm:$0xff] }
 0x48b   :  { %7267 = vtanh.f32 %v800_v41  ;;  %v9608_v31 = vpop.f32.mrf.mxu0  ;;  %v9624_v37 = vpop.f32.mrf.mxu1  ;;  %v768_v53 = vadd.f32 %v9545_v17, %v170_v44  ;;  %v762_v17 = vadd.f32 %v9539_v14, %v168_v52 }
 0x48c   :  { %7269 = vtanh.f32 %v798_v45  ;;  %v169_v45 = vld [vmem:[#allocation2 + $0x140] sm:$0xff] }
 0x48d   :  { %7271 = vtanh.f32 %v796_v48  ;;  %v9612_v55 = vpop.f32.mrf.mxu0  ;;  %v7250_v7 = vpop.eup %7249 }
 0x48e   :  { %7273 = vtanh.f32 %v792_v22 }
 0x48f   :  { %7275 = vtanh.f32 %v790_v25  ;;  %v9618_v26 = vpop.f32.mrf.mxu0  ;;  %v7252_v46 = vpop.eup %7251  ;;  %v167_v25 = vld [vmem:[#allocation2 + $0x130] sm:$0xff] }
 0x490   :  { %7277 = vtanh.f32 %v788_v27  ;;  %v1351_v22 = vmul.f32 %v7252_v46, %v9535_v12  ;;  %v1350_v27 = vmul.f32 %v7250_v7, %v9529_v9  ;;  %v9638_v12 = vpop.f32.mrf.mxu1 }
 0x491   :  { %v7254_v35 = vpop.eup %7253  ;;  %7279 = vtanh.f32 %v786_v54  ;;  %v9622_v41 = vpop.f32.mrf.mxu0 }
 0x492   :  { %v7256_v42 = vpop.eup %7255  ;;  %7281 = vtanh.f32 %v782_v30  ;;  %v1352_v47 = vmul.f32 %v7254_v35, %v9541_v15  ;;  %v766_v15 = vadd.f32 %v9543_v16, %v169_v45  ;;  %v165_v30 = vld [vmem:[#allocation2 + $0x120] sm:$0xff]  ;;  %v760_v16 = vadd.f32 %v9537_v13, %v167_v25  ;;  %v162_v35 = vld [vmem:[#allocation2 + $0x108] sm:$0xff] }
 0x493   :  { %v7258_v48 = vpop.eup %7257  ;;  %7283 = vtanh.f32 %v780_v18  ;;  %v9630_v23 = vpop.f32.mrf.mxu0  ;;  %v1349_v19 = vmul.f32 %v7256_v42, %v9523_v5  ;;  %v756_v44 = vadd.f32 %v9531_v10, %v165_v30  ;;  %v161_v45 = vld [vmem:[#allocation2 + $0x100] sm:$0xff]  ;;  %v748_v52 = vadd.f32 %v9521_v4, %v162_v35 }
 0x494   :  { %v7260_v24 = vpop.eup %7259  ;;  %7285 = vtanh.f32 %v778_v43  ;;  %1385 = vmatprep.subr.mxu0 %v1352_v47  ;;  %v1348_v9 = vmul.f32 %v7258_v48, %v9517_v2  ;;  %v758_v43 = vadd.f32 %v9533_v11, %v166_v29  ;;  %v752_v11 = vadd.f32 %v9527_v8, %v164_v40  ;;  %v13743_v40 = vld [vmem:[#allocation30_spill] sm:$0xff] }
 0x495   :  { %v7262_v20 = vpop.eup %7261  ;;  %7287 = vtanh.f32 %v776_v32  ;;  %v9636_v54 = vpop.f32.mrf.mxu0  ;;  %1386 = vmatpush1.msra.mxu0 %v1351_v22  ;;  %v1347_v5 = vmul.f32 %v7260_v24, %v9515_v1  ;;  %v750_v47 = vadd.f32 %v9525_v6, %v163_v36  ;;  %v13744_v36 = vld [vmem:[#allocation29_spill] sm:$0xff] }
 0x496   :  { %v7264_v34 = vpop.eup %7263  ;;  %7289 = vtanh.f32 %v772_v33  ;;  %1387 = vmatprep.subr.mxu0 %v1350_v27  ;;  %v1346_v14 = vmul.f32 %v7262_v20, %v9513_v63  ;;  %v9652_v1 = vpop.f32.mrf.mxu1 }
 0x497   :  { %v7266_v7 = vpop.eup %7265  ;;  %7291 = vtanh.f32 %v770_v28  ;;  %v9644_v18 = vpop.f32.mrf.mxu0  ;;  %1388 = vmatpush1.msra.mxu0 %v1349_v19  ;;  %v1345_v13 = vmul.f32 %v7264_v34, %v9511_v62 }
 0x498   :  { %v7268_v46 = vpop.eup %7267  ;;  %7293 = vtanh.f32 %v768_v53  ;;  %1389 = vmatprep.subr.mxu0 %v1348_v9  ;;  %v1344_v63 = vmul.f32 %v7266_v7, %v9509_v61  ;;  %v746_v61 = vadd.f32 %v9519_v3, %v161_v45  ;;  %v13746_v45 = vld [vmem:[#allocation27_spill] sm:$0xff] }
 0x499   :  { %v7270_v2 = vpop.eup %7269  ;;  %7295 = vtanh.f32 %v766_v15  ;;  %v9650_v32 = vpop.f32.mrf.mxu0  ;;  %1390 = vmatpush1.msra.mxu0 %v1347_v5  ;;  %v1343_v10 = vmul.f32 %v7268_v46, %v9507_v60  ;;  %v13741_v15 = vld [vmem:[#allocation32_spill] sm:$0xff] }
 0x49a   :  { %v7272_v42 = vpop.eup %7271  ;;  %7297 = vtanh.f32 %v762_v17  ;;  %1391 = vmatprep.subr.mxu0 %v1346_v14  ;;  %v1342_v28 = vmul.f32 %v7270_v2, %v9505_v59  ;;  %v9666_v60 = vpop.f32.mrf.mxu1  ;;  %v13739_v59 = vld [vmem:[#allocation34_spill] sm:$0xff]  ;;  %v13742_v17 = vld [vmem:[#allocation31_spill] sm:$0xff]  ;;  %v13745_v2 = vld [vmem:[#allocation28_spill] sm:$0xff] }
 0x49b   :  { %v7274_v33 = vpop.eup %7273  ;;  %7299 = vtanh.f32 %v760_v16  ;;  %v9658_v62 = vpop.f32.mrf.mxu0  ;;  %1392 = vmatpush1.msra.mxu0 %v1345_v13  ;;  %v1341_v22 = vmul.f32 %v7272_v42, %v9503_v58  ;;  %v13740_v58 = vld [vmem:[#allocation33_spill] sm:$0xff] }
 0x49c   :  { %v7276_v48 = vpop.eup %7275  ;;  %7301 = vtanh.f32 %v758_v43  ;;  %1393 = vmatprep.subr.mxu0 %v1344_v63  ;;  %v1340_v25 = vmul.f32 %v7274_v33, %v9501_v57  ;;  %v9676_v57 = vpop.f32.mrf.mxu1  ;;  %v13747_v33 = vld [vmem:[#allocation26_spill] sm:$0xff] }
 0x49d   :  { %v7278_v8 = vpop.eup %7277  ;;  %7303 = vtanh.f32 %v756_v44  ;;  %v9664_v6 = vpop.f32.mrf.mxu0  ;;  %1394 = vmatpush1.msra.mxu0 %v1343_v10  ;;  %v1339_v53 = vmul.f32 %v7276_v48, %v13739_v59  ;;  %v13750_v59 = vld [vmem:[#allocation23_spill] sm:$0xff] }
 0x49e   :  { %v7280_v24 = vpop.eup %7279  ;;  %7305 = vtanh.f32 %v752_v11  ;;  %1395 = vmatprep.subr.mxu0 %v1342_v28  ;;  %v1338_v20 = vmul.f32 %v7278_v8, %v13740_v58  ;;  %v9686_v13 = vpop.f32.mrf.mxu1  ;;  %v13751_v58 = vld [vmem:[#allocation22_spill] sm:$0xff] }
 0x49f   :  { %v7282_v4 = vpop.eup %7281  ;;  %7307 = vtanh.f32 %v750_v47  ;;  %v9670_v27 = vpop.f32.mrf.mxu0  ;;  %1396 = vmatpush1.msra.mxu0 %v1341_v22  ;;  %v1337_v19 = vmul.f32 %v7280_v24, %v13741_v15 }
 0x4a0   :  { %v7284_v3 = vpop.eup %7283  ;;  %7309 = vtanh.f32 %v748_v52  ;;  %1397 = vmatprep.subr.mxu0 %v1340_v25  ;;  %v1336_v9 = vmul.f32 %v7282_v4, %v13742_v17  ;;  %v13748_v52 = vld [vmem:[#allocation25_spill] sm:$0xff]  ;;  %v9696_v25 = vpop.f32.mrf.mxu1 }
 0x4a1   :  { %v7286_v29 = vpop.eup %7285  ;;  %7311 = vtanh.f32 %v746_v61  ;;  %v9674_v34 = vpop.f32.mrf.mxu0  ;;  %1398 = vmatpush1.msra.mxu0 %v1339_v53  ;;  %v1335_v16 = vmul.f32 %v7284_v3, %v13743_v40  ;;  %v13749_v61 = vld [vmem:[#allocation24_spill] sm:$0xff] }
 0x4a2   :  { %v7288_v30 = vpop.eup %7287  ;;  %1399 = vmatprep.subr.mxu0 %v1338_v20  ;;  %v1334_v43 = vmul.f32 %v7286_v29, %v13744_v36  ;;  %v13754_v36 = vld [vmem:[#allocation19_spill] sm:$0xff] }
 0x4a3   :  { %v7290_v7 = vpop.eup %7289  ;;  %v9680_v5 = vpop.f32.mrf.mxu0  ;;  %1400 = vmatpush1.msra.mxu0 %v1337_v19  ;;  %v1333_v35 = vmul.f32 %v7288_v30, %v13745_v2  ;;  %v13752_v19 = vld [vmem:[#allocation21_spill] sm:$0xff] }
 0x4a4   :  { %v7292_v46 = vpop.eup %7291  ;;  %1401 = vmatprep.subr.mxu0 %v1336_v9  ;;  %v1332_v11 = vmul.f32 %v7290_v7, %v13746_v45  ;;  %v13753_v9 = vld [vmem:[#allocation20_spill] sm:$0xff] }
 0x4a5   :  { %v7294_v14 = vpop.eup %7293  ;;  %v9684_v44 = vpop.f32.mrf.mxu0  ;;  %1402 = vmatpush1.msra.mxu0 %v1335_v16  ;;  %v1331_v47 = vmul.f32 %v7292_v46, %v13747_v33 }
 0x4a6   :  { %v7296_v42 = vpop.eup %7295  ;;  %1403 = vmatprep.subr.mxu0 %v1334_v43  ;;  %v1330_v28 = vmul.f32 %v7294_v14, %v13748_v52  ;;  %v9704_v16 = vpop.f32.mrf.mxu1  ;;  %v13755_v14 = vld [vmem:[#allocation18_spill] sm:$0xff] }
 0x4a7   :  { %v7298_v63 = vpop.eup %7297  ;;  %v9690_v10 = vpop.f32.mrf.mxu0  ;;  %1404 = vmatpush1.msra.mxu0 %v1333_v35  ;;  %v1329_v22 = vmul.f32 %v7296_v42, %v13749_v61  ;;  %v13756_v42 = vld [vmem:[#allocation17_spill] sm:$0xff] }
 0x4a8   :  { %v7300_v48 = vpop.eup %7299  ;;  %1405 = vmatprep.subr.mxu0 %v1332_v11  ;;  %v1328_v53 = vmul.f32 %v7298_v63, %v13750_v59  ;;  %v13757_v11 = vld [vmem:[#allocation16_spill] sm:$0xff]  ;;  %v222_v59 = vld [vmem:[#allocation2 + $0x2e8] sm:$0xff] }
 0x4a9   :  { %v7302_v8 = vpop.eup %7301  ;;  %v9694_v24 = vpop.f32.mrf.mxu0  ;;  %1406 = vmatpush1.msra.mxu0 %v1331_v47  ;;  %v1327_v20 = vmul.f32 %v7300_v48, %v13751_v58 }
 0x4aa   :  { %v7304_v4 = vpop.eup %7303  ;;  %1407 = vmatprep.subr.mxu0 %v1330_v28  ;;  %v1326_v30 = vmul.f32 %v7302_v8, %v13752_v19  ;;  %v9710_v47 = vpop.f32.mrf.mxu1  ;;  %v220_v19 = vld [vmem:[#allocation2 + $0x2d8] sm:$0xff] }
 0x4ab   :  { %v7306_v3 = vpop.eup %7305  ;;  %v9700_v29 = vpop.f32.mrf.mxu0  ;;  %1408 = vmatpush1.msra.mxu0 %v1329_v22  ;;  %v1325_v7 = vmul.f32 %v7304_v4, %v13753_v9  ;;  %v219_v9 = vld [vmem:[#allocation2 + $0x2d0] sm:$0xff] }
 0x4ac   :  { %v7308_v15 = vpop.eup %7307  ;;  %1409 = vmatprep.subr.mxu0 %v1328_v53  ;;  %v1324_v43 = vmul.f32 %v7306_v3, %v13754_v36  ;;  %v9712_v28 = vpop.f32.mrf.mxu1  ;;  %v223_v3 = vld [vmem:[#allocation2 + $0x2f0] sm:$0xff] }
 0x4ad   :  { %v7310_v17 = vpop.eup %7309  ;;  %v877_v40 = vpop.f32.mrf.mxu0  ;;  %1410 = vmatpush1.msra.mxu0 %v1327_v20  ;;  %v1323_v2 = vmul.f32 %v7308_v15, %v13755_v14  ;;  %v221_v20 = vld [vmem:[#allocation2 + $0x2e0] sm:$0xff] }
 0x4ae   :  { %v7312_v46 = vpop.eup %7311  ;;  %1411 = vmatprep.subr.mxu0 %v1326_v30  ;;  %v1322_v45 = vmul.f32 %v7310_v17, %v13756_v42  ;;  %v9714_v22 = vpop.f32.mrf.mxu1  ;;  %v224_v17 = vld [vmem:[#allocation2 + $0x2f8] sm:$0xff] }
 0x4af   :  { %v879_v35 = vpop.f32.mrf.mxu0  ;;  %1412 = vmatpush1.msra.mxu0 %v1325_v7  ;;  %v1321_v63 = vmul.f32 %v7312_v46, %v13757_v11  ;;  %v218_v46 = vld [vmem:[#allocation2 + $0x2c8] sm:$0xff]  ;;  %v216_v11 = vld [vmem:[#allocation2 + $0x2b8] sm:$0xff] }
 0x4b0   :  { %1413 = vmatprep.subr.mxu0 %v1324_v43  ;;  %v9716_v58 = vpop.f32.mrf.mxu1 }
 0x4b1   :  { %v881_v33 = vpop.f32.mrf.mxu0  ;;  %1414 = vmatpush1.msra.mxu0 %v1323_v2  ;;  %v217_v2 = vld [vmem:[#allocation2 + $0x2c0] sm:$0xff] }
 0x4b2   :  { %1415 = vmatprep.subr.mxu0 %v1322_v45  ;;  %v9718_v14 = vpop.f32.mrf.mxu1 }
 0x4b3   :  { %v885_v48 = vpop.f32.mrf.mxu0  ;;  %1416 = vmatpush1.msra.mxu0 %v1321_v63 }
 0x4b4   :  { %v9720_v49 = vpop.f32.mrf.mxu1 }
 0x4b5   :  { %v887_v52 = vpop.f32.mrf.mxu0 }
 0x4b6   :  { %v888_v21 = vadd.f32 %v887_v52, %v218_v46  ;;  %v1312_v52 = vpop.f32.mrf.mxu1 }
 0x4b7   :  { %v889_v8 = vpop.f32.mrf.mxu0 }
 0x4b8   :  { %v890_v63 = vadd.f32 %v889_v8, %v219_v9  ;;  %v208_v9 = vld [vmem:[#allocation2 + $0x278] sm:$0xff] }
 0x4b9   :  { %v891_v61 = vpop.f32.mrf.mxu0  ;;  %v862_v46 = vadd.f32 %v9674_v34, %v208_v9 }
 0x4ba   :  { %v892_v42 = vadd.f32 %v891_v61, %v220_v19  ;;  %v211_v61 = vld [vmem:[#allocation2 + $0x290] sm:$0xff]  ;;  %v210_v19 = vld [vmem:[#allocation2 + $0x288] sm:$0xff] }
 0x4bb   :  { %v895_v4 = vpop.f32.mrf.mxu0 }
 0x4bc   :  { %v896_v36 = vadd.f32 %v895_v4, %v221_v20  ;;  %v882_v4 = vadd.f32 %v881_v33, %v216_v11  ;;  %v212_v20 = vld [vmem:[#allocation2 + $0x298] sm:$0xff]  ;;  %v207_v33 = vld [vmem:[#allocation2 + $0x270] sm:$0xff] }
 0x4bd   :  { %v897_v53 = vpop.f32.mrf.mxu0 }
 0x4be   :  { %v898_v15 = vadd.f32 %v897_v53, %v222_v59  ;;  %v214_v59 = vld [vmem:[#allocation2 + $0x2a8] sm:$0xff]  ;;  %v886_v53 = vadd.f32 %v885_v48, %v217_v2  ;;  %v872_v48 = vadd.f32 %v9694_v24, %v212_v20  ;;  %v204_v24 = vld [vmem:[#allocation2 + $0x258] sm:$0xff]  ;;  %v203_v2 = vld [vmem:[#allocation2 + $0x250] sm:$0xff] }
 0x4bf   :  { %v899_v30 = vpop.f32.mrf.mxu0  ;;  %v852_v34 = vadd.f32 %v9650_v32, %v204_v24 }
 0x4c0   :  { %v900_v7 = vadd.f32 %v899_v30, %v223_v3  ;;  %7313 = vtanh.f32 %v898_v15  ;;  %v213_v3 = vld [vmem:[#allocation2 + $0x2a0] sm:$0xff]  ;;  %v880_v30 = vadd.f32 %v879_v35, %v215_v50  ;;  %v878_v15 = vadd.f32 %v877_v40, %v214_v59  ;;  %v206_v35 = vld [vmem:[#allocation2 + $0x268] sm:$0xff]  ;;  %v1316_v40 = vpop.f32.mrf.mxu1 }
 0x4c1   :  { %v901_v43 = vpop.f32.mrf.mxu0  ;;  %v876_v8 = vadd.f32 %v9700_v29, %v213_v3  ;;  %v868_v50 = vadd.f32 %v9684_v44, %v210_v19  ;;  %v205_v29 = vld [vmem:[#allocation2 + $0x260] sm:$0xff]  ;;  %v198_v19 = vld [vmem:[#allocation2 + $0x228] sm:$0xff] }
 0x4c2   :  { %v902_v45 = vadd.f32 %v901_v43, %v224_v17  ;;  %7315 = vtanh.f32 %v900_v7  ;;  %v209_v17 = vld [vmem:[#allocation2 + $0x280] sm:$0xff]  ;;  %v870_v7 = vadd.f32 %v9690_v10, %v211_v61  ;;  %v860_v43 = vadd.f32 %v9670_v27, %v207_v33  ;;  %v1318_v11 = vpop.f32.mrf.mxu1  ;;  %v200_v27 = vld [vmem:[#allocation2 + $0x238] sm:$0xff] }
 0x4c3   :  { %v201_v59 = vld [vmem:[#allocation2 + $0x240] sm:$0xff] }
 0x4c4   :  { %7317 = vtanh.f32 %v902_v45  ;;  %v202_v45 = vld [vmem:[#allocation2 + $0x248] sm:$0xff] }
 0x4c5   :  { %7319 = vtanh.f32 %v896_v36  ;;  %v848_v61 = vadd.f32 %v9636_v54, %v202_v45 }
 0x4c6   :  { %7321 = vtanh.f32 %v892_v42  ;;  %v858_v42 = vadd.f32 %v9664_v6, %v206_v35 }
 0x4c7   :  { %7323 = vtanh.f32 %v890_v63 }
 0x4c8   :  { %7325 = vtanh.f32 %v888_v21  ;;  %v866_v21 = vadd.f32 %v9680_v5, %v209_v17  ;;  %v856_v5 = vadd.f32 %v9658_v62, %v205_v29  ;;  %v193_v29 = vld [vmem:[#allocation2 + $0x200] sm:$0xff] }
 0x4c9   :  { %7327 = vtanh.f32 %v886_v53 }
 0x4ca   :  { %7329 = vtanh.f32 %v882_v4  ;;  %v850_v4 = vadd.f32 %v9644_v18, %v203_v2  ;;  %v842_v18 = vadd.f32 %v9622_v41, %v200_v27  ;;  %v13761_v27 = vld [vmem:[#allocation45_spill] sm:$0xff] }
 0x4cb   :  { %7331 = vtanh.f32 %v880_v30  ;;  %v199_v30 = vld [vmem:[#allocation2 + $0x230] sm:$0xff] }
 0x4cc   :  { %7333 = vtanh.f32 %v878_v15 }
 0x4cd   :  { %7335 = vtanh.f32 %v876_v8  ;;  %v7314_v36 = vpop.eup %7313  ;;  %v846_v8 = vadd.f32 %v9630_v23, %v201_v59 }
 0x4ce   :  { %7337 = vtanh.f32 %v872_v48  ;;  %v1382_v62 = vmul.f32 %v7314_v36, %v1312_v52  ;;  %v197_v48 = vld [vmem:[#allocation2 + $0x220] sm:$0xff]  ;;  %v840_v52 = vadd.f32 %v9618_v26, %v199_v30  ;;  %v13763_v30 = vld [vmem:[#allocation43_spill] sm:$0xff] }
 0x4cf   :  { %7339 = vtanh.f32 %v870_v7  ;;  %v7316_v10 = vpop.eup %7315  ;;  %v196_v7 = vld [vmem:[#allocation2 + $0x218] sm:$0xff] }
 0x4d0   :  { %7341 = vtanh.f32 %v868_v50  ;;  %v1383_v20 = vmul.f32 %v7316_v10, %v1316_v40  ;;  %v195_v50 = vld [vmem:[#allocation2 + $0x210] sm:$0xff] }
 0x4d1   :  { %v7318_v44 = vpop.eup %7317  ;;  %7343 = vtanh.f32 %v866_v21  ;;  %v194_v21 = vld [vmem:[#allocation2 + $0x208] sm:$0xff] }
 0x4d2   :  { %v7320_v63 = vpop.eup %7319  ;;  %7345 = vtanh.f32 %v862_v46  ;;  %v1384_v53 = vmul.f32 %v7318_v44, %v1318_v11  ;;  %v828_v24 = vadd.f32 %v9596_v38, %v194_v21 }
 0x4d3   :  { %v7322_v3 = vpop.eup %7321  ;;  %7347 = vtanh.f32 %v860_v43  ;;  %v1381_v32 = vmul.f32 %v7320_v63, %v9720_v49  ;;  %v838_v49 = vadd.f32 %v9612_v55, %v198_v19 }
 0x4d4   :  { %v7324_v6 = vpop.eup %7323  ;;  %7349 = vtanh.f32 %v858_v42  ;;  %1417 = vmatprep.subr.mxu0 %v1384_v53  ;;  %v1380_v9 = vmul.f32 %v7322_v3, %v9718_v14  ;;  %v836_v14 = vadd.f32 %v9608_v31, %v197_v48  ;;  %v13760_v53 = vld [vmem:[#allocation46_spill] sm:$0xff] }
 0x4d5   :  { %v7326_v15 = vpop.eup %7325  ;;  %7351 = vtanh.f32 %v856_v5  ;;  %1418 = vmatpush2.msra.mxu0 %v1383_v20  ;;  %v1379_v33 = vmul.f32 %v7324_v6, %v9716_v58  ;;  %v832_v58 = vadd.f32 %v9602_v51, %v196_v7  ;;  %v826_v51 = vadd.f32 %v9594_v39, %v193_v29  ;;  %v13758_v5 = vld [vmem:[#allocation48_spill] sm:$0xff]  ;;  %v13767_v7 = vld [vmem:[#allocation39_spill] sm:$0xff] }
 0x4d6   :  { %v7328_v17 = vpop.eup %7327  ;;  %7353 = vtanh.f32 %v852_v34  ;;  %1419 = vmatprep.subr.mxu0 %v1382_v62  ;;  %v1378_v35 = vmul.f32 %v7326_v15, %v9714_v22  ;;  %v830_v22 = vadd.f32 %v9600_v0, %v195_v50  ;;  %v13762_v20 = vld [vmem:[#allocation44_spill] sm:$0xff]  ;;  %v13764_v15 = vld [vmem:[#allocation42_spill] sm:$0xff]  ;;  %v124_v29 = vld [vmem:[%s13625_s4 + $0x18] sm:$0xff] }
 0x4d7   :  { %v7330_v54 = vpop.eup %7329  ;;  %7355 = vtanh.f32 %v850_v4  ;;  %1420 = vmatpush2.msra.mxu0 %v1381_v32  ;;  %v1377_v40 = vmul.f32 %v7328_v17, %v9712_v28  ;;  %v13765_v32 = vld [vmem:[#allocation41_spill] sm:$0xff] }
 0x4d8   :  { %v7332_v23 = vpop.eup %7331  ;;  %7357 = vtanh.f32 %v848_v61  ;;  %1421 = vmatprep.subr.mxu0 %v1380_v9  ;;  %v1376_v46 = vmul.f32 %v7330_v54, %v9710_v47 }
 0x4d9   :  { %v7334_v41 = vpop.eup %7333  ;;  %7359 = vtanh.f32 %v846_v8  ;;  %1422 = vmatpush2.msra.mxu0 %v1379_v33  ;;  %v1375_v36 = vmul.f32 %v7332_v23, %v9704_v16  ;;  %v13768_v23 = vld [vmem:[#allocation38_spill] sm:$0xff] }
 0x4da   :  { %v7336_v26 = vpop.eup %7335  ;;  %7361 = vtanh.f32 %v842_v18  ;;  %1423 = vmatprep.subr.mxu0 %v1378_v35  ;;  %v1374_v28 = vmul.f32 %v7334_v41, %v9696_v25  ;;  %v13766_v18 = vld [vmem:[#allocation40_spill] sm:$0xff] }
 0x4db   :  { %v7338_v55 = vpop.eup %7337  ;;  %7363 = vtanh.f32 %v840_v52  ;;  %1424 = vmatpush2.msra.mxu0 %v1377_v40  ;;  %v1373_v47 = vmul.f32 %v7336_v26, %v9686_v13  ;;  %v13770_v41 = vld [vmem:[#allocation36_spill] sm:$0xff] }
 0x4dc   :  { %v7340_v31 = vpop.eup %7339  ;;  %7365 = vtanh.f32 %v838_v49  ;;  %1425 = vmatprep.subr.mxu0 %v1376_v46  ;;  %v1372_v0 = vmul.f32 %v7338_v55, %v9676_v57  ;;  %v13769_v49 = vld [vmem:[#allocation37_spill] sm:$0xff]  ;;  %v121_v26 = vld [vmem:[%s13625_s4] sm:$0xff] }
 0x4dd   :  { %v7342_v43 = vpop.eup %7341  ;;  %7367 = vtanh.f32 %v836_v14  ;;  %1426 = vmatpush2.msra.mxu0 %v1375_v36  ;;  %v1371_v38 = vmul.f32 %v7340_v31, %v9666_v60  ;;  %v13771_v14 = vld [vmem:[#allocation35_spill] sm:$0xff]  ;;  %v126_v46 = vld [vmem:[%s13625_s4 + $0x28] sm:$0xff]  ;;  %v125_v55 = vld [vmem:[%s13625_s4 + $0x20] sm:$0xff]  ;;  %v13772_v31 = vmov 0  }
 0x4de   :  { %v7344_v10 = vpop.eup %7343  ;;  %7369 = vtanh.f32 %v832_v58  ;;  %1427 = vmatprep.subr.mxu0 %v1374_v28  ;;  %v1370_v25 = vmul.f32 %v7342_v43, %v9652_v1  ;;  %v13759_v1 = vld [vmem:[#allocation47_spill] sm:$0xff]  ;;  %v123_v58 = vld [vmem:[%s13625_s4 + $0x10] sm:$0xff] }
 0x4df   :  { %v7346_v16 = vpop.eup %7345  ;;  %7371 = vtanh.f32 %v830_v22  ;;  %1428 = vmatpush2.msra.mxu0 %v1373_v47  ;;  %v1369_v13 = vmul.f32 %v7344_v10, %v9638_v12  ;;  %v128_v22 = vld [vmem:[%s13625_s4 + $0x38] sm:$0xff]  ;;  %v127_v36 = vld [vmem:[%s13625_s4 + $0x30] sm:$0xff] }
 0x4e0   :  { %v7348_v2 = vpop.eup %7347  ;;  %7373 = vtanh.f32 %v828_v24  ;;  %1429 = vmatprep.subr.mxu0 %v1372_v0  ;;  %v1368_v44 = vmul.f32 %v7346_v16, %v9624_v37  ;;  %v13773_v16 = vld [vmem:[#allocation8_spill] sm:$0xff] }
 0x4e1   :  { %v7350_v39 = vpop.eup %7349  ;;  %7375 = vtanh.f32 %v826_v51  ;;  %1430 = vmatpush2.msra.mxu0 %v1371_v38  ;;  %v1367_v45 = vmul.f32 %v7348_v2, %v9614_v56 }
 0x4e2   :  { %v7352_v42 = vpop.eup %7351  ;;  %1431 = vmatprep.subr.mxu0 %v1370_v25  ;;  %v1366_v11 = vmul.f32 %v7350_v39, %v13758_v5  ;;  %v13775_v25 = vld [vmem:[#allocation9_spill] sm:$0xff] }
 0x4e3   :  { %v7354_v57 = vpop.eup %7353  ;;  %1432 = vmatpush2.msra.mxu0 %v1369_v13  ;;  %v1365_v59 = vmul.f32 %v7352_v42, %v13759_v1  ;;  %v13777_v13 = vld [vmem:[#allocation10_spill] sm:$0xff]  ;;  %v13783_v5 = vld [vmem:[#allocation13_spill] sm:$0xff] }
 0x4e4   :  { %v7356_v60 = vpop.eup %7355  ;;  %1433 = vmatprep.subr.mxu0 %v1368_v44  ;;  %v1364_v12 = vmul.f32 %v7354_v57, %v13760_v53  ;;  %v13779_v44 = vld [vmem:[#allocation11_spill] sm:$0xff]  ;;  %v13785_v1 = vld [vmem:[#allocation14_spill] sm:$0xff] }
 0x4e5   :  { %v7358_v63 = vpop.eup %7357  ;;  %1434 = vmatpush2.msra.mxu0 %v1367_v45  ;;  %v1363_v37 = vmul.f32 %v7356_v60, %v13761_v27  ;;  %v13781_v45 = vld [vmem:[#allocation12_spill] sm:$0xff] }
 0x4e6   :  { %v7360_v34 = vpop.eup %7359  ;;  %1435 = vmatprep.subr.mxu0 %v1366_v11  ;;  %v1362_v56 = vmul.f32 %v7358_v63, %v13762_v20 }
 0x4e7   :  { %v7362_v3 = vpop.eup %7361  ;;  %1436 = vmatpush2.msra.mxu0 %v1365_v59  ;;  %v1361_v61 = vmul.f32 %v7360_v34, %v13763_v30 }
 0x4e8   :  { %v7364_v4 = vpop.eup %7363  ;;  %1437 = vmatprep.subr.mxu0 %v1364_v12  ;;  %v1360_v19 = vmul.f32 %v7362_v3, %v13764_v15  ;;  %v13787_v12 = vld [vmem:[#allocation15_spill] sm:$0xff] }
 0x4e9   :  { %v7366_v6 = vpop.eup %7365  ;;  %1438 = vmatpush2.msra.mxu0 %v1363_v37  ;;  %v1359_v17 = vmul.f32 %v7364_v4, %v13765_v32  ;;  %v8145_v37 = vld [vmem:[%s13623_s2] sm:$0xff]   ;;  %v8146_v4 = vld [vmem:[%s13623_s2 + $0x8] sm:$0xff]  }
 0x4ea   :  { %v7368_v62 = vpop.eup %7367  ;;  %1439 = vmatprep.subr.mxu0 %v1362_v56  ;;  %v1358_v9 = vmul.f32 %v7366_v6, %v13766_v18  ;;  %v8148_v32 = vld [vmem:[#allocation2 + $0x68] sm:$0xff] }
 0x4eb   :  { %v7370_v8 = vpop.eup %7369  ;;  %1440 = vmatpush2.msra.mxu0 %v1361_v61  ;;  %v1357_v52 = vmul.f32 %v7368_v62, %v13767_v7 }
 0x4ec   :  { %v7372_v48 = vpop.eup %7371  ;;  %1441 = vmatprep.subr.mxu0 %v1360_v19  ;;  %v1356_v50 = vmul.f32 %v7370_v8, %v13768_v23  ;;  %v8147_v19 = vld [vmem:[#allocation2 + $0x58] sm:$0xff] }
 0x4ed   :  { %v7374_v54 = vpop.eup %7373  ;;  %1442 = vmatpush2.msra.mxu0 %v1359_v17  ;;  %v1355_v35 = vmul.f32 %v7372_v48, %v13769_v49  ;;  %v8149_v48 = vld [vmem:[#allocation2 + $0x70] sm:$0xff]  ;;  %v8152_v23 = vld [vmem:[#allocation2 + $0x78] sm:$0xff] }
 0x4ee   :  { %v7376_v33 = vpop.eup %7375  ;;  %1443 = vmatprep.subr.mxu0 %v1358_v9  ;;  %v1354_v21 = vmul.f32 %v7374_v54, %v13770_v41  ;;  %v8150_v9 = vld [vmem:[#allocation2 + $0x60] sm:$0xff]  ;;  %v8153_v49 = vld [vmem:[#allocation2 + $0x50] sm:$0xff] }
 0x4ef   :  { %1444 = vmatpush2.msra.mxu0 %v1357_v52  ;;  %v1353_v40 = vmul.f32 %v7376_v33, %v13771_v14  ;;  %v8151_v52 = vld [vmem:[#allocation2 + $0x48] sm:$0xff] }
 0x4f0   :  { %1445 = vmatprep.subr.mxu0 %v1356_v50 }
 0x4f1   :  { %1446 = vmatpush2.msra.mxu0 %v1355_v35 }
 0x4f2   :  { %1447 = vmatprep.subr.mxu0 %v1354_v21 }
 0x4f3   :  { %1448 = vmatpush2.msra.mxu0 %v1353_v40 }
 0x4f4   :  { %1450 = vmatmul.mubr.f32.vlgmr.msra.gmra.mxu0 %v121_v26  ;;  %v8154_v26 = vld [vmem:[#allocation2 + $0x40] sm:$0xff] }
 0x4f5   :  { %1455 = vmatprep.mubr.f32.mxu0 %v124_v29 }
 0x4f8   :  { %1456 = vmatmul.mubr.f32.gmra.mxu0 %v123_v58 }
 0x4f9   :  { %1461 = vmatprep.mubr.f32.mxu0 %v126_v46 }
 0x4fc   :  { %1462 = vmatmul.mubr.f32.gmra.mxu0 %v125_v55 }
 0x4fd   :  { %1467 = vmatprep.mubr.f32.mxu0 %v128_v22 }
 0x500   :  { %1468 = vmatmul.mubr.f32.gmra.mxu0 %v127_v36 }
 0x501   :  { %1585 = vmatprep.mubr.bf16.mxu0 %v13772_v31 }
 0x5b4   :  { %v1451_v24 = vpop.f32.mrf.mxu0 }
 0x5b5   :  { %v9822_v3 = vadd.f32 %v1451_v24, %v13787_v12  ;;  %v8160_v12 = vld [vmem:[#allocation2 + $0xa0] sm:$0xff] }
 0x5b6   :  { %v1453_v28 = vpop.f32.mrf.mxu0 }
 0x5b7   :  { %v9810_v11 = vadd.f32 %v1453_v28, %v13783_v5  ;;  %13788 = vst [vmem:[#allocation27_spill] sm:$0xff] %v9822_v3 }
 0x5b8   :  { %v1457_v43 = vpop.f32.mrf.mxu0 }
 0x5b9   :  { %13784 = vst [vmem:[#allocation29_spill] sm:$0xff] %v9810_v11  ;;  %v9815_v59 = vadd.f32 %v1457_v43, %v13785_v1 }
 0x5ba   :  { %v1459_v51 = vpop.f32.mrf.mxu0 }
 0x5bb   :  { %v9798_v39 = vadd.f32 %v1459_v51, %v13775_v25  ;;  %13786 = vst [vmem:[#allocation28_spill] sm:$0xff] %v9815_v59  ;;  %v1484_v27 = vpack.c.bf16 %v9815_v59, %v9822_v3  ;;  %v8155_v51 = vld [vmem:[%s13623_s2 + $0x10] sm:$0xff]  }
 0x5bc   :  { %v1463_v47 = vpop.f32.mrf.mxu0 }
 0x5bd   :  { %13776 = vst [vmem:[#allocation33_spill] sm:$0xff] %v9798_v39  ;;  %v9807_v60 = vadd.f32 %v1463_v47, %v13781_v45  ;;  %v1485_v53 = vpack.c.bf16 %v9798_v39, %v9810_v11  ;;  %v8156_v47 = vld [vmem:[%s13623_s2 + $0x18] sm:$0xff]  }
 0x5be   :  { %v1465_v10 = vpop.f32.mrf.mxu0  ;;  %v8157_v45 = vld [vmem:[#allocation2 + $0x98] sm:$0xff] }
 0x5bf   :  { %v9801_v42 = vadd.f32 %v1465_v10, %v13777_v13  ;;  %13782 = vst [vmem:[#allocation30_spill] sm:$0xff] %v9807_v60 }
 0x5c0   :  { %v1469_v0 = vpop.f32.mrf.mxu0 }
 0x5c1   :  { %v9795_v38 = vadd.f32 %v1469_v0, %v13773_v16  ;;  %13778 = vst [vmem:[#allocation32_spill] sm:$0xff] %v9801_v42 }
 0x5c2   :  { %v1471_v2 = vpop.f32.mrf.mxu0 }
 0x5c3   :  { %13774 = vst [vmem:[#allocation34_spill] sm:$0xff] %v9795_v38  ;;  %v9804_v57 = vadd.f32 %v1471_v2, %v13779_v44  ;;  %v1486_v34 = vpack.c.bf16 %v9795_v38, %v9807_v60 }
 0x5c5   :  { %13780 = vst [vmem:[#allocation31_spill] sm:$0xff] %v9804_v57  ;;  %v1487_v63 = vpack.c.bf16 %v9804_v57, %v9801_v42 }
 0x5c7   :  { %1500 = vmatprep.subr.bf16.mxu1 %v1487_v63  ;;  %v8158_v63 = vld [vmem:[#allocation2 + $0xa8] sm:$0xff] }
 0x5c8   :  { %1501 = vmatpush1.bf16.msra.mxu1 %v1486_v34  ;;  %v8159_v34 = vld [vmem:[#allocation2 + $0xb0] sm:$0xff] }
 0x5c9   :  { %1502 = vmatprep.subr.bf16.mxu1 %v1485_v53 }
 0x5cc   :  { %1503 = vmatpush1.bf16.msra.mxu1 %v1484_v27 }
 0x5cf   :  { %6894 = vmatmul.mubr.msk.bf16.vlgmr.msra.gmra.mxu1 %vm349_vm1, %v8145_v37 }
 0x5d0   :  { %1530 = vmatprep.mubr.bf16.mxu1 %v13772_v31 }
 0x5d7   :  { %6895 = vmatmul.mubr.msk.bf16.gmra.mxu1 %vm349_vm1, %v8146_v4  ;;  %v8161_v4 = vld [vmem:[#allocation2 + $0x88] sm:$0xff] }
 0x5d8   :  { %1650 = vmatprep.mubr.bf16.mxu1 %v13772_v31 }
 0x68f   :  { %v1522_v20 = vpop.f32.mrf.mxu1 }
 0x690   :  { %v1523_v29 = vadd.f32 %v8154_v26, %v1522_v20  ;;  %v8169_v26 = vld [vmem:[%s13624_s3 + $0x30] sm:$0xff] }
 0x691   :  { %v1524_v56 = vpop.f32.mrf.mxu1 }
 0x692   :  { %v1525_v33 = vadd.f32 %v8151_v52, %v1524_v56  ;;  %v1541_v28 = vmax.f32 %v1523_v29, 0.0  ;;  %v8162_v56 = vld [vmem:[#allocation2 + $0xb8] sm:$0xff] }
 0x693   :  { %v1526_v6 = vpop.f32.mrf.mxu1  ;;  %v8170_v29 = vld [vmem:[%s13624_s3 + $0x38] sm:$0xff] }
 0x694   :  { %v1527_v35 = vadd.f32 %v8153_v49, %v1526_v6  ;;  %v1542_v46 = vmax.f32 %v1525_v33, 0.0  ;;  %v8166_v49 = vld [vmem:[%s13623_s2 + $0x28] sm:$0xff]  }
 0x695   :  { %v1528_v30 = vpop.f32.mrf.mxu1 }
 0x696   :  { %v1529_v8 = vadd.f32 %v8147_v19, %v1528_v30  ;;  %v1543_v22 = vmax.f32 %v1527_v35, 0.0  ;;  %v8163_v30 = vld [vmem:[#allocation2 + $0x90] sm:$0xff]  ;;  %v13789_v35 = vmov 0.0  }
 0x697   :  { %v1532_v61 = vpop.f32.mrf.mxu1 }
 0x698   :  { %v1533_v54 = vadd.f32 %v8150_v9, %v1532_v61  ;;  %v1544_v21 = vmax.f32 %v1529_v8, 0.0  ;;  %v1549_v43 = vpack.c.bf16 %v1543_v22, %v1541_v28  ;;  %v8174_v22 = vld [vmem:[%s13624_s3 + $0x58] sm:$0xff]  ;;  %v8177_v28 = vld [vmem:[%s13624_s3 + $0x70] sm:$0xff] }
 0x699   :  { %v1534_v62 = vpop.f32.mrf.mxu1 }
 0x69a   :  { %v1535_v17 = vadd.f32 %v8148_v32, %v1534_v62  ;;  %v1545_v58 = vmax.f32 %v1533_v54, 0.0  ;;  %v1550_v24 = vpack.c.bf16 %v1544_v21, %v1542_v46  ;;  %v8164_v32 = vld [vmem:[#allocation2 + $0x80] sm:$0xff]  ;;  %v1482_v21 = vld [vmem:[%s13622_s1 + $0x10] sm:$0xff]  ;;  %v8172_v46 = vld [vmem:[%s13624_s3 + $0x48] sm:$0xff] }
 0x69b   :  { %v1536_v15 = vpop.f32.mrf.mxu1 }
 0x69c   :  { %v1537_v18 = vadd.f32 %v8149_v48, %v1536_v15  ;;  %v1546_v14 = vmax.f32 %v1535_v17, 0.0 }
 0x69d   :  { %v1538_v7 = vpop.f32.mrf.mxu1 }
 0x69e   :  { %v1539_v50 = vadd.f32 %v8152_v23, %v1538_v7  ;;  %v1547_v41 = vmax.f32 %v1537_v18, 0.0 }
 0x6a0   :  { %v1548_v40 = vmax.f32 %v1539_v50, 0.0  ;;  %v1551_v36 = vpack.c.bf16 %v1547_v41, %v1545_v58  ;;  %v8165_v50 = vld [vmem:[%s13623_s2 + $0x20] sm:$0xff]   ;;  %v1483_v41 = vld [vmem:[%s13622_s1 + $0x18] sm:$0xff] }
 0x6a1   :  { %v8171_v58 = vld [vmem:[%s13624_s3 + $0x40] sm:$0xff] }
 0x6a2   :  { %v1552_v55 = vpack.c.bf16 %v1548_v40, %v1546_v14  ;;  %v8167_v14 = vld [vmem:[%s13624_s3 + $0x20] sm:$0xff]  ;;  %v8168_v40 = vld [vmem:[%s13624_s3 + $0x28] sm:$0xff] }
 0x6a4   :  { %1565 = vmatprep.subr.bf16.mxu0 %v1552_v55  ;;  %v8173_v55 = vld [vmem:[%s13624_s3 + $0x50] sm:$0xff] }
 0x6a5   :  { %1566 = vmatpush1.bf16.msra.mxu0 %v1551_v36  ;;  %v8175_v36 = vld [vmem:[%s13624_s3 + $0x60] sm:$0xff] }
 0x6a6   :  { %1567 = vmatprep.subr.bf16.mxu0 %v1550_v24  ;;  %v8176_v24 = vld [vmem:[%s13624_s3 + $0x68] sm:$0xff] }
 0x6a9   :  { %1568 = vmatpush1.bf16.msra.mxu0 %v1549_v43  ;;  %v8178_v43 = vld [vmem:[%s13624_s3 + $0x78] sm:$0xff] }
 0x6ac   :  { %6896 = vmatmul.mubr.msk.bf16.vlgmr.msra.gmra.mxu0 %vm349_vm1, %v8155_v51  ;;  %v8179_v51 = vld [vmem:[%s13624_s3 + $0x80] sm:$0xff] }
 0x6ad   :  { %1595 = vmatprep.mubr.bf16.mxu0 %v13772_v31 }
 0x6b4   :  { %6897 = vmatmul.mubr.msk.bf16.gmra.mxu0 %vm349_vm1, %v8156_v47  ;;  %v8180_v47 = vld [vmem:[%s13624_s3 + $0x88] sm:$0xff] }
 0x6b5   :  { %1715 = vmatprep.mubr.bf16.mxu0 %v13772_v31 }
 0x76c   :  { %v1587_v10 = vpop.f32.mrf.mxu0 }
 0x76d   :  { %v1588_v17 = vadd.f32 %v8164_v32, %v1587_v10  ;;  %v8181_v10 = vld [vmem:[%s13624_s3 + $0x90] sm:$0xff] }
 0x76e   :  { %v1589_v0 = vpop.f32.mrf.mxu0 }
 0x76f   :  { %v1590_v20 = vadd.f32 %v8161_v4, %v1589_v0  ;;  %v1606_v33 = vmax.f32 %v1588_v17, 0.0  ;;  %v8182_v0 = vld [vmem:[%s13624_s3 + $0x98] sm:$0xff] }
 0x770   :  { %v1591_v16 = vpop.f32.mrf.mxu0 }
 0x771   :  { %v1592_v61 = vadd.f32 %v8163_v30, %v1591_v16  ;;  %v1607_v18 = vmax.f32 %v1590_v20, 0.0  ;;  %v8183_v16 = vld [vmem:[%s13624_s3 + $0xa0] sm:$0xff] }
 0x772   :  { %v1593_v2 = vpop.f32.mrf.mxu0 }
 0x773   :  { %v1594_v5 = vadd.f32 %v8157_v45, %v1593_v2  ;;  %v1608_v54 = vmax.f32 %v1592_v61, 0.0  ;;  %v8184_v2 = vld [vmem:[%s13624_s3 + $0xa8] sm:$0xff] }
 0x774   :  { %v1597_v25 = vpop.f32.mrf.mxu0  ;;  %v8188_v45 = vld [vmem:[%s13624_s3 + $0xc8] sm:$0xff] }
 0x775   :  { %v1598_v27 = vadd.f32 %v8160_v12, %v1597_v25  ;;  %v1609_v15 = vmax.f32 %v1594_v5, 0.0  ;;  %v1614_v23 = vpack.c.bf16 %v1608_v54, %v1606_v33  ;;  %v8185_v25 = vld [vmem:[%s13624_s3 + $0xb0] sm:$0xff]  ;;  %v8194_v61 = vld [vmem:[#allocation2 + $0xe8] sm:$0xff] }
 0x776   :  { %v1599_v13 = vpop.f32.mrf.mxu0 }
 0x777   :  { %v1600_v1 = vadd.f32 %v8158_v63, %v1599_v13  ;;  %v1610_v48 = vmax.f32 %v1598_v27, 0.0  ;;  %v1615_v52 = vpack.c.bf16 %v1609_v15, %v1607_v18  ;;  %v8186_v13 = vld [vmem:[%s13624_s3 + $0xb8] sm:$0xff]  ;;  %v8189_v63 = vld [vmem:[%s13624_s3 + $0xd0] sm:$0xff] }
 0x778   :  { %v1601_v44 = vpop.f32.mrf.mxu0  ;;  %v8195_v15 = vld [vmem:[#allocation2 + $0xf0] sm:$0xff] }
 0x779   :  { %v1602_v53 = vadd.f32 %v8159_v34, %v1601_v44  ;;  %v1611_v19 = vmax.f32 %v1600_v1, 0.0  ;;  %v8187_v44 = vld [vmem:[%s13624_s3 + $0xc0] sm:$0xff] }
 0x77a   :  { %v1603_v37 = vpop.f32.mrf.mxu0 }
 0x77b   :  { %v1604_v6 = vadd.f32 %v8162_v56, %v1603_v37  ;;  %v1612_v62 = vmax.f32 %v1602_v53, 0.0  ;;  %v8190_v53 = vld [vmem:[%s13624_s3 + $0xd8] sm:$0xff]  ;;  %v8191_v37 = vld [vmem:[%s13624_s3 + $0xe0] sm:$0xff]  ;;  %v8192_v56 = vld [vmem:[%s13624_s3 + $0xe8] sm:$0xff] }
 0x77d   :  { %v1613_v8 = vmax.f32 %v1604_v6, 0.0  ;;  %v1616_v7 = vpack.c.bf16 %v1612_v62, %v1610_v48  ;;  %v8193_v6 = vld [vmem:[#allocation2 + $0xd8] sm:$0xff]  ;;  %v8197_v48 = vld [vmem:[#allocation2 + $0xc8] sm:$0xff] }
 0x77f   :  { %v1617_v9 = vpack.c.bf16 %v1613_v8, %v1611_v19  ;;  %v8196_v8 = vld [vmem:[#allocation2 + $0xe0] sm:$0xff] }
 0x781   :  { %1630 = vmatprep.subr.bf16.mxu1 %v1617_v9  ;;  %v8198_v9 = vld [vmem:[#allocation2 + $0xf8] sm:$0xff] }
 0x782   :  { %1631 = vmatpush1.bf16.msra.mxu1 %v1616_v7  ;;  %v8199_v7 = vld [vmem:[#allocation2 + $0xd0] sm:$0xff] }
 0x783   :  { %1632 = vmatprep.subr.bf16.mxu1 %v1615_v52 }
 0x786   :  { %1633 = vmatpush1.bf16.msra.mxu1 %v1614_v23  ;;  %v8200_v23 = vld [vmem:[%s13624_s3 + $0xf0] sm:$0xff] }
 0x787   :  { %1970 = vmatprep.subr.mxu1 %v1483_v41 }
 0x789   :  { %6898 = vmatmul.mubr.msk.bf16.vlgmr.msra.gmra.mxu1 %vm349_vm1, %v8165_v50 }
 0x78a   :  { %1660 = vmatprep.mubr.bf16.mxu1 %v13772_v31  ;;  %1971 = vmatpush1.msra.mxu1 %v1482_v21  ;;  %v8201_v21 = vld [vmem:[#allocation2 + $0xc0] sm:$0xff] }
 0x791   :  { %6899 = vmatmul.mubr.msk.bf16.gmra.mxu1 %vm349_vm1, %v8166_v49 }
 0x792   :  { %2004 = vmatprep.mubr.f32.mxu1 %v13789_v35 }
 0x799   :  { %6916 = vmatmul.mubr.msk.f32.vlgmr.msra.gmra.mxu1 %vm231_vm0, %v8167_v14 }
 0x79a   :  { %2010 = vmatprep.mubr.f32.mxu1 %v13789_v35 }
 0x79d   :  { %6917 = vmatmul.mubr.msk.f32.gmra.mxu1 %vm231_vm0, %v8168_v40 }
 0x79e   :  { %2016 = vmatprep.mubr.f32.mxu1 %v13789_v35 }
 0x7a1   :  { %6918 = vmatmul.mubr.msk.f32.gmra.mxu1 %vm231_vm0, %v8169_v26 }
 0x7a2   :  { %2022 = vmatprep.mubr.f32.mxu1 %v13789_v35 }
 0x7a5   :  { %6919 = vmatmul.mubr.msk.f32.gmra.mxu1 %vm231_vm0, %v8170_v29 }
 0x7a6   :  { %2028 = vmatprep.mubr.f32.mxu1 %v13789_v35 }
 0x7a9   :  { %6920 = vmatmul.mubr.msk.f32.gmra.mxu1 %vm231_vm0, %v8171_v58 }
 0x7aa   :  { %2034 = vmatprep.mubr.f32.mxu1 %v13789_v35 }
 0x7ad   :  { %6921 = vmatmul.mubr.msk.f32.gmra.mxu1 %vm231_vm0, %v8172_v46 }
 0x7ae   :  { %2040 = vmatprep.mubr.f32.mxu1 %v13789_v35 }
 0x7b1   :  { %6922 = vmatmul.mubr.msk.f32.gmra.mxu1 %vm231_vm0, %v8173_v55  ;;  %v8202_v55 = vld [vmem:[%s13624_s3 + $0xf8] sm:$0xff] }
 0x7b2   :  { %2046 = vmatprep.mubr.f32.mxu1 %v13789_v35 }
 0x7b5   :  { %6923 = vmatmul.mubr.msk.f32.gmra.mxu1 %vm231_vm0, %v8174_v22 }
 0x7b6   :  { %2052 = vmatprep.mubr.f32.mxu1 %v13789_v35 }
 0x7b9   :  { %6924 = vmatmul.mubr.msk.f32.gmra.mxu1 %vm231_vm0, %v8175_v36 }
 0x7ba   :  { %2058 = vmatprep.mubr.f32.mxu1 %v13789_v35 }
 0x7bd   :  { %6925 = vmatmul.mubr.msk.f32.gmra.mxu1 %vm231_vm0, %v8176_v24 }
 0x7be   :  { %2064 = vmatprep.mubr.f32.mxu1 %v13789_v35 }
 0x7c1   :  { %6926 = vmatmul.mubr.msk.f32.gmra.mxu1 %vm231_vm0, %v8177_v28  ;;  %v8203_v28 = vld [vmem:[%s13624_s3 + $0x100] sm:$0xff] }
 0x7c2   :  { %2070 = vmatprep.mubr.f32.mxu1 %v13789_v35 }
 0x7c5   :  { %6927 = vmatmul.mubr.msk.f32.gmra.mxu1 %vm231_vm0, %v8178_v43  ;;  %v8204_v43 = vld [vmem:[%s13624_s3 + $0x108] sm:$0xff] }
 0x7c6   :  { %2076 = vmatprep.mubr.f32.mxu1 %v13789_v35 }
 0x7c9   :  { %6928 = vmatmul.mubr.msk.f32.gmra.mxu1 %vm231_vm0, %v8179_v51  ;;  %v8205_v51 = vld [vmem:[%s13623_s2 + $0x30] sm:$0xff]  }
 0x7ca   :  { %2082 = vmatprep.mubr.f32.mxu1 %v13789_v35 }
 0x7cd   :  { %6929 = vmatmul.mubr.msk.f32.gmra.mxu1 %vm231_vm0, %v8180_v47  ;;  %v8206_v47 = vld [vmem:[%s13624_s3 + $0x110] sm:$0xff] }
 0x7ce   :  { %2088 = vmatprep.mubr.f32.mxu1 %v13789_v35 }
 0x7d1   :  { %6930 = vmatmul.mubr.msk.f32.gmra.mxu1 %vm231_vm0, %v8181_v10  ;;  %v8207_v10 = vld [vmem:[%s13624_s3 + $0x118] sm:$0xff] }
 0x7d2   :  { %2094 = vmatprep.mubr.f32.mxu1 %v13789_v35 }
 0x7d5   :  { %6931 = vmatmul.mubr.msk.f32.gmra.mxu1 %vm231_vm0, %v8182_v0  ;;  %v8208_v0 = vld [vmem:[%s13623_s2 + $0x38] sm:$0xff]  }
 0x7d6   :  { %2100 = vmatprep.mubr.f32.mxu1 %v13789_v35 }
 0x7d9   :  { %6932 = vmatmul.mubr.msk.f32.gmra.mxu1 %vm231_vm0, %v8183_v16  ;;  %v8209_v16 = vld [vmem:[%s13623_s2 + $0x40] sm:$0xff]  }
 0x7da   :  { %2106 = vmatprep.mubr.f32.mxu1 %v13789_v35 }
 0x7dd   :  { %6933 = vmatmul.mubr.msk.f32.gmra.mxu1 %vm231_vm0, %v8184_v2  ;;  %v8210_v2 = vld [vmem:[%s13623_s2 + $0x48] sm:$0xff]  }
 0x7de   :  { %2112 = vmatprep.mubr.f32.mxu1 %v13789_v35 }
 0x7e1   :  { %6934 = vmatmul.mubr.msk.f32.gmra.mxu1 %vm231_vm0, %v8185_v25  ;;  %v8211_v25 = vld [vmem:[%s13623_s2 + $0x50] sm:$0xff]  }
 0x7e2   :  { %2118 = vmatprep.mubr.f32.mxu1 %v13789_v35 }
 0x7e5   :  { %6935 = vmatmul.mubr.msk.f32.gmra.mxu1 %vm231_vm0, %v8186_v13  ;;  %v8212_v13 = vld [vmem:[%s13623_s2 + $0x58] sm:$0xff]  }
 0x7e6   :  { %2124 = vmatprep.mubr.f32.mxu1 %v13789_v35 }
 0x7e9   :  { %6936 = vmatmul.mubr.msk.f32.gmra.mxu1 %vm231_vm0, %v8187_v44  ;;  %v8213_v44 = vld [vmem:[%s13623_s2 + $0x60] sm:$0xff]  }
 0x7ea   :  { %2130 = vmatprep.mubr.f32.mxu1 %v13789_v35 }
 0x7ed   :  { %6937 = vmatmul.mubr.msk.f32.gmra.mxu1 %vm231_vm0, %v8188_v45  ;;  %v8214_v45 = vld [vmem:[%s13623_s2 + $0x68] sm:$0xff]  }
 0x7ee   :  { %2136 = vmatprep.mubr.f32.mxu1 %v13789_v35 }
 0x7f1   :  { %6938 = vmatmul.mubr.msk.f32.gmra.mxu1 %vm231_vm0, %v8189_v63  ;;  %v8216_v63 = vld [vmem:[%s13623_s2 + $0x78] sm:$0xff]  }
 0x7f2   :  { %2142 = vmatprep.mubr.f32.mxu1 %v13789_v35 }
 0x7f5   :  { %6939 = vmatmul.mubr.msk.f32.gmra.mxu1 %vm231_vm0, %v8190_v53 }
 0x7f6   :  { %2148 = vmatprep.mubr.f32.mxu1 %v13789_v35 }
 0x7f9   :  { %6940 = vmatmul.mubr.msk.f32.gmra.mxu1 %vm231_vm0, %v8191_v37 }
 0x7fa   :  { %2154 = vmatprep.mubr.f32.mxu1 %v13789_v35 }
 0x7fd   :  { %6941 = vmatmul.mubr.msk.f32.gmra.mxu1 %vm231_vm0, %v8192_v56 }
 0x7fe   :  { %2160 = vmatprep.mubr.f32.mxu1 %v13789_v35 }
 0x801   :  { %6942 = vmatmul.mubr.msk.f32.gmra.mxu1 %vm231_vm0, %v8200_v23 }
 0x802   :  { %2166 = vmatprep.mubr.f32.mxu1 %v13789_v35 }
 0x805   :  { %6943 = vmatmul.mubr.msk.f32.gmra.mxu1 %vm231_vm0, %v8202_v55 }
 0x806   :  { %2172 = vmatprep.mubr.f32.mxu1 %v13789_v35 }
 0x809   :  { %6944 = vmatmul.mubr.msk.f32.gmra.mxu1 %vm231_vm0, %v8203_v28 }
 0x80a   :  { %2178 = vmatprep.mubr.f32.mxu1 %v13789_v35 }
 0x80d   :  { %6945 = vmatmul.mubr.msk.f32.gmra.mxu1 %vm231_vm0, %v8204_v43 }
 0x80e   :  { %2184 = vmatprep.mubr.f32.mxu1 %v13789_v35 }
 0x811   :  { %6946 = vmatmul.mubr.msk.f32.gmra.mxu1 %vm231_vm0, %v8206_v47 }
 0x812   :  { %2190 = vmatprep.mubr.f32.mxu1 %v13789_v35 }
 0x815   :  { %6947 = vmatmul.mubr.msk.f32.gmra.mxu1 %vm231_vm0, %v8207_v10 }
 0x816   :  { %2396 = vmatprep.mubr.bf16.mxu1 %v13772_v31 }
 0x849   :  { %v1652_v5 = vpop.f32.mrf.mxu1 }
 0x84a   :  { %v1653_v14 = vadd.f32 %v8201_v21, %v1652_v5  ;;  %v8215_v5 = vld [vmem:[%s13623_s2 + $0x70] sm:$0xff]  }
 0x84b   :  { %v1654_v1 = vpop.f32.mrf.mxu1 }
 0x84c   :  { %v1655_v18 = vadd.f32 %v8197_v48, %v1654_v1  ;;  %v1671_v36 = vmax.f32 %v1653_v14, 0.0  ;;  %v8217_v1 = vld [vmem:[%s13623_s2 + $0x80] sm:$0xff]  }
 0x84d   :  { %v1656_v34 = vpop.f32.mrf.mxu1 }
 0x84e   :  { %v1657_v52 = vadd.f32 %v8199_v7, %v1656_v34  ;;  %v1672_v26 = vmax.f32 %v1655_v18, 0.0 }
 0x84f   :  { %v1658_v12 = vpop.f32.mrf.mxu1 }
 0x850   :  { %v1659_v30 = vadd.f32 %v8193_v6, %v1658_v12  ;;  %v1673_v58 = vmax.f32 %v1657_v52, 0.0  ;;  %v8218_v12 = vld [vmem:[%s13623_s2 + $0x88] sm:$0xff]   ;;  %v8220_v6 = vld [vmem:[%s13623_s2 + $0x98] sm:$0xff]  }
 0x851   :  { %v1662_v27 = vpop.f32.mrf.mxu1 }
 0x852   :  { %v1663_v32 = vadd.f32 %v8196_v8, %v1662_v27  ;;  %v1674_v50 = vmax.f32 %v1659_v30, 0.0  ;;  %v1679_v24 = vpack.c.bf16 %v1673_v58, %v1671_v36  ;;  %v8222_v8 = vld [vmem:[%s13623_s2 + $0xa8] sm:$0xff]  }
 0x853   :  { %v1664_v4 = vpop.f32.mrf.mxu1 }
 0x854   :  { %v1665_v62 = vadd.f32 %v8194_v61, %v1664_v4  ;;  %v1675_v40 = vmax.f32 %v1663_v32, 0.0  ;;  %v1680_v22 = vpack.c.bf16 %v1674_v50, %v1672_v26  ;;  %v8219_v4 = vld [vmem:[%s13623_s2 + $0x90] sm:$0xff]   ;;  %v8223_v32 = vld [vmem:[%s13625_s4 + $0x8] sm:$0xff] }
 0x855   :  { %v1666_v20 = vpop.f32.mrf.mxu1 }
 0x856   :  { %v1667_v19 = vadd.f32 %v8195_v15, %v1666_v20  ;;  %v1676_v49 = vmax.f32 %v1665_v62, 0.0  ;;  %v8221_v62 = vld [vmem:[%s13623_s2 + $0xa0] sm:$0xff]  }
 0x857   :  { %v1668_v17 = vpop.f32.mrf.mxu1 }
 0x858   :  { %v1669_v54 = vadd.f32 %v8198_v9, %v1668_v17  ;;  %v1677_v33 = vmax.f32 %v1667_v19, 0.0 }
 0x859   :  { %v10077_v34 = vpop.f32.mrf.mxu1 }
 0x85a   :  { %v1678_v41 = vmax.f32 %v1669_v54, 0.0  ;;  %v1681_v46 = vpack.c.bf16 %v1677_v33, %v1675_v40  ;;  %13790 = vst [vmem:[#allocation26_spill] sm:$0xff] %v10077_v34 }
 0x85b   :  { %v10079_v53 = vpop.f32.mrf.mxu1 }
 0x85c   :  { %v1682_v29 = vpack.c.bf16 %v1678_v41, %v1676_v49  ;;  %13791 = vst [vmem:[#allocation25_spill] sm:$0xff] %v10079_v53 }
 0x85d   :  { %v10086_v27 = vpop.f32.mrf.mxu1 }
 0x85e   :  { %1695 = vmatprep.subr.bf16.mxu0 %v1682_v29  ;;  %13792 = vst [vmem:[#allocation24_spill] sm:$0xff] %v10086_v27 }
 0x85f   :  { %1696 = vmatpush1.bf16.msra.mxu0 %v1681_v46  ;;  %v10088_v37 = vpop.f32.mrf.mxu1 }
 0x860   :  { %1697 = vmatprep.subr.bf16.mxu0 %v1680_v22  ;;  %13793 = vst [vmem:[#allocation23_spill] sm:$0xff] %v10088_v37 }
 0x861   :  { %v10095_v20 = vpop.f32.mrf.mxu1 }
 0x862   :  { %13794 = vst [vmem:[#allocation22_spill] sm:$0xff] %v10095_v20 }
 0x863   :  { %1698 = vmatpush1.bf16.msra.mxu0 %v1679_v24  ;;  %v10097_v56 = vpop.f32.mrf.mxu1 }
 0x864   :  { %13795 = vst [vmem:[#allocation21_spill] sm:$0xff] %v10097_v56 }
 0x865   :  { %v10104_v30 = vpop.f32.mrf.mxu1 }
 0x866   :  { %6900 = vmatmul.mubr.msk.bf16.vlgmr.msra.gmra.mxu0 %vm349_vm1, %v8205_v51  ;;  %13796 = vst [vmem:[#allocation20_spill] sm:$0xff] %v10104_v30 }
 0x867   :  { %1725 = vmatprep.mubr.bf16.mxu0 %v13772_v31  ;;  %v10106_v61 = vpop.f32.mrf.mxu1 }
 0x868   :  { %13797 = vst [vmem:[#allocation19_spill] sm:$0xff] %v10106_v61  ;;  %v8226_v61 = vld [vmem:[#allocation2 + $0x1e0] sm:$0xff] }
 0x869   :  { %v10113_v15 = vpop.f32.mrf.mxu1 }
 0x86a   :  { %13798 = vst [vmem:[#allocation18_spill] sm:$0xff] %v10113_v15 }
 0x86b   :  { %v10115_v19 = vpop.f32.mrf.mxu1 }
 0x86c   :  { %13799 = vst [vmem:[#allocation17_spill] sm:$0xff] %v10115_v19 }
 0x86d   :  { %v10124_v17 = vpop.f32.mrf.mxu1 }
 0x86e   :  { %6901 = vmatmul.mubr.msk.bf16.gmra.mxu0 %vm349_vm1, %v8208_v0  ;;  %13800 = vst [vmem:[#allocation16_spill] sm:$0xff] %v10124_v17  ;;  %v8227_v17 = vld [vmem:[#allocation2 + $0x1d8] sm:$0xff] }
 0x86f   :  { %1735 = vmatprep.mubr.bf16.mxu0 %v13772_v31  ;;  %v10126_v48 = vpop.f32.mrf.mxu1 }
 0x870   :  { %13801 = vst [vmem:[#allocation48_spill] sm:$0xff] %v10126_v48  ;;  %v8228_v48 = vld [vmem:[#allocation2 + $0x1f8] sm:$0xff] }
 0x871   :  { %v10128_v18 = vpop.f32.mrf.mxu1 }
 0x872   :  { %13802 = vst [vmem:[#allocation47_spill] sm:$0xff] %v10128_v18 }
 0x873   :  { %v10130_v9 = vpop.f32.mrf.mxu1 }
 0x874   :  { %13803 = vst [vmem:[#allocation46_spill] sm:$0xff] %v10130_v9 }
 0x875   :  { %v10132_v54 = vpop.f32.mrf.mxu1 }
 0x876   :  { %6902 = vmatmul.mubr.msk.bf16.gmra.mxu0 %vm349_vm1, %v8209_v16  ;;  %13804 = vst [vmem:[#allocation45_spill] sm:$0xff] %v10132_v54 }
 0x877   :  { %1745 = vmatprep.mubr.bf16.mxu0 %v13772_v31  ;;  %v10134_v7 = vpop.f32.mrf.mxu1 }
 0x879   :  { %v10136_v52 = vpop.f32.mrf.mxu1 }
 0x87b   :  { %v10138_v33 = vpop.f32.mrf.mxu1 }
 0x87d   :  { %v10140_v23 = vpop.f32.mrf.mxu1 }
 0x87e   :  { %6903 = vmatmul.mubr.msk.bf16.gmra.mxu0 %vm349_vm1, %v8210_v2 }
 0x87f   :  { %1755 = vmatprep.mubr.bf16.mxu0 %v13772_v31  ;;  %v10142_v50 = vpop.f32.mrf.mxu1 }
 0x881   :  { %v10144_v49 = vpop.f32.mrf.mxu1 }
 0x883   :  { %v10146_v41 = vpop.f32.mrf.mxu1 }
 0x885   :  { %v10148_v21 = vpop.f32.mrf.mxu1 }
 0x886   :  { %6904 = vmatmul.mubr.msk.bf16.gmra.mxu0 %vm349_vm1, %v8211_v25 }
 0x887   :  { %1765 = vmatprep.mubr.bf16.mxu0 %v13772_v31  ;;  %v10150_v14 = vpop.f32.mrf.mxu1 }
 0x889   :  { %v10152_v40 = vpop.f32.mrf.mxu1 }
 0x88b   :  { %v10154_v26 = vpop.f32.mrf.mxu1 }
 0x88d   :  { %v10156_v29 = vpop.f32.mrf.mxu1 }
 0x88e   :  { %6905 = vmatmul.mubr.msk.bf16.gmra.mxu0 %vm349_vm1, %v8212_v13 }
 0x88f   :  { %1775 = vmatprep.mubr.bf16.mxu0 %v13772_v31  ;;  %v10158_v58 = vpop.f32.mrf.mxu1 }
 0x891   :  { %v10164_v22 = vpop.f32.mrf.mxu1 }
 0x893   :  { %v10170_v28 = vpop.f32.mrf.mxu1 }
 0x895   :  { %v10176_v47 = vpop.f32.mrf.mxu1 }
 0x896   :  { %6906 = vmatmul.mubr.msk.bf16.gmra.mxu0 %vm349_vm1, %v8213_v44 }
 0x897   :  { %1785 = vmatprep.mubr.bf16.mxu0 %v13772_v31  ;;  %v10182_v16 = vpop.f32.mrf.mxu1 }
 0x899   :  { %v10188_v13 = vpop.f32.mrf.mxu1 }
 0x89a   :  { %13805 = vst [vmem:[#allocation44_spill] sm:$0xff] %v10188_v13 }
 0x89e   :  { %6907 = vmatmul.mubr.msk.bf16.gmra.mxu0 %vm349_vm1, %v8214_v45 }
 0x89f   :  { %1795 = vmatprep.mubr.bf16.mxu0 %v13772_v31 }
 0x8a6   :  { %6908 = vmatmul.mubr.msk.bf16.gmra.mxu0 %vm349_vm1, %v8215_v5  ;;  %v10194_v5 = vpop.f32.mrf.mxu1 }
 0x8a7   :  { %1805 = vmatprep.mubr.bf16.mxu0 %v13772_v31  ;;  %13806 = vst [vmem:[#allocation43_spill] sm:$0xff] %v10194_v5 }
 0x8ae   :  { %6909 = vmatmul.mubr.msk.bf16.gmra.mxu0 %vm349_vm1, %v8216_v63 }
 0x8af   :  { %1815 = vmatprep.mubr.bf16.mxu0 %v13772_v31 }
 0x8b6   :  { %6910 = vmatmul.mubr.msk.bf16.gmra.mxu0 %vm349_vm1, %v8217_v1 }
 0x8b7   :  { %1825 = vmatprep.mubr.bf16.mxu0 %v13772_v31 }
 0x8be   :  { %6911 = vmatmul.mubr.msk.bf16.gmra.mxu0 %vm349_vm1, %v8218_v12  ;;  %v10200_v12 = vpop.f32.mrf.mxu1 }
 0x8bf   :  { %1835 = vmatprep.mubr.bf16.mxu0 %v13772_v31  ;;  %13807 = vst [vmem:[#allocation42_spill] sm:$0xff] %v10200_v12 }
 0x8c6   :  { %6912 = vmatmul.mubr.msk.bf16.gmra.mxu0 %vm349_vm1, %v8219_v4 }
 0x8c7   :  { %1845 = vmatprep.mubr.bf16.mxu0 %v13772_v31 }
 0x8ce   :  { %6913 = vmatmul.mubr.msk.bf16.gmra.mxu0 %vm349_vm1, %v8220_v6 }
 0x8cf   :  { %1855 = vmatprep.mubr.bf16.mxu0 %v13772_v31 }
 0x8d6   :  { %6914 = vmatmul.mubr.msk.bf16.gmra.mxu0 %vm349_vm1, %v8221_v62  ;;  %v10206_v62 = vpop.f32.mrf.mxu1 }
 0x8d7   :  { %1865 = vmatprep.mubr.bf16.mxu0 %v13772_v31  ;;  %13808 = vst [vmem:[#allocation41_spill] sm:$0xff] %v10206_v62 }
 0x8d8   :  { %v10212_v35 = vpop.f32.mrf.mxu1 }
 0x8d9   :  { %13809 = vst [vmem:[#allocation40_spill] sm:$0xff] %v10212_v35 }
 0x8da   :  { %v10216_v11 = vpop.f32.mrf.mxu1 }
 0x8db   :  { %13810 = vst [vmem:[#allocation39_spill] sm:$0xff] %v10216_v11  ;;  %v8224_v11 = vld [vmem:[#allocation2 + $0x1e8] sm:$0xff] }
 0x8dc   :  { %v10218_v42 = vpop.f32.mrf.mxu1 }
 0x8dd   :  { %13811 = vst [vmem:[#allocation38_spill] sm:$0xff] %v10218_v42  ;;  %v8225_v42 = vld [vmem:[#allocation2 + $0x1f0] sm:$0xff] }
 0x8de   :  { %6915 = vmatmul.mubr.msk.bf16.gmra.mxu0 %vm349_vm1, %v8222_v8  ;;  %v10220_v31 = vpop.f32.mrf.mxu1 }
 0x8df   :  { %2325 = vmatprep.mubr.f32.mxu0 %v8223_v32  ;;  %13812 = vst [vmem:[#allocation37_spill] sm:$0xff] %v10220_v31 }
 0x8e0   :  { %v10222_v12 = vpop.f32.mrf.mxu1 }
 0x8e1   :  { %13813 = vst [vmem:[#allocation36_spill] sm:$0xff] %v10222_v12 }
 0x8e2   :  { %v10224_v35 = vpop.f32.mrf.mxu1 }
 0x8e3   :  { %13814 = vst [vmem:[#allocation35_spill] sm:$0xff] %v10224_v35  ;;  %v8229_v35 = vld [vmem:[#allocation2 + $0x1d0] sm:$0xff] }
 0x8e4   :  { %v10226_v37 = vpop.f32.mrf.mxu1 }
 0x8e5   :  { %13815 = vst [vmem:[#allocation8_spill] sm:$0xff] %v10226_v37  ;;  %v8230_v37 = vld [vmem:[#allocation2 + $0x1c8] sm:$0xff] }
 0x8e6   :  { %v10228_v19 = vpop.f32.mrf.mxu1 }
 0x926   :  { %v10160_v46 = vpop.f32.mrf.mxu0 }
 0x928   :  { %v10162_v55 = vpop.f32.mrf.mxu0 }
 0x92a   :  { %v10166_v36 = vpop.f32.mrf.mxu0 }
 0x92c   :  { %v10168_v24 = vpop.f32.mrf.mxu0 }
 0x92e   :  { %v10172_v43 = vpop.f32.mrf.mxu0 }
 0x930   :  { %v10174_v51 = vpop.f32.mrf.mxu0 }
 0x932   :  { %v10178_v10 = vpop.f32.mrf.mxu0 }
 0x934   :  { %v10180_v0 = vpop.f32.mrf.mxu0 }
 0x936   :  { %v10184_v2 = vpop.f32.mrf.mxu0 }
 0x938   :  { %v10186_v25 = vpop.f32.mrf.mxu0 }
 0x93a   :  { %v10190_v44 = vpop.f32.mrf.mxu0 }
 0x93c   :  { %v10192_v45 = vpop.f32.mrf.mxu0 }
 0x93e   :  { %v10196_v63 = vpop.f32.mrf.mxu0 }
 0x940   :  { %v10198_v1 = vpop.f32.mrf.mxu0 }
 0x942   :  { %v10202_v4 = vpop.f32.mrf.mxu0 }
 0x944   :  { %v10204_v6 = vpop.f32.mrf.mxu0 }
 0x946   :  { %v10208_v8 = vpop.f32.mrf.mxu0 }
 0x948   :  { %v10210_v32 = vpop.f32.mrf.mxu0 }
 0x94a   :  { %v10214_v3 = vpop.f32.mrf.mxu0 }
 0x94c   :  { %v1763_v59 = vpop.f32.mrf.mxu0 }
 0x94e   :  { %v1767_v60 = vpop.f32.mrf.mxu0 }
 0x950   :  { %v1769_v57 = vpop.f32.mrf.mxu0 }
 0x952   :  { %v1771_v39 = vpop.f32.mrf.mxu0 }
 0x954   :  { %v1773_v38 = vpop.f32.mrf.mxu0 }
 0x956   :  { %v1777_v13 = vpop.f32.mrf.mxu0 }
 0x958   :  { %v1779_v5 = vpop.f32.mrf.mxu0 }
 0x95a   :  { %v1781_v62 = vpop.f32.mrf.mxu0 }
 0x95b   :  { %v1782_v9 = vadd.f32 %v8229_v35, %v1781_v62  ;;  %v8239_v62 = vld [vmem:[#allocation2 + $0x180] sm:$0xff] }
 0x95c   :  { %v1783_v34 = vpop.f32.mrf.mxu0 }
 0x95d   :  { %v1784_v12 = vadd.f32 %v8227_v17, %v1783_v34 }
 0x95e   :  { %v1787_v53 = vpop.f32.mrf.mxu0 }
 0x95f   :  { %v1788_v15 = vadd.f32 %v8226_v61, %v1787_v53  ;;  %v8232_v61 = vld [vmem:[#allocation2 + $0x1b8] sm:$0xff] }
 0x960   :  { %v1789_v27 = vpop.f32.mrf.mxu0  ;;  %v1774_v34 = vadd.f32 %v8232_v61, %v1773_v38  ;;  %v8237_v38 = vld [vmem:[#allocation2 + $0x190] sm:$0xff] }
 0x961   :  { %v1790_v20 = vadd.f32 %v8224_v11, %v1789_v27  ;;  %v1780_v11 = vadd.f32 %v8230_v37, %v1779_v5  ;;  %v8231_v27 = vld [vmem:[#allocation2 + $0x1c0] sm:$0xff]  ;;  %v8241_v61 = vld [vmem:[#allocation2 + $0x170] sm:$0xff] }
 0x962   :  { %v1791_v56 = vpop.f32.mrf.mxu0  ;;  %v8235_v37 = vld [vmem:[#allocation2 + $0x1a0] sm:$0xff] }
 0x963   :  { %v1792_v30 = vadd.f32 %v8225_v42, %v1791_v56  ;;  %7377 = vtanh.f32 %v1790_v20  ;;  %v1778_v42 = vadd.f32 %v8231_v27, %v1777_v13  ;;  %v10234_v56 = vpop.f32.mrf.mxu1  ;;  %v8233_v20 = vld [vmem:[#allocation2 + $0x1b0] sm:$0xff]  ;;  %v8236_v13 = vld [vmem:[#allocation2 + $0x198] sm:$0xff] }
 0x964   :  { %v1793_v31 = vpop.f32.mrf.mxu0  ;;  %v1764_v5 = vadd.f32 %v8236_v13, %v1763_v59  ;;  %v8240_v59 = vld [vmem:[#allocation2 + $0x178] sm:$0xff] }
 0x965   :  { %v1794_v18 = vadd.f32 %v8228_v48, %v1793_v31  ;;  %7379 = vtanh.f32 %v1792_v30  ;;  %v1772_v31 = vadd.f32 %v8233_v20, %v1771_v39  ;;  %v8234_v30 = vld [vmem:[#allocation2 + $0x1a8] sm:$0xff]  ;;  %v1768_v48 = vadd.f32 %v8235_v37, %v1767_v60 }
 0x966   :  { %v10230_v54 = vpop.f32.mrf.mxu0  ;;  %v1770_v17 = vadd.f32 %v8234_v30, %v1769_v57  ;;  %v1758_v60 = vadd.f32 %v8239_v62, %v10208_v8 }
 0x967   :  { %7381 = vtanh.f32 %v1794_v18 }
 0x968   :  { %7383 = vtanh.f32 %v1788_v15  ;;  %v10232_v53 = vpop.f32.mrf.mxu0  ;;  %v10240_v15 = vpop.f32.mrf.mxu1 }
 0x969   :  { %7385 = vtanh.f32 %v1784_v12  ;;  %v1762_v12 = vadd.f32 %v8237_v38, %v10214_v3 }
 0x96a   :  { %7387 = vtanh.f32 %v1782_v9  ;;  %v10236_v35 = vpop.f32.mrf.mxu0  ;;  %v8238_v9 = vld [vmem:[#allocation2 + $0x188] sm:$0xff]  ;;  %v10249_v27 = vpop.f32.mrf.mxu1 }
 0x96b   :  { %7389 = vtanh.f32 %v1780_v11  ;;  %v1760_v57 = vadd.f32 %v8238_v9, %v10210_v32  ;;  %v8245_v9 = vld [vmem:[#allocation2 + $0x150] sm:$0xff] }
 0x96c   :  { %7391 = vtanh.f32 %v1778_v42  ;;  %v10238_v18 = vpop.f32.mrf.mxu0  ;;  %v1754_v42 = vadd.f32 %v8240_v59, %v10204_v6  ;;  %v10259_v6 = vpop.f32.mrf.mxu1 }
 0x96d   :  { %7393 = vtanh.f32 %v1774_v34  ;;  %v1752_v34 = vadd.f32 %v8241_v61, %v10202_v4 }
 0x96e   :  { %7395 = vtanh.f32 %v1772_v31  ;;  %v10243_v39 = vpop.f32.mrf.mxu0  ;;  %v8242_v31 = vld [vmem:[#allocation2 + $0x168] sm:$0xff] }
 0x96f   :  { %7397 = vtanh.f32 %v1770_v17  ;;  %v1750_v8 = vadd.f32 %v8242_v31, %v10198_v1  ;;  %v8243_v17 = vld [vmem:[#allocation2 + $0x160] sm:$0xff]  ;;  %v1742_v1 = vadd.f32 %v8245_v9, %v10190_v44  ;;  %v8248_v31 = vld [vmem:[#allocation2 + $0x138] sm:$0xff] }
 0x970   :  { %7399 = vtanh.f32 %v1768_v48  ;;  %v10247_v11 = vpop.f32.mrf.mxu0  ;;  %v7378_v3 = vpop.eup %7377  ;;  %v1748_v37 = vadd.f32 %v8243_v17, %v10196_v63  ;;  %v8252_v9 = vld [vmem:[#allocation2 + $0x118] sm:$0xff] }
 0x971   :  { %7401 = vtanh.f32 %v1764_v5  ;;  %v8244_v5 = vld [vmem:[#allocation2 + $0x158] sm:$0xff]  ;;  %v2226_v61 = vmul.f32 %v7378_v3, %v10170_v28 }
 0x972   :  { %7403 = vtanh.f32 %v1762_v12  ;;  %v10253_v20 = vpop.f32.mrf.mxu0  ;;  %v7380_v32 = vpop.eup %7379  ;;  %v1744_v4 = vadd.f32 %v8244_v5, %v10192_v45  ;;  %v8251_v5 = vld [vmem:[#allocation2 + $0x120] sm:$0xff] }
 0x973   :  { %7405 = vtanh.f32 %v1760_v57  ;;  %v2227_v57 = vmul.f32 %v7380_v32, %v10176_v47  ;;  %v10273_v47 = vpop.f32.mrf.mxu1 }
 0x974   :  { %v7382_v30 = vpop.eup %7381  ;;  %7407 = vtanh.f32 %v1758_v60  ;;  %v10257_v48 = vpop.f32.mrf.mxu0  ;;  %v8246_v60 = vld [vmem:[#allocation2 + $0x148] sm:$0xff] }
 0x975   :  { %v7384_v13 = vpop.eup %7383  ;;  %7409 = vtanh.f32 %v1754_v42  ;;  %v2228_v38 = vmul.f32 %v7382_v30, %v10182_v16  ;;  %v1740_v59 = vadd.f32 %v8246_v60, %v10186_v25  ;;  %v8247_v42 = vld [vmem:[#allocation2 + $0x140] sm:$0xff]  ;;  %v1734_v25 = vadd.f32 %v8248_v31, %v10180_v0 }
 0x976   :  { %v7386_v12 = vpop.eup %7385  ;;  %7411 = vtanh.f32 %v1752_v34  ;;  %v10265_v63 = vpop.f32.mrf.mxu0  ;;  %v1738_v16 = vadd.f32 %v8247_v42, %v10184_v2  ;;  %v2225_v44 = vmul.f32 %v7384_v13, %v10164_v22 }
 0x977   :  { %v7388_v62 = vpop.eup %7387  ;;  %7413 = vtanh.f32 %v1750_v8  ;;  %2261 = vmatprep.subr.mxu0 %v2228_v38  ;;  %v2224_v28 = vmul.f32 %v7386_v12, %v10158_v58  ;;  %v8249_v8 = vld [vmem:[#allocation2 + $0x130] sm:$0xff] }
 0x978   :  { %v7390_v45 = vpop.eup %7389  ;;  %7415 = vtanh.f32 %v1748_v37  ;;  %v10271_v34 = vpop.f32.mrf.mxu0  ;;  %2262 = vmatpush1.msra.mxu0 %v2227_v57  ;;  %v1732_v2 = vadd.f32 %v8249_v8, %v10178_v10  ;;  %v2223_v22 = vmul.f32 %v7388_v62, %v10156_v29  ;;  %v8250_v37 = vld [vmem:[#allocation2 + $0x128] sm:$0xff]  ;;  %v8253_v57 = vld [vmem:[#allocation2 + $0x110] sm:$0xff] }
 0x979   :  { %v7392_v32 = vpop.eup %7391  ;;  %7417 = vtanh.f32 %v1744_v4  ;;  %2263 = vmatprep.subr.mxu0 %v2226_v61  ;;  %v1730_v13 = vadd.f32 %v8250_v37, %v10174_v51  ;;  %v2222_v0 = vmul.f32 %v7390_v45, %v10154_v26  ;;  %v1728_v4 = vadd.f32 %v8251_v5, %v10172_v43  ;;  %v10287_v29 = vpop.f32.mrf.mxu1  ;;  %v8255_v45 = vld [vmem:[#allocation2 + $0x100] sm:$0xff] }
 0x97a   :  { %v7394_v3 = vpop.eup %7393  ;;  %7419 = vtanh.f32 %v1742_v1  ;;  %v10279_v30 = vpop.f32.mrf.mxu0  ;;  %2264 = vmatpush1.msra.mxu0 %v2225_v44  ;;  %v2221_v10 = vmul.f32 %v7392_v32, %v10152_v40  ;;  %v1724_v51 = vadd.f32 %v8252_v9, %v10168_v24  ;;  %v1722_v43 = vadd.f32 %v8253_v57, %v10166_v36 }
 0x97b   :  { %v7396_v17 = vpop.eup %7395  ;;  %7421 = vtanh.f32 %v1740_v59  ;;  %2265 = vmatprep.subr.mxu0 %v2224_v28  ;;  %v2220_v26 = vmul.f32 %v7394_v3, %v10150_v14  ;;  %v8254_v59 = vld [vmem:[#allocation2 + $0x108] sm:$0xff]  ;;  %v1718_v42 = vadd.f32 %v8255_v45, %v10160_v46 }
 0x97c   :  { %v7398_v58 = vpop.eup %7397  ;;  %7423 = vtanh.f32 %v1738_v16  ;;  %v10285_v38 = vpop.f32.mrf.mxu0  ;;  %2266 = vmatpush1.msra.mxu0 %v2223_v22  ;;  %v2219_v40 = vmul.f32 %v7396_v17, %v10148_v21  ;;  %v1720_v61 = vadd.f32 %v8254_v59, %v10162_v55  ;;  %v13816_v22 = vld [vmem:[#allocation45_spill] sm:$0xff] }
 0x97d   :  { %v7400_v12 = vpop.eup %7399  ;;  %7425 = vtanh.f32 %v1734_v25  ;;  %2267 = vmatprep.subr.mxu0 %v2222_v0  ;;  %v2218_v24 = vmul.f32 %v7398_v58, %v10146_v41  ;;  %v10301_v21 = vpop.f32.mrf.mxu1  ;;  %v13818_v58 = vld [vmem:[#allocation47_spill] sm:$0xff] }
 0x97e   :  { %v7402_v1 = vpop.eup %7401  ;;  %7427 = vtanh.f32 %v1732_v2  ;;  %v10293_v62 = vpop.f32.mrf.mxu0  ;;  %2268 = vmatpush1.msra.mxu0 %v2221_v10  ;;  %v2217_v36 = vmul.f32 %v7400_v12, %v10144_v49  ;;  %v13819_v12 = vld [vmem:[#allocation48_spill] sm:$0xff] }
 0x97f   :  { %v7404_v60 = vpop.eup %7403  ;;  %7429 = vtanh.f32 %v1730_v13  ;;  %2269 = vmatprep.subr.mxu0 %v2220_v26  ;;  %v2216_v55 = vmul.f32 %v7402_v1, %v10142_v50  ;;  %v10311_v50 = vpop.f32.mrf.mxu1  ;;  %v13817_v13 = vld [vmem:[#allocation46_spill] sm:$0xff]  ;;  %v13820_v26 = vld [vmem:[#allocation16_spill] sm:$0xff] }
 0x980   :  { %v7406_v14 = vpop.eup %7405  ;;  %7431 = vtanh.f32 %v1728_v4  ;;  %v10299_v16 = vpop.f32.mrf.mxu0  ;;  %2270 = vmatpush1.msra.mxu0 %v2219_v40  ;;  %v2215_v41 = vmul.f32 %v7404_v60, %v10140_v23  ;;  %v13821_v40 = vld [vmem:[#allocation17_spill] sm:$0xff] }
 0x981   :  { %v7408_v44 = vpop.eup %7407  ;;  %7433 = vtanh.f32 %v1724_v51  ;;  %2271 = vmatprep.subr.mxu0 %v2218_v24  ;;  %v2214_v49 = vmul.f32 %v7406_v14, %v10138_v33  ;;  %v10321_v10 = vpop.f32.mrf.mxu1 }
 0x982   :  { %v7410_v32 = vpop.eup %7409  ;;  %7435 = vtanh.f32 %v1722_v43  ;;  %v10305_v31 = vpop.f32.mrf.mxu0  ;;  %2272 = vmatpush1.msra.mxu0 %v2217_v36  ;;  %v2213_v28 = vmul.f32 %v7408_v44, %v10136_v52  ;;  %v13823_v36 = vld [vmem:[#allocation19_spill] sm:$0xff] }
 0x983   :  { %v7412_v46 = vpop.eup %7411  ;;  %7437 = vtanh.f32 %v1720_v61  ;;  %2273 = vmatprep.subr.mxu0 %v2216_v55  ;;  %v2212_v23 = vmul.f32 %v7410_v32, %v10134_v7  ;;  %v13822_v61 = vld [vmem:[#allocation18_spill] sm:$0xff]  ;;  %v10331_v45 = vpop.f32.mrf.mxu1  ;;  %v13824_v32 = vld [vmem:[#allocation20_spill] sm:$0xff] }
 0x984   :  { %v7414_v25 = vpop.eup %7413  ;;  %7439 = vtanh.f32 %v1718_v42  ;;  %v10309_v3 = vpop.f32.mrf.mxu0  ;;  %2274 = vmatpush1.msra.mxu0 %v2215_v41  ;;  %v2211_v17 = vmul.f32 %v7412_v46, %v13816_v22 }
 0x985   :  { %v7416_v8 = vpop.eup %7415  ;;  %2275 = vmatprep.subr.mxu0 %v2214_v49  ;;  %v2210_v0 = vmul.f32 %v7414_v25, %v13817_v13  ;;  %v13825_v25 = vld [vmem:[#allocation21_spill] sm:$0xff]  ;;  %v13827_v13 = vld [vmem:[#allocation23_spill] sm:$0xff] }
 0x986   :  { %v7418_v2 = vpop.eup %7417  ;;  %v10315_v37 = vpop.f32.mrf.mxu0  ;;  %2276 = vmatpush1.msra.mxu0 %v2213_v28  ;;  %v2209_v5 = vmul.f32 %v7416_v8, %v13818_v58 }
 0x987   :  { %v7420_v33 = vpop.eup %7419  ;;  %2277 = vmatprep.subr.mxu0 %v2212_v23  ;;  %v2208_v9 = vmul.f32 %v7418_v2, %v13819_v12  ;;  %v13826_v23 = vld [vmem:[#allocation22_spill] sm:$0xff] }
 0x988   :  { %v7422_v52 = vpop.eup %7421  ;;  %v10319_v4 = vpop.f32.mrf.mxu0  ;;  %2278 = vmatpush1.msra.mxu0 %v2211_v17  ;;  %v2207_v1 = vmul.f32 %v7420_v33, %v13820_v26 }
 0x989   :  { %v7424_v7 = vpop.eup %7423  ;;  %2279 = vmatprep.subr.mxu0 %v2210_v0  ;;  %v2206_v60 = vmul.f32 %v7422_v52, %v13821_v40  ;;  %v10339_v17 = vpop.f32.mrf.mxu1  ;;  %v13828_v52 = vld [vmem:[#allocation24_spill] sm:$0xff] }
 0x98a   :  { %v7426_v51 = vpop.eup %7425  ;;  %v10325_v57 = vpop.f32.mrf.mxu0  ;;  %2280 = vmatpush1.msra.mxu0 %v2209_v5  ;;  %v2205_v24 = vmul.f32 %v7424_v7, %v13822_v61  ;;  %v13829_v7 = vld [vmem:[#allocation25_spill] sm:$0xff] }
 0x98b   :  { %v7428_v43 = vpop.eup %7427  ;;  %2281 = vmatprep.subr.mxu0 %v2208_v9  ;;  %v2204_v44 = vmul.f32 %v7426_v51, %v13823_v36  ;;  %v13830_v9 = vld [vmem:[#allocation26_spill] sm:$0xff] }
 0x98c   :  { %v7430_v59 = vpop.eup %7429  ;;  %v10329_v14 = vpop.f32.mrf.mxu0  ;;  %2282 = vmatpush1.msra.mxu0 %v2207_v1  ;;  %v2203_v41 = vmul.f32 %v7428_v43, %v13824_v32 }
 0x98d   :  { %v7432_v42 = vpop.eup %7431  ;;  %2283 = vmatprep.subr.mxu0 %v2206_v60  ;;  %v2202_v28 = vmul.f32 %v7430_v59, %v13825_v25  ;;  %v10345_v1 = vpop.f32.mrf.mxu1 }
 0x98e   :  { %v7434_v55 = vpop.eup %7433  ;;  %v10335_v46 = vpop.f32.mrf.mxu0  ;;  %2284 = vmatpush1.msra.mxu0 %v2205_v24  ;;  %v2201_v2 = vmul.f32 %v7432_v42, %v13826_v23 }
 0x98f   :  { %v7436_v49 = vpop.eup %7435  ;;  %2285 = vmatprep.subr.mxu0 %v2204_v44  ;;  %v2200_v0 = vmul.f32 %v7434_v55, %v13827_v13  ;;  %v10347_v60 = vpop.f32.mrf.mxu1  ;;  %v8256_v55 = vld [vmem:[#allocation2 + $0x2e8] sm:$0xff] }
 0x990   :  { %v7438_v8 = vpop.eup %7437  ;;  %v1849_v22 = vpop.f32.mrf.mxu0  ;;  %2286 = vmatpush1.msra.mxu0 %v2203_v41  ;;  %v2199_v58 = vmul.f32 %v7436_v49, %v13828_v52  ;;  %v8257_v49 = vld [vmem:[#allocation2 + $0x2f0] sm:$0xff] }
 0x991   :  { %v7440_v33 = vpop.eup %7439  ;;  %2287 = vmatprep.subr.mxu0 %v2202_v28  ;;  %v2198_v12 = vmul.f32 %v7438_v8, %v13829_v7  ;;  %v10349_v24 = vpop.f32.mrf.mxu1  ;;  %v8258_v28 = vld [vmem:[#allocation2 + $0x2e0] sm:$0xff] }
 0x992   :  { %v1851_v5 = vpop.f32.mrf.mxu0  ;;  %2288 = vmatpush1.msra.mxu0 %v2201_v2  ;;  %v2197_v51 = vmul.f32 %v7440_v33, %v13830_v9  ;;  %v8259_v33 = vld [vmem:[#allocation2 + $0x2d8] sm:$0xff] }
 0x993   :  { %2289 = vmatprep.subr.mxu0 %v2200_v0  ;;  %v10351_v44 = vpop.f32.mrf.mxu1  ;;  %v8260_v0 = vld [vmem:[#allocation2 + $0x2f8] sm:$0xff] }
 0x994   :  { %v1853_v26 = vpop.f32.mrf.mxu0  ;;  %2290 = vmatpush1.msra.mxu0 %v2199_v58  ;;  %v8261_v58 = vld [vmem:[#allocation2 + $0x2d0] sm:$0xff] }
 0x995   :  { %2291 = vmatprep.subr.mxu0 %v2198_v12  ;;  %v10353_v2 = vpop.f32.mrf.mxu1  ;;  %v8262_v12 = vld [vmem:[#allocation2 + $0x2c8] sm:$0xff] }
 0x996   :  { %v1857_v43 = vpop.f32.mrf.mxu0  ;;  %2292 = vmatpush1.msra.mxu0 %v2197_v51  ;;  %v8263_v51 = vld [vmem:[#allocation2 + $0x2c0] sm:$0xff] }
 0x998   :  { %v1859_v40 = vpop.f32.mrf.mxu0 }
 0x999   :  { %v1860_v9 = vadd.f32 %v8262_v12, %v1859_v40  ;;  %v8274_v12 = vld [vmem:[#allocation2 + $0x268] sm:$0xff] }
 0x99a   :  { %v1861_v59 = vpop.f32.mrf.mxu0 }
 0x99b   :  { %v1862_v7 = vadd.f32 %v8261_v58, %v1861_v59 }
 0x99c   :  { %v1863_v61 = vpop.f32.mrf.mxu0 }
 0x99d   :  { %v1864_v13 = vadd.f32 %v8259_v33, %v1863_v61  ;;  %v8266_v61 = vld [vmem:[#allocation2 + $0x2a8] sm:$0xff] }
 0x99e   :  { %v1867_v42 = vpop.f32.mrf.mxu0 }
 0x99f   :  { %v1868_v8 = vadd.f32 %v8258_v28, %v1867_v42  ;;  %v8264_v42 = vld [vmem:[#allocation2 + $0x2b8] sm:$0xff] }
 0x9a0   :  { %v1869_v36 = vpop.f32.mrf.mxu0 }
 0x9a1   :  { %v1870_v32 = vadd.f32 %v8256_v55, %v1869_v36  ;;  %v1858_v36 = vadd.f32 %v8263_v51, %v1857_v43  ;;  %v10355_v55 = vpop.f32.mrf.mxu1  ;;  %v8275_v51 = vld [vmem:[#allocation2 + $0x260] sm:$0xff] }
 0x9a2   :  { %v1871_v41 = vpop.f32.mrf.mxu0 }
 0x9a3   :  { %v1872_v25 = vadd.f32 %v8257_v49, %v1871_v41  ;;  %7441 = vtanh.f32 %v1870_v32  ;;  %v1854_v41 = vadd.f32 %v8264_v42, %v1853_v26  ;;  %v8265_v49 = vld [vmem:[#allocation2 + $0x2b0] sm:$0xff]  ;;  %v1850_v32 = vadd.f32 %v8266_v61, %v1849_v22  ;;  %v2188_v40 = vpop.f32.mrf.mxu1  ;;  %v8270_v26 = vld [vmem:[#allocation2 + $0x288] sm:$0xff] }
 0x9a4   :  { %v1873_v23 = vpop.f32.mrf.mxu0  ;;  %v1852_v28 = vadd.f32 %v8265_v49, %v1851_v5  ;;  %v1840_v5 = vadd.f32 %v8270_v26, %v10319_v4  ;;  %v8280_v26 = vld [vmem:[#allocation2 + $0x238] sm:$0xff] }
 0x9a5   :  { %v1874_v52 = vadd.f32 %v8260_v0, %v1873_v23  ;;  %7443 = vtanh.f32 %v1872_v25  ;;  %v8267_v23 = vld [vmem:[#allocation2 + $0x2a0] sm:$0xff]  ;;  %v8268_v25 = vld [vmem:[#allocation2 + $0x298] sm:$0xff]  ;;  %v2192_v0 = vpop.f32.mrf.mxu1 }
 0x9a6   :  { %v1848_v59 = vadd.f32 %v8267_v23, %v10335_v46  ;;  %v1844_v43 = vadd.f32 %v8268_v25, %v10329_v14  ;;  %v8272_v46 = vld [vmem:[#allocation2 + $0x278] sm:$0xff]  ;;  %v8273_v14 = vld [vmem:[#allocation2 + $0x270] sm:$0xff]  ;;  %v8278_v23 = vld [vmem:[#allocation2 + $0x248] sm:$0xff] }
 0x9a7   :  { %7445 = vtanh.f32 %v1874_v52  ;;  %v1834_v52 = vadd.f32 %v8272_v46, %v10309_v3 }
 0x9a8   :  { %7447 = vtanh.f32 %v1868_v8  ;;  %v8269_v8 = vld [vmem:[#allocation2 + $0x290] sm:$0xff] }
 0x9a9   :  { %7449 = vtanh.f32 %v1864_v13  ;;  %v1842_v33 = vadd.f32 %v8269_v8, %v10325_v57  ;;  %v8271_v13 = vld [vmem:[#allocation2 + $0x280] sm:$0xff] }
 0x9aa   :  { %7451 = vtanh.f32 %v1862_v7  ;;  %v1838_v22 = vadd.f32 %v8271_v13, %v10315_v37  ;;  %v1832_v7 = vadd.f32 %v8273_v14, %v10305_v31  ;;  %v1828_v37 = vadd.f32 %v8275_v51, %v10293_v62  ;;  %v8277_v31 = vld [vmem:[#allocation2 + $0x250] sm:$0xff]  ;;  %v8284_v14 = vld [vmem:[#allocation2 + $0x218] sm:$0xff]  ;;  %v8287_v51 = vld [vmem:[#allocation2 + $0x200] sm:$0xff] }
 0x9ab   :  { %7453 = vtanh.f32 %v1860_v9  ;;  %v1830_v9 = vadd.f32 %v8274_v12, %v10299_v16  ;;  %v1822_v61 = vadd.f32 %v8277_v31, %v10279_v30  ;;  %v1814_v30 = vadd.f32 %v8280_v26, %v10257_v48  ;;  %v8281_v13 = vld [vmem:[#allocation2 + $0x230] sm:$0xff] }
 0x9ac   :  { %7455 = vtanh.f32 %v1858_v36  ;;  %v2194_v36 = vpop.f32.mrf.mxu1 }
 0x9ad   :  { %7457 = vtanh.f32 %v1854_v41  ;;  %v8276_v41 = vld [vmem:[#allocation2 + $0x258] sm:$0xff] }
 0x9ae   :  { %7459 = vtanh.f32 %v1852_v28  ;;  %v1824_v3 = vadd.f32 %v8276_v41, %v10285_v38 }
 0x9af   :  { %7461 = vtanh.f32 %v1850_v32 }
 0x9b0   :  { %7463 = vtanh.f32 %v1848_v59  ;;  %v7442_v58 = vpop.eup %7441  ;;  %v1820_v59 = vadd.f32 %v8278_v23, %v10271_v34 }
 0x9b1   :  { %7465 = vtanh.f32 %v1844_v43  ;;  %v2258_v62 = vmul.f32 %v7442_v58, %v2188_v40  ;;  %v8279_v43 = vld [vmem:[#allocation2 + $0x240] sm:$0xff]  ;;  %v1812_v40 = vadd.f32 %v8281_v13, %v10253_v20 }
 0x9b2   :  { %7467 = vtanh.f32 %v1842_v33  ;;  %v7444_v57 = vpop.eup %7443  ;;  %v1818_v8 = vadd.f32 %v8279_v43, %v10265_v63  ;;  %v13837_v13 = vld [vmem:[#allocation40_spill] sm:$0xff] }
 0x9b3   :  { %7469 = vtanh.f32 %v1840_v5  ;;  %v2259_v32 = vmul.f32 %v7444_v57, %v2192_v0  ;;  %v8282_v0 = vld [vmem:[#allocation2 + $0x228] sm:$0xff]  ;;  %v8285_v57 = vld [vmem:[#allocation2 + $0x210] sm:$0xff] }
 0x9b4   :  { %v7446_v4 = vpop.eup %7445  ;;  %7471 = vtanh.f32 %v1838_v22 }
 0x9b5   :  { %v7448_v42 = vpop.eup %7447  ;;  %7473 = vtanh.f32 %v1834_v52  ;;  %v2260_v49 = vmul.f32 %v7446_v4, %v2194_v36  ;;  %v8283_v52 = vld [vmem:[#allocation2 + $0x220] sm:$0xff] }
 0x9b6   :  { %v7450_v28 = vpop.eup %7449  ;;  %7475 = vtanh.f32 %v1832_v7  ;;  %v2257_v38 = vmul.f32 %v7448_v42, %v10355_v55  ;;  %v1810_v55 = vadd.f32 %v8282_v0, %v10247_v11 }
 0x9b7   :  { %v7452_v16 = vpop.eup %7451  ;;  %7477 = vtanh.f32 %v1830_v9  ;;  %2293 = vmatprep.subr.mxu0 %v2260_v49  ;;  %v2256_v5 = vmul.f32 %v7450_v28, %v10353_v2  ;;  %v1808_v2 = vadd.f32 %v8283_v52, %v10243_v39  ;;  %v8286_v9 = vld [vmem:[#allocation2 + $0x208] sm:$0xff] }
 0x9b8   :  { %v7454_v25 = vpop.eup %7453  ;;  %7479 = vtanh.f32 %v1828_v37  ;;  %2294 = vmatpush2.msra.mxu0 %v2259_v32  ;;  %v2255_v22 = vmul.f32 %v7452_v16, %v10351_v44  ;;  %v1804_v44 = vadd.f32 %v8284_v14, %v10238_v18  ;;  %v13831_v16 = vld [vmem:[#allocation8_spill] sm:$0xff]  ;;  %v8289_v14 = vld [vmem:[%s13625_s4 + $0x18] sm:$0xff] }
 0x9b9   :  { %v7456_v33 = vpop.eup %7455  ;;  %7481 = vtanh.f32 %v1824_v3  ;;  %2295 = vmatprep.subr.mxu0 %v2258_v62  ;;  %v2254_v46 = vmul.f32 %v7454_v25, %v10349_v24  ;;  %v1802_v24 = vadd.f32 %v8285_v57, %v10236_v35  ;;  %v13833_v25 = vld [vmem:[#allocation36_spill] sm:$0xff]  ;;  %v8293_v57 = vld [vmem:[%s13625_s4 + $0x38] sm:$0xff] }
 0x9ba   :  { %v7458_v34 = vpop.eup %7457  ;;  %7483 = vtanh.f32 %v1822_v61  ;;  %2296 = vmatpush2.msra.mxu0 %v2257_v38  ;;  %v2253_v58 = vmul.f32 %v7456_v33, %v10347_v60  ;;  %v1800_v60 = vadd.f32 %v8286_v9, %v10232_v53  ;;  %v13835_v33 = vld [vmem:[#allocation38_spill] sm:$0xff] }
 0x9bb   :  { %v7460_v63 = vpop.eup %7459  ;;  %7485 = vtanh.f32 %v1820_v59  ;;  %2297 = vmatprep.subr.mxu0 %v2256_v5  ;;  %v2252_v7 = vmul.f32 %v7458_v34, %v10345_v1  ;;  %v1798_v1 = vadd.f32 %v8287_v51, %v10230_v54  ;;  %v13832_v59 = vld [vmem:[#allocation35_spill] sm:$0xff] }
 0x9bc   :  { %v7462_v48 = vpop.eup %7461  ;;  %7487 = vtanh.f32 %v1818_v8  ;;  %2298 = vmatpush2.msra.mxu0 %v2255_v22  ;;  %v2251_v12 = vmul.f32 %v7460_v63, %v10339_v17  ;;  %v13834_v8 = vld [vmem:[#allocation37_spill] sm:$0xff] }
 0x9bd   :  { %v7464_v20 = vpop.eup %7463  ;;  %7489 = vtanh.f32 %v1814_v30  ;;  %2299 = vmatprep.subr.mxu0 %v2254_v46  ;;  %v2250_v4 = vmul.f32 %v7462_v48, %v10331_v45  ;;  %v13836_v30 = vld [vmem:[#allocation39_spill] sm:$0xff]  ;;  %v13838_v63 = vld [vmem:[#allocation41_spill] sm:$0xff] }
 0x9be   :  { %v7466_v11 = vpop.eup %7465  ;;  %7491 = vtanh.f32 %v1812_v40  ;;  %2300 = vmatpush2.msra.mxu0 %v2253_v58  ;;  %v2249_v37 = vmul.f32 %v7464_v20, %v10321_v10  ;;  %v13840_v48 = vld [vmem:[#allocation43_spill] sm:$0xff]  ;;  %v8288_v20 = vld [vmem:[%s13625_s4] sm:$0xff] }
 0x9bf   :  { %v7468_v39 = vpop.eup %7467  ;;  %7493 = vtanh.f32 %v1810_v55  ;;  %2301 = vmatprep.subr.mxu0 %v2252_v7  ;;  %v2248_v17 = vmul.f32 %v7466_v11, %v10311_v50  ;;  %v13839_v55 = vld [vmem:[#allocation42_spill] sm:$0xff]  ;;  %v8291_v7 = vld [vmem:[%s13625_s4 + $0x28] sm:$0xff]  ;;  %v8292_v11 = vld [vmem:[%s13625_s4 + $0x20] sm:$0xff] }
 0x9c0   :  { %v7470_v18 = vpop.eup %7469  ;;  %7495 = vtanh.f32 %v1808_v2  ;;  %2302 = vmatpush2.msra.mxu0 %v2251_v12  ;;  %v2247_v53 = vmul.f32 %v7468_v39, %v10301_v21  ;;  %v13841_v2 = vld [vmem:[#allocation44_spill] sm:$0xff]  ;;  %v13842_v12 = vmov 0  }
 0x9c1   :  { %v7472_v35 = vpop.eup %7471  ;;  %7497 = vtanh.f32 %v1804_v44  ;;  %2303 = vmatprep.subr.mxu0 %v2250_v4  ;;  %v2246_v42 = vmul.f32 %v7470_v18, %v10287_v29  ;;  %v8290_v44 = vld [vmem:[%s13625_s4 + $0x10] sm:$0xff] }
 0x9c2   :  { %v7474_v36 = vpop.eup %7473  ;;  %7499 = vtanh.f32 %v1802_v24  ;;  %2304 = vmatpush2.msra.mxu0 %v2249_v37  ;;  %v2245_v10 = vmul.f32 %v7472_v35, %v10273_v47  ;;  %v8294_v24 = vld [vmem:[%s13625_s4 + $0x30] sm:$0xff] }
 0x9c3   :  { %v7476_v45 = vpop.eup %7475  ;;  %7501 = vtanh.f32 %v1800_v60  ;;  %2305 = vmatprep.subr.mxu0 %v2248_v17  ;;  %v2244_v3 = vmul.f32 %v7474_v36, %v10259_v6  ;;  %v13843_v37 = vld [vmem:[#allocation34_spill] sm:$0xff]  ;;  %v13845_v36 = vld [vmem:[#allocation33_spill] sm:$0xff] }
 0x9c4   :  { %v7478_v54 = vpop.eup %7477  ;;  %7503 = vtanh.f32 %v1798_v1  ;;  %2306 = vmatpush2.msra.mxu0 %v2247_v53  ;;  %v2243_v49 = vmul.f32 %v7476_v45, %v10249_v27  ;;  %v13847_v45 = vld [vmem:[#allocation32_spill] sm:$0xff] }
 0x9c5   :  { %v7480_v41 = vpop.eup %7479  ;;  %2307 = vmatprep.subr.mxu0 %v2246_v42  ;;  %v2242_v28 = vmul.f32 %v7478_v54, %v10240_v15  ;;  %v13849_v54 = vld [vmem:[#allocation31_spill] sm:$0xff] }
 0x9c6   :  { %v7482_v50 = vpop.eup %7481  ;;  %2308 = vmatpush2.msra.mxu0 %v2245_v10  ;;  %v2241_v29 = vmul.f32 %v7480_v41, %v10234_v56  ;;  %v13851_v41 = vld [vmem:[#allocation30_spill] sm:$0xff] }
 0x9c7   :  { %v7484_v21 = vpop.eup %7483  ;;  %2309 = vmatprep.subr.mxu0 %v2244_v3  ;;  %v2240_v47 = vmul.f32 %v7482_v50, %v10228_v19  ;;  %v13853_v50 = vld [vmem:[#allocation29_spill] sm:$0xff] }
 0x9c8   :  { %v7486_v31 = vpop.eup %7485  ;;  %2310 = vmatpush2.msra.mxu0 %v2243_v49  ;;  %v2239_v6 = vmul.f32 %v7484_v21, %v13831_v16 }
 0x9c9   :  { %v7488_v61 = vpop.eup %7487  ;;  %2311 = vmatprep.subr.mxu0 %v2242_v28  ;;  %v2238_v27 = vmul.f32 %v7486_v31, %v13832_v59  ;;  %v13855_v28 = vld [vmem:[#allocation28_spill] sm:$0xff] }
 0x9ca   :  { %v7490_v32 = vpop.eup %7489  ;;  %2312 = vmatpush2.msra.mxu0 %v2241_v29  ;;  %v2237_v15 = vmul.f32 %v7488_v61, %v13833_v25 }
 0x9cb   :  { %v7492_v23 = vpop.eup %7491  ;;  %2313 = vmatprep.subr.mxu0 %v2240_v47  ;;  %v2236_v56 = vmul.f32 %v7490_v32, %v13834_v8  ;;  %v13857_v47 = vld [vmem:[#allocation27_spill] sm:$0xff] }
 0x9cc   :  { %v7494_v62 = vpop.eup %7493  ;;  %2314 = vmatpush2.msra.mxu0 %v2239_v6  ;;  %v2235_v19 = vmul.f32 %v7492_v23, %v13835_v33  ;;  %v8295_v6 = vld [vmem:[%s13623_s2] sm:$0xff]   ;;  %v8296_v23 = vld [vmem:[%s13623_s2 + $0x8] sm:$0xff]  }
 0x9cd   :  { %v7496_v43 = vpop.eup %7495  ;;  %2315 = vmatprep.subr.mxu0 %v2238_v27  ;;  %v2234_v5 = vmul.f32 %v7494_v62, %v13836_v30  ;;  %v8298_v33 = vld [vmem:[#allocation2 + $0x68] sm:$0xff] }
 0x9ce   :  { %v7498_v38 = vpop.eup %7497  ;;  %2316 = vmatpush2.msra.mxu0 %v2237_v15  ;;  %v2233_v40 = vmul.f32 %v7496_v43, %v13837_v13 }
 0x9cf   :  { %v7500_v26 = vpop.eup %7499  ;;  %2317 = vmatprep.subr.mxu0 %v2236_v56  ;;  %v2232_v0 = vmul.f32 %v7498_v38, %v13838_v63  ;;  %v8297_v56 = vld [vmem:[#allocation2 + $0x58] sm:$0xff] }
 0x9d0   :  { %v7502_v34 = vpop.eup %7501  ;;  %2318 = vmatpush2.msra.mxu0 %v2235_v19  ;;  %v2231_v46 = vmul.f32 %v7500_v26, %v13839_v55  ;;  %v8299_v26 = vld [vmem:[#allocation2 + $0x70] sm:$0xff]  ;;  %v8302_v63 = vld [vmem:[#allocation2 + $0x78] sm:$0xff] }
 0x9d1   :  { %v7504_v22 = vpop.eup %7503  ;;  %2319 = vmatprep.subr.mxu0 %v2234_v5  ;;  %v2230_v52 = vmul.f32 %v7502_v34, %v13840_v48  ;;  %v8300_v5 = vld [vmem:[#allocation2 + $0x60] sm:$0xff]  ;;  %v8303_v55 = vld [vmem:[#allocation2 + $0x50] sm:$0xff] }
 0x9d2   :  { %2320 = vmatpush2.msra.mxu0 %v2233_v40  ;;  %v2229_v58 = vmul.f32 %v7504_v22, %v13841_v2  ;;  %v8301_v40 = vld [vmem:[#allocation2 + $0x48] sm:$0xff] }
 0x9d3   :  { %2321 = vmatprep.subr.mxu0 %v2232_v0 }
 0x9d4   :  { %2322 = vmatpush2.msra.mxu0 %v2231_v46 }
 0x9d5   :  { %2323 = vmatprep.subr.mxu0 %v2230_v52 }
 0x9d6   :  { %2324 = vmatpush2.msra.mxu0 %v2229_v58 }
 0x9d7   :  { %2326 = vmatmul.mubr.f32.vlgmr.msra.gmra.mxu0 %v8288_v20  ;;  %v8304_v20 = vld [vmem:[#allocation2 + $0x40] sm:$0xff] }
 0x9d8   :  { %2331 = vmatprep.mubr.f32.mxu0 %v8289_v14 }
 0x9db   :  { %2332 = vmatmul.mubr.f32.gmra.mxu0 %v8290_v44 }
 0x9dc   :  { %2337 = vmatprep.mubr.f32.mxu0 %v8291_v7 }
 0x9df   :  { %2338 = vmatmul.mubr.f32.gmra.mxu0 %v8292_v11 }
 0x9e0   :  { %2343 = vmatprep.mubr.f32.mxu0 %v8293_v57 }
 0x9e3   :  { %2344 = vmatmul.mubr.f32.gmra.mxu0 %v8294_v24 }
 0x9e4   :  { %2461 = vmatprep.mubr.bf16.mxu0 %v13842_v12 }
 0xa97   :  { %v2327_v39 = vpop.f32.mrf.mxu0 }
 0xa98   :  { %v10457_v32 = vadd.f32 %v2327_v39, %v13857_v47  ;;  %v8310_v47 = vld [vmem:[#allocation2 + $0xa0] sm:$0xff] }
 0xa99   :  { %v2329_v9 = vpop.f32.mrf.mxu0 }
 0xa9a   :  { %v10445_v49 = vadd.f32 %v2329_v9, %v13853_v50  ;;  %13858 = vst [vmem:[#allocation45_spill] sm:$0xff] %v10457_v32 }
 0xa9b   :  { %v2333_v60 = vpop.f32.mrf.mxu0 }
 0xa9c   :  { %13854 = vst [vmem:[#allocation14_spill] sm:$0xff] %v10445_v49  ;;  %v10450_v31 = vadd.f32 %v2333_v60, %v13855_v28 }
 0xa9d   :  { %v2335_v4 = vpop.f32.mrf.mxu0 }
 0xa9e   :  { %v10433_v53 = vadd.f32 %v2335_v4, %v13845_v36  ;;  %13856 = vst [vmem:[#allocation15_spill] sm:$0xff] %v10450_v31  ;;  %v2360_v16 = vpack.c.bf16 %v10450_v31, %v10457_v32  ;;  %v8305_v4 = vld [vmem:[%s13623_s2 + $0x10] sm:$0xff]  }
 0xa9f   :  { %v2339_v18 = vpop.f32.mrf.mxu0 }
 0xaa0   :  { %13846 = vst [vmem:[#allocation10_spill] sm:$0xff] %v10433_v53  ;;  %v10442_v3 = vadd.f32 %v2339_v18, %v13851_v41  ;;  %v2361_v61 = vpack.c.bf16 %v10433_v53, %v10445_v49  ;;  %v8306_v18 = vld [vmem:[%s13623_s2 + $0x18] sm:$0xff]  }
 0xaa1   :  { %v2341_v51 = vpop.f32.mrf.mxu0  ;;  %v8307_v41 = vld [vmem:[#allocation2 + $0x98] sm:$0xff] }
 0xaa2   :  { %v10436_v42 = vadd.f32 %v2341_v51, %v13847_v45  ;;  %13852 = vst [vmem:[#allocation13_spill] sm:$0xff] %v10442_v3 }
 0xaa3   :  { %v2345_v1 = vpop.f32.mrf.mxu0 }
 0xaa4   :  { %v10430_v35 = vadd.f32 %v2345_v1, %v13843_v37  ;;  %13848 = vst [vmem:[#allocation11_spill] sm:$0xff] %v10436_v42 }
 0xaa5   :  { %v2347_v17 = vpop.f32.mrf.mxu0 }
 0xaa6   :  { %13844 = vst [vmem:[#allocation9_spill] sm:$0xff] %v10430_v35  ;;  %v10439_v10 = vadd.f32 %v2347_v17, %v13849_v54  ;;  %v2362_v29 = vpack.c.bf16 %v10430_v35, %v10442_v3 }
 0xaa8   :  { %13850 = vst [vmem:[#allocation12_spill] sm:$0xff] %v10439_v10  ;;  %v2363_v21 = vpack.c.bf16 %v10439_v10, %v10436_v42 }
 0xaaa   :  { %2376 = vmatprep.subr.bf16.mxu1 %v2363_v21  ;;  %v8308_v21 = vld [vmem:[#allocation2 + $0xa8] sm:$0xff] }
 0xaab   :  { %2377 = vmatpush1.bf16.msra.mxu1 %v2362_v29  ;;  %v8309_v29 = vld [vmem:[#allocation2 + $0xb0] sm:$0xff] }
 0xaac   :  { %2378 = vmatprep.subr.bf16.mxu1 %v2361_v61 }
 0xaaf   :  { %2379 = vmatpush1.bf16.msra.mxu1 %v2360_v16 }
 0xab2   :  { %6948 = vmatmul.mubr.msk.bf16.vlgmr.msra.gmra.mxu1 %vm349_vm1, %v8295_v6 }
 0xab3   :  { %2406 = vmatprep.mubr.bf16.mxu1 %v13842_v12 }
 0xaba   :  { %6949 = vmatmul.mubr.msk.bf16.gmra.mxu1 %vm349_vm1, %v8296_v23  ;;  %v8311_v23 = vld [vmem:[#allocation2 + $0x88] sm:$0xff] }
 0xabb   :  { %2526 = vmatprep.mubr.bf16.mxu1 %v13842_v12 }
 0xb72   :  { %v2398_v59 = vpop.f32.mrf.mxu1 }
 0xb73   :  { %v2399_v14 = vadd.f32 %v8304_v20, %v2398_v59  ;;  %v8319_v20 = vld [vmem:[%s13624_s3 + $0x30] sm:$0xff] }
 0xb74   :  { %v2400_v27 = vpop.f32.mrf.mxu1 }
 0xb75   :  { %v2401_v22 = vadd.f32 %v8301_v40, %v2400_v27  ;;  %v2417_v9 = vmax.f32 %v2399_v14, 0.0  ;;  %v8312_v27 = vld [vmem:[#allocation2 + $0xb8] sm:$0xff] }
 0xb76   :  { %v2402_v62 = vpop.f32.mrf.mxu1  ;;  %v8320_v14 = vld [vmem:[%s13624_s3 + $0x38] sm:$0xff] }
 0xb77   :  { %v2403_v46 = vadd.f32 %v8303_v55, %v2402_v62  ;;  %v2418_v7 = vmax.f32 %v2401_v22, 0.0  ;;  %v8316_v55 = vld [vmem:[%s13623_s2 + $0x28] sm:$0xff]  }
 0xb78   :  { %v2404_v25 = vpop.f32.mrf.mxu1 }
 0xb79   :  { %v2405_v38 = vadd.f32 %v8297_v56, %v2404_v25  ;;  %v2419_v57 = vmax.f32 %v2403_v46, 0.0  ;;  %v8313_v25 = vld [vmem:[#allocation2 + $0x90] sm:$0xff]  ;;  %v13859_v46 = vmov 0.0  }
 0xb7a   :  { %v2408_v15 = vpop.f32.mrf.mxu1 }
 0xb7b   :  { %v2409_v34 = vadd.f32 %v8300_v5, %v2408_v15  ;;  %v2420_v52 = vmax.f32 %v2405_v38, 0.0  ;;  %v2425_v60 = vpack.c.bf16 %v2419_v57, %v2417_v9  ;;  %v8324_v57 = vld [vmem:[%s13624_s3 + $0x58] sm:$0xff]  ;;  %v8327_v9 = vld [vmem:[%s13624_s3 + $0x70] sm:$0xff] }
 0xb7c   :  { %v2410_v43 = vpop.f32.mrf.mxu1 }
 0xb7d   :  { %v2411_v19 = vadd.f32 %v8298_v33, %v2410_v43  ;;  %v2421_v44 = vmax.f32 %v2409_v34, 0.0  ;;  %v2426_v39 = vpack.c.bf16 %v2420_v52, %v2418_v7  ;;  %v8314_v33 = vld [vmem:[#allocation2 + $0x80] sm:$0xff]  ;;  %v8322_v7 = vld [vmem:[%s13624_s3 + $0x48] sm:$0xff] }
 0xb7e   :  { %v2412_v8 = vpop.f32.mrf.mxu1  ;;  %v2358_v52 = vld [vmem:[%s13622_s1 + $0x20] sm:$0xff] }
 0xb7f   :  { %v2413_v30 = vadd.f32 %v8299_v26, %v2412_v8  ;;  %v2422_v2 = vmax.f32 %v2411_v19, 0.0 }
 0xb80   :  { %v2414_v13 = vpop.f32.mrf.mxu1 }
 0xb81   :  { %v2415_v0 = vadd.f32 %v8302_v63, %v2414_v13  ;;  %v2423_v48 = vmax.f32 %v2413_v30, 0.0 }
 0xb83   :  { %v2424_v58 = vmax.f32 %v2415_v0, 0.0  ;;  %v2427_v24 = vpack.c.bf16 %v2423_v48, %v2421_v44  ;;  %v8315_v0 = vld [vmem:[%s13623_s2 + $0x20] sm:$0xff]   ;;  %v2359_v48 = vld [vmem:[%s13622_s1 + $0x28] sm:$0xff] }
 0xb84   :  { %v8321_v44 = vld [vmem:[%s13624_s3 + $0x40] sm:$0xff] }
 0xb85   :  { %v2428_v11 = vpack.c.bf16 %v2424_v58, %v2422_v2  ;;  %v8317_v2 = vld [vmem:[%s13624_s3 + $0x20] sm:$0xff]  ;;  %v8318_v58 = vld [vmem:[%s13624_s3 + $0x28] sm:$0xff] }
 0xb87   :  { %2441 = vmatprep.subr.bf16.mxu0 %v2428_v11  ;;  %v8323_v11 = vld [vmem:[%s13624_s3 + $0x50] sm:$0xff] }
 0xb88   :  { %2442 = vmatpush1.bf16.msra.mxu0 %v2427_v24  ;;  %v8325_v24 = vld [vmem:[%s13624_s3 + $0x60] sm:$0xff] }
 0xb89   :  { %2443 = vmatprep.subr.bf16.mxu0 %v2426_v39  ;;  %v8326_v39 = vld [vmem:[%s13624_s3 + $0x68] sm:$0xff] }
 0xb8c   :  { %2444 = vmatpush1.bf16.msra.mxu0 %v2425_v60  ;;  %v8328_v60 = vld [vmem:[%s13624_s3 + $0x78] sm:$0xff] }
 0xb8f   :  { %6950 = vmatmul.mubr.msk.bf16.vlgmr.msra.gmra.mxu0 %vm349_vm1, %v8305_v4  ;;  %v8329_v4 = vld [vmem:[%s13624_s3 + $0x80] sm:$0xff] }
 0xb90   :  { %2471 = vmatprep.mubr.bf16.mxu0 %v13842_v12 }
 0xb97   :  { %6951 = vmatmul.mubr.msk.bf16.gmra.mxu0 %vm349_vm1, %v8306_v18  ;;  %v8330_v18 = vld [vmem:[%s13624_s3 + $0x88] sm:$0xff] }
 0xb98   :  { %2591 = vmatprep.mubr.bf16.mxu0 %v13842_v12 }
 0xc4f   :  { %v2463_v51 = vpop.f32.mrf.mxu0 }
 0xc50   :  { %v2464_v19 = vadd.f32 %v8314_v33, %v2463_v51  ;;  %v8331_v51 = vld [vmem:[%s13624_s3 + $0x90] sm:$0xff] }
 0xc51   :  { %v2465_v1 = vpop.f32.mrf.mxu0 }
 0xc52   :  { %v2466_v59 = vadd.f32 %v8311_v23, %v2465_v1  ;;  %v2482_v22 = vmax.f32 %v2464_v19, 0.0  ;;  %v8332_v1 = vld [vmem:[%s13624_s3 + $0x98] sm:$0xff] }
 0xc53   :  { %v2467_v37 = vpop.f32.mrf.mxu0 }
 0xc54   :  { %v2468_v15 = vadd.f32 %v8313_v25, %v2467_v37  ;;  %v2483_v30 = vmax.f32 %v2466_v59, 0.0  ;;  %v8333_v37 = vld [vmem:[%s13624_s3 + $0xa0] sm:$0xff] }
 0xc55   :  { %v2469_v17 = vpop.f32.mrf.mxu0 }
 0xc56   :  { %v2470_v50 = vadd.f32 %v8307_v41, %v2469_v17  ;;  %v2484_v34 = vmax.f32 %v2468_v15, 0.0  ;;  %v8334_v17 = vld [vmem:[%s13624_s3 + $0xa8] sm:$0xff] }
 0xc57   :  { %v2473_v36 = vpop.f32.mrf.mxu0  ;;  %v8338_v41 = vld [vmem:[%s13624_s3 + $0xc8] sm:$0xff] }
 0xc58   :  { %v2474_v16 = vadd.f32 %v8310_v47, %v2473_v36  ;;  %v2485_v8 = vmax.f32 %v2470_v50, 0.0  ;;  %v2490_v63 = vpack.c.bf16 %v2484_v34, %v2482_v22  ;;  %v8335_v36 = vld [vmem:[%s13624_s3 + $0xb0] sm:$0xff]  ;;  %v8344_v15 = vld [vmem:[#allocation2 + $0xe8] sm:$0xff] }
 0xc59   :  { %v2475_v45 = vpop.f32.mrf.mxu0 }
 0xc5a   :  { %v2476_v28 = vadd.f32 %v8308_v21, %v2475_v45  ;;  %v2486_v26 = vmax.f32 %v2474_v16, 0.0  ;;  %v2491_v40 = vpack.c.bf16 %v2485_v8, %v2483_v30  ;;  %v8336_v45 = vld [vmem:[%s13624_s3 + $0xb8] sm:$0xff]  ;;  %v8339_v21 = vld [vmem:[%s13624_s3 + $0xd0] sm:$0xff] }
 0xc5b   :  { %v2477_v54 = vpop.f32.mrf.mxu0  ;;  %v8345_v8 = vld [vmem:[#allocation2 + $0xf0] sm:$0xff] }
 0xc5c   :  { %v2478_v61 = vadd.f32 %v8309_v29, %v2477_v54  ;;  %v2487_v56 = vmax.f32 %v2476_v28, 0.0  ;;  %v8337_v54 = vld [vmem:[%s13624_s3 + $0xc0] sm:$0xff] }
 0xc5d   :  { %v2479_v6 = vpop.f32.mrf.mxu0 }
 0xc5e   :  { %v2480_v62 = vadd.f32 %v8312_v27, %v2479_v6  ;;  %v2488_v43 = vmax.f32 %v2478_v61, 0.0  ;;  %v8340_v61 = vld [vmem:[%s13624_s3 + $0xd8] sm:$0xff]  ;;  %v8341_v6 = vld [vmem:[%s13624_s3 + $0xe0] sm:$0xff]  ;;  %v8342_v27 = vld [vmem:[%s13624_s3 + $0xe8] sm:$0xff] }
 0xc60   :  { %v2489_v38 = vmax.f32 %v2480_v62, 0.0  ;;  %v2492_v13 = vpack.c.bf16 %v2488_v43, %v2486_v26  ;;  %v8343_v62 = vld [vmem:[#allocation2 + $0xd8] sm:$0xff]  ;;  %v8347_v26 = vld [vmem:[#allocation2 + $0xc8] sm:$0xff] }
 0xc62   :  { %v2493_v5 = vpack.c.bf16 %v2489_v38, %v2487_v56  ;;  %v8346_v38 = vld [vmem:[#allocation2 + $0xe0] sm:$0xff] }
 0xc64   :  { %2506 = vmatprep.subr.bf16.mxu1 %v2493_v5  ;;  %v8348_v5 = vld [vmem:[#allocation2 + $0xf8] sm:$0xff] }
 0xc65   :  { %2507 = vmatpush1.bf16.msra.mxu1 %v2492_v13  ;;  %v8349_v13 = vld [vmem:[#allocation2 + $0xd0] sm:$0xff] }
 0xc66   :  { %2508 = vmatprep.subr.bf16.mxu1 %v2491_v40 }
 0xc69   :  { %2509 = vmatpush1.bf16.msra.mxu1 %v2490_v63  ;;  %v8350_v63 = vld [vmem:[%s13624_s3 + $0xf0] sm:$0xff] }
 0xc6a   :  { %2846 = vmatprep.subr.mxu1 %v2359_v48 }
 0xc6c   :  { %6952 = vmatmul.mubr.msk.bf16.vlgmr.msra.gmra.mxu1 %vm349_vm1, %v8315_v0 }
 0xc6d   :  { %2536 = vmatprep.mubr.bf16.mxu1 %v13842_v12  ;;  %2847 = vmatpush1.msra.mxu1 %v2358_v52  ;;  %v8351_v52 = vld [vmem:[#allocation2 + $0xc0] sm:$0xff] }
 0xc74   :  { %6953 = vmatmul.mubr.msk.bf16.gmra.mxu1 %vm349_vm1, %v8316_v55 }
 0xc75   :  { %2880 = vmatprep.mubr.f32.mxu1 %v13859_v46 }
 0xc7c   :  { %6970 = vmatmul.mubr.msk.f32.vlgmr.msra.gmra.mxu1 %vm231_vm0, %v8317_v2 }
 0xc7d   :  { %2886 = vmatprep.mubr.f32.mxu1 %v13859_v46 }
 0xc80   :  { %6971 = vmatmul.mubr.msk.f32.gmra.mxu1 %vm231_vm0, %v8318_v58 }
 0xc81   :  { %2892 = vmatprep.mubr.f32.mxu1 %v13859_v46 }
 0xc84   :  { %6972 = vmatmul.mubr.msk.f32.gmra.mxu1 %vm231_vm0, %v8319_v20 }
 0xc85   :  { %2898 = vmatprep.mubr.f32.mxu1 %v13859_v46 }
 0xc88   :  { %6973 = vmatmul.mubr.msk.f32.gmra.mxu1 %vm231_vm0, %v8320_v14 }
 0xc89   :  { %2904 = vmatprep.mubr.f32.mxu1 %v13859_v46 }
 0xc8c   :  { %6974 = vmatmul.mubr.msk.f32.gmra.mxu1 %vm231_vm0, %v8321_v44 }
 0xc8d   :  { %2910 = vmatprep.mubr.f32.mxu1 %v13859_v46 }
 0xc90   :  { %6975 = vmatmul.mubr.msk.f32.gmra.mxu1 %vm231_vm0, %v8322_v7 }
 0xc91   :  { %2916 = vmatprep.mubr.f32.mxu1 %v13859_v46 }
 0xc94   :  { %6976 = vmatmul.mubr.msk.f32.gmra.mxu1 %vm231_vm0, %v8323_v11  ;;  %v8352_v11 = vld [vmem:[%s13624_s3 + $0xf8] sm:$0xff] }
 0xc95   :  { %2922 = vmatprep.mubr.f32.mxu1 %v13859_v46 }
 0xc98   :  { %6977 = vmatmul.mubr.msk.f32.gmra.mxu1 %vm231_vm0, %v8324_v57 }
 0xc99   :  { %2928 = vmatprep.mubr.f32.mxu1 %v13859_v46 }
 0xc9c   :  { %6978 = vmatmul.mubr.msk.f32.gmra.mxu1 %vm231_vm0, %v8325_v24 }
 0xc9d   :  { %2934 = vmatprep.mubr.f32.mxu1 %v13859_v46 }
 0xca0   :  { %6979 = vmatmul.mubr.msk.f32.gmra.mxu1 %vm231_vm0, %v8326_v39 }
 0xca1   :  { %2940 = vmatprep.mubr.f32.mxu1 %v13859_v46 }
 0xca4   :  { %6980 = vmatmul.mubr.msk.f32.gmra.mxu1 %vm231_vm0, %v8327_v9  ;;  %v8353_v9 = vld [vmem:[%s13624_s3 + $0x100] sm:$0xff] }
 0xca5   :  { %2946 = vmatprep.mubr.f32.mxu1 %v13859_v46 }
 0xca8   :  { %6981 = vmatmul.mubr.msk.f32.gmra.mxu1 %vm231_vm0, %v8328_v60  ;;  %v8354_v60 = vld [vmem:[%s13624_s3 + $0x108] sm:$0xff] }
 0xca9   :  { %2952 = vmatprep.mubr.f32.mxu1 %v13859_v46 }
 0xcac   :  { %6982 = vmatmul.mubr.msk.f32.gmra.mxu1 %vm231_vm0, %v8329_v4  ;;  %v8355_v4 = vld [vmem:[%s13623_s2 + $0x30] sm:$0xff]  }
 0xcad   :  { %2958 = vmatprep.mubr.f32.mxu1 %v13859_v46 }
 0xcb0   :  { %6983 = vmatmul.mubr.msk.f32.gmra.mxu1 %vm231_vm0, %v8330_v18  ;;  %v8356_v18 = vld [vmem:[%s13624_s3 + $0x110] sm:$0xff] }
 0xcb1   :  { %2964 = vmatprep.mubr.f32.mxu1 %v13859_v46 }
 0xcb4   :  { %6984 = vmatmul.mubr.msk.f32.gmra.mxu1 %vm231_vm0, %v8331_v51  ;;  %v8357_v51 = vld [vmem:[%s13624_s3 + $0x118] sm:$0xff] }
 0xcb5   :  { %2970 = vmatprep.mubr.f32.mxu1 %v13859_v46 }
 0xcb8   :  { %6985 = vmatmul.mubr.msk.f32.gmra.mxu1 %vm231_vm0, %v8332_v1  ;;  %v8358_v1 = vld [vmem:[%s13623_s2 + $0x38] sm:$0xff]  }
 0xcb9   :  { %2976 = vmatprep.mubr.f32.mxu1 %v13859_v46 }
 0xcbc   :  { %6986 = vmatmul.mubr.msk.f32.gmra.mxu1 %vm231_vm0, %v8333_v37  ;;  %v8359_v37 = vld [vmem:[%s13623_s2 + $0x40] sm:$0xff]  }
 0xcbd   :  { %2982 = vmatprep.mubr.f32.mxu1 %v13859_v46 }
 0xcc0   :  { %6987 = vmatmul.mubr.msk.f32.gmra.mxu1 %vm231_vm0, %v8334_v17  ;;  %v8360_v17 = vld [vmem:[%s13623_s2 + $0x48] sm:$0xff]  }
 0xcc1   :  { %2988 = vmatprep.mubr.f32.mxu1 %v13859_v46 }
 0xcc4   :  { %6988 = vmatmul.mubr.msk.f32.gmra.mxu1 %vm231_vm0, %v8335_v36  ;;  %v8361_v36 = vld [vmem:[%s13623_s2 + $0x50] sm:$0xff]  }
 0xcc5   :  { %2994 = vmatprep.mubr.f32.mxu1 %v13859_v46 }
 0xcc8   :  { %6989 = vmatmul.mubr.msk.f32.gmra.mxu1 %vm231_vm0, %v8336_v45  ;;  %v8362_v45 = vld [vmem:[%s13623_s2 + $0x58] sm:$0xff]  }
 0xcc9   :  { %3000 = vmatprep.mubr.f32.mxu1 %v13859_v46 }
 0xccc   :  { %6990 = vmatmul.mubr.msk.f32.gmra.mxu1 %vm231_vm0, %v8337_v54  ;;  %v8363_v54 = vld [vmem:[%s13623_s2 + $0x60] sm:$0xff]  }
 0xccd   :  { %3006 = vmatprep.mubr.f32.mxu1 %v13859_v46 }
 0xcd0   :  { %6991 = vmatmul.mubr.msk.f32.gmra.mxu1 %vm231_vm0, %v8338_v41  ;;  %v8364_v41 = vld [vmem:[%s13623_s2 + $0x68] sm:$0xff]  }
 0xcd1   :  { %3012 = vmatprep.mubr.f32.mxu1 %v13859_v46 }
 0xcd4   :  { %6992 = vmatmul.mubr.msk.f32.gmra.mxu1 %vm231_vm0, %v8339_v21  ;;  %v8366_v21 = vld [vmem:[%s13623_s2 + $0x78] sm:$0xff]  }
 0xcd5   :  { %3018 = vmatprep.mubr.f32.mxu1 %v13859_v46 }
 0xcd8   :  { %6993 = vmatmul.mubr.msk.f32.gmra.mxu1 %vm231_vm0, %v8340_v61 }
 0xcd9   :  { %3024 = vmatprep.mubr.f32.mxu1 %v13859_v46 }
 0xcdc   :  { %6994 = vmatmul.mubr.msk.f32.gmra.mxu1 %vm231_vm0, %v8341_v6 }
 0xcdd   :  { %3030 = vmatprep.mubr.f32.mxu1 %v13859_v46 }
 0xce0   :  { %6995 = vmatmul.mubr.msk.f32.gmra.mxu1 %vm231_vm0, %v8342_v27 }
 0xce1   :  { %3036 = vmatprep.mubr.f32.mxu1 %v13859_v46 }
 0xce4   :  { %6996 = vmatmul.mubr.msk.f32.gmra.mxu1 %vm231_vm0, %v8350_v63 }
 0xce5   :  { %3042 = vmatprep.mubr.f32.mxu1 %v13859_v46 }
 0xce8   :  { %6997 = vmatmul.mubr.msk.f32.gmra.mxu1 %vm231_vm0, %v8352_v11 }
 0xce9   :  { %3048 = vmatprep.mubr.f32.mxu1 %v13859_v46 }
 0xcec   :  { %6998 = vmatmul.mubr.msk.f32.gmra.mxu1 %vm231_vm0, %v8353_v9 }
 0xced   :  { %3054 = vmatprep.mubr.f32.mxu1 %v13859_v46 }
 0xcf0   :  { %6999 = vmatmul.mubr.msk.f32.gmra.mxu1 %vm231_vm0, %v8354_v60 }
 0xcf1   :  { %3060 = vmatprep.mubr.f32.mxu1 %v13859_v46 }
 0xcf4   :  { %7000 = vmatmul.mubr.msk.f32.gmra.mxu1 %vm231_vm0, %v8356_v18 }
 0xcf5   :  { %3066 = vmatprep.mubr.f32.mxu1 %v13859_v46 }
 0xcf8   :  { %7001 = vmatmul.mubr.msk.f32.gmra.mxu1 %vm231_vm0, %v8357_v51 }
 0xcf9   :  { %3272 = vmatprep.mubr.bf16.mxu1 %v13842_v12 }
 0xd2c   :  { %v2528_v50 = vpop.f32.mrf.mxu1 }
 0xd2d   :  { %v2529_v2 = vadd.f32 %v8351_v52, %v2528_v50  ;;  %v8365_v50 = vld [vmem:[%s13623_s2 + $0x70] sm:$0xff]  }
 0xd2e   :  { %v2530_v28 = vpop.f32.mrf.mxu1 }
 0xd2f   :  { %v2531_v30 = vadd.f32 %v8347_v26, %v2530_v28  ;;  %v2547_v24 = vmax.f32 %v2529_v2, 0.0  ;;  %v8367_v28 = vld [vmem:[%s13623_s2 + $0x80] sm:$0xff]  }
 0xd30   :  { %v2532_v29 = vpop.f32.mrf.mxu1 }
 0xd31   :  { %v2533_v40 = vadd.f32 %v8349_v13, %v2532_v29  ;;  %v2548_v20 = vmax.f32 %v2531_v30, 0.0 }
 0xd32   :  { %v2534_v47 = vpop.f32.mrf.mxu1 }
 0xd33   :  { %v2535_v25 = vadd.f32 %v8343_v62, %v2534_v47  ;;  %v2549_v44 = vmax.f32 %v2533_v40, 0.0  ;;  %v8368_v47 = vld [vmem:[%s13623_s2 + $0x88] sm:$0xff]   ;;  %v8370_v62 = vld [vmem:[%s13623_s2 + $0x98] sm:$0xff]  }
 0xd34   :  { %v2538_v16 = vpop.f32.mrf.mxu1 }
 0xd35   :  { %v2539_v33 = vadd.f32 %v8346_v38, %v2538_v16  ;;  %v2550_v0 = vmax.f32 %v2535_v25, 0.0  ;;  %v2555_v39 = vpack.c.bf16 %v2549_v44, %v2547_v24  ;;  %v8372_v38 = vld [vmem:[%s13623_s2 + $0xa8] sm:$0xff]  }
 0xd36   :  { %v2540_v23 = vpop.f32.mrf.mxu1 }
 0xd37   :  { %v2541_v43 = vadd.f32 %v8344_v15, %v2540_v23  ;;  %v2551_v58 = vmax.f32 %v2539_v33, 0.0  ;;  %v2556_v57 = vpack.c.bf16 %v2550_v0, %v2548_v20  ;;  %v8369_v23 = vld [vmem:[%s13623_s2 + $0x90] sm:$0xff]   ;;  %v8373_v33 = vld [vmem:[%s13625_s4 + $0x8] sm:$0xff] }
 0xd38   :  { %v2542_v59 = vpop.f32.mrf.mxu1 }
 0xd39   :  { %v2543_v56 = vadd.f32 %v8345_v8, %v2542_v59  ;;  %v2552_v55 = vmax.f32 %v2541_v43, 0.0  ;;  %v8371_v43 = vld [vmem:[%s13623_s2 + $0xa0] sm:$0xff]  }
 0xd3a   :  { %v2544_v19 = vpop.f32.mrf.mxu1 }
 0xd3b   :  { %v2545_v34 = vadd.f32 %v8348_v5, %v2544_v19  ;;  %v2553_v22 = vmax.f32 %v2543_v56, 0.0 }
 0xd3c   :  { %v10712_v29 = vpop.f32.mrf.mxu1 }
 0xd3d   :  { %v2554_v48 = vmax.f32 %v2545_v34, 0.0  ;;  %v2557_v7 = vpack.c.bf16 %v2553_v22, %v2551_v58  ;;  %13860 = vst [vmem:[#allocation46_spill] sm:$0xff] %v10712_v29 }
 0xd3e   :  { %v10714_v61 = vpop.f32.mrf.mxu1 }
 0xd3f   :  { %v2558_v14 = vpack.c.bf16 %v2554_v48, %v2552_v55  ;;  %13861 = vst [vmem:[#allocation47_spill] sm:$0xff] %v10714_v61 }
 0xd40   :  { %v10721_v16 = vpop.f32.mrf.mxu1 }
 0xd41   :  { %2571 = vmatprep.subr.bf16.mxu0 %v2558_v14  ;;  %13862 = vst [vmem:[#allocation48_spill] sm:$0xff] %v10721_v16 }
 0xd42   :  { %2572 = vmatpush1.bf16.msra.mxu0 %v2557_v7  ;;  %v10723_v6 = vpop.f32.mrf.mxu1 }
 0xd43   :  { %2573 = vmatprep.subr.bf16.mxu0 %v2556_v57  ;;  %13863 = vst [vmem:[#allocation16_spill] sm:$0xff] %v10723_v6 }
 0xd44   :  { %v10730_v59 = vpop.f32.mrf.mxu1 }
 0xd45   :  { %13864 = vst [vmem:[#allocation17_spill] sm:$0xff] %v10730_v59 }
 0xd46   :  { %2574 = vmatpush1.bf16.msra.mxu0 %v2555_v39  ;;  %v10732_v27 = vpop.f32.mrf.mxu1 }
 0xd47   :  { %13865 = vst [vmem:[#allocation18_spill] sm:$0xff] %v10732_v27 }
 0xd48   :  { %v10739_v25 = vpop.f32.mrf.mxu1 }
 0xd49   :  { %6954 = vmatmul.mubr.msk.bf16.vlgmr.msra.gmra.mxu0 %vm349_vm1, %v8355_v4  ;;  %13866 = vst [vmem:[#allocation19_spill] sm:$0xff] %v10739_v25 }
 0xd4a   :  { %2601 = vmatprep.mubr.bf16.mxu0 %v13842_v12  ;;  %v10741_v15 = vpop.f32.mrf.mxu1 }
 0xd4b   :  { %13867 = vst [vmem:[#allocation20_spill] sm:$0xff] %v10741_v15  ;;  %v8376_v15 = vld [vmem:[#allocation2 + $0x1e0] sm:$0xff] }
 0xd4c   :  { %v10748_v8 = vpop.f32.mrf.mxu1 }
 0xd4d   :  { %13868 = vst [vmem:[#allocation21_spill] sm:$0xff] %v10748_v8 }
 0xd4e   :  { %v10750_v56 = vpop.f32.mrf.mxu1 }
 0xd4f   :  { %13869 = vst [vmem:[#allocation22_spill] sm:$0xff] %v10750_v56 }
 0xd50   :  { %v10759_v19 = vpop.f32.mrf.mxu1 }
 0xd51   :  { %6955 = vmatmul.mubr.msk.bf16.gmra.mxu0 %vm349_vm1, %v8358_v1  ;;  %13870 = vst [vmem:[#allocation23_spill] sm:$0xff] %v10759_v19  ;;  %v8377_v19 = vld [vmem:[#allocation2 + $0x1d8] sm:$0xff] }
 0xd52   :  { %2611 = vmatprep.mubr.bf16.mxu0 %v13842_v12  ;;  %v10761_v26 = vpop.f32.mrf.mxu1 }
 0xd53   :  { %13871 = vst [vmem:[#allocation24_spill] sm:$0xff] %v10761_v26  ;;  %v8378_v26 = vld [vmem:[#allocation2 + $0x1f8] sm:$0xff] }
 0xd54   :  { %v10763_v30 = vpop.f32.mrf.mxu1 }
 0xd55   :  { %13872 = vst [vmem:[#allocation25_spill] sm:$0xff] %v10763_v30 }
 0xd56   :  { %v10765_v5 = vpop.f32.mrf.mxu1 }
 0xd57   :  { %13873 = vst [vmem:[#allocation26_spill] sm:$0xff] %v10765_v5 }
 0xd58   :  { %v10767_v34 = vpop.f32.mrf.mxu1 }
 0xd59   :  { %6956 = vmatmul.mubr.msk.bf16.gmra.mxu0 %vm349_vm1, %v8359_v37  ;;  %13874 = vst [vmem:[#allocation8_spill] sm:$0xff] %v10767_v34 }
 0xd5a   :  { %2621 = vmatprep.mubr.bf16.mxu0 %v13842_v12  ;;  %v10769_v13 = vpop.f32.mrf.mxu1 }
 0xd5c   :  { %v10771_v40 = vpop.f32.mrf.mxu1 }
 0xd5e   :  { %v10773_v22 = vpop.f32.mrf.mxu1 }
 0xd60   :  { %v10775_v63 = vpop.f32.mrf.mxu1 }
 0xd61   :  { %6957 = vmatmul.mubr.msk.bf16.gmra.mxu0 %vm349_vm1, %v8360_v17 }
 0xd62   :  { %2631 = vmatprep.mubr.bf16.mxu0 %v13842_v12  ;;  %v10777_v0 = vpop.f32.mrf.mxu1 }
 0xd64   :  { %v10779_v55 = vpop.f32.mrf.mxu1 }
 0xd66   :  { %v10781_v48 = vpop.f32.mrf.mxu1 }
 0xd68   :  { %v10783_v52 = vpop.f32.mrf.mxu1 }
 0xd69   :  { %6958 = vmatmul.mubr.msk.bf16.gmra.mxu0 %vm349_vm1, %v8361_v36 }
 0xd6a   :  { %2641 = vmatprep.mubr.bf16.mxu0 %v13842_v12  ;;  %v10785_v2 = vpop.f32.mrf.mxu1 }
 0xd6c   :  { %v10787_v58 = vpop.f32.mrf.mxu1 }
 0xd6e   :  { %v10789_v20 = vpop.f32.mrf.mxu1 }
 0xd70   :  { %v10791_v14 = vpop.f32.mrf.mxu1 }
 0xd71   :  { %6959 = vmatmul.mubr.msk.bf16.gmra.mxu0 %vm349_vm1, %v8362_v45 }
 0xd72   :  { %2651 = vmatprep.mubr.bf16.mxu0 %v13842_v12  ;;  %v10793_v44 = vpop.f32.mrf.mxu1 }
 0xd74   :  { %v10799_v57 = vpop.f32.mrf.mxu1 }
 0xd76   :  { %v10805_v9 = vpop.f32.mrf.mxu1 }
 0xd78   :  { %v10811_v18 = vpop.f32.mrf.mxu1 }
 0xd79   :  { %6960 = vmatmul.mubr.msk.bf16.gmra.mxu0 %vm349_vm1, %v8363_v54 }
 0xd7a   :  { %2661 = vmatprep.mubr.bf16.mxu0 %v13842_v12  ;;  %v10817_v37 = vpop.f32.mrf.mxu1 }
 0xd7c   :  { %v10823_v45 = vpop.f32.mrf.mxu1 }
 0xd7d   :  { %13875 = vst [vmem:[#allocation35_spill] sm:$0xff] %v10823_v45 }
 0xd81   :  { %6961 = vmatmul.mubr.msk.bf16.gmra.mxu0 %vm349_vm1, %v8364_v41 }
 0xd82   :  { %2671 = vmatprep.mubr.bf16.mxu0 %v13842_v12 }
 0xd89   :  { %6962 = vmatmul.mubr.msk.bf16.gmra.mxu0 %vm349_vm1, %v8365_v50  ;;  %v10829_v50 = vpop.f32.mrf.mxu1 }
 0xd8a   :  { %2681 = vmatprep.mubr.bf16.mxu0 %v13842_v12  ;;  %13876 = vst [vmem:[#allocation36_spill] sm:$0xff] %v10829_v50 }
 0xd91   :  { %6963 = vmatmul.mubr.msk.bf16.gmra.mxu0 %vm349_vm1, %v8366_v21 }
 0xd92   :  { %2691 = vmatprep.mubr.bf16.mxu0 %v13842_v12 }
 0xd99   :  { %6964 = vmatmul.mubr.msk.bf16.gmra.mxu0 %vm349_vm1, %v8367_v28 }
 0xd9a   :  { %2701 = vmatprep.mubr.bf16.mxu0 %v13842_v12 }
 0xda1   :  { %6965 = vmatmul.mubr.msk.bf16.gmra.mxu0 %vm349_vm1, %v8368_v47  ;;  %v10835_v47 = vpop.f32.mrf.mxu1 }
 0xda2   :  { %2711 = vmatprep.mubr.bf16.mxu0 %v13842_v12  ;;  %13877 = vst [vmem:[#allocation37_spill] sm:$0xff] %v10835_v47 }
 0xda9   :  { %6966 = vmatmul.mubr.msk.bf16.gmra.mxu0 %vm349_vm1, %v8369_v23 }
 0xdaa   :  { %2721 = vmatprep.mubr.bf16.mxu0 %v13842_v12 }
 0xdb1   :  { %6967 = vmatmul.mubr.msk.bf16.gmra.mxu0 %vm349_vm1, %v8370_v62 }
 0xdb2   :  { %2731 = vmatprep.mubr.bf16.mxu0 %v13842_v12 }
 0xdb9   :  { %6968 = vmatmul.mubr.msk.bf16.gmra.mxu0 %vm349_vm1, %v8371_v43  ;;  %v10841_v43 = vpop.f32.mrf.mxu1 }
 0xdba   :  { %2741 = vmatprep.mubr.bf16.mxu0 %v13842_v12  ;;  %13878 = vst [vmem:[#allocation38_spill] sm:$0xff] %v10841_v43 }
 0xdbb   :  { %v10847_v46 = vpop.f32.mrf.mxu1 }
 0xdbc   :  { %13879 = vst [vmem:[#allocation39_spill] sm:$0xff] %v10847_v46 }
 0xdbd   :  { %v10851_v49 = vpop.f32.mrf.mxu1 }
 0xdbe   :  { %13880 = vst [vmem:[#allocation40_spill] sm:$0xff] %v10851_v49  ;;  %v8374_v49 = vld [vmem:[#allocation2 + $0x1e8] sm:$0xff] }
 0xdbf   :  { %v10853_v42 = vpop.f32.mrf.mxu1 }
 0xdc0   :  { %13881 = vst [vmem:[#allocation41_spill] sm:$0xff] %v10853_v42  ;;  %v8375_v42 = vld [vmem:[#allocation2 + $0x1f0] sm:$0xff] }
 0xdc1   :  { %6969 = vmatmul.mubr.msk.bf16.gmra.mxu0 %vm349_vm1, %v8372_v38  ;;  %v10855_v12 = vpop.f32.mrf.mxu1 }
 0xdc2   :  { %3201 = vmatprep.mubr.f32.mxu0 %v8373_v33  ;;  %13882 = vst [vmem:[#allocation42_spill] sm:$0xff] %v10855_v12 }
 0xdc3   :  { %v10857_v47 = vpop.f32.mrf.mxu1 }
 0xdc4   :  { %13883 = vst [vmem:[#allocation43_spill] sm:$0xff] %v10857_v47 }
 0xdc5   :  { %v10859_v46 = vpop.f32.mrf.mxu1 }
 0xdc6   :  { %13884 = vst [vmem:[#allocation44_spill] sm:$0xff] %v10859_v46  ;;  %v8379_v46 = vld [vmem:[#allocation2 + $0x1d0] sm:$0xff] }
 0xdc7   :  { %v10861_v6 = vpop.f32.mrf.mxu1 }
 0xdc8   :  { %13885 = vst [vmem:[#allocation34_spill] sm:$0xff] %v10861_v6  ;;  %v8380_v6 = vld [vmem:[#allocation2 + $0x1c8] sm:$0xff] }
 0xdc9   :  { %v10863_v56 = vpop.f32.mrf.mxu1 }
 0xe09   :  { %v10795_v7 = vpop.f32.mrf.mxu0 }
 0xe0b   :  { %v10797_v11 = vpop.f32.mrf.mxu0 }
 0xe0d   :  { %v10801_v24 = vpop.f32.mrf.mxu0 }
 0xe0f   :  { %v10803_v39 = vpop.f32.mrf.mxu0 }
 0xe11   :  { %v10807_v60 = vpop.f32.mrf.mxu0 }
 0xe13   :  { %v10809_v4 = vpop.f32.mrf.mxu0 }
 0xe15   :  { %v10813_v51 = vpop.f32.mrf.mxu0 }
 0xe17   :  { %v10815_v1 = vpop.f32.mrf.mxu0 }
 0xe19   :  { %v10819_v17 = vpop.f32.mrf.mxu0 }
 0xe1b   :  { %v10821_v36 = vpop.f32.mrf.mxu0 }
 0xe1d   :  { %v10825_v54 = vpop.f32.mrf.mxu0 }
 0xe1f   :  { %v10827_v41 = vpop.f32.mrf.mxu0 }
 0xe21   :  { %v10831_v21 = vpop.f32.mrf.mxu0 }
 0xe23   :  { %v10833_v28 = vpop.f32.mrf.mxu0 }
 0xe25   :  { %v10837_v23 = vpop.f32.mrf.mxu0 }
 0xe27   :  { %v10839_v62 = vpop.f32.mrf.mxu0 }
 0xe29   :  { %v10843_v38 = vpop.f32.mrf.mxu0 }
 0xe2b   :  { %v10845_v33 = vpop.f32.mrf.mxu0 }
 0xe2d   :  { %v10849_v32 = vpop.f32.mrf.mxu0 }
 0xe2f   :  { %v2639_v31 = vpop.f32.mrf.mxu0 }
 0xe31   :  { %v2643_v3 = vpop.f32.mrf.mxu0 }
 0xe33   :  { %v2645_v10 = vpop.f32.mrf.mxu0 }
 0xe35   :  { %v2647_v53 = vpop.f32.mrf.mxu0 }
 0xe37   :  { %v2649_v35 = vpop.f32.mrf.mxu0 }
 0xe39   :  { %v2653_v45 = vpop.f32.mrf.mxu0 }
 0xe3b   :  { %v2655_v50 = vpop.f32.mrf.mxu0 }
 0xe3d   :  { %v2657_v43 = vpop.f32.mrf.mxu0 }
 0xe3e   :  { %v2658_v5 = vadd.f32 %v8379_v46, %v2657_v43  ;;  %v8389_v43 = vld [vmem:[#allocation2 + $0x180] sm:$0xff] }
 0xe3f   :  { %v2659_v29 = vpop.f32.mrf.mxu0 }
 0xe40   :  { %v2660_v47 = vadd.f32 %v8377_v19, %v2659_v29 }
 0xe41   :  { %v2663_v61 = vpop.f32.mrf.mxu0 }
 0xe42   :  { %v2664_v8 = vadd.f32 %v8376_v15, %v2663_v61  ;;  %v8382_v15 = vld [vmem:[#allocation2 + $0x1b8] sm:$0xff] }
 0xe43   :  { %v2665_v16 = vpop.f32.mrf.mxu0  ;;  %v2650_v29 = vadd.f32 %v8382_v15, %v2649_v35  ;;  %v8387_v35 = vld [vmem:[#allocation2 + $0x190] sm:$0xff] }
 0xe44   :  { %v2666_v59 = vadd.f32 %v8374_v49, %v2665_v16  ;;  %v2656_v49 = vadd.f32 %v8380_v6, %v2655_v50  ;;  %v8381_v16 = vld [vmem:[#allocation2 + $0x1c0] sm:$0xff]  ;;  %v8391_v15 = vld [vmem:[#allocation2 + $0x170] sm:$0xff] }
 0xe45   :  { %v2667_v27 = vpop.f32.mrf.mxu0  ;;  %v8385_v6 = vld [vmem:[#allocation2 + $0x1a0] sm:$0xff] }
 0xe46   :  { %v2668_v25 = vadd.f32 %v8375_v42, %v2667_v27  ;;  %7505 = vtanh.f32 %v2666_v59  ;;  %v2654_v42 = vadd.f32 %v8381_v16, %v2653_v45  ;;  %v10869_v27 = vpop.f32.mrf.mxu1  ;;  %v8383_v59 = vld [vmem:[#allocation2 + $0x1b0] sm:$0xff]  ;;  %v8386_v45 = vld [vmem:[#allocation2 + $0x198] sm:$0xff] }
 0xe47   :  { %v2669_v12 = vpop.f32.mrf.mxu0  ;;  %v2640_v50 = vadd.f32 %v8386_v45, %v2639_v31  ;;  %v8390_v31 = vld [vmem:[#allocation2 + $0x178] sm:$0xff] }
 0xe48   :  { %v2670_v30 = vadd.f32 %v8378_v26, %v2669_v12  ;;  %7507 = vtanh.f32 %v2668_v25  ;;  %v2648_v12 = vadd.f32 %v8383_v59, %v2647_v53  ;;  %v8384_v25 = vld [vmem:[#allocation2 + $0x1a8] sm:$0xff]  ;;  %v2644_v26 = vadd.f32 %v8385_v6, %v2643_v3 }
 0xe49   :  { %v10865_v34 = vpop.f32.mrf.mxu0  ;;  %v2646_v19 = vadd.f32 %v8384_v25, %v2645_v10  ;;  %v2634_v3 = vadd.f32 %v8389_v43, %v10843_v38 }
 0xe4a   :  { %7509 = vtanh.f32 %v2670_v30 }
 0xe4b   :  { %7511 = vtanh.f32 %v2664_v8  ;;  %v10867_v61 = vpop.f32.mrf.mxu0  ;;  %v10875_v8 = vpop.f32.mrf.mxu1 }
 0xe4c   :  { %7513 = vtanh.f32 %v2660_v47  ;;  %v2638_v47 = vadd.f32 %v8387_v35, %v10849_v32 }
 0xe4d   :  { %7515 = vtanh.f32 %v2658_v5  ;;  %v10871_v46 = vpop.f32.mrf.mxu0  ;;  %v8388_v5 = vld [vmem:[#allocation2 + $0x188] sm:$0xff]  ;;  %v10884_v16 = vpop.f32.mrf.mxu1 }
 0xe4e   :  { %7517 = vtanh.f32 %v2656_v49  ;;  %v2636_v10 = vadd.f32 %v8388_v5, %v10845_v33  ;;  %v8395_v5 = vld [vmem:[#allocation2 + $0x150] sm:$0xff] }
 0xe4f   :  { %7519 = vtanh.f32 %v2654_v42  ;;  %v10873_v30 = vpop.f32.mrf.mxu0  ;;  %v2630_v42 = vadd.f32 %v8390_v31, %v10839_v62  ;;  %v10894_v62 = vpop.f32.mrf.mxu1 }
 0xe50   :  { %7521 = vtanh.f32 %v2650_v29  ;;  %v2628_v29 = vadd.f32 %v8391_v15, %v10837_v23 }
 0xe51   :  { %7523 = vtanh.f32 %v2648_v12  ;;  %v10878_v53 = vpop.f32.mrf.mxu0  ;;  %v8392_v12 = vld [vmem:[#allocation2 + $0x168] sm:$0xff] }
 0xe52   :  { %7525 = vtanh.f32 %v2646_v19  ;;  %v2626_v38 = vadd.f32 %v8392_v12, %v10833_v28  ;;  %v8393_v19 = vld [vmem:[#allocation2 + $0x160] sm:$0xff]  ;;  %v2618_v28 = vadd.f32 %v8395_v5, %v10825_v54  ;;  %v8398_v12 = vld [vmem:[#allocation2 + $0x138] sm:$0xff] }
 0xe53   :  { %7527 = vtanh.f32 %v2644_v26  ;;  %v10882_v49 = vpop.f32.mrf.mxu0  ;;  %v7506_v32 = vpop.eup %7505  ;;  %v2624_v6 = vadd.f32 %v8393_v19, %v10831_v21  ;;  %v8402_v5 = vld [vmem:[#allocation2 + $0x118] sm:$0xff] }
 0xe54   :  { %7529 = vtanh.f32 %v2640_v50  ;;  %v8394_v50 = vld [vmem:[#allocation2 + $0x158] sm:$0xff]  ;;  %v3102_v15 = vmul.f32 %v7506_v32, %v10805_v9 }
 0xe55   :  { %7531 = vtanh.f32 %v2638_v47  ;;  %v10888_v59 = vpop.f32.mrf.mxu0  ;;  %v7508_v33 = vpop.eup %7507  ;;  %v2620_v23 = vadd.f32 %v8394_v50, %v10827_v41  ;;  %v8401_v50 = vld [vmem:[#allocation2 + $0x120] sm:$0xff] }
 0xe56   :  { %7533 = vtanh.f32 %v2636_v10  ;;  %v3103_v10 = vmul.f32 %v7508_v33, %v10811_v18  ;;  %v10908_v18 = vpop.f32.mrf.mxu1 }
 0xe57   :  { %v7510_v25 = vpop.eup %7509  ;;  %7535 = vtanh.f32 %v2634_v3  ;;  %v10892_v26 = vpop.f32.mrf.mxu0  ;;  %v8396_v3 = vld [vmem:[#allocation2 + $0x148] sm:$0xff] }
 0xe58   :  { %v7512_v45 = vpop.eup %7511  ;;  %7537 = vtanh.f32 %v2630_v42  ;;  %v3104_v35 = vmul.f32 %v7510_v25, %v10817_v37  ;;  %v2616_v31 = vadd.f32 %v8396_v3, %v10821_v36  ;;  %v8397_v42 = vld [vmem:[#allocation2 + $0x140] sm:$0xff]  ;;  %v2610_v36 = vadd.f32 %v8398_v12, %v10815_v1 }
 0xe59   :  { %v7514_v47 = vpop.eup %7513  ;;  %7539 = vtanh.f32 %v2628_v29  ;;  %v10900_v21 = vpop.f32.mrf.mxu0  ;;  %v2614_v37 = vadd.f32 %v8397_v42, %v10819_v17  ;;  %v3101_v54 = vmul.f32 %v7512_v45, %v10799_v57 }
 0xe5a   :  { %v7516_v43 = vpop.eup %7515  ;;  %7541 = vtanh.f32 %v2626_v38  ;;  %3137 = vmatprep.subr.mxu0 %v3104_v35  ;;  %v3100_v9 = vmul.f32 %v7514_v47, %v10793_v44  ;;  %v8399_v38 = vld [vmem:[#allocation2 + $0x130] sm:$0xff] }
 0xe5b   :  { %v7518_v41 = vpop.eup %7517  ;;  %7543 = vtanh.f32 %v2624_v6  ;;  %v10906_v29 = vpop.f32.mrf.mxu0  ;;  %3138 = vmatpush1.msra.mxu0 %v3103_v10  ;;  %v2608_v17 = vadd.f32 %v8399_v38, %v10813_v51  ;;  %v3099_v57 = vmul.f32 %v7516_v43, %v10791_v14  ;;  %v8400_v6 = vld [vmem:[#allocation2 + $0x128] sm:$0xff]  ;;  %v8403_v10 = vld [vmem:[#allocation2 + $0x110] sm:$0xff] }
 0xe5c   :  { %v7520_v33 = vpop.eup %7519  ;;  %7545 = vtanh.f32 %v2620_v23  ;;  %3139 = vmatprep.subr.mxu0 %v3102_v15  ;;  %v2606_v45 = vadd.f32 %v8400_v6, %v10809_v4  ;;  %v3098_v1 = vmul.f32 %v7518_v41, %v10789_v20  ;;  %v2604_v23 = vadd.f32 %v8401_v50, %v10807_v60  ;;  %v10922_v14 = vpop.f32.mrf.mxu1  ;;  %v8405_v41 = vld [vmem:[#allocation2 + $0x100] sm:$0xff] }
 0xe5d   :  { %v7522_v32 = vpop.eup %7521  ;;  %7547 = vtanh.f32 %v2618_v28  ;;  %v10914_v25 = vpop.f32.mrf.mxu0  ;;  %3140 = vmatpush1.msra.mxu0 %v3101_v54  ;;  %v3097_v51 = vmul.f32 %v7520_v33, %v10787_v58  ;;  %v2600_v4 = vadd.f32 %v8402_v5, %v10803_v39  ;;  %v2598_v60 = vadd.f32 %v8403_v10, %v10801_v24 }
 0xe5e   :  { %v7524_v19 = vpop.eup %7523  ;;  %7549 = vtanh.f32 %v2616_v31  ;;  %3141 = vmatprep.subr.mxu0 %v3100_v9  ;;  %v3096_v20 = vmul.f32 %v7522_v32, %v10785_v2  ;;  %v8404_v31 = vld [vmem:[#allocation2 + $0x108] sm:$0xff]  ;;  %v2594_v42 = vadd.f32 %v8405_v41, %v10795_v7 }
 0xe5f   :  { %v7526_v44 = vpop.eup %7525  ;;  %7551 = vtanh.f32 %v2614_v37  ;;  %v10920_v35 = vpop.f32.mrf.mxu0  ;;  %3142 = vmatpush1.msra.mxu0 %v3099_v57  ;;  %v3095_v58 = vmul.f32 %v7524_v19, %v10783_v52  ;;  %v2596_v15 = vadd.f32 %v8404_v31, %v10797_v11  ;;  %v13886_v57 = vld [vmem:[#allocation8_spill] sm:$0xff] }
 0xe60   :  { %v7528_v47 = vpop.eup %7527  ;;  %7553 = vtanh.f32 %v2610_v36  ;;  %3143 = vmatprep.subr.mxu0 %v3098_v1  ;;  %v3094_v39 = vmul.f32 %v7526_v44, %v10781_v48  ;;  %v10936_v52 = vpop.f32.mrf.mxu1  ;;  %v13888_v44 = vld [vmem:[#allocation25_spill] sm:$0xff] }
 0xe61   :  { %v7530_v28 = vpop.eup %7529  ;;  %7555 = vtanh.f32 %v2608_v17  ;;  %v10928_v43 = vpop.f32.mrf.mxu0  ;;  %3144 = vmatpush1.msra.mxu0 %v3097_v51  ;;  %v3093_v24 = vmul.f32 %v7528_v47, %v10779_v55  ;;  %v13889_v47 = vld [vmem:[#allocation24_spill] sm:$0xff] }
 0xe62   :  { %v7532_v3 = vpop.eup %7531  ;;  %7557 = vtanh.f32 %v2606_v45  ;;  %3145 = vmatprep.subr.mxu0 %v3096_v20  ;;  %v3092_v11 = vmul.f32 %v7530_v28, %v10777_v0  ;;  %v10946_v0 = vpop.f32.mrf.mxu1  ;;  %v13887_v45 = vld [vmem:[#allocation26_spill] sm:$0xff]  ;;  %v13890_v20 = vld [vmem:[#allocation23_spill] sm:$0xff] }
 0xe63   :  { %v7534_v2 = vpop.eup %7533  ;;  %7559 = vtanh.f32 %v2604_v23  ;;  %v10934_v37 = vpop.f32.mrf.mxu0  ;;  %3146 = vmatpush1.msra.mxu0 %v3095_v58  ;;  %v3091_v48 = vmul.f32 %v7532_v3, %v10775_v63  ;;  %v13891_v58 = vld [vmem:[#allocation22_spill] sm:$0xff] }
 0xe64   :  { %v7536_v54 = vpop.eup %7535  ;;  %7561 = vtanh.f32 %v2600_v4  ;;  %3147 = vmatprep.subr.mxu0 %v3094_v39  ;;  %v3090_v55 = vmul.f32 %v7534_v2, %v10773_v22  ;;  %v10956_v51 = vpop.f32.mrf.mxu1 }
 0xe65   :  { %v7538_v33 = vpop.eup %7537  ;;  %7563 = vtanh.f32 %v2598_v60  ;;  %v10940_v12 = vpop.f32.mrf.mxu0  ;;  %3148 = vmatpush1.msra.mxu0 %v3093_v24  ;;  %v3089_v9 = vmul.f32 %v7536_v54, %v10771_v40  ;;  %v13893_v24 = vld [vmem:[#allocation20_spill] sm:$0xff] }
 0xe66   :  { %v7540_v7 = vpop.eup %7539  ;;  %7565 = vtanh.f32 %v2596_v15  ;;  %3149 = vmatprep.subr.mxu0 %v3092_v11  ;;  %v3088_v63 = vmul.f32 %v7538_v33, %v10769_v13  ;;  %v13892_v15 = vld [vmem:[#allocation21_spill] sm:$0xff]  ;;  %v10966_v41 = vpop.f32.mrf.mxu1  ;;  %v13894_v33 = vld [vmem:[#allocation19_spill] sm:$0xff] }
 0xe67   :  { %v7542_v36 = vpop.eup %7541  ;;  %7567 = vtanh.f32 %v2594_v42  ;;  %v10944_v32 = vpop.f32.mrf.mxu0  ;;  %3150 = vmatpush1.msra.mxu0 %v3091_v48  ;;  %v3087_v19 = vmul.f32 %v7540_v7, %v13886_v57 }
 0xe68   :  { %v7544_v38 = vpop.eup %7543  ;;  %3151 = vmatprep.subr.mxu0 %v3090_v55  ;;  %v3086_v1 = vmul.f32 %v7542_v36, %v13887_v45  ;;  %v13895_v36 = vld [vmem:[#allocation18_spill] sm:$0xff]  ;;  %v13897_v45 = vld [vmem:[#allocation16_spill] sm:$0xff] }
 0xe69   :  { %v7546_v17 = vpop.eup %7545  ;;  %v10950_v6 = vpop.f32.mrf.mxu0  ;;  %3152 = vmatpush1.msra.mxu0 %v3089_v9  ;;  %v3085_v50 = vmul.f32 %v7544_v38, %v13888_v44 }
 0xe6a   :  { %v7548_v22 = vpop.eup %7547  ;;  %3153 = vmatprep.subr.mxu0 %v3088_v63  ;;  %v3084_v5 = vmul.f32 %v7546_v17, %v13889_v47  ;;  %v13896_v63 = vld [vmem:[#allocation17_spill] sm:$0xff] }
 0xe6b   :  { %v7550_v40 = vpop.eup %7549  ;;  %v10954_v23 = vpop.f32.mrf.mxu0  ;;  %3154 = vmatpush1.msra.mxu0 %v3087_v19  ;;  %v3083_v28 = vmul.f32 %v7548_v22, %v13890_v20 }
 0xe6c   :  { %v7552_v13 = vpop.eup %7551  ;;  %3155 = vmatprep.subr.mxu0 %v3086_v1  ;;  %v3082_v3 = vmul.f32 %v7550_v40, %v13891_v58  ;;  %v10974_v19 = vpop.f32.mrf.mxu1  ;;  %v13898_v40 = vld [vmem:[#allocation48_spill] sm:$0xff] }
 0xe6d   :  { %v7554_v4 = vpop.eup %7553  ;;  %v10960_v10 = vpop.f32.mrf.mxu0  ;;  %3156 = vmatpush1.msra.mxu0 %v3085_v50  ;;  %v3081_v39 = vmul.f32 %v7552_v13, %v13892_v15  ;;  %v13899_v13 = vld [vmem:[#allocation47_spill] sm:$0xff] }
 0xe6e   :  { %v7556_v60 = vpop.eup %7555  ;;  %3157 = vmatprep.subr.mxu0 %v3084_v5  ;;  %v3080_v54 = vmul.f32 %v7554_v4, %v13893_v24  ;;  %v13900_v5 = vld [vmem:[#allocation46_spill] sm:$0xff] }
 0xe6f   :  { %v7558_v31 = vpop.eup %7557  ;;  %v10964_v2 = vpop.f32.mrf.mxu0  ;;  %3158 = vmatpush1.msra.mxu0 %v3083_v28  ;;  %v3079_v48 = vmul.f32 %v7556_v60, %v13894_v33 }
 0xe70   :  { %v7560_v42 = vpop.eup %7559  ;;  %3159 = vmatprep.subr.mxu0 %v3082_v3  ;;  %v3078_v9 = vmul.f32 %v7558_v31, %v13895_v36  ;;  %v10980_v28 = vpop.f32.mrf.mxu1 }
 0xe71   :  { %v7562_v11 = vpop.eup %7561  ;;  %v10970_v7 = vpop.f32.mrf.mxu0  ;;  %3160 = vmatpush1.msra.mxu0 %v3081_v39  ;;  %v3077_v17 = vmul.f32 %v7560_v42, %v13896_v63 }
 0xe72   :  { %v7564_v55 = vpop.eup %7563  ;;  %3161 = vmatprep.subr.mxu0 %v3080_v54  ;;  %v3076_v1 = vmul.f32 %v7562_v11, %v13897_v45  ;;  %v10982_v3 = vpop.f32.mrf.mxu1  ;;  %v8406_v11 = vld [vmem:[#allocation2 + $0x2e8] sm:$0xff] }
 0xe73   :  { %v7566_v38 = vpop.eup %7565  ;;  %v2725_v57 = vpop.f32.mrf.mxu0  ;;  %3162 = vmatpush1.msra.mxu0 %v3079_v48  ;;  %v3075_v44 = vmul.f32 %v7564_v55, %v13898_v40  ;;  %v8407_v55 = vld [vmem:[#allocation2 + $0x2f0] sm:$0xff] }
 0xe74   :  { %v7568_v22 = vpop.eup %7567  ;;  %3163 = vmatprep.subr.mxu0 %v3078_v9  ;;  %v3074_v47 = vmul.f32 %v7566_v38, %v13899_v13  ;;  %v10984_v39 = vpop.f32.mrf.mxu1  ;;  %v8408_v9 = vld [vmem:[#allocation2 + $0x2e0] sm:$0xff] }
 0xe75   :  { %v2727_v50 = vpop.f32.mrf.mxu0  ;;  %3164 = vmatpush1.msra.mxu0 %v3077_v17  ;;  %v3073_v4 = vmul.f32 %v7568_v22, %v13900_v5  ;;  %v8409_v22 = vld [vmem:[#allocation2 + $0x2d8] sm:$0xff] }
 0xe76   :  { %3165 = vmatprep.subr.mxu0 %v3076_v1  ;;  %v10986_v54 = vpop.f32.mrf.mxu1  ;;  %v8410_v1 = vld [vmem:[#allocation2 + $0x2f8] sm:$0xff] }
 0xe77   :  { %v2729_v20 = vpop.f32.mrf.mxu0  ;;  %3166 = vmatpush1.msra.mxu0 %v3075_v44  ;;  %v8411_v44 = vld [vmem:[#allocation2 + $0x2d0] sm:$0xff] }
 0xe78   :  { %3167 = vmatprep.subr.mxu0 %v3074_v47  ;;  %v10988_v17 = vpop.f32.mrf.mxu1  ;;  %v8412_v47 = vld [vmem:[#allocation2 + $0x2c8] sm:$0xff] }
 0xe79   :  { %v2733_v60 = vpop.f32.mrf.mxu0  ;;  %3168 = vmatpush1.msra.mxu0 %v3073_v4  ;;  %v8413_v4 = vld [vmem:[#allocation2 + $0x2c0] sm:$0xff] }
 0xe7b   :  { %v2735_v58 = vpop.f32.mrf.mxu0 }
 0xe7c   :  { %v2736_v5 = vadd.f32 %v8412_v47, %v2735_v58  ;;  %v8424_v47 = vld [vmem:[#allocation2 + $0x268] sm:$0xff] }
 0xe7d   :  { %v2737_v31 = vpop.f32.mrf.mxu0 }
 0xe7e   :  { %v2738_v13 = vadd.f32 %v8411_v44, %v2737_v31 }
 0xe7f   :  { %v2739_v15 = vpop.f32.mrf.mxu0 }
 0xe80   :  { %v2740_v45 = vadd.f32 %v8409_v22, %v2739_v15  ;;  %v8416_v15 = vld [vmem:[#allocation2 + $0x2a8] sm:$0xff] }
 0xe81   :  { %v2743_v42 = vpop.f32.mrf.mxu0 }
 0xe82   :  { %v2744_v38 = vadd.f32 %v8408_v9, %v2743_v42  ;;  %v8414_v42 = vld [vmem:[#allocation2 + $0x2b8] sm:$0xff] }
 0xe83   :  { %v2745_v24 = vpop.f32.mrf.mxu0 }
 0xe84   :  { %v2746_v33 = vadd.f32 %v8406_v11, %v2745_v24  ;;  %v2734_v24 = vadd.f32 %v8413_v4, %v2733_v60  ;;  %v10990_v11 = vpop.f32.mrf.mxu1  ;;  %v8425_v4 = vld [vmem:[#allocation2 + $0x260] sm:$0xff] }
 0xe85   :  { %v2747_v48 = vpop.f32.mrf.mxu0 }
 0xe86   :  { %v2748_v36 = vadd.f32 %v8407_v55, %v2747_v48  ;;  %7569 = vtanh.f32 %v2746_v33  ;;  %v2730_v48 = vadd.f32 %v8414_v42, %v2729_v20  ;;  %v8415_v55 = vld [vmem:[#allocation2 + $0x2b0] sm:$0xff]  ;;  %v2726_v33 = vadd.f32 %v8416_v15, %v2725_v57  ;;  %v3064_v58 = vpop.f32.mrf.mxu1  ;;  %v8420_v20 = vld [vmem:[#allocation2 + $0x288] sm:$0xff] }
 0xe87   :  { %v2749_v63 = vpop.f32.mrf.mxu0  ;;  %v2728_v9 = vadd.f32 %v8415_v55, %v2727_v50  ;;  %v2716_v50 = vadd.f32 %v8420_v20, %v10954_v23  ;;  %v8430_v20 = vld [vmem:[#allocation2 + $0x238] sm:$0xff] }
 0xe88   :  { %v2750_v40 = vadd.f32 %v8410_v1, %v2749_v63  ;;  %7571 = vtanh.f32 %v2748_v36  ;;  %v8417_v63 = vld [vmem:[#allocation2 + $0x2a0] sm:$0xff]  ;;  %v8418_v36 = vld [vmem:[#allocation2 + $0x298] sm:$0xff]  ;;  %v3068_v1 = vpop.f32.mrf.mxu1 }
 0xe89   :  { %v2724_v31 = vadd.f32 %v8417_v63, %v10970_v7  ;;  %v2720_v60 = vadd.f32 %v8418_v36, %v10964_v2  ;;  %v8422_v7 = vld [vmem:[#allocation2 + $0x278] sm:$0xff]  ;;  %v8423_v2 = vld [vmem:[#allocation2 + $0x270] sm:$0xff]  ;;  %v8428_v63 = vld [vmem:[#allocation2 + $0x248] sm:$0xff] }
 0xe8a   :  { %7573 = vtanh.f32 %v2750_v40  ;;  %v2710_v40 = vadd.f32 %v8422_v7, %v10944_v32 }
 0xe8b   :  { %7575 = vtanh.f32 %v2744_v38  ;;  %v8419_v38 = vld [vmem:[#allocation2 + $0x290] sm:$0xff] }
 0xe8c   :  { %7577 = vtanh.f32 %v2740_v45  ;;  %v2718_v22 = vadd.f32 %v8419_v38, %v10960_v10  ;;  %v8421_v45 = vld [vmem:[#allocation2 + $0x280] sm:$0xff] }
 0xe8d   :  { %7579 = vtanh.f32 %v2738_v13  ;;  %v2714_v57 = vadd.f32 %v8421_v45, %v10950_v6  ;;  %v2708_v13 = vadd.f32 %v8423_v2, %v10940_v12  ;;  %v2704_v6 = vadd.f32 %v8425_v4, %v10928_v43  ;;  %v8427_v12 = vld [vmem:[#allocation2 + $0x250] sm:$0xff]  ;;  %v8434_v2 = vld [vmem:[#allocation2 + $0x218] sm:$0xff]  ;;  %v8437_v4 = vld [vmem:[#allocation2 + $0x200] sm:$0xff] }
 0xe8e   :  { %7581 = vtanh.f32 %v2736_v5  ;;  %v2706_v5 = vadd.f32 %v8424_v47, %v10934_v37  ;;  %v2698_v15 = vadd.f32 %v8427_v12, %v10914_v25  ;;  %v2690_v25 = vadd.f32 %v8430_v20, %v10892_v26  ;;  %v8431_v45 = vld [vmem:[#allocation2 + $0x230] sm:$0xff] }
 0xe8f   :  { %7583 = vtanh.f32 %v2734_v24  ;;  %v3070_v24 = vpop.f32.mrf.mxu1 }
 0xe90   :  { %7585 = vtanh.f32 %v2730_v48  ;;  %v8426_v48 = vld [vmem:[#allocation2 + $0x258] sm:$0xff] }
 0xe91   :  { %7587 = vtanh.f32 %v2728_v9  ;;  %v2700_v32 = vadd.f32 %v8426_v48, %v10920_v35 }
 0xe92   :  { %7589 = vtanh.f32 %v2726_v33 }
 0xe93   :  { %7591 = vtanh.f32 %v2724_v31  ;;  %v7570_v44 = vpop.eup %7569  ;;  %v2696_v31 = vadd.f32 %v8428_v63, %v10906_v29 }
 0xe94   :  { %7593 = vtanh.f32 %v2720_v60  ;;  %v3134_v43 = vmul.f32 %v7570_v44, %v3064_v58  ;;  %v8429_v60 = vld [vmem:[#allocation2 + $0x240] sm:$0xff]  ;;  %v2688_v58 = vadd.f32 %v8431_v45, %v10888_v59  ;;  %v13907_v45 = vld [vmem:[#allocation39_spill] sm:$0xff] }
 0xe95   :  { %7595 = vtanh.f32 %v2718_v22  ;;  %v7572_v10 = vpop.eup %7571  ;;  %v2694_v38 = vadd.f32 %v8429_v60, %v10900_v21 }
 0xe96   :  { %7597 = vtanh.f32 %v2716_v50  ;;  %v3135_v33 = vmul.f32 %v7572_v10, %v3068_v1  ;;  %v8432_v1 = vld [vmem:[#allocation2 + $0x228] sm:$0xff]  ;;  %v8435_v10 = vld [vmem:[#allocation2 + $0x210] sm:$0xff] }
 0xe97   :  { %v7574_v23 = vpop.eup %7573  ;;  %7599 = vtanh.f32 %v2714_v57 }
 0xe98   :  { %v7576_v42 = vpop.eup %7575  ;;  %7601 = vtanh.f32 %v2710_v40  ;;  %v3136_v55 = vmul.f32 %v7574_v23, %v3070_v24  ;;  %v8433_v40 = vld [vmem:[#allocation2 + $0x220] sm:$0xff] }
 0xe99   :  { %v7578_v9 = vpop.eup %7577  ;;  %7603 = vtanh.f32 %v2708_v13  ;;  %v3133_v35 = vmul.f32 %v7576_v42, %v10990_v11  ;;  %v2686_v11 = vadd.f32 %v8432_v1, %v10882_v49 }
 0xe9a   :  { %v7580_v37 = vpop.eup %7579  ;;  %7605 = vtanh.f32 %v2706_v5  ;;  %3169 = vmatprep.subr.mxu0 %v3136_v55  ;;  %v3132_v50 = vmul.f32 %v7578_v9, %v10988_v17  ;;  %v2684_v17 = vadd.f32 %v8433_v40, %v10878_v53  ;;  %v8436_v5 = vld [vmem:[#allocation2 + $0x208] sm:$0xff] }
 0xe9b   :  { %v7582_v36 = vpop.eup %7581  ;;  %7607 = vtanh.f32 %v2704_v6  ;;  %3170 = vmatpush2.msra.mxu0 %v3135_v33  ;;  %v3131_v57 = vmul.f32 %v7580_v37, %v10986_v54  ;;  %v2680_v54 = vadd.f32 %v8434_v2, %v10873_v30  ;;  %v13901_v37 = vld [vmem:[#allocation34_spill] sm:$0xff]  ;;  %v8439_v2 = vld [vmem:[%s13625_s4 + $0x18] sm:$0xff] }
 0xe9c   :  { %v7584_v22 = vpop.eup %7583  ;;  %7609 = vtanh.f32 %v2700_v32  ;;  %3171 = vmatprep.subr.mxu0 %v3134_v43  ;;  %v3130_v7 = vmul.f32 %v7582_v36, %v10984_v39  ;;  %v2678_v39 = vadd.f32 %v8435_v10, %v10871_v46  ;;  %v13903_v36 = vld [vmem:[#allocation43_spill] sm:$0xff] }
 0xe9d   :  { %v7586_v29 = vpop.eup %7585  ;;  %7611 = vtanh.f32 %v2698_v15  ;;  %3172 = vmatpush2.msra.mxu0 %v3133_v35  ;;  %v3129_v44 = vmul.f32 %v7584_v22, %v10982_v3  ;;  %v2676_v3 = vadd.f32 %v8436_v5, %v10867_v61  ;;  %v13905_v22 = vld [vmem:[#allocation41_spill] sm:$0xff]  ;;  %v8443_v10 = vld [vmem:[%s13625_s4 + $0x38] sm:$0xff] }
 0xe9e   :  { %v7588_v21 = vpop.eup %7587  ;;  %7613 = vtanh.f32 %v2696_v31  ;;  %3173 = vmatprep.subr.mxu0 %v3132_v50  ;;  %v3128_v13 = vmul.f32 %v7586_v29, %v10980_v28  ;;  %v2674_v28 = vadd.f32 %v8437_v4, %v10865_v34  ;;  %v13902_v31 = vld [vmem:[#allocation44_spill] sm:$0xff] }
 0xe9f   :  { %v7590_v26 = vpop.eup %7589  ;;  %7615 = vtanh.f32 %v2694_v38  ;;  %3174 = vmatpush2.msra.mxu0 %v3131_v57  ;;  %v3127_v47 = vmul.f32 %v7588_v21, %v10974_v19  ;;  %v13904_v38 = vld [vmem:[#allocation42_spill] sm:$0xff] }
 0xea0   :  { %v7592_v59 = vpop.eup %7591  ;;  %7617 = vtanh.f32 %v2690_v25  ;;  %3175 = vmatprep.subr.mxu0 %v3130_v7  ;;  %v3126_v23 = vmul.f32 %v7590_v26, %v10966_v41  ;;  %v13906_v25 = vld [vmem:[#allocation40_spill] sm:$0xff]  ;;  %v13908_v21 = vld [vmem:[#allocation38_spill] sm:$0xff] }
 0xea1   :  { %v7594_v49 = vpop.eup %7593  ;;  %7619 = vtanh.f32 %v2688_v58  ;;  %3176 = vmatpush2.msra.mxu0 %v3129_v44  ;;  %v3125_v6 = vmul.f32 %v7592_v59, %v10956_v51  ;;  %v13910_v26 = vld [vmem:[#allocation36_spill] sm:$0xff] }
 0xea2   :  { %v7596_v53 = vpop.eup %7595  ;;  %7621 = vtanh.f32 %v2686_v11  ;;  %3177 = vmatprep.subr.mxu0 %v3128_v13  ;;  %v3124_v19 = vmul.f32 %v7594_v49, %v10946_v0  ;;  %v13909_v11 = vld [vmem:[#allocation37_spill] sm:$0xff]  ;;  %v8438_v59 = vld [vmem:[%s13625_s4] sm:$0xff] }
 0xea3   :  { %v7598_v30 = vpop.eup %7597  ;;  %7623 = vtanh.f32 %v2684_v17  ;;  %3178 = vmatpush2.msra.mxu0 %v3127_v47  ;;  %v3123_v61 = vmul.f32 %v7596_v53, %v10936_v52  ;;  %v13911_v17 = vld [vmem:[#allocation35_spill] sm:$0xff]  ;;  %v8441_v13 = vld [vmem:[%s13625_s4 + $0x28] sm:$0xff]  ;;  %v8442_v49 = vld [vmem:[%s13625_s4 + $0x20] sm:$0xff]  ;;  %v13912_v47 = vmov 0  }
 0xea4   :  { %v7600_v46 = vpop.eup %7599  ;;  %7625 = vtanh.f32 %v2680_v54  ;;  %3179 = vmatprep.subr.mxu0 %v3126_v23  ;;  %v3122_v42 = vmul.f32 %v7598_v30, %v10922_v14  ;;  %v8440_v54 = vld [vmem:[%s13625_s4 + $0x10] sm:$0xff] }
 0xea5   :  { %v7602_v24 = vpop.eup %7601  ;;  %7627 = vtanh.f32 %v2678_v39  ;;  %3180 = vmatpush2.msra.mxu0 %v3125_v6  ;;  %v3121_v51 = vmul.f32 %v7600_v46, %v10908_v18  ;;  %v8444_v39 = vld [vmem:[%s13625_s4 + $0x30] sm:$0xff]  ;;  %v13913_v6 = vld [vmem:[#allocation9_spill] sm:$0xff] }
 0xea6   :  { %v7604_v41 = vpop.eup %7603  ;;  %7629 = vtanh.f32 %v2676_v3  ;;  %3181 = vmatprep.subr.mxu0 %v3124_v19  ;;  %v3120_v32 = vmul.f32 %v7602_v24, %v10894_v62  ;;  %v13915_v24 = vld [vmem:[#allocation10_spill] sm:$0xff] }
 0xea7   :  { %v7606_v34 = vpop.eup %7605  ;;  %7631 = vtanh.f32 %v2674_v28  ;;  %3182 = vmatpush2.msra.mxu0 %v3123_v61  ;;  %v3119_v55 = vmul.f32 %v7604_v41, %v10884_v16  ;;  %v13917_v41 = vld [vmem:[#allocation11_spill] sm:$0xff] }
 0xea8   :  { %v7608_v48 = vpop.eup %7607  ;;  %3183 = vmatprep.subr.mxu0 %v3122_v42  ;;  %v3118_v9 = vmul.f32 %v7606_v34, %v10875_v8  ;;  %v13919_v34 = vld [vmem:[#allocation12_spill] sm:$0xff] }
 0xea9   :  { %v7610_v0 = vpop.eup %7609  ;;  %3184 = vmatpush2.msra.mxu0 %v3121_v51  ;;  %v3117_v14 = vmul.f32 %v7608_v48, %v10869_v27  ;;  %v13921_v48 = vld [vmem:[#allocation13_spill] sm:$0xff] }
 0xeaa   :  { %v7612_v52 = vpop.eup %7611  ;;  %3185 = vmatprep.subr.mxu0 %v3120_v32  ;;  %v3116_v18 = vmul.f32 %v7610_v0, %v10863_v56  ;;  %v13923_v0 = vld [vmem:[#allocation14_spill] sm:$0xff] }
 0xeab   :  { %v7614_v12 = vpop.eup %7613  ;;  %3186 = vmatpush2.msra.mxu0 %v3119_v55  ;;  %v3115_v62 = vmul.f32 %v7612_v52, %v13901_v37 }
 0xeac   :  { %v7616_v15 = vpop.eup %7615  ;;  %3187 = vmatprep.subr.mxu0 %v3118_v9  ;;  %v3114_v16 = vmul.f32 %v7614_v12, %v13902_v31  ;;  %v13925_v9 = vld [vmem:[#allocation15_spill] sm:$0xff] }
 0xead   :  { %v7618_v33 = vpop.eup %7617  ;;  %3188 = vmatpush2.msra.mxu0 %v3117_v14  ;;  %v3113_v8 = vmul.f32 %v7616_v15, %v13903_v36 }
 0xeae   :  { %v7620_v63 = vpop.eup %7619  ;;  %3189 = vmatprep.subr.mxu0 %v3116_v18  ;;  %v3112_v27 = vmul.f32 %v7618_v33, %v13904_v38  ;;  %v13927_v18 = vld [vmem:[#allocation45_spill] sm:$0xff] }
 0xeaf   :  { %v7622_v43 = vpop.eup %7621  ;;  %3190 = vmatpush2.msra.mxu0 %v3115_v62  ;;  %v3111_v56 = vmul.f32 %v7620_v63, %v13905_v22  ;;  %v8445_v62 = vld [vmem:[%s13623_s2] sm:$0xff]   ;;  %v8446_v63 = vld [vmem:[%s13623_s2 + $0x8] sm:$0xff]  }
 0xeb0   :  { %v7624_v60 = vpop.eup %7623  ;;  %3191 = vmatprep.subr.mxu0 %v3114_v16  ;;  %v3110_v50 = vmul.f32 %v7622_v43, %v13906_v25  ;;  %v8448_v22 = vld [vmem:[#allocation2 + $0x68] sm:$0xff] }
 0xeb1   :  { %v7626_v35 = vpop.eup %7625  ;;  %3192 = vmatpush2.msra.mxu0 %v3113_v8  ;;  %v3109_v58 = vmul.f32 %v7624_v60, %v13907_v45 }
 0xeb2   :  { %v7628_v20 = vpop.eup %7627  ;;  %3193 = vmatprep.subr.mxu0 %v3112_v27  ;;  %v3108_v1 = vmul.f32 %v7626_v35, %v13908_v21  ;;  %v8447_v27 = vld [vmem:[#allocation2 + $0x58] sm:$0xff] }
 0xeb3   :  { %v7630_v29 = vpop.eup %7629  ;;  %3194 = vmatpush2.msra.mxu0 %v3111_v56  ;;  %v3107_v7 = vmul.f32 %v7628_v20, %v13909_v11  ;;  %v8449_v20 = vld [vmem:[#allocation2 + $0x70] sm:$0xff]  ;;  %v8452_v21 = vld [vmem:[#allocation2 + $0x78] sm:$0xff] }
 0xeb4   :  { %v7632_v57 = vpop.eup %7631  ;;  %3195 = vmatprep.subr.mxu0 %v3110_v50  ;;  %v3106_v40 = vmul.f32 %v7630_v29, %v13910_v26  ;;  %v8450_v50 = vld [vmem:[#allocation2 + $0x60] sm:$0xff]  ;;  %v8453_v11 = vld [vmem:[#allocation2 + $0x50] sm:$0xff] }
 0xeb5   :  { %3196 = vmatpush2.msra.mxu0 %v3109_v58  ;;  %v3105_v44 = vmul.f32 %v7632_v57, %v13911_v17  ;;  %v8451_v58 = vld [vmem:[#allocation2 + $0x48] sm:$0xff] }
 0xeb6   :  { %3197 = vmatprep.subr.mxu0 %v3108_v1 }
 0xeb7   :  { %3198 = vmatpush2.msra.mxu0 %v3107_v7 }
 0xeb8   :  { %3199 = vmatprep.subr.mxu0 %v3106_v40 }
 0xeb9   :  { %3200 = vmatpush2.msra.mxu0 %v3105_v44 }
 0xeba   :  { %3202 = vmatmul.mubr.f32.vlgmr.msra.gmra.mxu0 %v8438_v59  ;;  %v8454_v59 = vld [vmem:[#allocation2 + $0x40] sm:$0xff] }
 0xebb   :  { %3207 = vmatprep.mubr.f32.mxu0 %v8439_v2 }
 0xebe   :  { %3208 = vmatmul.mubr.f32.gmra.mxu0 %v8440_v54 }
 0xebf   :  { %3213 = vmatprep.mubr.f32.mxu0 %v8441_v13 }
 0xec2   :  { %3214 = vmatmul.mubr.f32.gmra.mxu0 %v8442_v49 }
 0xec3   :  { %3219 = vmatprep.mubr.f32.mxu0 %v8443_v10 }
 0xec6   :  { %3220 = vmatmul.mubr.f32.gmra.mxu0 %v8444_v39 }
 0xec7   :  { %3337 = vmatprep.mubr.bf16.mxu0 %v13912_v47 }
 0xf7a   :  { %v3203_v53 = vpop.f32.mrf.mxu0 }
 0xf7b   :  { %v11092_v33 = vadd.f32 %v3203_v53, %v13927_v18  ;;  %v8460_v18 = vld [vmem:[#allocation2 + $0xa0] sm:$0xff] }
 0xf7c   :  { %v3205_v5 = vpop.f32.mrf.mxu0 }
 0xf7d   :  { %v11080_v55 = vadd.f32 %v3205_v5, %v13923_v0  ;;  %13928 = vst [vmem:[#allocation8_spill] sm:$0xff] %v11092_v33 }
 0xf7e   :  { %v3209_v3 = vpop.f32.mrf.mxu0 }
 0xf7f   :  { %13924 = vst [vmem:[#allocation28_spill] sm:$0xff] %v11080_v55  ;;  %v11085_v12 = vadd.f32 %v3209_v3, %v13925_v9 }
 0xf80   :  { %v3211_v23 = vpop.f32.mrf.mxu0 }
 0xf81   :  { %v11068_v61 = vadd.f32 %v3211_v23, %v13915_v24  ;;  %13926 = vst [vmem:[#allocation27_spill] sm:$0xff] %v11085_v12  ;;  %v3236_v37 = vpack.c.bf16 %v11085_v12, %v11092_v33  ;;  %v8455_v23 = vld [vmem:[%s13623_s2 + $0x10] sm:$0xff]  }
 0xf82   :  { %v3215_v30 = vpop.f32.mrf.mxu0 }
 0xf83   :  { %13916 = vst [vmem:[#allocation32_spill] sm:$0xff] %v11068_v61  ;;  %v11077_v32 = vadd.f32 %v3215_v30, %v13921_v48  ;;  %v3237_v15 = vpack.c.bf16 %v11068_v61, %v11080_v55  ;;  %v8456_v30 = vld [vmem:[%s13623_s2 + $0x18] sm:$0xff]  }
 0xf84   :  { %v3217_v4 = vpop.f32.mrf.mxu0  ;;  %v8457_v48 = vld [vmem:[#allocation2 + $0x98] sm:$0xff] }
 0xf85   :  { %v11071_v42 = vadd.f32 %v3217_v4, %v13917_v41  ;;  %13922 = vst [vmem:[#allocation29_spill] sm:$0xff] %v11077_v32 }
 0xf86   :  { %v3221_v28 = vpop.f32.mrf.mxu0 }
 0xf87   :  { %v11065_v46 = vadd.f32 %v3221_v28, %v13913_v6  ;;  %13918 = vst [vmem:[#allocation31_spill] sm:$0xff] %v11071_v42 }
 0xf88   :  { %v3223_v19 = vpop.f32.mrf.mxu0 }
 0xf89   :  { %13914 = vst [vmem:[#allocation33_spill] sm:$0xff] %v11065_v46  ;;  %v11074_v51 = vadd.f32 %v3223_v19, %v13919_v34  ;;  %v3238_v14 = vpack.c.bf16 %v11065_v46, %v11077_v32 }
 0xf8b   :  { %13920 = vst [vmem:[#allocation30_spill] sm:$0xff] %v11074_v51  ;;  %v3239_v52 = vpack.c.bf16 %v11074_v51, %v11071_v42 }
 0xf8d   :  { %3252 = vmatprep.subr.bf16.mxu1 %v3239_v52  ;;  %v8458_v52 = vld [vmem:[#allocation2 + $0xa8] sm:$0xff] }
 0xf8e   :  { %3253 = vmatpush1.bf16.msra.mxu1 %v3238_v14  ;;  %v8459_v14 = vld [vmem:[#allocation2 + $0xb0] sm:$0xff] }
 0xf8f   :  { %3254 = vmatprep.subr.bf16.mxu1 %v3237_v15 }
 0xf92   :  { %3255 = vmatpush1.bf16.msra.mxu1 %v3236_v37 }
 0xf95   :  { %7002 = vmatmul.mubr.msk.bf16.vlgmr.msra.gmra.mxu1 %vm349_vm1, %v8445_v62 }
 0xf96   :  { %3282 = vmatprep.mubr.bf16.mxu1 %v13912_v47 }
 0xf9d   :  { %7003 = vmatmul.mubr.msk.bf16.gmra.mxu1 %vm349_vm1, %v8446_v63  ;;  %v8461_v63 = vld [vmem:[#allocation2 + $0x88] sm:$0xff] }
 0xf9e   :  { %3402 = vmatprep.mubr.bf16.mxu1 %v13912_v47 }
0x1055   :  { %v3274_v31 = vpop.f32.mrf.mxu1 }
0x1056   :  { %v3275_v2 = vadd.f32 %v8454_v59, %v3274_v31  ;;  %v8469_v59 = vld [vmem:[%s13624_s3 + $0x30] sm:$0xff] }
0x1057   :  { %v3276_v16 = vpop.f32.mrf.mxu1 }
0x1058   :  { %v3277_v57 = vadd.f32 %v8451_v58, %v3276_v16  ;;  %v3293_v5 = vmax.f32 %v3275_v2, 0.0  ;;  %v8462_v16 = vld [vmem:[#allocation2 + $0xb8] sm:$0xff] }
0x1059   :  { %v3278_v43 = vpop.f32.mrf.mxu1  ;;  %v8470_v2 = vld [vmem:[%s13624_s3 + $0x38] sm:$0xff] }
0x105a   :  { %v3279_v7 = vadd.f32 %v8453_v11, %v3278_v43  ;;  %v3294_v13 = vmax.f32 %v3277_v57, 0.0  ;;  %v8466_v11 = vld [vmem:[%s13623_s2 + $0x28] sm:$0xff]  }
0x105b   :  { %v3280_v36 = vpop.f32.mrf.mxu1 }
0x105c   :  { %v3281_v35 = vadd.f32 %v8447_v27, %v3280_v36  ;;  %v3295_v10 = vmax.f32 %v3279_v7, 0.0  ;;  %v8463_v36 = vld [vmem:[#allocation2 + $0x90] sm:$0xff]  ;;  %v13929_v7 = vmov 0.0  }
0x105d   :  { %v3284_v8 = vpop.f32.mrf.mxu1 }
0x105e   :  { %v3285_v29 = vadd.f32 %v8450_v50, %v3284_v8  ;;  %v3296_v40 = vmax.f32 %v3281_v35, 0.0  ;;  %v3301_v3 = vpack.c.bf16 %v3295_v10, %v3293_v5  ;;  %v8474_v10 = vld [vmem:[%s13624_s3 + $0x58] sm:$0xff]  ;;  %v8477_v5 = vld [vmem:[%s13624_s3 + $0x70] sm:$0xff] }
0x105f   :  { %v3286_v60 = vpop.f32.mrf.mxu1 }
0x1060   :  { %v3287_v56 = vadd.f32 %v8448_v22, %v3286_v60  ;;  %v3297_v54 = vmax.f32 %v3285_v29, 0.0  ;;  %v3302_v53 = vpack.c.bf16 %v3296_v40, %v3294_v13  ;;  %v8464_v22 = vld [vmem:[#allocation2 + $0x80] sm:$0xff]  ;;  %v3234_v40 = vld [vmem:[%s13622_s1 + $0x30] sm:$0xff]  ;;  %v8472_v13 = vld [vmem:[%s13624_s3 + $0x48] sm:$0xff] }
0x1061   :  { %v3288_v38 = vpop.f32.mrf.mxu1 }
0x1062   :  { %v3289_v25 = vadd.f32 %v8449_v20, %v3288_v38  ;;  %v3298_v17 = vmax.f32 %v3287_v56, 0.0 }
0x1063   :  { %v3290_v45 = vpop.f32.mrf.mxu1 }
0x1064   :  { %v3291_v1 = vadd.f32 %v8452_v21, %v3290_v45  ;;  %v3299_v26 = vmax.f32 %v3289_v25, 0.0 }
0x1066   :  { %v3300_v44 = vmax.f32 %v3291_v1, 0.0  ;;  %v3303_v39 = vpack.c.bf16 %v3299_v26, %v3297_v54  ;;  %v8465_v1 = vld [vmem:[%s13623_s2 + $0x20] sm:$0xff]   ;;  %v3235_v26 = vld [vmem:[%s13622_s1 + $0x38] sm:$0xff] }
0x1067   :  { %v8471_v54 = vld [vmem:[%s13624_s3 + $0x40] sm:$0xff] }
0x1068   :  { %v3304_v49 = vpack.c.bf16 %v3300_v44, %v3298_v17  ;;  %v8467_v17 = vld [vmem:[%s13624_s3 + $0x20] sm:$0xff]  ;;  %v8468_v44 = vld [vmem:[%s13624_s3 + $0x28] sm:$0xff] }
0x106a   :  { %3317 = vmatprep.subr.bf16.mxu0 %v3304_v49  ;;  %v8473_v49 = vld [vmem:[%s13624_s3 + $0x50] sm:$0xff] }
0x106b   :  { %3318 = vmatpush1.bf16.msra.mxu0 %v3303_v39  ;;  %v8475_v39 = vld [vmem:[%s13624_s3 + $0x60] sm:$0xff] }
0x106c   :  { %3319 = vmatprep.subr.bf16.mxu0 %v3302_v53  ;;  %v8476_v53 = vld [vmem:[%s13624_s3 + $0x68] sm:$0xff] }
0x106f   :  { %3320 = vmatpush1.bf16.msra.mxu0 %v3301_v3  ;;  %v8478_v3 = vld [vmem:[%s13624_s3 + $0x78] sm:$0xff] }
0x1072   :  { %7004 = vmatmul.mubr.msk.bf16.vlgmr.msra.gmra.mxu0 %vm349_vm1, %v8455_v23  ;;  %v8479_v23 = vld [vmem:[%s13624_s3 + $0x80] sm:$0xff] }
0x1073   :  { %3347 = vmatprep.mubr.bf16.mxu0 %v13912_v47 }
0x107a   :  { %7005 = vmatmul.mubr.msk.bf16.gmra.mxu0 %vm349_vm1, %v8456_v30  ;;  %v8480_v30 = vld [vmem:[%s13624_s3 + $0x88] sm:$0xff] }
0x107b   :  { %3467 = vmatprep.mubr.bf16.mxu0 %v13912_v47 }
0x1132   :  { %v3339_v4 = vpop.f32.mrf.mxu0 }
0x1133   :  { %v3340_v56 = vadd.f32 %v8464_v22, %v3339_v4  ;;  %v8481_v4 = vld [vmem:[%s13624_s3 + $0x90] sm:$0xff] }
0x1134   :  { %v3341_v28 = vpop.f32.mrf.mxu0 }
0x1135   :  { %v3342_v31 = vadd.f32 %v8461_v63, %v3341_v28  ;;  %v3358_v57 = vmax.f32 %v3340_v56, 0.0  ;;  %v8482_v28 = vld [vmem:[%s13624_s3 + $0x98] sm:$0xff] }
0x1136   :  { %v3343_v6 = vpop.f32.mrf.mxu0 }
0x1137   :  { %v3344_v8 = vadd.f32 %v8463_v36, %v3343_v6  ;;  %v3359_v25 = vmax.f32 %v3342_v31, 0.0  ;;  %v8483_v6 = vld [vmem:[%s13624_s3 + $0xa0] sm:$0xff] }
0x1138   :  { %v3345_v19 = vpop.f32.mrf.mxu0 }
0x1139   :  { %v3346_v0 = vadd.f32 %v8457_v48, %v3345_v19  ;;  %v3360_v29 = vmax.f32 %v3344_v8, 0.0  ;;  %v8484_v19 = vld [vmem:[%s13624_s3 + $0xa8] sm:$0xff] }
0x113a   :  { %v3349_v24 = vpop.f32.mrf.mxu0  ;;  %v8488_v48 = vld [vmem:[%s13624_s3 + $0xc8] sm:$0xff] }
0x113b   :  { %v3350_v37 = vadd.f32 %v8460_v18, %v3349_v24  ;;  %v3361_v38 = vmax.f32 %v3346_v0, 0.0  ;;  %v3366_v21 = vpack.c.bf16 %v3360_v29, %v3358_v57  ;;  %v8485_v24 = vld [vmem:[%s13624_s3 + $0xb0] sm:$0xff]  ;;  %v8494_v8 = vld [vmem:[#allocation2 + $0xe8] sm:$0xff] }
0x113c   :  { %v3351_v41 = vpop.f32.mrf.mxu0 }
0x113d   :  { %v3352_v9 = vadd.f32 %v8458_v52, %v3351_v41  ;;  %v3362_v20 = vmax.f32 %v3350_v37, 0.0  ;;  %v3367_v58 = vpack.c.bf16 %v3361_v38, %v3359_v25  ;;  %v8486_v41 = vld [vmem:[%s13624_s3 + $0xb8] sm:$0xff]  ;;  %v8489_v52 = vld [vmem:[%s13624_s3 + $0xd0] sm:$0xff] }
0x113e   :  { %v3353_v34 = vpop.f32.mrf.mxu0  ;;  %v8495_v38 = vld [vmem:[#allocation2 + $0xf0] sm:$0xff] }
0x113f   :  { %v3354_v15 = vadd.f32 %v8459_v14, %v3353_v34  ;;  %v3363_v27 = vmax.f32 %v3352_v9, 0.0  ;;  %v8487_v34 = vld [vmem:[%s13624_s3 + $0xc0] sm:$0xff] }
0x1140   :  { %v3355_v62 = vpop.f32.mrf.mxu0 }
0x1141   :  { %v3356_v43 = vadd.f32 %v8462_v16, %v3355_v62  ;;  %v3364_v60 = vmax.f32 %v3354_v15, 0.0  ;;  %v8490_v15 = vld [vmem:[%s13624_s3 + $0xd8] sm:$0xff]  ;;  %v8491_v62 = vld [vmem:[%s13624_s3 + $0xe0] sm:$0xff]  ;;  %v8492_v16 = vld [vmem:[%s13624_s3 + $0xe8] sm:$0xff] }
0x1143   :  { %v3365_v35 = vmax.f32 %v3356_v43, 0.0  ;;  %v3368_v45 = vpack.c.bf16 %v3364_v60, %v3362_v20  ;;  %v8493_v43 = vld [vmem:[#allocation2 + $0xd8] sm:$0xff]  ;;  %v8497_v20 = vld [vmem:[#allocation2 + $0xc8] sm:$0xff] }
0x1145   :  { %v3369_v50 = vpack.c.bf16 %v3365_v35, %v3363_v27  ;;  %v8496_v35 = vld [vmem:[#allocation2 + $0xe0] sm:$0xff] }
0x1147   :  { %3382 = vmatprep.subr.bf16.mxu1 %v3369_v50  ;;  %v8498_v50 = vld [vmem:[#allocation2 + $0xf8] sm:$0xff] }
0x1148   :  { %3383 = vmatpush1.bf16.msra.mxu1 %v3368_v45  ;;  %v8499_v45 = vld [vmem:[#allocation2 + $0xd0] sm:$0xff] }
0x1149   :  { %3384 = vmatprep.subr.bf16.mxu1 %v3367_v58 }
0x114c   :  { %3385 = vmatpush1.bf16.msra.mxu1 %v3366_v21  ;;  %v8500_v21 = vld [vmem:[%s13624_s3 + $0xf0] sm:$0xff] }
0x114d   :  { %3722 = vmatprep.subr.mxu1 %v3235_v26 }
0x114f   :  { %7006 = vmatmul.mubr.msk.bf16.vlgmr.msra.gmra.mxu1 %vm349_vm1, %v8465_v1 }
0x1150   :  { %3412 = vmatprep.mubr.bf16.mxu1 %v13912_v47  ;;  %3723 = vmatpush1.msra.mxu1 %v3234_v40  ;;  %v8501_v40 = vld [vmem:[#allocation2 + $0xc0] sm:$0xff] }
0x1157   :  { %7007 = vmatmul.mubr.msk.bf16.gmra.mxu1 %vm349_vm1, %v8466_v11 }
0x1158   :  { %3756 = vmatprep.mubr.f32.mxu1 %v13929_v7 }
0x115f   :  { %7024 = vmatmul.mubr.msk.f32.vlgmr.msra.gmra.mxu1 %vm231_vm0, %v8467_v17 }
0x1160   :  { %3762 = vmatprep.mubr.f32.mxu1 %v13929_v7 }
0x1163   :  { %7025 = vmatmul.mubr.msk.f32.gmra.mxu1 %vm231_vm0, %v8468_v44 }
0x1164   :  { %3768 = vmatprep.mubr.f32.mxu1 %v13929_v7 }
0x1167   :  { %7026 = vmatmul.mubr.msk.f32.gmra.mxu1 %vm231_vm0, %v8469_v59 }
0x1168   :  { %3774 = vmatprep.mubr.f32.mxu1 %v13929_v7 }
0x116b   :  { %7027 = vmatmul.mubr.msk.f32.gmra.mxu1 %vm231_vm0, %v8470_v2 }
0x116c   :  { %3780 = vmatprep.mubr.f32.mxu1 %v13929_v7 }
0x116f   :  { %7028 = vmatmul.mubr.msk.f32.gmra.mxu1 %vm231_vm0, %v8471_v54 }
0x1170   :  { %3786 = vmatprep.mubr.f32.mxu1 %v13929_v7 }
0x1173   :  { %7029 = vmatmul.mubr.msk.f32.gmra.mxu1 %vm231_vm0, %v8472_v13 }
0x1174   :  { %3792 = vmatprep.mubr.f32.mxu1 %v13929_v7 }
0x1177   :  { %7030 = vmatmul.mubr.msk.f32.gmra.mxu1 %vm231_vm0, %v8473_v49  ;;  %v8502_v49 = vld [vmem:[%s13624_s3 + $0xf8] sm:$0xff] }
0x1178   :  { %3798 = vmatprep.mubr.f32.mxu1 %v13929_v7 }
0x117b   :  { %7031 = vmatmul.mubr.msk.f32.gmra.mxu1 %vm231_vm0, %v8474_v10 }
0x117c   :  { %3804 = vmatprep.mubr.f32.mxu1 %v13929_v7 }
0x117f   :  { %7032 = vmatmul.mubr.msk.f32.gmra.mxu1 %vm231_vm0, %v8475_v39 }
0x1180   :  { %3810 = vmatprep.mubr.f32.mxu1 %v13929_v7 }
0x1183   :  { %7033 = vmatmul.mubr.msk.f32.gmra.mxu1 %vm231_vm0, %v8476_v53 }
0x1184   :  { %3816 = vmatprep.mubr.f32.mxu1 %v13929_v7 }
0x1187   :  { %7034 = vmatmul.mubr.msk.f32.gmra.mxu1 %vm231_vm0, %v8477_v5  ;;  %v8503_v5 = vld [vmem:[%s13624_s3 + $0x100] sm:$0xff] }
0x1188   :  { %3822 = vmatprep.mubr.f32.mxu1 %v13929_v7 }
0x118b   :  { %7035 = vmatmul.mubr.msk.f32.gmra.mxu1 %vm231_vm0, %v8478_v3  ;;  %v8504_v3 = vld [vmem:[%s13624_s3 + $0x108] sm:$0xff] }
0x118c   :  { %3828 = vmatprep.mubr.f32.mxu1 %v13929_v7 }
0x118f   :  { %7036 = vmatmul.mubr.msk.f32.gmra.mxu1 %vm231_vm0, %v8479_v23  ;;  %v8505_v23 = vld [vmem:[%s13623_s2 + $0x30] sm:$0xff]  }
0x1190   :  { %3834 = vmatprep.mubr.f32.mxu1 %v13929_v7 }
0x1193   :  { %7037 = vmatmul.mubr.msk.f32.gmra.mxu1 %vm231_vm0, %v8480_v30  ;;  %v8506_v30 = vld [vmem:[%s13624_s3 + $0x110] sm:$0xff] }
0x1194   :  { %3840 = vmatprep.mubr.f32.mxu1 %v13929_v7 }
0x1197   :  { %7038 = vmatmul.mubr.msk.f32.gmra.mxu1 %vm231_vm0, %v8481_v4  ;;  %v8507_v4 = vld [vmem:[%s13624_s3 + $0x118] sm:$0xff] }
0x1198   :  { %3846 = vmatprep.mubr.f32.mxu1 %v13929_v7 }
0x119b   :  { %7039 = vmatmul.mubr.msk.f32.gmra.mxu1 %vm231_vm0, %v8482_v28  ;;  %v8508_v28 = vld [vmem:[%s13623_s2 + $0x38] sm:$0xff]  }
0x119c   :  { %3852 = vmatprep.mubr.f32.mxu1 %v13929_v7 }
0x119f   :  { %7040 = vmatmul.mubr.msk.f32.gmra.mxu1 %vm231_vm0, %v8483_v6  ;;  %v8509_v6 = vld [vmem:[%s13623_s2 + $0x40] sm:$0xff]  }
0x11a0   :  { %3858 = vmatprep.mubr.f32.mxu1 %v13929_v7 }
0x11a3   :  { %7041 = vmatmul.mubr.msk.f32.gmra.mxu1 %vm231_vm0, %v8484_v19  ;;  %v8510_v19 = vld [vmem:[%s13623_s2 + $0x48] sm:$0xff]  }
0x11a4   :  { %3864 = vmatprep.mubr.f32.mxu1 %v13929_v7 }
0x11a7   :  { %7042 = vmatmul.mubr.msk.f32.gmra.mxu1 %vm231_vm0, %v8485_v24  ;;  %v8511_v24 = vld [vmem:[%s13623_s2 + $0x50] sm:$0xff]  }
0x11a8   :  { %3870 = vmatprep.mubr.f32.mxu1 %v13929_v7 }
0x11ab   :  { %7043 = vmatmul.mubr.msk.f32.gmra.mxu1 %vm231_vm0, %v8486_v41  ;;  %v8512_v41 = vld [vmem:[%s13623_s2 + $0x58] sm:$0xff]  }
0x11ac   :  { %3876 = vmatprep.mubr.f32.mxu1 %v13929_v7 }
0x11af   :  { %7044 = vmatmul.mubr.msk.f32.gmra.mxu1 %vm231_vm0, %v8487_v34  ;;  %v8513_v34 = vld [vmem:[%s13623_s2 + $0x60] sm:$0xff]  }
0x11b0   :  { %3882 = vmatprep.mubr.f32.mxu1 %v13929_v7 }
0x11b3   :  { %7045 = vmatmul.mubr.msk.f32.gmra.mxu1 %vm231_vm0, %v8488_v48  ;;  %v8514_v48 = vld [vmem:[%s13623_s2 + $0x68] sm:$0xff]  }
0x11b4   :  { %3888 = vmatprep.mubr.f32.mxu1 %v13929_v7 }
0x11b7   :  { %7046 = vmatmul.mubr.msk.f32.gmra.mxu1 %vm231_vm0, %v8489_v52  ;;  %v8516_v52 = vld [vmem:[%s13623_s2 + $0x78] sm:$0xff]  }
0x11b8   :  { %3894 = vmatprep.mubr.f32.mxu1 %v13929_v7 }
0x11bb   :  { %7047 = vmatmul.mubr.msk.f32.gmra.mxu1 %vm231_vm0, %v8490_v15 }
0x11bc   :  { %3900 = vmatprep.mubr.f32.mxu1 %v13929_v7 }
0x11bf   :  { %7048 = vmatmul.mubr.msk.f32.gmra.mxu1 %vm231_vm0, %v8491_v62 }
0x11c0   :  { %3906 = vmatprep.mubr.f32.mxu1 %v13929_v7 }
0x11c3   :  { %7049 = vmatmul.mubr.msk.f32.gmra.mxu1 %vm231_vm0, %v8492_v16 }
0x11c4   :  { %3912 = vmatprep.mubr.f32.mxu1 %v13929_v7 }
0x11c7   :  { %7050 = vmatmul.mubr.msk.f32.gmra.mxu1 %vm231_vm0, %v8500_v21 }
0x11c8   :  { %3918 = vmatprep.mubr.f32.mxu1 %v13929_v7 }
0x11cb   :  { %7051 = vmatmul.mubr.msk.f32.gmra.mxu1 %vm231_vm0, %v8502_v49 }
0x11cc   :  { %3924 = vmatprep.mubr.f32.mxu1 %v13929_v7 }
0x11cf   :  { %7052 = vmatmul.mubr.msk.f32.gmra.mxu1 %vm231_vm0, %v8503_v5 }
0x11d0   :  { %3930 = vmatprep.mubr.f32.mxu1 %v13929_v7 }
0x11d3   :  { %7053 = vmatmul.mubr.msk.f32.gmra.mxu1 %vm231_vm0, %v8504_v3 }
0x11d4   :  { %3936 = vmatprep.mubr.f32.mxu1 %v13929_v7 }
0x11d7   :  { %7054 = vmatmul.mubr.msk.f32.gmra.mxu1 %vm231_vm0, %v8506_v30 }
0x11d8   :  { %3942 = vmatprep.mubr.f32.mxu1 %v13929_v7 }
0x11db   :  { %7055 = vmatmul.mubr.msk.f32.gmra.mxu1 %vm231_vm0, %v8507_v4 }
0x11dc   :  { %4148 = vmatprep.mubr.bf16.mxu1 %v13912_v47 }
0x120f   :  { %v3404_v0 = vpop.f32.mrf.mxu1 }
0x1210   :  { %v3405_v17 = vadd.f32 %v8501_v40, %v3404_v0  ;;  %v8515_v0 = vld [vmem:[%s13623_s2 + $0x70] sm:$0xff]  }
0x1211   :  { %v3406_v9 = vpop.f32.mrf.mxu1 }
0x1212   :  { %v3407_v25 = vadd.f32 %v8497_v20, %v3406_v9  ;;  %v3423_v39 = vmax.f32 %v3405_v17, 0.0  ;;  %v8517_v9 = vld [vmem:[%s13623_s2 + $0x80] sm:$0xff]  }
0x1213   :  { %v3408_v14 = vpop.f32.mrf.mxu1 }
0x1214   :  { %v3409_v58 = vadd.f32 %v8499_v45, %v3408_v14  ;;  %v3424_v59 = vmax.f32 %v3407_v25, 0.0 }
0x1215   :  { %v3410_v18 = vpop.f32.mrf.mxu1 }
0x1216   :  { %v3411_v36 = vadd.f32 %v8493_v43, %v3410_v18  ;;  %v3425_v54 = vmax.f32 %v3409_v58, 0.0  ;;  %v8518_v18 = vld [vmem:[%s13623_s2 + $0x88] sm:$0xff]   ;;  %v8520_v43 = vld [vmem:[%s13623_s2 + $0x98] sm:$0xff]  }
0x1217   :  { %v3414_v37 = vpop.f32.mrf.mxu1 }
0x1218   :  { %v3415_v22 = vadd.f32 %v8496_v35, %v3414_v37  ;;  %v3426_v1 = vmax.f32 %v3411_v36, 0.0  ;;  %v3431_v53 = vpack.c.bf16 %v3425_v54, %v3423_v39  ;;  %v8522_v35 = vld [vmem:[%s13623_s2 + $0xa8] sm:$0xff]  }
0x1219   :  { %v3416_v63 = vpop.f32.mrf.mxu1 }
0x121a   :  { %v3417_v60 = vadd.f32 %v8494_v8, %v3416_v63  ;;  %v3427_v44 = vmax.f32 %v3415_v22, 0.0  ;;  %v3432_v10 = vpack.c.bf16 %v3426_v1, %v3424_v59  ;;  %v8519_v63 = vld [vmem:[%s13623_s2 + $0x90] sm:$0xff]   ;;  %v8523_v22 = vld [vmem:[%s13625_s4 + $0x8] sm:$0xff] }
0x121b   :  { %v3418_v31 = vpop.f32.mrf.mxu1 }
0x121c   :  { %v3419_v27 = vadd.f32 %v8495_v38, %v3418_v31  ;;  %v3428_v11 = vmax.f32 %v3417_v60, 0.0  ;;  %v8521_v60 = vld [vmem:[%s13623_s2 + $0xa0] sm:$0xff]  }
0x121d   :  { %v3420_v56 = vpop.f32.mrf.mxu1 }
0x121e   :  { %v3421_v29 = vadd.f32 %v8498_v50, %v3420_v56  ;;  %v3429_v57 = vmax.f32 %v3419_v27, 0.0 }
0x121f   :  { %v11347_v14 = vpop.f32.mrf.mxu1 }
0x1220   :  { %v3430_v26 = vmax.f32 %v3421_v29, 0.0  ;;  %v3433_v13 = vpack.c.bf16 %v3429_v57, %v3427_v44  ;;  %13930 = vst [vmem:[#allocation26_spill] sm:$0xff] %v11347_v14 }
0x1221   :  { %v11349_v15 = vpop.f32.mrf.mxu1 }
0x1222   :  { %v3434_v2 = vpack.c.bf16 %v3430_v26, %v3428_v11  ;;  %13931 = vst [vmem:[#allocation25_spill] sm:$0xff] %v11349_v15 }
0x1223   :  { %v11356_v37 = vpop.f32.mrf.mxu1 }
0x1224   :  { %3447 = vmatprep.subr.bf16.mxu0 %v3434_v2  ;;  %13932 = vst [vmem:[#allocation24_spill] sm:$0xff] %v11356_v37 }
0x1225   :  { %3448 = vmatpush1.bf16.msra.mxu0 %v3433_v13  ;;  %v11358_v62 = vpop.f32.mrf.mxu1 }
0x1226   :  { %3449 = vmatprep.subr.bf16.mxu0 %v3432_v10  ;;  %13933 = vst [vmem:[#allocation23_spill] sm:$0xff] %v11358_v62 }
0x1227   :  { %v11365_v31 = vpop.f32.mrf.mxu1 }
0x1228   :  { %13934 = vst [vmem:[#allocation22_spill] sm:$0xff] %v11365_v31 }
0x1229   :  { %3450 = vmatpush1.bf16.msra.mxu0 %v3431_v53  ;;  %v11367_v16 = vpop.f32.mrf.mxu1 }
0x122a   :  { %13935 = vst [vmem:[#allocation21_spill] sm:$0xff] %v11367_v16 }
0x122b   :  { %v11374_v36 = vpop.f32.mrf.mxu1 }
0x122c   :  { %7008 = vmatmul.mubr.msk.bf16.vlgmr.msra.gmra.mxu0 %vm349_vm1, %v8505_v23  ;;  %13936 = vst [vmem:[#allocation20_spill] sm:$0xff] %v11374_v36 }
0x122d   :  { %3477 = vmatprep.mubr.bf16.mxu0 %v13912_v47  ;;  %v11376_v8 = vpop.f32.mrf.mxu1 }
0x122e   :  { %13937 = vst [vmem:[#allocation19_spill] sm:$0xff] %v11376_v8  ;;  %v8526_v8 = vld [vmem:[#allocation2 + $0x1e0] sm:$0xff] }
0x122f   :  { %v11383_v38 = vpop.f32.mrf.mxu1 }
0x1230   :  { %13938 = vst [vmem:[#allocation18_spill] sm:$0xff] %v11383_v38 }
0x1231   :  { %v11385_v27 = vpop.f32.mrf.mxu1 }
0x1232   :  { %13939 = vst [vmem:[#allocation17_spill] sm:$0xff] %v11385_v27 }
0x1233   :  { %v11394_v56 = vpop.f32.mrf.mxu1 }
0x1234   :  { %7009 = vmatmul.mubr.msk.bf16.gmra.mxu0 %vm349_vm1, %v8508_v28  ;;  %13940 = vst [vmem:[#allocation16_spill] sm:$0xff] %v11394_v56  ;;  %v8527_v56 = vld [vmem:[#allocation2 + $0x1d8] sm:$0xff] }
0x1235   :  { %3487 = vmatprep.mubr.bf16.mxu0 %v13912_v47  ;;  %v11396_v20 = vpop.f32.mrf.mxu1 }
0x1236   :  { %13941 = vst [vmem:[#allocation48_spill] sm:$0xff] %v11396_v20  ;;  %v8528_v20 = vld [vmem:[#allocation2 + $0x1f8] sm:$0xff] }
0x1237   :  { %v11398_v25 = vpop.f32.mrf.mxu1 }
0x1238   :  { %13942 = vst [vmem:[#allocation47_spill] sm:$0xff] %v11398_v25 }
0x1239   :  { %v11400_v50 = vpop.f32.mrf.mxu1 }
0x123a   :  { %13943 = vst [vmem:[#allocation46_spill] sm:$0xff] %v11400_v50 }
0x123b   :  { %v11402_v29 = vpop.f32.mrf.mxu1 }
0x123c   :  { %7010 = vmatmul.mubr.msk.bf16.gmra.mxu0 %vm349_vm1, %v8509_v6  ;;  %13944 = vst [vmem:[#allocation34_spill] sm:$0xff] %v11402_v29 }
0x123d   :  { %3497 = vmatprep.mubr.bf16.mxu0 %v13912_v47  ;;  %v11404_v45 = vpop.f32.mrf.mxu1 }
0x123f   :  { %v11406_v58 = vpop.f32.mrf.mxu1 }
0x1241   :  { %v11408_v57 = vpop.f32.mrf.mxu1 }
0x1243   :  { %v11410_v21 = vpop.f32.mrf.mxu1 }
0x1244   :  { %7011 = vmatmul.mubr.msk.bf16.gmra.mxu0 %vm349_vm1, %v8510_v19 }
0x1245   :  { %3507 = vmatprep.mubr.bf16.mxu0 %v13912_v47  ;;  %v11412_v1 = vpop.f32.mrf.mxu1 }
0x1247   :  { %v11414_v11 = vpop.f32.mrf.mxu1 }
0x1249   :  { %v11416_v26 = vpop.f32.mrf.mxu1 }
0x124b   :  { %v11418_v40 = vpop.f32.mrf.mxu1 }
0x124c   :  { %7012 = vmatmul.mubr.msk.bf16.gmra.mxu0 %vm349_vm1, %v8511_v24 }
0x124d   :  { %3517 = vmatprep.mubr.bf16.mxu0 %v13912_v47  ;;  %v11420_v17 = vpop.f32.mrf.mxu1 }
0x124f   :  { %v11422_v44 = vpop.f32.mrf.mxu1 }
0x1251   :  { %v11424_v59 = vpop.f32.mrf.mxu1 }
0x1253   :  { %v11426_v2 = vpop.f32.mrf.mxu1 }
0x1254   :  { %7013 = vmatmul.mubr.msk.bf16.gmra.mxu0 %vm349_vm1, %v8512_v41 }
0x1255   :  { %3527 = vmatprep.mubr.bf16.mxu0 %v13912_v47  ;;  %v11428_v54 = vpop.f32.mrf.mxu1 }
0x1257   :  { %v11434_v10 = vpop.f32.mrf.mxu1 }
0x1259   :  { %v11440_v5 = vpop.f32.mrf.mxu1 }
0x125b   :  { %v11446_v30 = vpop.f32.mrf.mxu1 }
0x125c   :  { %7014 = vmatmul.mubr.msk.bf16.gmra.mxu0 %vm349_vm1, %v8513_v34 }
0x125d   :  { %3537 = vmatprep.mubr.bf16.mxu0 %v13912_v47  ;;  %v11452_v6 = vpop.f32.mrf.mxu1 }
0x125f   :  { %v11458_v41 = vpop.f32.mrf.mxu1 }
0x1260   :  { %13945 = vst [vmem:[#allocation44_spill] sm:$0xff] %v11458_v41 }
0x1264   :  { %7015 = vmatmul.mubr.msk.bf16.gmra.mxu0 %vm349_vm1, %v8514_v48 }
0x1265   :  { %3547 = vmatprep.mubr.bf16.mxu0 %v13912_v47 }
0x126c   :  { %7016 = vmatmul.mubr.msk.bf16.gmra.mxu0 %vm349_vm1, %v8515_v0  ;;  %v11464_v0 = vpop.f32.mrf.mxu1 }
0x126d   :  { %3557 = vmatprep.mubr.bf16.mxu0 %v13912_v47  ;;  %13946 = vst [vmem:[#allocation43_spill] sm:$0xff] %v11464_v0 }
0x1274   :  { %7017 = vmatmul.mubr.msk.bf16.gmra.mxu0 %vm349_vm1, %v8516_v52 }
0x1275   :  { %3567 = vmatprep.mubr.bf16.mxu0 %v13912_v47 }
0x127c   :  { %7018 = vmatmul.mubr.msk.bf16.gmra.mxu0 %vm349_vm1, %v8517_v9 }
0x127d   :  { %3577 = vmatprep.mubr.bf16.mxu0 %v13912_v47 }
0x1284   :  { %7019 = vmatmul.mubr.msk.bf16.gmra.mxu0 %vm349_vm1, %v8518_v18  ;;  %v11470_v18 = vpop.f32.mrf.mxu1 }
0x1285   :  { %3587 = vmatprep.mubr.bf16.mxu0 %v13912_v47  ;;  %13947 = vst [vmem:[#allocation42_spill] sm:$0xff] %v11470_v18 }
0x128c   :  { %7020 = vmatmul.mubr.msk.bf16.gmra.mxu0 %vm349_vm1, %v8519_v63 }
0x128d   :  { %3597 = vmatprep.mubr.bf16.mxu0 %v13912_v47 }
0x1294   :  { %7021 = vmatmul.mubr.msk.bf16.gmra.mxu0 %vm349_vm1, %v8520_v43 }
0x1295   :  { %3607 = vmatprep.mubr.bf16.mxu0 %v13912_v47 }
0x129c   :  { %7022 = vmatmul.mubr.msk.bf16.gmra.mxu0 %vm349_vm1, %v8521_v60  ;;  %v11476_v60 = vpop.f32.mrf.mxu1 }
0x129d   :  { %3617 = vmatprep.mubr.bf16.mxu0 %v13912_v47  ;;  %13948 = vst [vmem:[#allocation41_spill] sm:$0xff] %v11476_v60 }
0x129e   :  { %v11482_v7 = vpop.f32.mrf.mxu1 }
0x129f   :  { %13949 = vst [vmem:[#allocation40_spill] sm:$0xff] %v11482_v7 }
0x12a0   :  { %v11486_v55 = vpop.f32.mrf.mxu1 }
0x12a1   :  { %13950 = vst [vmem:[#allocation39_spill] sm:$0xff] %v11486_v55  ;;  %v8524_v55 = vld [vmem:[#allocation2 + $0x1e8] sm:$0xff] }
0x12a2   :  { %v11488_v42 = vpop.f32.mrf.mxu1 }
0x12a3   :  { %13951 = vst [vmem:[#allocation38_spill] sm:$0xff] %v11488_v42  ;;  %v8525_v42 = vld [vmem:[#allocation2 + $0x1f0] sm:$0xff] }
0x12a4   :  { %7023 = vmatmul.mubr.msk.bf16.gmra.mxu0 %vm349_vm1, %v8522_v35  ;;  %v11490_v47 = vpop.f32.mrf.mxu1 }
0x12a5   :  { %4077 = vmatprep.mubr.f32.mxu0 %v8523_v22  ;;  %13952 = vst [vmem:[#allocation37_spill] sm:$0xff] %v11490_v47 }
0x12a6   :  { %v11492_v18 = vpop.f32.mrf.mxu1 }
0x12a7   :  { %13953 = vst [vmem:[#allocation36_spill] sm:$0xff] %v11492_v18 }
0x12a8   :  { %v11494_v7 = vpop.f32.mrf.mxu1 }
0x12a9   :  { %13954 = vst [vmem:[#allocation35_spill] sm:$0xff] %v11494_v7  ;;  %v8529_v7 = vld [vmem:[#allocation2 + $0x1d0] sm:$0xff] }
0x12aa   :  { %v11496_v62 = vpop.f32.mrf.mxu1 }
0x12ab   :  { %13955 = vst [vmem:[#allocation9_spill] sm:$0xff] %v11496_v62  ;;  %v8530_v62 = vld [vmem:[#allocation2 + $0x1c8] sm:$0xff] }
0x12ac   :  { %v11498_v27 = vpop.f32.mrf.mxu1 }
0x12ec   :  { %v11430_v13 = vpop.f32.mrf.mxu0 }
0x12ee   :  { %v11432_v49 = vpop.f32.mrf.mxu0 }
0x12f0   :  { %v11436_v39 = vpop.f32.mrf.mxu0 }
0x12f2   :  { %v11438_v53 = vpop.f32.mrf.mxu0 }
0x12f4   :  { %v11442_v3 = vpop.f32.mrf.mxu0 }
0x12f6   :  { %v11444_v23 = vpop.f32.mrf.mxu0 }
0x12f8   :  { %v11448_v4 = vpop.f32.mrf.mxu0 }
0x12fa   :  { %v11450_v28 = vpop.f32.mrf.mxu0 }
0x12fc   :  { %v11454_v19 = vpop.f32.mrf.mxu0 }
0x12fe   :  { %v11456_v24 = vpop.f32.mrf.mxu0 }
0x1300   :  { %v11460_v34 = vpop.f32.mrf.mxu0 }
0x1302   :  { %v11462_v48 = vpop.f32.mrf.mxu0 }
0x1304   :  { %v11466_v52 = vpop.f32.mrf.mxu0 }
0x1306   :  { %v11468_v9 = vpop.f32.mrf.mxu0 }
0x1308   :  { %v11472_v63 = vpop.f32.mrf.mxu0 }
0x130a   :  { %v11474_v43 = vpop.f32.mrf.mxu0 }
0x130c   :  { %v11478_v35 = vpop.f32.mrf.mxu0 }
0x130e   :  { %v11480_v22 = vpop.f32.mrf.mxu0 }
0x1310   :  { %v11484_v33 = vpop.f32.mrf.mxu0 }
0x1312   :  { %v3515_v12 = vpop.f32.mrf.mxu0 }
0x1314   :  { %v3519_v32 = vpop.f32.mrf.mxu0 }
0x1316   :  { %v3521_v51 = vpop.f32.mrf.mxu0 }
0x1318   :  { %v3523_v61 = vpop.f32.mrf.mxu0 }
0x131a   :  { %v3525_v46 = vpop.f32.mrf.mxu0 }
0x131c   :  { %v3529_v41 = vpop.f32.mrf.mxu0 }
0x131e   :  { %v3531_v0 = vpop.f32.mrf.mxu0 }
0x1320   :  { %v3533_v60 = vpop.f32.mrf.mxu0 }
0x1321   :  { %v3534_v50 = vadd.f32 %v8529_v7, %v3533_v60  ;;  %v8539_v60 = vld [vmem:[#allocation2 + $0x180] sm:$0xff] }
0x1322   :  { %v3535_v14 = vpop.f32.mrf.mxu0 }
0x1323   :  { %v3536_v18 = vadd.f32 %v8527_v56, %v3535_v14 }
0x1324   :  { %v3539_v15 = vpop.f32.mrf.mxu0 }
0x1325   :  { %v3540_v38 = vadd.f32 %v8526_v8, %v3539_v15  ;;  %v8532_v8 = vld [vmem:[#allocation2 + $0x1b8] sm:$0xff] }
0x1326   :  { %v3541_v37 = vpop.f32.mrf.mxu0  ;;  %v3526_v14 = vadd.f32 %v8532_v8, %v3525_v46  ;;  %v8537_v46 = vld [vmem:[#allocation2 + $0x190] sm:$0xff] }
0x1327   :  { %v3542_v31 = vadd.f32 %v8524_v55, %v3541_v37  ;;  %v3532_v55 = vadd.f32 %v8530_v62, %v3531_v0  ;;  %v8531_v37 = vld [vmem:[#allocation2 + $0x1c0] sm:$0xff]  ;;  %v8541_v8 = vld [vmem:[#allocation2 + $0x170] sm:$0xff] }
0x1328   :  { %v3543_v16 = vpop.f32.mrf.mxu0  ;;  %v8535_v62 = vld [vmem:[#allocation2 + $0x1a0] sm:$0xff] }
0x1329   :  { %v3544_v36 = vadd.f32 %v8525_v42, %v3543_v16  ;;  %7633 = vtanh.f32 %v3542_v31  ;;  %v3530_v42 = vadd.f32 %v8531_v37, %v3529_v41  ;;  %v11504_v16 = vpop.f32.mrf.mxu1  ;;  %v8533_v31 = vld [vmem:[#allocation2 + $0x1b0] sm:$0xff]  ;;  %v8536_v41 = vld [vmem:[#allocation2 + $0x198] sm:$0xff] }
0x132a   :  { %v3545_v47 = vpop.f32.mrf.mxu0  ;;  %v3516_v0 = vadd.f32 %v8536_v41, %v3515_v12  ;;  %v8540_v12 = vld [vmem:[#allocation2 + $0x178] sm:$0xff] }
0x132b   :  { %v3546_v25 = vadd.f32 %v8528_v20, %v3545_v47  ;;  %7635 = vtanh.f32 %v3544_v36  ;;  %v3524_v47 = vadd.f32 %v8533_v31, %v3523_v61  ;;  %v8534_v36 = vld [vmem:[#allocation2 + $0x1a8] sm:$0xff]  ;;  %v3520_v20 = vadd.f32 %v8535_v62, %v3519_v32 }
0x132c   :  { %v11500_v29 = vpop.f32.mrf.mxu0  ;;  %v3522_v56 = vadd.f32 %v8534_v36, %v3521_v51  ;;  %v3510_v32 = vadd.f32 %v8539_v60, %v11478_v35 }
0x132d   :  { %7637 = vtanh.f32 %v3546_v25 }
0x132e   :  { %7639 = vtanh.f32 %v3540_v38  ;;  %v11502_v15 = vpop.f32.mrf.mxu0  ;;  %v11510_v38 = vpop.f32.mrf.mxu1 }
0x132f   :  { %7641 = vtanh.f32 %v3536_v18  ;;  %v3514_v18 = vadd.f32 %v8537_v46, %v11484_v33 }
0x1330   :  { %7643 = vtanh.f32 %v3534_v50  ;;  %v11506_v7 = vpop.f32.mrf.mxu0  ;;  %v8538_v50 = vld [vmem:[#allocation2 + $0x188] sm:$0xff]  ;;  %v11519_v37 = vpop.f32.mrf.mxu1 }
0x1331   :  { %7645 = vtanh.f32 %v3532_v55  ;;  %v3512_v51 = vadd.f32 %v8538_v50, %v11480_v22  ;;  %v8545_v50 = vld [vmem:[#allocation2 + $0x150] sm:$0xff] }
0x1332   :  { %7647 = vtanh.f32 %v3530_v42  ;;  %v11508_v25 = vpop.f32.mrf.mxu0  ;;  %v3506_v42 = vadd.f32 %v8540_v12, %v11474_v43  ;;  %v11529_v43 = vpop.f32.mrf.mxu1 }
0x1333   :  { %7649 = vtanh.f32 %v3526_v14  ;;  %v3504_v14 = vadd.f32 %v8541_v8, %v11472_v63 }
0x1334   :  { %7651 = vtanh.f32 %v3524_v47  ;;  %v11513_v61 = vpop.f32.mrf.mxu0  ;;  %v8542_v47 = vld [vmem:[#allocation2 + $0x168] sm:$0xff] }
0x1335   :  { %7653 = vtanh.f32 %v3522_v56  ;;  %v3502_v35 = vadd.f32 %v8542_v47, %v11468_v9  ;;  %v8543_v56 = vld [vmem:[#allocation2 + $0x160] sm:$0xff]  ;;  %v3494_v9 = vadd.f32 %v8545_v50, %v11460_v34  ;;  %v8548_v47 = vld [vmem:[#allocation2 + $0x138] sm:$0xff] }
0x1336   :  { %7655 = vtanh.f32 %v3520_v20  ;;  %v11517_v55 = vpop.f32.mrf.mxu0  ;;  %v7634_v33 = vpop.eup %7633  ;;  %v3500_v62 = vadd.f32 %v8543_v56, %v11466_v52  ;;  %v8552_v50 = vld [vmem:[#allocation2 + $0x118] sm:$0xff] }
0x1337   :  { %7657 = vtanh.f32 %v3516_v0  ;;  %v8544_v0 = vld [vmem:[#allocation2 + $0x158] sm:$0xff]  ;;  %v3978_v8 = vmul.f32 %v7634_v33, %v11440_v5 }
0x1338   :  { %7659 = vtanh.f32 %v3514_v18  ;;  %v11523_v31 = vpop.f32.mrf.mxu0  ;;  %v7636_v22 = vpop.eup %7635  ;;  %v3496_v63 = vadd.f32 %v8544_v0, %v11462_v48  ;;  %v8551_v0 = vld [vmem:[#allocation2 + $0x120] sm:$0xff] }
0x1339   :  { %7661 = vtanh.f32 %v3512_v51  ;;  %v3979_v51 = vmul.f32 %v7636_v22, %v11446_v30  ;;  %v11543_v30 = vpop.f32.mrf.mxu1 }
0x133a   :  { %v7638_v36 = vpop.eup %7637  ;;  %7663 = vtanh.f32 %v3510_v32  ;;  %v11527_v20 = vpop.f32.mrf.mxu0  ;;  %v8546_v32 = vld [vmem:[#allocation2 + $0x148] sm:$0xff] }
0x133b   :  { %v7640_v41 = vpop.eup %7639  ;;  %7665 = vtanh.f32 %v3506_v42  ;;  %v3980_v46 = vmul.f32 %v7638_v36, %v11452_v6  ;;  %v3492_v12 = vadd.f32 %v8546_v32, %v11456_v24  ;;  %v8547_v42 = vld [vmem:[#allocation2 + $0x140] sm:$0xff]  ;;  %v3486_v24 = vadd.f32 %v8548_v47, %v11450_v28 }
0x133c   :  { %v7642_v18 = vpop.eup %7641  ;;  %7667 = vtanh.f32 %v3504_v14  ;;  %v11535_v52 = vpop.f32.mrf.mxu0  ;;  %v3490_v6 = vadd.f32 %v8547_v42, %v11454_v19  ;;  %v3977_v34 = vmul.f32 %v7640_v41, %v11434_v10 }
0x133d   :  { %v7644_v60 = vpop.eup %7643  ;;  %7669 = vtanh.f32 %v3502_v35  ;;  %4013 = vmatprep.subr.mxu0 %v3980_v46  ;;  %v3976_v5 = vmul.f32 %v7642_v18, %v11428_v54  ;;  %v8549_v35 = vld [vmem:[#allocation2 + $0x130] sm:$0xff] }
0x133e   :  { %v7646_v48 = vpop.eup %7645  ;;  %7671 = vtanh.f32 %v3500_v62  ;;  %v11541_v14 = vpop.f32.mrf.mxu0  ;;  %4014 = vmatpush1.msra.mxu0 %v3979_v51  ;;  %v3484_v19 = vadd.f32 %v8549_v35, %v11448_v4  ;;  %v3975_v10 = vmul.f32 %v7644_v60, %v11426_v2  ;;  %v8550_v62 = vld [vmem:[#allocation2 + $0x128] sm:$0xff]  ;;  %v8553_v51 = vld [vmem:[#allocation2 + $0x110] sm:$0xff] }
0x133f   :  { %v7648_v22 = vpop.eup %7647  ;;  %7673 = vtanh.f32 %v3496_v63  ;;  %4015 = vmatprep.subr.mxu0 %v3978_v8  ;;  %v3482_v41 = vadd.f32 %v8550_v62, %v11444_v23  ;;  %v3974_v28 = vmul.f32 %v7646_v48, %v11424_v59  ;;  %v3480_v63 = vadd.f32 %v8551_v0, %v11442_v3  ;;  %v11557_v2 = vpop.f32.mrf.mxu1  ;;  %v8555_v48 = vld [vmem:[#allocation2 + $0x100] sm:$0xff] }
0x1340   :  { %v7650_v33 = vpop.eup %7649  ;;  %7675 = vtanh.f32 %v3494_v9  ;;  %v11549_v36 = vpop.f32.mrf.mxu0  ;;  %4016 = vmatpush1.msra.mxu0 %v3977_v34  ;;  %v3973_v4 = vmul.f32 %v7648_v22, %v11422_v44  ;;  %v3476_v23 = vadd.f32 %v8552_v50, %v11438_v53  ;;  %v3474_v3 = vadd.f32 %v8553_v51, %v11436_v39 }
0x1341   :  { %v7652_v56 = vpop.eup %7651  ;;  %7677 = vtanh.f32 %v3492_v12  ;;  %4017 = vmatprep.subr.mxu0 %v3976_v5  ;;  %v3972_v59 = vmul.f32 %v7650_v33, %v11420_v17  ;;  %v8554_v12 = vld [vmem:[#allocation2 + $0x108] sm:$0xff]  ;;  %v3470_v42 = vadd.f32 %v8555_v48, %v11430_v13 }
0x1342   :  { %v7654_v54 = vpop.eup %7653  ;;  %7679 = vtanh.f32 %v3490_v6  ;;  %v11555_v46 = vpop.f32.mrf.mxu0  ;;  %4018 = vmatpush1.msra.mxu0 %v3975_v10  ;;  %v3971_v44 = vmul.f32 %v7652_v56, %v11418_v40  ;;  %v3472_v8 = vadd.f32 %v8554_v12, %v11432_v49  ;;  %v13956_v10 = vld [vmem:[#allocation34_spill] sm:$0xff] }
0x1343   :  { %v7656_v18 = vpop.eup %7655  ;;  %7681 = vtanh.f32 %v3486_v24  ;;  %4019 = vmatprep.subr.mxu0 %v3974_v28  ;;  %v3970_v53 = vmul.f32 %v7654_v54, %v11416_v26  ;;  %v11571_v40 = vpop.f32.mrf.mxu1  ;;  %v13958_v54 = vld [vmem:[#allocation47_spill] sm:$0xff] }
0x1344   :  { %v7658_v9 = vpop.eup %7657  ;;  %7683 = vtanh.f32 %v3484_v19  ;;  %v11563_v60 = vpop.f32.mrf.mxu0  ;;  %4020 = vmatpush1.msra.mxu0 %v3973_v4  ;;  %v3969_v39 = vmul.f32 %v7656_v18, %v11414_v11  ;;  %v13959_v18 = vld [vmem:[#allocation48_spill] sm:$0xff] }
0x1345   :  { %v7660_v32 = vpop.eup %7659  ;;  %7685 = vtanh.f32 %v3482_v41  ;;  %4021 = vmatprep.subr.mxu0 %v3972_v59  ;;  %v3968_v49 = vmul.f32 %v7658_v9, %v11412_v1  ;;  %v11581_v1 = vpop.f32.mrf.mxu1  ;;  %v13957_v41 = vld [vmem:[#allocation46_spill] sm:$0xff]  ;;  %v13960_v59 = vld [vmem:[#allocation16_spill] sm:$0xff] }
0x1346   :  { %v7662_v17 = vpop.eup %7661  ;;  %7687 = vtanh.f32 %v3480_v63  ;;  %v11569_v6 = vpop.f32.mrf.mxu0  ;;  %4022 = vmatpush1.msra.mxu0 %v3971_v44  ;;  %v3967_v26 = vmul.f32 %v7660_v32, %v11410_v21  ;;  %v13961_v44 = vld [vmem:[#allocation17_spill] sm:$0xff] }
0x1347   :  { %v7664_v34 = vpop.eup %7663  ;;  %7689 = vtanh.f32 %v3476_v23  ;;  %4023 = vmatprep.subr.mxu0 %v3970_v53  ;;  %v3966_v11 = vmul.f32 %v7662_v17, %v11408_v57  ;;  %v11591_v4 = vpop.f32.mrf.mxu1 }
0x1348   :  { %v7666_v22 = vpop.eup %7665  ;;  %7691 = vtanh.f32 %v3474_v3  ;;  %v11575_v47 = vpop.f32.mrf.mxu0  ;;  %4024 = vmatpush1.msra.mxu0 %v3969_v39  ;;  %v3965_v5 = vmul.f32 %v7664_v34, %v11406_v58  ;;  %v13963_v39 = vld [vmem:[#allocation19_spill] sm:$0xff] }
0x1349   :  { %v7668_v13 = vpop.eup %7667  ;;  %7693 = vtanh.f32 %v3472_v8  ;;  %4025 = vmatprep.subr.mxu0 %v3968_v49  ;;  %v3964_v21 = vmul.f32 %v7666_v22, %v11404_v45  ;;  %v13962_v8 = vld [vmem:[#allocation18_spill] sm:$0xff]  ;;  %v11601_v48 = vpop.f32.mrf.mxu1  ;;  %v13964_v22 = vld [vmem:[#allocation20_spill] sm:$0xff] }
0x134a   :  { %v7670_v24 = vpop.eup %7669  ;;  %7695 = vtanh.f32 %v3470_v42  ;;  %v11579_v33 = vpop.f32.mrf.mxu0  ;;  %4026 = vmatpush1.msra.mxu0 %v3967_v26  ;;  %v3963_v56 = vmul.f32 %v7668_v13, %v13956_v10 }
0x134b   :  { %v7672_v35 = vpop.eup %7671  ;;  %4027 = vmatprep.subr.mxu0 %v3966_v11  ;;  %v3962_v28 = vmul.f32 %v7670_v24, %v13957_v41  ;;  %v13965_v24 = vld [vmem:[#allocation21_spill] sm:$0xff]  ;;  %v13967_v41 = vld [vmem:[#allocation23_spill] sm:$0xff] }
0x134c   :  { %v7674_v19 = vpop.eup %7673  ;;  %v11585_v62 = vpop.f32.mrf.mxu0  ;;  %4028 = vmatpush1.msra.mxu0 %v3965_v5  ;;  %v3961_v0 = vmul.f32 %v7672_v35, %v13958_v54 }
0x134d   :  { %v7676_v57 = vpop.eup %7675  ;;  %4029 = vmatprep.subr.mxu0 %v3964_v21  ;;  %v3960_v50 = vmul.f32 %v7674_v19, %v13959_v18  ;;  %v13966_v21 = vld [vmem:[#allocation22_spill] sm:$0xff] }
0x134e   :  { %v7678_v58 = vpop.eup %7677  ;;  %v11589_v63 = vpop.f32.mrf.mxu0  ;;  %4030 = vmatpush1.msra.mxu0 %v3963_v56  ;;  %v3959_v9 = vmul.f32 %v7676_v57, %v13960_v59 }
0x134f   :  { %v7680_v45 = vpop.eup %7679  ;;  %4031 = vmatprep.subr.mxu0 %v3962_v28  ;;  %v3958_v32 = vmul.f32 %v7678_v58, %v13961_v44  ;;  %v11609_v56 = vpop.f32.mrf.mxu1  ;;  %v13968_v58 = vld [vmem:[#allocation24_spill] sm:$0xff] }
0x1350   :  { %v7682_v23 = vpop.eup %7681  ;;  %v11595_v51 = vpop.f32.mrf.mxu0  ;;  %4032 = vmatpush1.msra.mxu0 %v3961_v0  ;;  %v3957_v53 = vmul.f32 %v7680_v45, %v13962_v8  ;;  %v13969_v45 = vld [vmem:[#allocation25_spill] sm:$0xff] }
0x1351   :  { %v7684_v3 = vpop.eup %7683  ;;  %4033 = vmatprep.subr.mxu0 %v3960_v50  ;;  %v3956_v34 = vmul.f32 %v7682_v23, %v13963_v39  ;;  %v13970_v50 = vld [vmem:[#allocation26_spill] sm:$0xff] }
0x1352   :  { %v7686_v12 = vpop.eup %7685  ;;  %v11599_v17 = vpop.f32.mrf.mxu0  ;;  %4034 = vmatpush1.msra.mxu0 %v3959_v9  ;;  %v3955_v26 = vmul.f32 %v7684_v3, %v13964_v22 }
0x1353   :  { %v7688_v42 = vpop.eup %7687  ;;  %4035 = vmatprep.subr.mxu0 %v3958_v32  ;;  %v3954_v5 = vmul.f32 %v7686_v12, %v13965_v24  ;;  %v11615_v9 = vpop.f32.mrf.mxu1 }
0x1354   :  { %v7690_v49 = vpop.eup %7689  ;;  %v11605_v13 = vpop.f32.mrf.mxu0  ;;  %4036 = vmatpush1.msra.mxu0 %v3957_v53  ;;  %v3953_v19 = vmul.f32 %v7688_v42, %v13966_v21 }
0x1355   :  { %v7692_v11 = vpop.eup %7691  ;;  %4037 = vmatprep.subr.mxu0 %v3956_v34  ;;  %v3952_v28 = vmul.f32 %v7690_v49, %v13967_v41  ;;  %v11617_v32 = vpop.f32.mrf.mxu1  ;;  %v8556_v49 = vld [vmem:[#allocation2 + $0x2e8] sm:$0xff] }
0x1356   :  { %v7694_v35 = vpop.eup %7693  ;;  %v3601_v10 = vpop.f32.mrf.mxu0  ;;  %4038 = vmatpush1.msra.mxu0 %v3955_v26  ;;  %v3951_v54 = vmul.f32 %v7692_v11, %v13968_v58  ;;  %v8557_v11 = vld [vmem:[#allocation2 + $0x2f0] sm:$0xff] }
0x1357   :  { %v7696_v57 = vpop.eup %7695  ;;  %4039 = vmatprep.subr.mxu0 %v3954_v5  ;;  %v3950_v18 = vmul.f32 %v7694_v35, %v13969_v45  ;;  %v11619_v53 = vpop.f32.mrf.mxu1  ;;  %v8558_v5 = vld [vmem:[#allocation2 + $0x2e0] sm:$0xff] }
0x1358   :  { %v3603_v0 = vpop.f32.mrf.mxu0  ;;  %4040 = vmatpush1.msra.mxu0 %v3953_v19  ;;  %v3949_v23 = vmul.f32 %v7696_v57, %v13970_v50  ;;  %v8559_v57 = vld [vmem:[#allocation2 + $0x2d8] sm:$0xff] }
0x1359   :  { %4041 = vmatprep.subr.mxu0 %v3952_v28  ;;  %v11621_v34 = vpop.f32.mrf.mxu1  ;;  %v8560_v28 = vld [vmem:[#allocation2 + $0x2f8] sm:$0xff] }
0x135a   :  { %v3605_v59 = vpop.f32.mrf.mxu0  ;;  %4042 = vmatpush1.msra.mxu0 %v3951_v54  ;;  %v8561_v54 = vld [vmem:[#allocation2 + $0x2d0] sm:$0xff] }
0x135b   :  { %4043 = vmatprep.subr.mxu0 %v3950_v18  ;;  %v11623_v19 = vpop.f32.mrf.mxu1  ;;  %v8562_v18 = vld [vmem:[#allocation2 + $0x2c8] sm:$0xff] }
0x135c   :  { %v3609_v3 = vpop.f32.mrf.mxu0  ;;  %4044 = vmatpush1.msra.mxu0 %v3949_v23  ;;  %v8563_v23 = vld [vmem:[#allocation2 + $0x2c0] sm:$0xff] }
0x135e   :  { %v3611_v44 = vpop.f32.mrf.mxu0 }
0x135f   :  { %v3612_v50 = vadd.f32 %v8562_v18, %v3611_v44  ;;  %v8574_v18 = vld [vmem:[#allocation2 + $0x268] sm:$0xff] }
0x1360   :  { %v3613_v12 = vpop.f32.mrf.mxu0 }
0x1361   :  { %v3614_v45 = vadd.f32 %v8561_v54, %v3613_v12 }
0x1362   :  { %v3615_v8 = vpop.f32.mrf.mxu0 }
0x1363   :  { %v3616_v41 = vadd.f32 %v8559_v57, %v3615_v8  ;;  %v8566_v8 = vld [vmem:[#allocation2 + $0x2a8] sm:$0xff] }
0x1364   :  { %v3619_v42 = vpop.f32.mrf.mxu0 }
0x1365   :  { %v3620_v35 = vadd.f32 %v8558_v5, %v3619_v42  ;;  %v8564_v42 = vld [vmem:[#allocation2 + $0x2b8] sm:$0xff] }
0x1366   :  { %v3621_v39 = vpop.f32.mrf.mxu0 }
0x1367   :  { %v3622_v22 = vadd.f32 %v8556_v49, %v3621_v39  ;;  %v3610_v39 = vadd.f32 %v8563_v23, %v3609_v3  ;;  %v11625_v49 = vpop.f32.mrf.mxu1  ;;  %v8575_v23 = vld [vmem:[#allocation2 + $0x260] sm:$0xff] }
0x1368   :  { %v3623_v26 = vpop.f32.mrf.mxu0 }
0x1369   :  { %v3624_v24 = vadd.f32 %v8557_v11, %v3623_v26  ;;  %7697 = vtanh.f32 %v3622_v22  ;;  %v3606_v26 = vadd.f32 %v8564_v42, %v3605_v59  ;;  %v8565_v11 = vld [vmem:[#allocation2 + $0x2b0] sm:$0xff]  ;;  %v3602_v22 = vadd.f32 %v8566_v8, %v3601_v10  ;;  %v3940_v44 = vpop.f32.mrf.mxu1  ;;  %v8570_v59 = vld [vmem:[#allocation2 + $0x288] sm:$0xff] }
0x136a   :  { %v3625_v21 = vpop.f32.mrf.mxu0  ;;  %v3604_v5 = vadd.f32 %v8565_v11, %v3603_v0  ;;  %v3592_v0 = vadd.f32 %v8570_v59, %v11589_v63  ;;  %v8580_v59 = vld [vmem:[#allocation2 + $0x238] sm:$0xff] }
0x136b   :  { %v3626_v58 = vadd.f32 %v8560_v28, %v3625_v21  ;;  %7699 = vtanh.f32 %v3624_v24  ;;  %v8567_v21 = vld [vmem:[#allocation2 + $0x2a0] sm:$0xff]  ;;  %v8568_v24 = vld [vmem:[#allocation2 + $0x298] sm:$0xff]  ;;  %v3944_v28 = vpop.f32.mrf.mxu1 }
0x136c   :  { %v3600_v12 = vadd.f32 %v8567_v21, %v11605_v13  ;;  %v3596_v3 = vadd.f32 %v8568_v24, %v11599_v17  ;;  %v8572_v13 = vld [vmem:[#allocation2 + $0x278] sm:$0xff]  ;;  %v8573_v17 = vld [vmem:[#allocation2 + $0x270] sm:$0xff]  ;;  %v8578_v21 = vld [vmem:[#allocation2 + $0x248] sm:$0xff] }
0x136d   :  { %7701 = vtanh.f32 %v3626_v58  ;;  %v3586_v58 = vadd.f32 %v8572_v13, %v11579_v33 }
0x136e   :  { %7703 = vtanh.f32 %v3620_v35  ;;  %v8569_v35 = vld [vmem:[#allocation2 + $0x290] sm:$0xff] }
0x136f   :  { %7705 = vtanh.f32 %v3616_v41  ;;  %v3594_v57 = vadd.f32 %v8569_v35, %v11595_v51  ;;  %v8571_v41 = vld [vmem:[#allocation2 + $0x280] sm:$0xff] }
0x1370   :  { %7707 = vtanh.f32 %v3614_v45  ;;  %v3590_v10 = vadd.f32 %v8571_v41, %v11585_v62  ;;  %v3584_v45 = vadd.f32 %v8573_v17, %v11575_v47  ;;  %v3580_v62 = vadd.f32 %v8575_v23, %v11563_v60  ;;  %v8577_v47 = vld [vmem:[#allocation2 + $0x250] sm:$0xff]  ;;  %v8584_v17 = vld [vmem:[#allocation2 + $0x218] sm:$0xff]  ;;  %v8587_v23 = vld [vmem:[#allocation2 + $0x200] sm:$0xff] }
0x1371   :  { %7709 = vtanh.f32 %v3612_v50  ;;  %v3582_v50 = vadd.f32 %v8574_v18, %v11569_v6  ;;  %v3574_v8 = vadd.f32 %v8577_v47, %v11549_v36  ;;  %v3566_v36 = vadd.f32 %v8580_v59, %v11527_v20  ;;  %v8581_v41 = vld [vmem:[#allocation2 + $0x230] sm:$0xff] }
0x1372   :  { %7711 = vtanh.f32 %v3610_v39  ;;  %v3946_v39 = vpop.f32.mrf.mxu1 }
0x1373   :  { %7713 = vtanh.f32 %v3606_v26  ;;  %v8576_v26 = vld [vmem:[#allocation2 + $0x258] sm:$0xff] }
0x1374   :  { %7715 = vtanh.f32 %v3604_v5  ;;  %v3576_v33 = vadd.f32 %v8576_v26, %v11555_v46 }
0x1375   :  { %7717 = vtanh.f32 %v3602_v22 }
0x1376   :  { %7719 = vtanh.f32 %v3600_v12  ;;  %v7698_v54 = vpop.eup %7697  ;;  %v3572_v12 = vadd.f32 %v8578_v21, %v11541_v14 }
0x1377   :  { %7721 = vtanh.f32 %v3596_v3  ;;  %v4010_v60 = vmul.f32 %v7698_v54, %v3940_v44  ;;  %v8579_v3 = vld [vmem:[#allocation2 + $0x240] sm:$0xff]  ;;  %v3564_v44 = vadd.f32 %v8581_v41, %v11523_v31 }
0x1378   :  { %7723 = vtanh.f32 %v3594_v57  ;;  %v7700_v51 = vpop.eup %7699  ;;  %v3570_v35 = vadd.f32 %v8579_v3, %v11535_v52  ;;  %v13977_v41 = vld [vmem:[#allocation40_spill] sm:$0xff] }
0x1379   :  { %7725 = vtanh.f32 %v3592_v0  ;;  %v4011_v22 = vmul.f32 %v7700_v51, %v3944_v28  ;;  %v8582_v28 = vld [vmem:[#allocation2 + $0x228] sm:$0xff]  ;;  %v8585_v51 = vld [vmem:[#allocation2 + $0x210] sm:$0xff] }
0x137a   :  { %v7702_v63 = vpop.eup %7701  ;;  %7727 = vtanh.f32 %v3590_v10 }
0x137b   :  { %v7704_v42 = vpop.eup %7703  ;;  %7729 = vtanh.f32 %v3586_v58  ;;  %v4012_v11 = vmul.f32 %v7702_v63, %v3946_v39  ;;  %v8583_v58 = vld [vmem:[#allocation2 + $0x220] sm:$0xff] }
0x137c   :  { %v7706_v5 = vpop.eup %7705  ;;  %7731 = vtanh.f32 %v3584_v45  ;;  %v4009_v46 = vmul.f32 %v7704_v42, %v11625_v49  ;;  %v3562_v49 = vadd.f32 %v8582_v28, %v11517_v55 }
0x137d   :  { %v7708_v6 = vpop.eup %7707  ;;  %7733 = vtanh.f32 %v3582_v50  ;;  %4045 = vmatprep.subr.mxu0 %v4012_v11  ;;  %v4008_v0 = vmul.f32 %v7706_v5, %v11623_v19  ;;  %v3560_v19 = vadd.f32 %v8583_v58, %v11513_v61  ;;  %v8586_v50 = vld [vmem:[#allocation2 + $0x208] sm:$0xff] }
0x137e   :  { %v7710_v24 = vpop.eup %7709  ;;  %7735 = vtanh.f32 %v3580_v62  ;;  %4046 = vmatpush2.msra.mxu0 %v4011_v22  ;;  %v4007_v10 = vmul.f32 %v7708_v6, %v11621_v34  ;;  %v3556_v34 = vadd.f32 %v8584_v17, %v11508_v25  ;;  %v13971_v6 = vld [vmem:[#allocation9_spill] sm:$0xff]  ;;  %v8589_v17 = vld [vmem:[%s13625_s4 + $0x18] sm:$0xff] }
0x137f   :  { %v7712_v57 = vpop.eup %7711  ;;  %7737 = vtanh.f32 %v3576_v33  ;;  %4047 = vmatprep.subr.mxu0 %v4010_v60  ;;  %v4006_v13 = vmul.f32 %v7710_v24, %v11619_v53  ;;  %v3554_v53 = vadd.f32 %v8585_v51, %v11506_v7  ;;  %v13973_v24 = vld [vmem:[#allocation36_spill] sm:$0xff]  ;;  %v8593_v51 = vld [vmem:[%s13625_s4 + $0x38] sm:$0xff] }
0x1380   :  { %v7714_v14 = vpop.eup %7713  ;;  %7739 = vtanh.f32 %v3574_v8  ;;  %4048 = vmatpush2.msra.mxu0 %v4009_v46  ;;  %v4005_v54 = vmul.f32 %v7712_v57, %v11617_v32  ;;  %v3552_v32 = vadd.f32 %v8586_v50, %v11502_v15  ;;  %v13975_v57 = vld [vmem:[#allocation38_spill] sm:$0xff] }
0x1381   :  { %v7716_v52 = vpop.eup %7715  ;;  %7741 = vtanh.f32 %v3572_v12  ;;  %4049 = vmatprep.subr.mxu0 %v4008_v0  ;;  %v4004_v45 = vmul.f32 %v7714_v14, %v11615_v9  ;;  %v3550_v9 = vadd.f32 %v8587_v23, %v11500_v29  ;;  %v13972_v12 = vld [vmem:[#allocation35_spill] sm:$0xff] }
0x1382   :  { %v7718_v20 = vpop.eup %7717  ;;  %7743 = vtanh.f32 %v3570_v35  ;;  %4050 = vmatpush2.msra.mxu0 %v4007_v10  ;;  %v4003_v18 = vmul.f32 %v7716_v52, %v11609_v56  ;;  %v13974_v35 = vld [vmem:[#allocation37_spill] sm:$0xff] }
0x1383   :  { %v7720_v31 = vpop.eup %7719  ;;  %7745 = vtanh.f32 %v3566_v36  ;;  %4051 = vmatprep.subr.mxu0 %v4006_v13  ;;  %v4002_v63 = vmul.f32 %v7718_v20, %v11601_v48  ;;  %v13976_v36 = vld [vmem:[#allocation39_spill] sm:$0xff]  ;;  %v13978_v52 = vld [vmem:[#allocation41_spill] sm:$0xff] }
0x1384   :  { %v7722_v55 = vpop.eup %7721  ;;  %7747 = vtanh.f32 %v3564_v44  ;;  %4052 = vmatpush2.msra.mxu0 %v4005_v54  ;;  %v4001_v62 = vmul.f32 %v7720_v31, %v11591_v4  ;;  %v13980_v20 = vld [vmem:[#allocation43_spill] sm:$0xff]  ;;  %v8588_v31 = vld [vmem:[%s13625_s4] sm:$0xff] }
0x1385   :  { %v7724_v61 = vpop.eup %7723  ;;  %7749 = vtanh.f32 %v3562_v49  ;;  %4053 = vmatprep.subr.mxu0 %v4004_v45  ;;  %v4000_v56 = vmul.f32 %v7722_v55, %v11581_v1  ;;  %v13979_v49 = vld [vmem:[#allocation42_spill] sm:$0xff]  ;;  %v8591_v45 = vld [vmem:[%s13625_s4 + $0x28] sm:$0xff]  ;;  %v8592_v55 = vld [vmem:[%s13625_s4 + $0x20] sm:$0xff] }
0x1386   :  { %v7726_v25 = vpop.eup %7725  ;;  %7751 = vtanh.f32 %v3560_v19  ;;  %4054 = vmatpush2.msra.mxu0 %v4003_v18  ;;  %v3999_v15 = vmul.f32 %v7724_v61, %v11571_v40  ;;  %v13981_v19 = vld [vmem:[#allocation44_spill] sm:$0xff]  ;;  %v13982_v18 = vmov 0  }
0x1387   :  { %v7728_v7 = vpop.eup %7727  ;;  %7753 = vtanh.f32 %v3556_v34  ;;  %4055 = vmatprep.subr.mxu0 %v4002_v63  ;;  %v3998_v42 = vmul.f32 %v7726_v25, %v11557_v2  ;;  %v8590_v34 = vld [vmem:[%s13625_s4 + $0x10] sm:$0xff] }
0x1388   :  { %v7730_v39 = vpop.eup %7729  ;;  %7755 = vtanh.f32 %v3554_v53  ;;  %4056 = vmatpush2.msra.mxu0 %v4001_v62  ;;  %v3997_v4 = vmul.f32 %v7728_v7, %v11543_v30  ;;  %v8594_v53 = vld [vmem:[%s13625_s4 + $0x30] sm:$0xff]  ;;  %v13983_v62 = vld [vmem:[#allocation33_spill] sm:$0xff] }
0x1389   :  { %v7732_v48 = vpop.eup %7731  ;;  %7757 = vtanh.f32 %v3552_v32  ;;  %4057 = vmatprep.subr.mxu0 %v4000_v56  ;;  %v3996_v33 = vmul.f32 %v7730_v39, %v11529_v43  ;;  %v13985_v39 = vld [vmem:[#allocation32_spill] sm:$0xff] }
0x138a   :  { %v7734_v29 = vpop.eup %7733  ;;  %7759 = vtanh.f32 %v3550_v9  ;;  %4058 = vmatpush2.msra.mxu0 %v3999_v15  ;;  %v3995_v11 = vmul.f32 %v7732_v48, %v11519_v37  ;;  %v13987_v48 = vld [vmem:[#allocation31_spill] sm:$0xff] }
0x138b   :  { %v7736_v26 = vpop.eup %7735  ;;  %4059 = vmatprep.subr.mxu0 %v3998_v42  ;;  %v3994_v5 = vmul.f32 %v7734_v29, %v11510_v38  ;;  %v13989_v29 = vld [vmem:[#allocation30_spill] sm:$0xff] }
0x138c   :  { %v7738_v1 = vpop.eup %7737  ;;  %4060 = vmatpush2.msra.mxu0 %v3997_v4  ;;  %v3993_v2 = vmul.f32 %v7736_v26, %v11504_v16  ;;  %v13991_v26 = vld [vmem:[#allocation29_spill] sm:$0xff] }
0x138d   :  { %v7740_v40 = vpop.eup %7739  ;;  %4061 = vmatprep.subr.mxu0 %v3996_v33  ;;  %v3992_v30 = vmul.f32 %v7738_v1, %v11498_v27  ;;  %v13993_v1 = vld [vmem:[#allocation28_spill] sm:$0xff] }
0x138e   :  { %v7742_v47 = vpop.eup %7741  ;;  %4062 = vmatpush2.msra.mxu0 %v3995_v11  ;;  %v3991_v43 = vmul.f32 %v7740_v40, %v13971_v6 }
0x138f   :  { %v7744_v8 = vpop.eup %7743  ;;  %4063 = vmatprep.subr.mxu0 %v3994_v5  ;;  %v3990_v37 = vmul.f32 %v7742_v47, %v13972_v12  ;;  %v13995_v5 = vld [vmem:[#allocation27_spill] sm:$0xff] }
0x1390   :  { %v7746_v22 = vpop.eup %7745  ;;  %4064 = vmatpush2.msra.mxu0 %v3993_v2  ;;  %v3989_v38 = vmul.f32 %v7744_v8, %v13973_v24 }
0x1391   :  { %v7748_v21 = vpop.eup %7747  ;;  %4065 = vmatprep.subr.mxu0 %v3992_v30  ;;  %v3988_v16 = vmul.f32 %v7746_v22, %v13974_v35  ;;  %v13997_v30 = vld [vmem:[#allocation8_spill] sm:$0xff] }
0x1392   :  { %v7750_v60 = vpop.eup %7749  ;;  %4066 = vmatpush2.msra.mxu0 %v3991_v43  ;;  %v3987_v27 = vmul.f32 %v7748_v21, %v13975_v57  ;;  %v8595_v43 = vld [vmem:[%s13623_s2] sm:$0xff]   ;;  %v8596_v21 = vld [vmem:[%s13623_s2 + $0x8] sm:$0xff]  }
0x1393   :  { %v7752_v3 = vpop.eup %7751  ;;  %4067 = vmatprep.subr.mxu0 %v3990_v37  ;;  %v3986_v0 = vmul.f32 %v7750_v60, %v13976_v36  ;;  %v8598_v57 = vld [vmem:[#allocation2 + $0x68] sm:$0xff] }
0x1394   :  { %v7754_v46 = vpop.eup %7753  ;;  %4068 = vmatpush2.msra.mxu0 %v3989_v38  ;;  %v3985_v44 = vmul.f32 %v7752_v3, %v13977_v41 }
0x1395   :  { %v7756_v59 = vpop.eup %7755  ;;  %4069 = vmatprep.subr.mxu0 %v3988_v16  ;;  %v3984_v28 = vmul.f32 %v7754_v46, %v13978_v52  ;;  %v8597_v16 = vld [vmem:[#allocation2 + $0x58] sm:$0xff] }
0x1396   :  { %v7758_v14 = vpop.eup %7757  ;;  %4070 = vmatpush2.msra.mxu0 %v3987_v27  ;;  %v3983_v13 = vmul.f32 %v7756_v59, %v13979_v49  ;;  %v8599_v59 = vld [vmem:[#allocation2 + $0x70] sm:$0xff]  ;;  %v8602_v52 = vld [vmem:[#allocation2 + $0x78] sm:$0xff] }
0x1397   :  { %v7760_v10 = vpop.eup %7759  ;;  %4071 = vmatprep.subr.mxu0 %v3986_v0  ;;  %v3982_v58 = vmul.f32 %v7758_v14, %v13980_v20  ;;  %v8600_v0 = vld [vmem:[#allocation2 + $0x60] sm:$0xff]  ;;  %v8603_v49 = vld [vmem:[#allocation2 + $0x50] sm:$0xff] }
0x1398   :  { %4072 = vmatpush2.msra.mxu0 %v3985_v44  ;;  %v3981_v54 = vmul.f32 %v7760_v10, %v13981_v19  ;;  %v8601_v44 = vld [vmem:[#allocation2 + $0x48] sm:$0xff] }
0x1399   :  { %4073 = vmatprep.subr.mxu0 %v3984_v28 }
0x139a   :  { %4074 = vmatpush2.msra.mxu0 %v3983_v13 }
0x139b   :  { %4075 = vmatprep.subr.mxu0 %v3982_v58 }
0x139c   :  { %4076 = vmatpush2.msra.mxu0 %v3981_v54 }
0x139d   :  { %4078 = vmatmul.mubr.f32.vlgmr.msra.gmra.mxu0 %v8588_v31  ;;  %v8604_v31 = vld [vmem:[#allocation2 + $0x40] sm:$0xff] }
0x139e   :  { %4083 = vmatprep.mubr.f32.mxu0 %v8589_v17 }
0x13a1   :  { %4084 = vmatmul.mubr.f32.gmra.mxu0 %v8590_v34 }
0x13a2   :  { %4089 = vmatprep.mubr.f32.mxu0 %v8591_v45 }
0x13a5   :  { %4090 = vmatmul.mubr.f32.gmra.mxu0 %v8592_v55 }
0x13a6   :  { %4095 = vmatprep.mubr.f32.mxu0 %v8593_v51 }
0x13a9   :  { %4096 = vmatmul.mubr.f32.gmra.mxu0 %v8594_v53 }
0x13aa   :  { %4213 = vmatprep.mubr.bf16.mxu0 %v13982_v18 }
0x145d   :  { %v4079_v61 = vpop.f32.mrf.mxu0 }
0x145e   :  { %v11727_v22 = vadd.f32 %v4079_v61, %v13997_v30  ;;  %v8610_v30 = vld [vmem:[#allocation2 + $0xa0] sm:$0xff] }
0x145f   :  { %v4081_v50 = vpop.f32.mrf.mxu0 }
0x1460   :  { %v11715_v11 = vadd.f32 %v4081_v50, %v13993_v1  ;;  %13998 = vst [vmem:[#allocation34_spill] sm:$0xff] %v11727_v22 }
0x1461   :  { %v4085_v32 = vpop.f32.mrf.mxu0 }
0x1462   :  { %13994 = vst [vmem:[#allocation15_spill] sm:$0xff] %v11715_v11  ;;  %v11720_v47 = vadd.f32 %v4085_v32, %v13995_v5 }
0x1463   :  { %v4087_v63 = vpop.f32.mrf.mxu0 }
0x1464   :  { %v11703_v15 = vadd.f32 %v4087_v63, %v13985_v39  ;;  %13996 = vst [vmem:[#allocation45_spill] sm:$0xff] %v11720_v47  ;;  %v4112_v6 = vpack.c.bf16 %v11720_v47, %v11727_v22  ;;  %v8605_v63 = vld [vmem:[%s13623_s2 + $0x10] sm:$0xff]  }
0x1465   :  { %v4091_v25 = vpop.f32.mrf.mxu0 }
0x1466   :  { %13986 = vst [vmem:[#allocation11_spill] sm:$0xff] %v11703_v15  ;;  %v11712_v33 = vadd.f32 %v4091_v25, %v13991_v26  ;;  %v4113_v8 = vpack.c.bf16 %v11703_v15, %v11715_v11  ;;  %v8606_v25 = vld [vmem:[%s13623_s2 + $0x18] sm:$0xff]  }
0x1467   :  { %v4093_v23 = vpop.f32.mrf.mxu0  ;;  %v8607_v26 = vld [vmem:[#allocation2 + $0x98] sm:$0xff] }
0x1468   :  { %v11706_v42 = vadd.f32 %v4093_v23, %v13987_v48  ;;  %13992 = vst [vmem:[#allocation14_spill] sm:$0xff] %v11712_v33 }
0x1469   :  { %v4097_v9 = vpop.f32.mrf.mxu0 }
0x146a   :  { %v11700_v7 = vadd.f32 %v4097_v9, %v13983_v62  ;;  %13988 = vst [vmem:[#allocation12_spill] sm:$0xff] %v11706_v42 }
0x146b   :  { %v4099_v56 = vpop.f32.mrf.mxu0 }
0x146c   :  { %13984 = vst [vmem:[#allocation10_spill] sm:$0xff] %v11700_v7  ;;  %v11709_v4 = vadd.f32 %v4099_v56, %v13989_v29  ;;  %v4114_v2 = vpack.c.bf16 %v11700_v7, %v11712_v33 }
0x146e   :  { %13990 = vst [vmem:[#allocation13_spill] sm:$0xff] %v11709_v4  ;;  %v4115_v40 = vpack.c.bf16 %v11709_v4, %v11706_v42 }
0x1470   :  { %4128 = vmatprep.subr.bf16.mxu1 %v4115_v40  ;;  %v8608_v40 = vld [vmem:[#allocation2 + $0xa8] sm:$0xff] }
0x1471   :  { %4129 = vmatpush1.bf16.msra.mxu1 %v4114_v2  ;;  %v8609_v2 = vld [vmem:[#allocation2 + $0xb0] sm:$0xff] }
0x1472   :  { %4130 = vmatprep.subr.bf16.mxu1 %v4113_v8 }
0x1475   :  { %4131 = vmatpush1.bf16.msra.mxu1 %v4112_v6 }
0x1478   :  { %7056 = vmatmul.mubr.msk.bf16.vlgmr.msra.gmra.mxu1 %vm349_vm1, %v8595_v43 }
0x1479   :  { %4158 = vmatprep.mubr.bf16.mxu1 %v13982_v18 }
0x1480   :  { %7057 = vmatmul.mubr.msk.bf16.gmra.mxu1 %vm349_vm1, %v8596_v21  ;;  %v8611_v21 = vld [vmem:[#allocation2 + $0x88] sm:$0xff] }
0x1481   :  { %4278 = vmatprep.mubr.bf16.mxu1 %v13982_v18 }
0x1538   :  { %v4150_v12 = vpop.f32.mrf.mxu1 }
0x1539   :  { %v4151_v17 = vadd.f32 %v8604_v31, %v4150_v12  ;;  %v8619_v31 = vld [vmem:[%s13624_s3 + $0x30] sm:$0xff] }
0x153a   :  { %v4152_v37 = vpop.f32.mrf.mxu1 }
0x153b   :  { %v4153_v10 = vadd.f32 %v8601_v44, %v4152_v37  ;;  %v4169_v50 = vmax.f32 %v4151_v17, 0.0  ;;  %v8612_v37 = vld [vmem:[#allocation2 + $0xb8] sm:$0xff] }
0x153c   :  { %v4154_v60 = vpop.f32.mrf.mxu1  ;;  %v8620_v17 = vld [vmem:[%s13624_s3 + $0x38] sm:$0xff] }
0x153d   :  { %v4155_v13 = vadd.f32 %v8603_v49, %v4154_v60  ;;  %v4170_v45 = vmax.f32 %v4153_v10, 0.0  ;;  %v8616_v49 = vld [vmem:[%s13623_s2 + $0x28] sm:$0xff]  }
0x153e   :  { %v4156_v24 = vpop.f32.mrf.mxu1 }
0x153f   :  { %v4157_v46 = vadd.f32 %v8597_v16, %v4156_v24  ;;  %v4171_v51 = vmax.f32 %v4155_v13, 0.0  ;;  %v8613_v24 = vld [vmem:[#allocation2 + $0x90] sm:$0xff]  ;;  %v13999_v13 = vmov 0.0  }
0x1540   :  { %v4160_v38 = vpop.f32.mrf.mxu1 }
0x1541   :  { %v4161_v14 = vadd.f32 %v8600_v0, %v4160_v38  ;;  %v4172_v58 = vmax.f32 %v4157_v46, 0.0  ;;  %v4177_v32 = vpack.c.bf16 %v4171_v51, %v4169_v50  ;;  %v8624_v51 = vld [vmem:[%s13624_s3 + $0x58] sm:$0xff]  ;;  %v8627_v50 = vld [vmem:[%s13624_s3 + $0x70] sm:$0xff] }
0x1542   :  { %v4162_v3 = vpop.f32.mrf.mxu1 }
0x1543   :  { %v4163_v27 = vadd.f32 %v8598_v57, %v4162_v3  ;;  %v4173_v34 = vmax.f32 %v4161_v14, 0.0  ;;  %v4178_v61 = vpack.c.bf16 %v4172_v58, %v4170_v45  ;;  %v8614_v57 = vld [vmem:[#allocation2 + $0x80] sm:$0xff]  ;;  %v8622_v45 = vld [vmem:[%s13624_s3 + $0x48] sm:$0xff] }
0x1544   :  { %v4164_v35 = vpop.f32.mrf.mxu1  ;;  %v4110_v58 = vld [vmem:[%s13622_s1 + $0x40] sm:$0xff] }
0x1545   :  { %v4165_v36 = vadd.f32 %v8599_v59, %v4164_v35  ;;  %v4174_v19 = vmax.f32 %v4163_v27, 0.0 }
0x1546   :  { %v4166_v41 = vpop.f32.mrf.mxu1 }
0x1547   :  { %v4167_v28 = vadd.f32 %v8602_v52, %v4166_v41  ;;  %v4175_v20 = vmax.f32 %v4165_v36, 0.0 }
0x1549   :  { %v4176_v54 = vmax.f32 %v4167_v28, 0.0  ;;  %v4179_v53 = vpack.c.bf16 %v4175_v20, %v4173_v34  ;;  %v8615_v28 = vld [vmem:[%s13623_s2 + $0x20] sm:$0xff]   ;;  %v4111_v20 = vld [vmem:[%s13622_s1 + $0x48] sm:$0xff] }
0x154a   :  { %v8621_v34 = vld [vmem:[%s13624_s3 + $0x40] sm:$0xff] }
0x154b   :  { %v4180_v55 = vpack.c.bf16 %v4176_v54, %v4174_v19  ;;  %v8617_v19 = vld [vmem:[%s13624_s3 + $0x20] sm:$0xff]  ;;  %v8618_v54 = vld [vmem:[%s13624_s3 + $0x28] sm:$0xff] }
0x154d   :  { %4193 = vmatprep.subr.bf16.mxu0 %v4180_v55  ;;  %v8623_v55 = vld [vmem:[%s13624_s3 + $0x50] sm:$0xff] }
0x154e   :  { %4194 = vmatpush1.bf16.msra.mxu0 %v4179_v53  ;;  %v8625_v53 = vld [vmem:[%s13624_s3 + $0x60] sm:$0xff] }
0x154f   :  { %4195 = vmatprep.subr.bf16.mxu0 %v4178_v61  ;;  %v8626_v61 = vld [vmem:[%s13624_s3 + $0x68] sm:$0xff] }
0x1552   :  { %4196 = vmatpush1.bf16.msra.mxu0 %v4177_v32  ;;  %v8628_v32 = vld [vmem:[%s13624_s3 + $0x78] sm:$0xff] }
0x1555   :  { %7058 = vmatmul.mubr.msk.bf16.vlgmr.msra.gmra.mxu0 %vm349_vm1, %v8605_v63  ;;  %v8629_v63 = vld [vmem:[%s13624_s3 + $0x80] sm:$0xff] }
0x1556   :  { %4223 = vmatprep.mubr.bf16.mxu0 %v13982_v18 }
0x155d   :  { %7059 = vmatmul.mubr.msk.bf16.gmra.mxu0 %vm349_vm1, %v8606_v25  ;;  %v8630_v25 = vld [vmem:[%s13624_s3 + $0x88] sm:$0xff] }
0x155e   :  { %4343 = vmatprep.mubr.bf16.mxu0 %v13982_v18 }
0x1615   :  { %v4215_v23 = vpop.f32.mrf.mxu0 }
0x1616   :  { %v4216_v27 = vadd.f32 %v8614_v57, %v4215_v23  ;;  %v8631_v23 = vld [vmem:[%s13624_s3 + $0x90] sm:$0xff] }
0x1617   :  { %v4217_v9 = vpop.f32.mrf.mxu0 }
0x1618   :  { %v4218_v12 = vadd.f32 %v8611_v21, %v4217_v9  ;;  %v4234_v10 = vmax.f32 %v4216_v27, 0.0  ;;  %v8632_v9 = vld [vmem:[%s13624_s3 + $0x98] sm:$0xff] }
0x1619   :  { %v4219_v62 = vpop.f32.mrf.mxu0 }
0x161a   :  { %v4220_v38 = vadd.f32 %v8613_v24, %v4219_v62  ;;  %v4235_v36 = vmax.f32 %v4218_v12, 0.0  ;;  %v8633_v62 = vld [vmem:[%s13624_s3 + $0xa0] sm:$0xff] }
0x161b   :  { %v4221_v56 = vpop.f32.mrf.mxu0 }
0x161c   :  { %v4222_v1 = vadd.f32 %v8607_v26, %v4221_v56  ;;  %v4236_v14 = vmax.f32 %v4220_v38, 0.0  ;;  %v8634_v56 = vld [vmem:[%s13624_s3 + $0xa8] sm:$0xff] }
0x161d   :  { %v4225_v39 = vpop.f32.mrf.mxu0  ;;  %v8638_v26 = vld [vmem:[%s13624_s3 + $0xc8] sm:$0xff] }
0x161e   :  { %v4226_v6 = vadd.f32 %v8610_v30, %v4225_v39  ;;  %v4237_v35 = vmax.f32 %v4222_v1, 0.0  ;;  %v4242_v52 = vpack.c.bf16 %v4236_v14, %v4234_v10  ;;  %v8635_v39 = vld [vmem:[%s13624_s3 + $0xb0] sm:$0xff]  ;;  %v8644_v38 = vld [vmem:[#allocation2 + $0xe8] sm:$0xff] }
0x161f   :  { %v4227_v48 = vpop.f32.mrf.mxu0 }
0x1620   :  { %v4228_v5 = vadd.f32 %v8608_v40, %v4227_v48  ;;  %v4238_v59 = vmax.f32 %v4226_v6, 0.0  ;;  %v4243_v44 = vpack.c.bf16 %v4237_v35, %v4235_v36  ;;  %v8636_v48 = vld [vmem:[%s13624_s3 + $0xb8] sm:$0xff]  ;;  %v8639_v40 = vld [vmem:[%s13624_s3 + $0xd0] sm:$0xff] }
0x1621   :  { %v4229_v29 = vpop.f32.mrf.mxu0  ;;  %v8645_v35 = vld [vmem:[#allocation2 + $0xf0] sm:$0xff] }
0x1622   :  { %v4230_v8 = vadd.f32 %v8609_v2, %v4229_v29  ;;  %v4239_v16 = vmax.f32 %v4228_v5, 0.0  ;;  %v8637_v29 = vld [vmem:[%s13624_s3 + $0xc0] sm:$0xff] }
0x1623   :  { %v4231_v43 = vpop.f32.mrf.mxu0 }
0x1624   :  { %v4232_v60 = vadd.f32 %v8612_v37, %v4231_v43  ;;  %v4240_v3 = vmax.f32 %v4230_v8, 0.0  ;;  %v8640_v8 = vld [vmem:[%s13624_s3 + $0xd8] sm:$0xff]  ;;  %v8641_v43 = vld [vmem:[%s13624_s3 + $0xe0] sm:$0xff]  ;;  %v8642_v37 = vld [vmem:[%s13624_s3 + $0xe8] sm:$0xff] }
0x1626   :  { %v4241_v46 = vmax.f32 %v4232_v60, 0.0  ;;  %v4244_v41 = vpack.c.bf16 %v4240_v3, %v4238_v59  ;;  %v8643_v60 = vld [vmem:[#allocation2 + $0xd8] sm:$0xff]  ;;  %v8647_v59 = vld [vmem:[#allocation2 + $0xc8] sm:$0xff] }
0x1628   :  { %v4245_v0 = vpack.c.bf16 %v4241_v46, %v4239_v16  ;;  %v8646_v46 = vld [vmem:[#allocation2 + $0xe0] sm:$0xff] }
0x162a   :  { %4258 = vmatprep.subr.bf16.mxu1 %v4245_v0  ;;  %v8648_v0 = vld [vmem:[#allocation2 + $0xf8] sm:$0xff] }
0x162b   :  { %4259 = vmatpush1.bf16.msra.mxu1 %v4244_v41  ;;  %v8649_v41 = vld [vmem:[#allocation2 + $0xd0] sm:$0xff] }
0x162c   :  { %4260 = vmatprep.subr.bf16.mxu1 %v4243_v44 }
0x162f   :  { %4261 = vmatpush1.bf16.msra.mxu1 %v4242_v52  ;;  %v8650_v52 = vld [vmem:[%s13624_s3 + $0xf0] sm:$0xff] }
0x1630   :  { %4598 = vmatprep.subr.mxu1 %v4111_v20 }
0x1632   :  { %7060 = vmatmul.mubr.msk.bf16.vlgmr.msra.gmra.mxu1 %vm349_vm1, %v8615_v28 }
0x1633   :  { %4288 = vmatprep.mubr.bf16.mxu1 %v13982_v18  ;;  %4599 = vmatpush1.msra.mxu1 %v4110_v58  ;;  %v8651_v58 = vld [vmem:[#allocation2 + $0xc0] sm:$0xff] }
0x163a   :  { %7061 = vmatmul.mubr.msk.bf16.gmra.mxu1 %vm349_vm1, %v8616_v49 }
0x163b   :  { %4632 = vmatprep.mubr.f32.mxu1 %v13999_v13 }
0x1642   :  { %7078 = vmatmul.mubr.msk.f32.vlgmr.msra.gmra.mxu1 %vm231_vm0, %v8617_v19 }
0x1643   :  { %4638 = vmatprep.mubr.f32.mxu1 %v13999_v13 }
0x1646   :  { %7079 = vmatmul.mubr.msk.f32.gmra.mxu1 %vm231_vm0, %v8618_v54 }
0x1647   :  { %4644 = vmatprep.mubr.f32.mxu1 %v13999_v13 }
0x164a   :  { %7080 = vmatmul.mubr.msk.f32.gmra.mxu1 %vm231_vm0, %v8619_v31 }
0x164b   :  { %4650 = vmatprep.mubr.f32.mxu1 %v13999_v13 }
0x164e   :  { %7081 = vmatmul.mubr.msk.f32.gmra.mxu1 %vm231_vm0, %v8620_v17 }
0x164f   :  { %4656 = vmatprep.mubr.f32.mxu1 %v13999_v13 }
0x1652   :  { %7082 = vmatmul.mubr.msk.f32.gmra.mxu1 %vm231_vm0, %v8621_v34 }
0x1653   :  { %4662 = vmatprep.mubr.f32.mxu1 %v13999_v13 }
0x1656   :  { %7083 = vmatmul.mubr.msk.f32.gmra.mxu1 %vm231_vm0, %v8622_v45 }
0x1657   :  { %4668 = vmatprep.mubr.f32.mxu1 %v13999_v13 }
0x165a   :  { %7084 = vmatmul.mubr.msk.f32.gmra.mxu1 %vm231_vm0, %v8623_v55  ;;  %v8652_v55 = vld [vmem:[%s13624_s3 + $0xf8] sm:$0xff] }
0x165b   :  { %4674 = vmatprep.mubr.f32.mxu1 %v13999_v13 }
0x165e   :  { %7085 = vmatmul.mubr.msk.f32.gmra.mxu1 %vm231_vm0, %v8624_v51 }
0x165f   :  { %4680 = vmatprep.mubr.f32.mxu1 %v13999_v13 }
0x1662   :  { %7086 = vmatmul.mubr.msk.f32.gmra.mxu1 %vm231_vm0, %v8625_v53 }
0x1663   :  { %4686 = vmatprep.mubr.f32.mxu1 %v13999_v13 }
0x1666   :  { %7087 = vmatmul.mubr.msk.f32.gmra.mxu1 %vm231_vm0, %v8626_v61 }
0x1667   :  { %4692 = vmatprep.mubr.f32.mxu1 %v13999_v13 }
0x166a   :  { %7088 = vmatmul.mubr.msk.f32.gmra.mxu1 %vm231_vm0, %v8627_v50  ;;  %v8653_v50 = vld [vmem:[%s13624_s3 + $0x100] sm:$0xff] }
0x166b   :  { %4698 = vmatprep.mubr.f32.mxu1 %v13999_v13 }
0x166e   :  { %7089 = vmatmul.mubr.msk.f32.gmra.mxu1 %vm231_vm0, %v8628_v32  ;;  %v8654_v32 = vld [vmem:[%s13624_s3 + $0x108] sm:$0xff] }
0x166f   :  { %4704 = vmatprep.mubr.f32.mxu1 %v13999_v13 }
0x1672   :  { %7090 = vmatmul.mubr.msk.f32.gmra.mxu1 %vm231_vm0, %v8629_v63  ;;  %v8655_v63 = vld [vmem:[%s13623_s2 + $0x30] sm:$0xff]  }
0x1673   :  { %4710 = vmatprep.mubr.f32.mxu1 %v13999_v13 }
0x1676   :  { %7091 = vmatmul.mubr.msk.f32.gmra.mxu1 %vm231_vm0, %v8630_v25  ;;  %v8656_v25 = vld [vmem:[%s13624_s3 + $0x110] sm:$0xff] }
0x1677   :  { %4716 = vmatprep.mubr.f32.mxu1 %v13999_v13 }
0x167a   :  { %7092 = vmatmul.mubr.msk.f32.gmra.mxu1 %vm231_vm0, %v8631_v23  ;;  %v8657_v23 = vld [vmem:[%s13624_s3 + $0x118] sm:$0xff] }
0x167b   :  { %4722 = vmatprep.mubr.f32.mxu1 %v13999_v13 }
0x167e   :  { %7093 = vmatmul.mubr.msk.f32.gmra.mxu1 %vm231_vm0, %v8632_v9  ;;  %v8658_v9 = vld [vmem:[%s13623_s2 + $0x38] sm:$0xff]  }
0x167f   :  { %4728 = vmatprep.mubr.f32.mxu1 %v13999_v13 }
0x1682   :  { %7094 = vmatmul.mubr.msk.f32.gmra.mxu1 %vm231_vm0, %v8633_v62  ;;  %v8659_v62 = vld [vmem:[%s13623_s2 + $0x40] sm:$0xff]  }
0x1683   :  { %4734 = vmatprep.mubr.f32.mxu1 %v13999_v13 }
0x1686   :  { %7095 = vmatmul.mubr.msk.f32.gmra.mxu1 %vm231_vm0, %v8634_v56  ;;  %v8660_v56 = vld [vmem:[%s13623_s2 + $0x48] sm:$0xff]  }
0x1687   :  { %4740 = vmatprep.mubr.f32.mxu1 %v13999_v13 }
0x168a   :  { %7096 = vmatmul.mubr.msk.f32.gmra.mxu1 %vm231_vm0, %v8635_v39  ;;  %v8661_v39 = vld [vmem:[%s13623_s2 + $0x50] sm:$0xff]  }
0x168b   :  { %4746 = vmatprep.mubr.f32.mxu1 %v13999_v13 }
0x168e   :  { %7097 = vmatmul.mubr.msk.f32.gmra.mxu1 %vm231_vm0, %v8636_v48  ;;  %v8662_v48 = vld [vmem:[%s13623_s2 + $0x58] sm:$0xff]  }
0x168f   :  { %4752 = vmatprep.mubr.f32.mxu1 %v13999_v13 }
0x1692   :  { %7098 = vmatmul.mubr.msk.f32.gmra.mxu1 %vm231_vm0, %v8637_v29  ;;  %v8663_v29 = vld [vmem:[%s13623_s2 + $0x60] sm:$0xff]  }
0x1693   :  { %4758 = vmatprep.mubr.f32.mxu1 %v13999_v13 }
0x1696   :  { %7099 = vmatmul.mubr.msk.f32.gmra.mxu1 %vm231_vm0, %v8638_v26  ;;  %v8664_v26 = vld [vmem:[%s13623_s2 + $0x68] sm:$0xff]  }
0x1697   :  { %4764 = vmatprep.mubr.f32.mxu1 %v13999_v13 }
0x169a   :  { %7100 = vmatmul.mubr.msk.f32.gmra.mxu1 %vm231_vm0, %v8639_v40  ;;  %v8666_v40 = vld [vmem:[%s13623_s2 + $0x78] sm:$0xff]  }
0x169b   :  { %4770 = vmatprep.mubr.f32.mxu1 %v13999_v13 }
0x169e   :  { %7101 = vmatmul.mubr.msk.f32.gmra.mxu1 %vm231_vm0, %v8640_v8 }
0x169f   :  { %4776 = vmatprep.mubr.f32.mxu1 %v13999_v13 }
0x16a2   :  { %7102 = vmatmul.mubr.msk.f32.gmra.mxu1 %vm231_vm0, %v8641_v43 }
0x16a3   :  { %4782 = vmatprep.mubr.f32.mxu1 %v13999_v13 }
0x16a6   :  { %7103 = vmatmul.mubr.msk.f32.gmra.mxu1 %vm231_vm0, %v8642_v37 }
0x16a7   :  { %4788 = vmatprep.mubr.f32.mxu1 %v13999_v13 }
0x16aa   :  { %7104 = vmatmul.mubr.msk.f32.gmra.mxu1 %vm231_vm0, %v8650_v52 }
0x16ab   :  { %4794 = vmatprep.mubr.f32.mxu1 %v13999_v13 }
0x16ae   :  { %7105 = vmatmul.mubr.msk.f32.gmra.mxu1 %vm231_vm0, %v8652_v55 }
0x16af   :  { %4800 = vmatprep.mubr.f32.mxu1 %v13999_v13 }
0x16b2   :  { %7106 = vmatmul.mubr.msk.f32.gmra.mxu1 %vm231_vm0, %v8653_v50 }
0x16b3   :  { %4806 = vmatprep.mubr.f32.mxu1 %v13999_v13 }
0x16b6   :  { %7107 = vmatmul.mubr.msk.f32.gmra.mxu1 %vm231_vm0, %v8654_v32 }
0x16b7   :  { %4812 = vmatprep.mubr.f32.mxu1 %v13999_v13 }
0x16ba   :  { %7108 = vmatmul.mubr.msk.f32.gmra.mxu1 %vm231_vm0, %v8656_v25 }
0x16bb   :  { %4818 = vmatprep.mubr.f32.mxu1 %v13999_v13 }
0x16be   :  { %7109 = vmatmul.mubr.msk.f32.gmra.mxu1 %vm231_vm0, %v8657_v23 }
0x16bf   :  { %5024 = vmatprep.mubr.bf16.mxu1 %v13982_v18 }
0x16f2   :  { %v4280_v1 = vpop.f32.mrf.mxu1 }
0x16f3   :  { %v4281_v19 = vadd.f32 %v8651_v58, %v4280_v1  ;;  %v8665_v1 = vld [vmem:[%s13623_s2 + $0x70] sm:$0xff]  }
0x16f4   :  { %v4282_v5 = vpop.f32.mrf.mxu1 }
0x16f5   :  { %v4283_v36 = vadd.f32 %v8647_v59, %v4282_v5  ;;  %v4299_v53 = vmax.f32 %v4281_v19, 0.0  ;;  %v8667_v5 = vld [vmem:[%s13623_s2 + $0x80] sm:$0xff]  }
0x16f6   :  { %v4284_v2 = vpop.f32.mrf.mxu1 }
0x16f7   :  { %v4285_v44 = vadd.f32 %v8649_v41, %v4284_v2  ;;  %v4300_v31 = vmax.f32 %v4283_v36, 0.0 }
0x16f8   :  { %v4286_v30 = vpop.f32.mrf.mxu1 }
0x16f9   :  { %v4287_v24 = vadd.f32 %v8643_v60, %v4286_v30  ;;  %v4301_v34 = vmax.f32 %v4285_v44, 0.0  ;;  %v8668_v30 = vld [vmem:[%s13623_s2 + $0x88] sm:$0xff]   ;;  %v8670_v60 = vld [vmem:[%s13623_s2 + $0x98] sm:$0xff]  }
0x16fa   :  { %v4290_v6 = vpop.f32.mrf.mxu1 }
0x16fb   :  { %v4291_v57 = vadd.f32 %v8646_v46, %v4290_v6  ;;  %v4302_v28 = vmax.f32 %v4287_v24, 0.0  ;;  %v4307_v61 = vpack.c.bf16 %v4301_v34, %v4299_v53  ;;  %v8672_v46 = vld [vmem:[%s13623_s2 + $0xa8] sm:$0xff]  }
0x16fc   :  { %v4292_v21 = vpop.f32.mrf.mxu1 }
0x16fd   :  { %v4293_v3 = vadd.f32 %v8644_v38, %v4292_v21  ;;  %v4303_v54 = vmax.f32 %v4291_v57, 0.0  ;;  %v4308_v51 = vpack.c.bf16 %v4302_v28, %v4300_v31  ;;  %v8669_v21 = vld [vmem:[%s13623_s2 + $0x90] sm:$0xff]   ;;  %v8673_v57 = vld [vmem:[%s13625_s4 + $0x8] sm:$0xff] }
0x16fe   :  { %v4294_v12 = vpop.f32.mrf.mxu1 }
0x16ff   :  { %v4295_v16 = vadd.f32 %v8645_v35, %v4294_v12  ;;  %v4304_v49 = vmax.f32 %v4293_v3, 0.0  ;;  %v8671_v3 = vld [vmem:[%s13623_s2 + $0xa0] sm:$0xff]  }
0x1700   :  { %v4296_v27 = vpop.f32.mrf.mxu1 }
0x1701   :  { %v4297_v14 = vadd.f32 %v8648_v0, %v4296_v27  ;;  %v4305_v10 = vmax.f32 %v4295_v16, 0.0 }
0x1702   :  { %v11982_v2 = vpop.f32.mrf.mxu1 }
0x1703   :  { %v4306_v20 = vmax.f32 %v4297_v14, 0.0  ;;  %v4309_v45 = vpack.c.bf16 %v4305_v10, %v4303_v54  ;;  %14000 = vst [vmem:[#allocation46_spill] sm:$0xff] %v11982_v2 }
0x1704   :  { %v11984_v8 = vpop.f32.mrf.mxu1 }
0x1705   :  { %v4310_v17 = vpack.c.bf16 %v4306_v20, %v4304_v49  ;;  %14001 = vst [vmem:[#allocation47_spill] sm:$0xff] %v11984_v8 }
0x1706   :  { %v11991_v6 = vpop.f32.mrf.mxu1 }
0x1707   :  { %4323 = vmatprep.subr.bf16.mxu0 %v4310_v17  ;;  %14002 = vst [vmem:[#allocation48_spill] sm:$0xff] %v11991_v6 }
0x1708   :  { %4324 = vmatpush1.bf16.msra.mxu0 %v4309_v45  ;;  %v11993_v43 = vpop.f32.mrf.mxu1 }
0x1709   :  { %4325 = vmatprep.subr.bf16.mxu0 %v4308_v51  ;;  %14003 = vst [vmem:[#allocation16_spill] sm:$0xff] %v11993_v43 }
0x170a   :  { %v12000_v12 = vpop.f32.mrf.mxu1 }
0x170b   :  { %14004 = vst [vmem:[#allocation17_spill] sm:$0xff] %v12000_v12 }
0x170c   :  { %4326 = vmatpush1.bf16.msra.mxu0 %v4307_v61  ;;  %v12002_v37 = vpop.f32.mrf.mxu1 }
0x170d   :  { %14005 = vst [vmem:[#allocation18_spill] sm:$0xff] %v12002_v37 }
0x170e   :  { %v12009_v24 = vpop.f32.mrf.mxu1 }
0x170f   :  { %7062 = vmatmul.mubr.msk.bf16.vlgmr.msra.gmra.mxu0 %vm349_vm1, %v8655_v63  ;;  %14006 = vst [vmem:[#allocation19_spill] sm:$0xff] %v12009_v24 }
0x1710   :  { %4353 = vmatprep.mubr.bf16.mxu0 %v13982_v18  ;;  %v12011_v38 = vpop.f32.mrf.mxu1 }
0x1711   :  { %14007 = vst [vmem:[#allocation20_spill] sm:$0xff] %v12011_v38  ;;  %v8676_v38 = vld [vmem:[#allocation2 + $0x1e0] sm:$0xff] }
0x1712   :  { %v12018_v35 = vpop.f32.mrf.mxu1 }
0x1713   :  { %14008 = vst [vmem:[#allocation21_spill] sm:$0xff] %v12018_v35 }
0x1714   :  { %v12020_v16 = vpop.f32.mrf.mxu1 }
0x1715   :  { %14009 = vst [vmem:[#allocation22_spill] sm:$0xff] %v12020_v16 }
0x1716   :  { %v12029_v27 = vpop.f32.mrf.mxu1 }
0x1717   :  { %7063 = vmatmul.mubr.msk.bf16.gmra.mxu0 %vm349_vm1, %v8658_v9  ;;  %14010 = vst [vmem:[#allocation23_spill] sm:$0xff] %v12029_v27  ;;  %v8677_v27 = vld [vmem:[#allocation2 + $0x1d8] sm:$0xff] }
0x1718   :  { %4363 = vmatprep.mubr.bf16.mxu0 %v13982_v18  ;;  %v12031_v59 = vpop.f32.mrf.mxu1 }
0x1719   :  { %14011 = vst [vmem:[#allocation24_spill] sm:$0xff] %v12031_v59  ;;  %v8678_v59 = vld [vmem:[#allocation2 + $0x1f8] sm:$0xff] }
0x171a   :  { %v12033_v36 = vpop.f32.mrf.mxu1 }
0x171b   :  { %14012 = vst [vmem:[#allocation25_spill] sm:$0xff] %v12033_v36 }
0x171c   :  { %v12035_v0 = vpop.f32.mrf.mxu1 }
0x171d   :  { %14013 = vst [vmem:[#allocation26_spill] sm:$0xff] %v12035_v0 }
0x171e   :  { %v12037_v14 = vpop.f32.mrf.mxu1 }
0x171f   :  { %7064 = vmatmul.mubr.msk.bf16.gmra.mxu0 %vm349_vm1, %v8659_v62  ;;  %14014 = vst [vmem:[#allocation9_spill] sm:$0xff] %v12037_v14 }
0x1720   :  { %4373 = vmatprep.mubr.bf16.mxu0 %v13982_v18  ;;  %v12039_v41 = vpop.f32.mrf.mxu1 }
0x1722   :  { %v12041_v44 = vpop.f32.mrf.mxu1 }
0x1724   :  { %v12043_v10 = vpop.f32.mrf.mxu1 }
0x1726   :  { %v12045_v52 = vpop.f32.mrf.mxu1 }
0x1727   :  { %7065 = vmatmul.mubr.msk.bf16.gmra.mxu0 %vm349_vm1, %v8660_v56 }
0x1728   :  { %4383 = vmatprep.mubr.bf16.mxu0 %v13982_v18  ;;  %v12047_v28 = vpop.f32.mrf.mxu1 }
0x172a   :  { %v12049_v49 = vpop.f32.mrf.mxu1 }
0x172c   :  { %v12051_v20 = vpop.f32.mrf.mxu1 }
0x172e   :  { %v12053_v58 = vpop.f32.mrf.mxu1 }
0x172f   :  { %7066 = vmatmul.mubr.msk.bf16.gmra.mxu0 %vm349_vm1, %v8661_v39 }
0x1730   :  { %4393 = vmatprep.mubr.bf16.mxu0 %v13982_v18  ;;  %v12055_v19 = vpop.f32.mrf.mxu1 }
0x1732   :  { %v12057_v54 = vpop.f32.mrf.mxu1 }
0x1734   :  { %v12059_v31 = vpop.f32.mrf.mxu1 }
0x1736   :  { %v12061_v17 = vpop.f32.mrf.mxu1 }
0x1737   :  { %7067 = vmatmul.mubr.msk.bf16.gmra.mxu0 %vm349_vm1, %v8662_v48 }
0x1738   :  { %4403 = vmatprep.mubr.bf16.mxu0 %v13982_v18  ;;  %v12063_v34 = vpop.f32.mrf.mxu1 }
0x173a   :  { %v12069_v51 = vpop.f32.mrf.mxu1 }
0x173c   :  { %v12075_v50 = vpop.f32.mrf.mxu1 }
0x173e   :  { %v12081_v25 = vpop.f32.mrf.mxu1 }
0x173f   :  { %7068 = vmatmul.mubr.msk.bf16.gmra.mxu0 %vm349_vm1, %v8663_v29 }
0x1740   :  { %4413 = vmatprep.mubr.bf16.mxu0 %v13982_v18  ;;  %v12087_v62 = vpop.f32.mrf.mxu1 }
0x1742   :  { %v12093_v48 = vpop.f32.mrf.mxu1 }
0x1743   :  { %14015 = vst [vmem:[#allocation35_spill] sm:$0xff] %v12093_v48 }
0x1747   :  { %7069 = vmatmul.mubr.msk.bf16.gmra.mxu0 %vm349_vm1, %v8664_v26 }
0x1748   :  { %4423 = vmatprep.mubr.bf16.mxu0 %v13982_v18 }
0x174f   :  { %7070 = vmatmul.mubr.msk.bf16.gmra.mxu0 %vm349_vm1, %v8665_v1  ;;  %v12099_v1 = vpop.f32.mrf.mxu1 }
0x1750   :  { %4433 = vmatprep.mubr.bf16.mxu0 %v13982_v18  ;;  %14016 = vst [vmem:[#allocation36_spill] sm:$0xff] %v12099_v1 }
0x1757   :  { %7071 = vmatmul.mubr.msk.bf16.gmra.mxu0 %vm349_vm1, %v8666_v40 }
0x1758   :  { %4443 = vmatprep.mubr.bf16.mxu0 %v13982_v18 }
0x175f   :  { %7072 = vmatmul.mubr.msk.bf16.gmra.mxu0 %vm349_vm1, %v8667_v5 }
0x1760   :  { %4453 = vmatprep.mubr.bf16.mxu0 %v13982_v18 }
0x1767   :  { %7073 = vmatmul.mubr.msk.bf16.gmra.mxu0 %vm349_vm1, %v8668_v30  ;;  %v12105_v30 = vpop.f32.mrf.mxu1 }
0x1768   :  { %4463 = vmatprep.mubr.bf16.mxu0 %v13982_v18  ;;  %14017 = vst [vmem:[#allocation37_spill] sm:$0xff] %v12105_v30 }
0x176f   :  { %7074 = vmatmul.mubr.msk.bf16.gmra.mxu0 %vm349_vm1, %v8669_v21 }
0x1770   :  { %4473 = vmatprep.mubr.bf16.mxu0 %v13982_v18 }
0x1777   :  { %7075 = vmatmul.mubr.msk.bf16.gmra.mxu0 %vm349_vm1, %v8670_v60 }
0x1778   :  { %4483 = vmatprep.mubr.bf16.mxu0 %v13982_v18 }
0x177f   :  { %7076 = vmatmul.mubr.msk.bf16.gmra.mxu0 %vm349_vm1, %v8671_v3  ;;  %v12111_v3 = vpop.f32.mrf.mxu1 }
0x1780   :  { %4493 = vmatprep.mubr.bf16.mxu0 %v13982_v18  ;;  %14018 = vst [vmem:[#allocation38_spill] sm:$0xff] %v12111_v3 }
0x1781   :  { %v12117_v13 = vpop.f32.mrf.mxu1 }
0x1782   :  { %14019 = vst [vmem:[#allocation39_spill] sm:$0xff] %v12117_v13 }
0x1783   :  { %v12121_v11 = vpop.f32.mrf.mxu1 }
0x1784   :  { %14020 = vst [vmem:[#allocation40_spill] sm:$0xff] %v12121_v11  ;;  %v8674_v11 = vld [vmem:[#allocation2 + $0x1e8] sm:$0xff] }
0x1785   :  { %v12123_v42 = vpop.f32.mrf.mxu1 }
0x1786   :  { %14021 = vst [vmem:[#allocation41_spill] sm:$0xff] %v12123_v42  ;;  %v8675_v42 = vld [vmem:[#allocation2 + $0x1f0] sm:$0xff] }
0x1787   :  { %7077 = vmatmul.mubr.msk.bf16.gmra.mxu0 %vm349_vm1, %v8672_v46  ;;  %v12125_v18 = vpop.f32.mrf.mxu1 }
0x1788   :  { %4953 = vmatprep.mubr.f32.mxu0 %v8673_v57  ;;  %14022 = vst [vmem:[#allocation42_spill] sm:$0xff] %v12125_v18 }
0x1789   :  { %v12127_v30 = vpop.f32.mrf.mxu1 }
0x178a   :  { %14023 = vst [vmem:[#allocation43_spill] sm:$0xff] %v12127_v30 }
0x178b   :  { %v12129_v13 = vpop.f32.mrf.mxu1 }
0x178c   :  { %14024 = vst [vmem:[#allocation44_spill] sm:$0xff] %v12129_v13  ;;  %v8679_v13 = vld [vmem:[#allocation2 + $0x1d0] sm:$0xff] }
0x178d   :  { %v12131_v43 = vpop.f32.mrf.mxu1 }
0x178e   :  { %14025 = vst [vmem:[#allocation33_spill] sm:$0xff] %v12131_v43  ;;  %v8680_v43 = vld [vmem:[#allocation2 + $0x1c8] sm:$0xff] }
0x178f   :  { %v12133_v16 = vpop.f32.mrf.mxu1 }
0x17cf   :  { %v12065_v45 = vpop.f32.mrf.mxu0 }
0x17d1   :  { %v12067_v55 = vpop.f32.mrf.mxu0 }
0x17d3   :  { %v12071_v53 = vpop.f32.mrf.mxu0 }
0x17d5   :  { %v12073_v61 = vpop.f32.mrf.mxu0 }
0x17d7   :  { %v12077_v32 = vpop.f32.mrf.mxu0 }
0x17d9   :  { %v12079_v63 = vpop.f32.mrf.mxu0 }
0x17db   :  { %v12083_v23 = vpop.f32.mrf.mxu0 }
0x17dd   :  { %v12085_v9 = vpop.f32.mrf.mxu0 }
0x17df   :  { %v12089_v56 = vpop.f32.mrf.mxu0 }
0x17e1   :  { %v12091_v39 = vpop.f32.mrf.mxu0 }
0x17e3   :  { %v12095_v29 = vpop.f32.mrf.mxu0 }
0x17e5   :  { %v12097_v26 = vpop.f32.mrf.mxu0 }
0x17e7   :  { %v12101_v40 = vpop.f32.mrf.mxu0 }
0x17e9   :  { %v12103_v5 = vpop.f32.mrf.mxu0 }
0x17eb   :  { %v12107_v21 = vpop.f32.mrf.mxu0 }
0x17ed   :  { %v12109_v60 = vpop.f32.mrf.mxu0 }
0x17ef   :  { %v12113_v46 = vpop.f32.mrf.mxu0 }
0x17f1   :  { %v12115_v57 = vpop.f32.mrf.mxu0 }
0x17f3   :  { %v12119_v22 = vpop.f32.mrf.mxu0 }
0x17f5   :  { %v4391_v47 = vpop.f32.mrf.mxu0 }
0x17f7   :  { %v4395_v33 = vpop.f32.mrf.mxu0 }
0x17f9   :  { %v4397_v4 = vpop.f32.mrf.mxu0 }
0x17fb   :  { %v4399_v15 = vpop.f32.mrf.mxu0 }
0x17fd   :  { %v4401_v7 = vpop.f32.mrf.mxu0 }
0x17ff   :  { %v4405_v48 = vpop.f32.mrf.mxu0 }
0x1801   :  { %v4407_v1 = vpop.f32.mrf.mxu0 }
0x1803   :  { %v4409_v3 = vpop.f32.mrf.mxu0 }
0x1804   :  { %v4410_v0 = vadd.f32 %v8679_v13, %v4409_v3  ;;  %v8689_v3 = vld [vmem:[#allocation2 + $0x180] sm:$0xff] }
0x1805   :  { %v4411_v2 = vpop.f32.mrf.mxu0 }
0x1806   :  { %v4412_v30 = vadd.f32 %v8677_v27, %v4411_v2 }
0x1807   :  { %v4415_v8 = vpop.f32.mrf.mxu0 }
0x1808   :  { %v4416_v35 = vadd.f32 %v8676_v38, %v4415_v8  ;;  %v8682_v38 = vld [vmem:[#allocation2 + $0x1b8] sm:$0xff] }
0x1809   :  { %v4417_v6 = vpop.f32.mrf.mxu0  ;;  %v4402_v2 = vadd.f32 %v8682_v38, %v4401_v7  ;;  %v8687_v7 = vld [vmem:[#allocation2 + $0x190] sm:$0xff] }
0x180a   :  { %v4418_v12 = vadd.f32 %v8674_v11, %v4417_v6  ;;  %v4408_v11 = vadd.f32 %v8680_v43, %v4407_v1  ;;  %v8681_v6 = vld [vmem:[#allocation2 + $0x1c0] sm:$0xff]  ;;  %v8691_v38 = vld [vmem:[#allocation2 + $0x170] sm:$0xff] }
0x180b   :  { %v4419_v37 = vpop.f32.mrf.mxu0  ;;  %v8685_v43 = vld [vmem:[#allocation2 + $0x1a0] sm:$0xff] }
0x180c   :  { %v4420_v24 = vadd.f32 %v8675_v42, %v4419_v37  ;;  %7761 = vtanh.f32 %v4418_v12  ;;  %v4406_v42 = vadd.f32 %v8681_v6, %v4405_v48  ;;  %v12139_v37 = vpop.f32.mrf.mxu1  ;;  %v8683_v12 = vld [vmem:[#allocation2 + $0x1b0] sm:$0xff]  ;;  %v8686_v48 = vld [vmem:[#allocation2 + $0x198] sm:$0xff] }
0x180d   :  { %v4421_v18 = vpop.f32.mrf.mxu0  ;;  %v4392_v1 = vadd.f32 %v8686_v48, %v4391_v47  ;;  %v8690_v47 = vld [vmem:[#allocation2 + $0x178] sm:$0xff] }
0x180e   :  { %v4422_v36 = vadd.f32 %v8678_v59, %v4421_v18  ;;  %7763 = vtanh.f32 %v4420_v24  ;;  %v4400_v18 = vadd.f32 %v8683_v12, %v4399_v15  ;;  %v8684_v24 = vld [vmem:[#allocation2 + $0x1a8] sm:$0xff]  ;;  %v4396_v59 = vadd.f32 %v8685_v43, %v4395_v33 }
0x180f   :  { %v12135_v14 = vpop.f32.mrf.mxu0  ;;  %v4398_v27 = vadd.f32 %v8684_v24, %v4397_v4  ;;  %v4386_v33 = vadd.f32 %v8689_v3, %v12113_v46 }
0x1810   :  { %7765 = vtanh.f32 %v4422_v36 }
0x1811   :  { %7767 = vtanh.f32 %v4416_v35  ;;  %v12137_v8 = vpop.f32.mrf.mxu0  ;;  %v12145_v35 = vpop.f32.mrf.mxu1 }
0x1812   :  { %7769 = vtanh.f32 %v4412_v30  ;;  %v4390_v30 = vadd.f32 %v8687_v7, %v12119_v22 }
0x1813   :  { %7771 = vtanh.f32 %v4410_v0  ;;  %v12141_v13 = vpop.f32.mrf.mxu0  ;;  %v8688_v0 = vld [vmem:[#allocation2 + $0x188] sm:$0xff]  ;;  %v12154_v6 = vpop.f32.mrf.mxu1 }
0x1814   :  { %7773 = vtanh.f32 %v4408_v11  ;;  %v4388_v4 = vadd.f32 %v8688_v0, %v12115_v57  ;;  %v8695_v0 = vld [vmem:[#allocation2 + $0x150] sm:$0xff] }
0x1815   :  { %7775 = vtanh.f32 %v4406_v42  ;;  %v12143_v36 = vpop.f32.mrf.mxu0  ;;  %v4382_v42 = vadd.f32 %v8690_v47, %v12109_v60  ;;  %v12164_v60 = vpop.f32.mrf.mxu1 }
0x1816   :  { %7777 = vtanh.f32 %v4402_v2  ;;  %v4380_v2 = vadd.f32 %v8691_v38, %v12107_v21 }
0x1817   :  { %7779 = vtanh.f32 %v4400_v18  ;;  %v12148_v15 = vpop.f32.mrf.mxu0  ;;  %v8692_v18 = vld [vmem:[#allocation2 + $0x168] sm:$0xff] }
0x1818   :  { %7781 = vtanh.f32 %v4398_v27  ;;  %v4378_v46 = vadd.f32 %v8692_v18, %v12103_v5  ;;  %v8693_v27 = vld [vmem:[#allocation2 + $0x160] sm:$0xff]  ;;  %v4370_v5 = vadd.f32 %v8695_v0, %v12095_v29  ;;  %v8698_v18 = vld [vmem:[#allocation2 + $0x138] sm:$0xff] }
0x1819   :  { %7783 = vtanh.f32 %v4396_v59  ;;  %v12152_v11 = vpop.f32.mrf.mxu0  ;;  %v7762_v22 = vpop.eup %7761  ;;  %v4376_v43 = vadd.f32 %v8693_v27, %v12101_v40  ;;  %v8702_v0 = vld [vmem:[#allocation2 + $0x118] sm:$0xff] }
0x181a   :  { %7785 = vtanh.f32 %v4392_v1  ;;  %v8694_v1 = vld [vmem:[#allocation2 + $0x158] sm:$0xff]  ;;  %v4854_v38 = vmul.f32 %v7762_v22, %v12075_v50 }
0x181b   :  { %7787 = vtanh.f32 %v4390_v30  ;;  %v12158_v12 = vpop.f32.mrf.mxu0  ;;  %v7764_v57 = vpop.eup %7763  ;;  %v4372_v21 = vadd.f32 %v8694_v1, %v12097_v26  ;;  %v8701_v1 = vld [vmem:[#allocation2 + $0x120] sm:$0xff] }
0x181c   :  { %7789 = vtanh.f32 %v4388_v4  ;;  %v4855_v4 = vmul.f32 %v7764_v57, %v12081_v25  ;;  %v12178_v25 = vpop.f32.mrf.mxu1 }
0x181d   :  { %v7766_v24 = vpop.eup %7765  ;;  %7791 = vtanh.f32 %v4386_v33  ;;  %v12162_v59 = vpop.f32.mrf.mxu0  ;;  %v8696_v33 = vld [vmem:[#allocation2 + $0x148] sm:$0xff] }
0x181e   :  { %v7768_v48 = vpop.eup %7767  ;;  %7793 = vtanh.f32 %v4382_v42  ;;  %v4856_v7 = vmul.f32 %v7766_v24, %v12087_v62  ;;  %v4368_v47 = vadd.f32 %v8696_v33, %v12091_v39  ;;  %v8697_v42 = vld [vmem:[#allocation2 + $0x140] sm:$0xff]  ;;  %v4362_v39 = vadd.f32 %v8698_v18, %v12085_v9 }
0x181f   :  { %v7770_v30 = vpop.eup %7769  ;;  %7795 = vtanh.f32 %v4380_v2  ;;  %v12170_v40 = vpop.f32.mrf.mxu0  ;;  %v4366_v62 = vadd.f32 %v8697_v42, %v12089_v56  ;;  %v4853_v29 = vmul.f32 %v7768_v48, %v12069_v51 }
0x1820   :  { %v7772_v3 = vpop.eup %7771  ;;  %7797 = vtanh.f32 %v4378_v46  ;;  %4889 = vmatprep.subr.mxu0 %v4856_v7  ;;  %v4852_v50 = vmul.f32 %v7770_v30, %v12063_v34  ;;  %v8699_v46 = vld [vmem:[#allocation2 + $0x130] sm:$0xff] }
0x1821   :  { %v7774_v26 = vpop.eup %7773  ;;  %7799 = vtanh.f32 %v4376_v43  ;;  %v12176_v2 = vpop.f32.mrf.mxu0  ;;  %4890 = vmatpush1.msra.mxu0 %v4855_v4  ;;  %v4360_v56 = vadd.f32 %v8699_v46, %v12083_v23  ;;  %v4851_v51 = vmul.f32 %v7772_v3, %v12061_v17  ;;  %v8700_v43 = vld [vmem:[#allocation2 + $0x128] sm:$0xff]  ;;  %v8703_v4 = vld [vmem:[#allocation2 + $0x110] sm:$0xff] }
0x1822   :  { %v7776_v57 = vpop.eup %7775  ;;  %7801 = vtanh.f32 %v4372_v21  ;;  %4891 = vmatprep.subr.mxu0 %v4854_v38  ;;  %v4358_v48 = vadd.f32 %v8700_v43, %v12079_v63  ;;  %v4850_v9 = vmul.f32 %v7774_v26, %v12059_v31  ;;  %v4356_v21 = vadd.f32 %v8701_v1, %v12077_v32  ;;  %v12192_v17 = vpop.f32.mrf.mxu1  ;;  %v8705_v26 = vld [vmem:[#allocation2 + $0x100] sm:$0xff] }
0x1823   :  { %v7778_v22 = vpop.eup %7777  ;;  %7803 = vtanh.f32 %v4370_v5  ;;  %v12184_v24 = vpop.f32.mrf.mxu0  ;;  %4892 = vmatpush1.msra.mxu0 %v4853_v29  ;;  %v4849_v23 = vmul.f32 %v7776_v57, %v12057_v54  ;;  %v4352_v63 = vadd.f32 %v8702_v0, %v12073_v61  ;;  %v4350_v32 = vadd.f32 %v8703_v4, %v12071_v53 }
0x1824   :  { %v7780_v27 = vpop.eup %7779  ;;  %7805 = vtanh.f32 %v4368_v47  ;;  %4893 = vmatprep.subr.mxu0 %v4852_v50  ;;  %v4848_v31 = vmul.f32 %v7778_v22, %v12055_v19  ;;  %v8704_v47 = vld [vmem:[#allocation2 + $0x108] sm:$0xff]  ;;  %v4346_v42 = vadd.f32 %v8705_v26, %v12065_v45 }
0x1825   :  { %v7782_v34 = vpop.eup %7781  ;;  %7807 = vtanh.f32 %v4366_v62  ;;  %v12190_v7 = vpop.f32.mrf.mxu0  ;;  %4894 = vmatpush1.msra.mxu0 %v4851_v51  ;;  %v4847_v54 = vmul.f32 %v7780_v27, %v12053_v58  ;;  %v4348_v38 = vadd.f32 %v8704_v47, %v12067_v55  ;;  %v14026_v51 = vld [vmem:[#allocation9_spill] sm:$0xff] }
0x1826   :  { %v7784_v30 = vpop.eup %7783  ;;  %7809 = vtanh.f32 %v4362_v39  ;;  %4895 = vmatprep.subr.mxu0 %v4850_v9  ;;  %v4846_v61 = vmul.f32 %v7782_v34, %v12051_v20  ;;  %v12206_v58 = vpop.f32.mrf.mxu1  ;;  %v14028_v34 = vld [vmem:[#allocation25_spill] sm:$0xff] }
0x1827   :  { %v7786_v5 = vpop.eup %7785  ;;  %7811 = vtanh.f32 %v4360_v56  ;;  %v12198_v3 = vpop.f32.mrf.mxu0  ;;  %4896 = vmatpush1.msra.mxu0 %v4849_v23  ;;  %v4845_v53 = vmul.f32 %v7784_v30, %v12049_v49  ;;  %v14029_v30 = vld [vmem:[#allocation24_spill] sm:$0xff] }
0x1828   :  { %v7788_v33 = vpop.eup %7787  ;;  %7813 = vtanh.f32 %v4358_v48  ;;  %4897 = vmatprep.subr.mxu0 %v4848_v31  ;;  %v4844_v55 = vmul.f32 %v7786_v5, %v12047_v28  ;;  %v12216_v28 = vpop.f32.mrf.mxu1  ;;  %v14027_v48 = vld [vmem:[#allocation26_spill] sm:$0xff]  ;;  %v14030_v31 = vld [vmem:[#allocation23_spill] sm:$0xff] }
0x1829   :  { %v7790_v19 = vpop.eup %7789  ;;  %7815 = vtanh.f32 %v4356_v21  ;;  %v12204_v62 = vpop.f32.mrf.mxu0  ;;  %4898 = vmatpush1.msra.mxu0 %v4847_v54  ;;  %v4843_v20 = vmul.f32 %v7788_v33, %v12045_v52  ;;  %v14031_v54 = vld [vmem:[#allocation22_spill] sm:$0xff] }
0x182a   :  { %v7792_v29 = vpop.eup %7791  ;;  %7817 = vtanh.f32 %v4352_v63  ;;  %4899 = vmatprep.subr.mxu0 %v4846_v61  ;;  %v4842_v49 = vmul.f32 %v7790_v19, %v12043_v10  ;;  %v12226_v23 = vpop.f32.mrf.mxu1 }
0x182b   :  { %v7794_v57 = vpop.eup %7793  ;;  %7819 = vtanh.f32 %v4350_v32  ;;  %v12210_v18 = vpop.f32.mrf.mxu0  ;;  %4900 = vmatpush1.msra.mxu0 %v4845_v53  ;;  %v4841_v50 = vmul.f32 %v7792_v29, %v12041_v44  ;;  %v14033_v53 = vld [vmem:[#allocation20_spill] sm:$0xff] }
0x182c   :  { %v7796_v45 = vpop.eup %7795  ;;  %7821 = vtanh.f32 %v4348_v38  ;;  %4901 = vmatprep.subr.mxu0 %v4844_v55  ;;  %v4840_v52 = vmul.f32 %v7794_v57, %v12039_v41  ;;  %v14032_v38 = vld [vmem:[#allocation21_spill] sm:$0xff]  ;;  %v12236_v26 = vpop.f32.mrf.mxu1  ;;  %v14034_v57 = vld [vmem:[#allocation19_spill] sm:$0xff] }
0x182d   :  { %v7798_v39 = vpop.eup %7797  ;;  %7823 = vtanh.f32 %v4346_v42  ;;  %v12214_v22 = vpop.f32.mrf.mxu0  ;;  %4902 = vmatpush1.msra.mxu0 %v4843_v20  ;;  %v4839_v27 = vmul.f32 %v7796_v45, %v14026_v51 }
0x182e   :  { %v7800_v46 = vpop.eup %7799  ;;  %4903 = vmatprep.subr.mxu0 %v4842_v49  ;;  %v4838_v9 = vmul.f32 %v7798_v39, %v14027_v48  ;;  %v14035_v39 = vld [vmem:[#allocation18_spill] sm:$0xff]  ;;  %v14037_v48 = vld [vmem:[#allocation16_spill] sm:$0xff] }
0x182f   :  { %v7802_v56 = vpop.eup %7801  ;;  %v12220_v43 = vpop.f32.mrf.mxu0  ;;  %4904 = vmatpush1.msra.mxu0 %v4841_v50  ;;  %v4837_v1 = vmul.f32 %v7800_v46, %v14028_v34 }
0x1830   :  { %v7804_v10 = vpop.eup %7803  ;;  %4905 = vmatprep.subr.mxu0 %v4840_v52  ;;  %v4836_v0 = vmul.f32 %v7802_v56, %v14029_v30  ;;  %v14036_v52 = vld [vmem:[#allocation17_spill] sm:$0xff] }
0x1831   :  { %v7806_v44 = vpop.eup %7805  ;;  %v12224_v21 = vpop.f32.mrf.mxu0  ;;  %4906 = vmatpush1.msra.mxu0 %v4839_v27  ;;  %v4835_v5 = vmul.f32 %v7804_v10, %v14030_v31 }
0x1832   :  { %v7808_v41 = vpop.eup %7807  ;;  %4907 = vmatprep.subr.mxu0 %v4838_v9  ;;  %v4834_v33 = vmul.f32 %v7806_v44, %v14031_v54  ;;  %v12244_v27 = vpop.f32.mrf.mxu1  ;;  %v14038_v44 = vld [vmem:[#allocation48_spill] sm:$0xff] }
0x1833   :  { %v7810_v63 = vpop.eup %7809  ;;  %v12230_v4 = vpop.f32.mrf.mxu0  ;;  %4908 = vmatpush1.msra.mxu0 %v4837_v1  ;;  %v4833_v61 = vmul.f32 %v7808_v41, %v14032_v38  ;;  %v14039_v41 = vld [vmem:[#allocation47_spill] sm:$0xff] }
0x1834   :  { %v7812_v32 = vpop.eup %7811  ;;  %4909 = vmatprep.subr.mxu0 %v4836_v0  ;;  %v4832_v29 = vmul.f32 %v7810_v63, %v14033_v53  ;;  %v14040_v0 = vld [vmem:[#allocation46_spill] sm:$0xff] }
0x1835   :  { %v7814_v47 = vpop.eup %7813  ;;  %v12234_v19 = vpop.f32.mrf.mxu0  ;;  %4910 = vmatpush1.msra.mxu0 %v4835_v5  ;;  %v4831_v20 = vmul.f32 %v7812_v32, %v14034_v57 }
0x1836   :  { %v7816_v42 = vpop.eup %7815  ;;  %4911 = vmatprep.subr.mxu0 %v4834_v33  ;;  %v4830_v50 = vmul.f32 %v7814_v47, %v14035_v39  ;;  %v12250_v5 = vpop.f32.mrf.mxu1 }
0x1837   :  { %v7818_v55 = vpop.eup %7817  ;;  %v12240_v45 = vpop.f32.mrf.mxu0  ;;  %4912 = vmatpush1.msra.mxu0 %v4833_v61  ;;  %v4829_v56 = vmul.f32 %v7816_v42, %v14036_v52 }
0x1838   :  { %v7820_v49 = vpop.eup %7819  ;;  %4913 = vmatprep.subr.mxu0 %v4832_v29  ;;  %v4828_v9 = vmul.f32 %v7818_v55, %v14037_v48  ;;  %v12252_v33 = vpop.f32.mrf.mxu1  ;;  %v8706_v55 = vld [vmem:[#allocation2 + $0x2e8] sm:$0xff] }
0x1839   :  { %v7822_v46 = vpop.eup %7821  ;;  %v4477_v51 = vpop.f32.mrf.mxu0  ;;  %4914 = vmatpush1.msra.mxu0 %v4831_v20  ;;  %v4827_v34 = vmul.f32 %v7820_v49, %v14038_v44  ;;  %v8707_v49 = vld [vmem:[#allocation2 + $0x2f0] sm:$0xff] }
0x183a   :  { %v7824_v10 = vpop.eup %7823  ;;  %4915 = vmatprep.subr.mxu0 %v4830_v50  ;;  %v4826_v30 = vmul.f32 %v7822_v46, %v14039_v41  ;;  %v12254_v61 = vpop.f32.mrf.mxu1  ;;  %v8708_v50 = vld [vmem:[#allocation2 + $0x2e0] sm:$0xff] }
0x183b   :  { %v4479_v1 = vpop.f32.mrf.mxu0  ;;  %4916 = vmatpush1.msra.mxu0 %v4829_v56  ;;  %v4825_v63 = vmul.f32 %v7824_v10, %v14040_v0  ;;  %v8709_v10 = vld [vmem:[#allocation2 + $0x2d8] sm:$0xff] }
0x183c   :  { %4917 = vmatprep.subr.mxu0 %v4828_v9  ;;  %v12256_v29 = vpop.f32.mrf.mxu1  ;;  %v8710_v9 = vld [vmem:[#allocation2 + $0x2f8] sm:$0xff] }
0x183d   :  { %v4481_v31 = vpop.f32.mrf.mxu0  ;;  %4918 = vmatpush1.msra.mxu0 %v4827_v34  ;;  %v8711_v34 = vld [vmem:[#allocation2 + $0x2d0] sm:$0xff] }
0x183e   :  { %4919 = vmatprep.subr.mxu0 %v4826_v30  ;;  %v12258_v56 = vpop.f32.mrf.mxu1  ;;  %v8712_v30 = vld [vmem:[#allocation2 + $0x2c8] sm:$0xff] }
0x183f   :  { %v4485_v32 = vpop.f32.mrf.mxu0  ;;  %4920 = vmatpush1.msra.mxu0 %v4825_v63  ;;  %v8713_v63 = vld [vmem:[#allocation2 + $0x2c0] sm:$0xff] }
0x1841   :  { %v4487_v54 = vpop.f32.mrf.mxu0 }
0x1842   :  { %v4488_v0 = vadd.f32 %v8712_v30, %v4487_v54  ;;  %v8724_v30 = vld [vmem:[#allocation2 + $0x268] sm:$0xff] }
0x1843   :  { %v4489_v47 = vpop.f32.mrf.mxu0 }
0x1844   :  { %v4490_v41 = vadd.f32 %v8711_v34, %v4489_v47 }
0x1845   :  { %v4491_v38 = vpop.f32.mrf.mxu0 }
0x1846   :  { %v4492_v48 = vadd.f32 %v8709_v10, %v4491_v38  ;;  %v8716_v38 = vld [vmem:[#allocation2 + $0x2a8] sm:$0xff] }
0x1847   :  { %v4495_v42 = vpop.f32.mrf.mxu0 }
0x1848   :  { %v4496_v46 = vadd.f32 %v8708_v50, %v4495_v42  ;;  %v8714_v42 = vld [vmem:[#allocation2 + $0x2b8] sm:$0xff] }
0x1849   :  { %v4497_v53 = vpop.f32.mrf.mxu0 }
0x184a   :  { %v4498_v57 = vadd.f32 %v8706_v55, %v4497_v53  ;;  %v4486_v53 = vadd.f32 %v8713_v63, %v4485_v32  ;;  %v12260_v55 = vpop.f32.mrf.mxu1  ;;  %v8725_v63 = vld [vmem:[#allocation2 + $0x260] sm:$0xff] }
0x184b   :  { %v4499_v20 = vpop.f32.mrf.mxu0 }
0x184c   :  { %v4500_v39 = vadd.f32 %v8707_v49, %v4499_v20  ;;  %7825 = vtanh.f32 %v4498_v57  ;;  %v4482_v20 = vadd.f32 %v8714_v42, %v4481_v31  ;;  %v8715_v49 = vld [vmem:[#allocation2 + $0x2b0] sm:$0xff]  ;;  %v4478_v57 = vadd.f32 %v8716_v38, %v4477_v51  ;;  %v4816_v54 = vpop.f32.mrf.mxu1  ;;  %v8720_v31 = vld [vmem:[#allocation2 + $0x288] sm:$0xff] }
0x184d   :  { %v4501_v52 = vpop.f32.mrf.mxu0  ;;  %v4480_v50 = vadd.f32 %v8715_v49, %v4479_v1  ;;  %v4468_v1 = vadd.f32 %v8720_v31, %v12224_v21  ;;  %v8730_v31 = vld [vmem:[#allocation2 + $0x238] sm:$0xff] }
0x184e   :  { %v4502_v44 = vadd.f32 %v8710_v9, %v4501_v52  ;;  %7827 = vtanh.f32 %v4500_v39  ;;  %v8717_v52 = vld [vmem:[#allocation2 + $0x2a0] sm:$0xff]  ;;  %v8718_v39 = vld [vmem:[#allocation2 + $0x298] sm:$0xff]  ;;  %v4820_v9 = vpop.f32.mrf.mxu1 }
0x184f   :  { %v4476_v47 = vadd.f32 %v8717_v52, %v12240_v45  ;;  %v4472_v32 = vadd.f32 %v8718_v39, %v12234_v19  ;;  %v8722_v45 = vld [vmem:[#allocation2 + $0x278] sm:$0xff]  ;;  %v8723_v19 = vld [vmem:[#allocation2 + $0x270] sm:$0xff]  ;;  %v8728_v52 = vld [vmem:[#allocation2 + $0x248] sm:$0xff] }
0x1850   :  { %7829 = vtanh.f32 %v4502_v44  ;;  %v4462_v44 = vadd.f32 %v8722_v45, %v12214_v22 }
0x1851   :  { %7831 = vtanh.f32 %v4496_v46  ;;  %v8719_v46 = vld [vmem:[#allocation2 + $0x290] sm:$0xff] }
0x1852   :  { %7833 = vtanh.f32 %v4492_v48  ;;  %v4470_v10 = vadd.f32 %v8719_v46, %v12230_v4  ;;  %v8721_v48 = vld [vmem:[#allocation2 + $0x280] sm:$0xff] }
0x1853   :  { %7835 = vtanh.f32 %v4490_v41  ;;  %v4466_v51 = vadd.f32 %v8721_v48, %v12220_v43  ;;  %v4460_v41 = vadd.f32 %v8723_v19, %v12210_v18  ;;  %v4456_v43 = vadd.f32 %v8725_v63, %v12198_v3  ;;  %v8727_v18 = vld [vmem:[#allocation2 + $0x250] sm:$0xff]  ;;  %v8734_v19 = vld [vmem:[#allocation2 + $0x218] sm:$0xff]  ;;  %v8737_v63 = vld [vmem:[#allocation2 + $0x200] sm:$0xff] }
0x1854   :  { %7837 = vtanh.f32 %v4488_v0  ;;  %v4458_v0 = vadd.f32 %v8724_v30, %v12204_v62  ;;  %v4450_v38 = vadd.f32 %v8727_v18, %v12184_v24  ;;  %v4442_v24 = vadd.f32 %v8730_v31, %v12162_v59  ;;  %v8731_v48 = vld [vmem:[#allocation2 + $0x230] sm:$0xff] }
0x1855   :  { %7839 = vtanh.f32 %v4486_v53  ;;  %v4822_v53 = vpop.f32.mrf.mxu1 }
0x1856   :  { %7841 = vtanh.f32 %v4482_v20  ;;  %v8726_v20 = vld [vmem:[#allocation2 + $0x258] sm:$0xff] }
0x1857   :  { %7843 = vtanh.f32 %v4480_v50  ;;  %v4452_v22 = vadd.f32 %v8726_v20, %v12190_v7 }
0x1858   :  { %7845 = vtanh.f32 %v4478_v57 }
0x1859   :  { %7847 = vtanh.f32 %v4476_v47  ;;  %v7826_v34 = vpop.eup %7825  ;;  %v4448_v47 = vadd.f32 %v8728_v52, %v12176_v2 }
0x185a   :  { %7849 = vtanh.f32 %v4472_v32  ;;  %v4886_v3 = vmul.f32 %v7826_v34, %v4816_v54  ;;  %v8729_v32 = vld [vmem:[#allocation2 + $0x240] sm:$0xff]  ;;  %v4440_v54 = vadd.f32 %v8731_v48, %v12158_v12  ;;  %v14047_v48 = vld [vmem:[#allocation39_spill] sm:$0xff] }
0x185b   :  { %7851 = vtanh.f32 %v4470_v10  ;;  %v7828_v4 = vpop.eup %7827  ;;  %v4446_v46 = vadd.f32 %v8729_v32, %v12170_v40 }
0x185c   :  { %7853 = vtanh.f32 %v4468_v1  ;;  %v4887_v57 = vmul.f32 %v7828_v4, %v4820_v9  ;;  %v8732_v9 = vld [vmem:[#allocation2 + $0x228] sm:$0xff]  ;;  %v8735_v4 = vld [vmem:[#allocation2 + $0x210] sm:$0xff] }
0x185d   :  { %v7830_v21 = vpop.eup %7829  ;;  %7855 = vtanh.f32 %v4466_v51 }
0x185e   :  { %v7832_v42 = vpop.eup %7831  ;;  %7857 = vtanh.f32 %v4462_v44  ;;  %v4888_v49 = vmul.f32 %v7830_v21, %v4822_v53  ;;  %v8733_v44 = vld [vmem:[#allocation2 + $0x220] sm:$0xff] }
0x185f   :  { %v7834_v50 = vpop.eup %7833  ;;  %7859 = vtanh.f32 %v4460_v41  ;;  %v4885_v7 = vmul.f32 %v7832_v42, %v12260_v55  ;;  %v4438_v55 = vadd.f32 %v8732_v9, %v12152_v11 }
0x1860   :  { %v7836_v62 = vpop.eup %7835  ;;  %7861 = vtanh.f32 %v4458_v0  ;;  %4921 = vmatprep.subr.mxu0 %v4888_v49  ;;  %v4884_v1 = vmul.f32 %v7834_v50, %v12258_v56  ;;  %v4436_v56 = vadd.f32 %v8733_v44, %v12148_v15  ;;  %v8736_v0 = vld [vmem:[#allocation2 + $0x208] sm:$0xff] }
0x1861   :  { %v7838_v39 = vpop.eup %7837  ;;  %7863 = vtanh.f32 %v4456_v43  ;;  %4922 = vmatpush2.msra.mxu0 %v4887_v57  ;;  %v4883_v51 = vmul.f32 %v7836_v62, %v12256_v29  ;;  %v4432_v29 = vadd.f32 %v8734_v19, %v12143_v36  ;;  %v14041_v62 = vld [vmem:[#allocation33_spill] sm:$0xff]  ;;  %v8739_v19 = vld [vmem:[%s13625_s4 + $0x18] sm:$0xff] }
0x1862   :  { %v7840_v10 = vpop.eup %7839  ;;  %7865 = vtanh.f32 %v4452_v22  ;;  %4923 = vmatprep.subr.mxu0 %v4886_v3  ;;  %v4882_v45 = vmul.f32 %v7838_v39, %v12254_v61  ;;  %v4430_v61 = vadd.f32 %v8735_v4, %v12141_v13  ;;  %v14043_v39 = vld [vmem:[#allocation43_spill] sm:$0xff] }
0x1863   :  { %v7842_v2 = vpop.eup %7841  ;;  %7867 = vtanh.f32 %v4450_v38  ;;  %4924 = vmatpush2.msra.mxu0 %v4885_v7  ;;  %v4881_v34 = vmul.f32 %v7840_v10, %v12252_v33  ;;  %v4428_v33 = vadd.f32 %v8736_v0, %v12137_v8  ;;  %v14045_v10 = vld [vmem:[#allocation41_spill] sm:$0xff]  ;;  %v8743_v4 = vld [vmem:[%s13625_s4 + $0x38] sm:$0xff] }
0x1864   :  { %v7844_v40 = vpop.eup %7843  ;;  %7869 = vtanh.f32 %v4448_v47  ;;  %4925 = vmatprep.subr.mxu0 %v4884_v1  ;;  %v4880_v41 = vmul.f32 %v7842_v2, %v12250_v5  ;;  %v4426_v5 = vadd.f32 %v8737_v63, %v12135_v14  ;;  %v14042_v47 = vld [vmem:[#allocation44_spill] sm:$0xff] }
0x1865   :  { %v7846_v59 = vpop.eup %7845  ;;  %7871 = vtanh.f32 %v4446_v46  ;;  %4926 = vmatpush2.msra.mxu0 %v4883_v51  ;;  %v4879_v30 = vmul.f32 %v7844_v40, %v12244_v27  ;;  %v14044_v46 = vld [vmem:[#allocation42_spill] sm:$0xff] }
0x1866   :  { %v7848_v12 = vpop.eup %7847  ;;  %7873 = vtanh.f32 %v4442_v24  ;;  %4927 = vmatprep.subr.mxu0 %v4882_v45  ;;  %v4878_v21 = vmul.f32 %v7846_v59, %v12236_v26  ;;  %v14046_v24 = vld [vmem:[#allocation40_spill] sm:$0xff]  ;;  %v14048_v40 = vld [vmem:[#allocation38_spill] sm:$0xff] }
0x1867   :  { %v7850_v11 = vpop.eup %7849  ;;  %7875 = vtanh.f32 %v4440_v54  ;;  %4928 = vmatpush2.msra.mxu0 %v4881_v34  ;;  %v4877_v43 = vmul.f32 %v7848_v12, %v12226_v23  ;;  %v14050_v59 = vld [vmem:[#allocation36_spill] sm:$0xff] }
0x1868   :  { %v7852_v15 = vpop.eup %7851  ;;  %7877 = vtanh.f32 %v4438_v55  ;;  %4929 = vmatprep.subr.mxu0 %v4880_v41  ;;  %v4876_v27 = vmul.f32 %v7850_v11, %v12216_v28  ;;  %v14049_v55 = vld [vmem:[#allocation37_spill] sm:$0xff]  ;;  %v8738_v12 = vld [vmem:[%s13625_s4] sm:$0xff] }
0x1869   :  { %v7854_v36 = vpop.eup %7853  ;;  %7879 = vtanh.f32 %v4436_v56  ;;  %4930 = vmatpush2.msra.mxu0 %v4879_v30  ;;  %v4875_v8 = vmul.f32 %v7852_v15, %v12206_v58  ;;  %v14051_v56 = vld [vmem:[#allocation35_spill] sm:$0xff]  ;;  %v8741_v41 = vld [vmem:[%s13625_s4 + $0x28] sm:$0xff]  ;;  %v8742_v11 = vld [vmem:[%s13625_s4 + $0x20] sm:$0xff]  ;;  %v14052_v30 = vmov 0  }
0x186a   :  { %v7856_v13 = vpop.eup %7855  ;;  %7881 = vtanh.f32 %v4432_v29  ;;  %4931 = vmatprep.subr.mxu0 %v4878_v21  ;;  %v4874_v42 = vmul.f32 %v7854_v36, %v12192_v17  ;;  %v8740_v29 = vld [vmem:[%s13625_s4 + $0x10] sm:$0xff] }
0x186b   :  { %v7858_v53 = vpop.eup %7857  ;;  %7883 = vtanh.f32 %v4430_v61  ;;  %4932 = vmatpush2.msra.mxu0 %v4877_v43  ;;  %v4873_v23 = vmul.f32 %v7856_v13, %v12178_v25  ;;  %v8744_v61 = vld [vmem:[%s13625_s4 + $0x30] sm:$0xff] }
0x186c   :  { %v7860_v26 = vpop.eup %7859  ;;  %7885 = vtanh.f32 %v4428_v33  ;;  %4933 = vmatprep.subr.mxu0 %v4876_v27  ;;  %v4872_v22 = vmul.f32 %v7858_v53, %v12164_v60  ;;  %v14053_v43 = vld [vmem:[#allocation10_spill] sm:$0xff]  ;;  %v14055_v53 = vld [vmem:[#allocation11_spill] sm:$0xff] }
0x186d   :  { %v7862_v14 = vpop.eup %7861  ;;  %7887 = vtanh.f32 %v4426_v5  ;;  %4934 = vmatpush2.msra.mxu0 %v4875_v8  ;;  %v4871_v49 = vmul.f32 %v7860_v26, %v12154_v6  ;;  %v14057_v26 = vld [vmem:[#allocation12_spill] sm:$0xff] }
0x186e   :  { %v7864_v20 = vpop.eup %7863  ;;  %4935 = vmatprep.subr.mxu0 %v4874_v42  ;;  %v4870_v50 = vmul.f32 %v7862_v14, %v12145_v35  ;;  %v14059_v14 = vld [vmem:[#allocation13_spill] sm:$0xff] }
0x186f   :  { %v7866_v28 = vpop.eup %7865  ;;  %4936 = vmatpush2.msra.mxu0 %v4873_v23  ;;  %v4869_v17 = vmul.f32 %v7864_v20, %v12139_v37  ;;  %v14061_v20 = vld [vmem:[#allocation14_spill] sm:$0xff] }
0x1870   :  { %v7868_v58 = vpop.eup %7867  ;;  %4937 = vmatprep.subr.mxu0 %v4872_v22  ;;  %v4868_v25 = vmul.f32 %v7866_v28, %v12133_v16  ;;  %v14063_v28 = vld [vmem:[#allocation15_spill] sm:$0xff] }
0x1871   :  { %v7870_v18 = vpop.eup %7869  ;;  %4938 = vmatpush2.msra.mxu0 %v4871_v49  ;;  %v4867_v60 = vmul.f32 %v7868_v58, %v14041_v62 }
0x1872   :  { %v7872_v38 = vpop.eup %7871  ;;  %4939 = vmatprep.subr.mxu0 %v4870_v50  ;;  %v4866_v6 = vmul.f32 %v7870_v18, %v14042_v47  ;;  %v14065_v50 = vld [vmem:[#allocation45_spill] sm:$0xff] }
0x1873   :  { %v7874_v57 = vpop.eup %7873  ;;  %4940 = vmatpush2.msra.mxu0 %v4869_v17  ;;  %v4865_v35 = vmul.f32 %v7872_v38, %v14043_v39 }
0x1874   :  { %v7876_v52 = vpop.eup %7875  ;;  %4941 = vmatprep.subr.mxu0 %v4868_v25  ;;  %v4864_v37 = vmul.f32 %v7874_v57, %v14044_v46  ;;  %v14067_v25 = vld [vmem:[#allocation34_spill] sm:$0xff] }
0x1875   :  { %v7878_v3 = vpop.eup %7877  ;;  %4942 = vmatpush2.msra.mxu0 %v4867_v60  ;;  %v4863_v16 = vmul.f32 %v7876_v52, %v14045_v10  ;;  %v8745_v60 = vld [vmem:[%s13623_s2] sm:$0xff]   ;;  %v8746_v52 = vld [vmem:[%s13623_s2 + $0x8] sm:$0xff]  }
0x1876   :  { %v7880_v32 = vpop.eup %7879  ;;  %4943 = vmatprep.subr.mxu0 %v4866_v6  ;;  %v4862_v1 = vmul.f32 %v7878_v3, %v14046_v24  ;;  %v8748_v10 = vld [vmem:[#allocation2 + $0x68] sm:$0xff] }
0x1877   :  { %v7882_v7 = vpop.eup %7881  ;;  %4944 = vmatpush2.msra.mxu0 %v4865_v35  ;;  %v4861_v54 = vmul.f32 %v7880_v32, %v14047_v48 }
0x1878   :  { %v7884_v31 = vpop.eup %7883  ;;  %4945 = vmatprep.subr.mxu0 %v4864_v37  ;;  %v4860_v9 = vmul.f32 %v7882_v7, %v14048_v40  ;;  %v8747_v37 = vld [vmem:[#allocation2 + $0x58] sm:$0xff] }
0x1879   :  { %v7886_v2 = vpop.eup %7885  ;;  %4946 = vmatpush2.msra.mxu0 %v4863_v16  ;;  %v4859_v45 = vmul.f32 %v7884_v31, %v14049_v55  ;;  %v8749_v31 = vld [vmem:[#allocation2 + $0x70] sm:$0xff]  ;;  %v8752_v40 = vld [vmem:[#allocation2 + $0x78] sm:$0xff] }
0x187a   :  { %v7888_v51 = vpop.eup %7887  ;;  %4947 = vmatprep.subr.mxu0 %v4862_v1  ;;  %v4858_v44 = vmul.f32 %v7886_v2, %v14050_v59  ;;  %v8750_v1 = vld [vmem:[#allocation2 + $0x60] sm:$0xff]  ;;  %v8753_v55 = vld [vmem:[#allocation2 + $0x50] sm:$0xff] }
0x187b   :  { %4948 = vmatpush2.msra.mxu0 %v4861_v54  ;;  %v4857_v34 = vmul.f32 %v7888_v51, %v14051_v56  ;;  %v8751_v54 = vld [vmem:[#allocation2 + $0x48] sm:$0xff] }
0x187c   :  { %4949 = vmatprep.subr.mxu0 %v4860_v9 }
0x187d   :  { %4950 = vmatpush2.msra.mxu0 %v4859_v45 }
0x187e   :  { %4951 = vmatprep.subr.mxu0 %v4858_v44 }
0x187f   :  { %4952 = vmatpush2.msra.mxu0 %v4857_v34 }
0x1880   :  { %4954 = vmatmul.mubr.f32.vlgmr.msra.gmra.mxu0 %v8738_v12  ;;  %v8754_v12 = vld [vmem:[#allocation2 + $0x40] sm:$0xff] }
0x1881   :  { %4959 = vmatprep.mubr.f32.mxu0 %v8739_v19 }
0x1884   :  { %4960 = vmatmul.mubr.f32.gmra.mxu0 %v8740_v29 }
0x1885   :  { %4965 = vmatprep.mubr.f32.mxu0 %v8741_v41 }
0x1888   :  { %4966 = vmatmul.mubr.f32.gmra.mxu0 %v8742_v11 }
0x1889   :  { %4971 = vmatprep.mubr.f32.mxu0 %v8743_v4 }
0x188c   :  { %4972 = vmatmul.mubr.f32.gmra.mxu0 %v8744_v61 }
0x188d   :  { %5089 = vmatprep.mubr.bf16.mxu0 %v14052_v30 }
0x1940   :  { %v4955_v15 = vpop.f32.mrf.mxu0 }
0x1941   :  { %v12362_v57 = vadd.f32 %v4955_v15, %v14067_v25  ;;  %v8760_v25 = vld [vmem:[#allocation2 + $0xa0] sm:$0xff] }
0x1942   :  { %v4957_v0 = vpop.f32.mrf.mxu0 }
0x1943   :  { %v12350_v49 = vadd.f32 %v4957_v0, %v14063_v28  ;;  %14068 = vst [vmem:[#allocation9_spill] sm:$0xff] %v12362_v57 }
0x1944   :  { %v4961_v33 = vpop.f32.mrf.mxu0 }
0x1945   :  { %14064 = vst [vmem:[#allocation27_spill] sm:$0xff] %v12350_v49  ;;  %v12355_v18 = vadd.f32 %v4961_v33, %v14065_v50 }
0x1946   :  { %v4963_v21 = vpop.f32.mrf.mxu0 }
0x1947   :  { %v12338_v8 = vadd.f32 %v4963_v21, %v14055_v53  ;;  %14066 = vst [vmem:[#allocation8_spill] sm:$0xff] %v12355_v18  ;;  %v4988_v62 = vpack.c.bf16 %v12355_v18, %v12362_v57  ;;  %v8755_v21 = vld [vmem:[%s13623_s2 + $0x10] sm:$0xff]  }
0x1948   :  { %v4967_v36 = vpop.f32.mrf.mxu0 }
0x1949   :  { %14056 = vst [vmem:[#allocation31_spill] sm:$0xff] %v12338_v8  ;;  %v12347_v22 = vadd.f32 %v4967_v36, %v14061_v20  ;;  %v4989_v38 = vpack.c.bf16 %v12338_v8, %v12350_v49  ;;  %v8756_v36 = vld [vmem:[%s13623_s2 + $0x18] sm:$0xff]  }
0x194a   :  { %v4969_v63 = vpop.f32.mrf.mxu0  ;;  %v8757_v20 = vld [vmem:[#allocation2 + $0x98] sm:$0xff] }
0x194b   :  { %v12341_v42 = vadd.f32 %v4969_v63, %v14057_v26  ;;  %14062 = vst [vmem:[#allocation28_spill] sm:$0xff] %v12347_v22 }
0x194c   :  { %v4973_v5 = vpop.f32.mrf.mxu0 }
0x194d   :  { %v12335_v13 = vadd.f32 %v4973_v5, %v14053_v43  ;;  %14058 = vst [vmem:[#allocation30_spill] sm:$0xff] %v12341_v42 }
0x194e   :  { %v4975_v27 = vpop.f32.mrf.mxu0 }
0x194f   :  { %14054 = vst [vmem:[#allocation32_spill] sm:$0xff] %v12335_v13  ;;  %v12344_v23 = vadd.f32 %v4975_v27, %v14059_v14  ;;  %v4990_v17 = vpack.c.bf16 %v12335_v13, %v12347_v22 }
0x1951   :  { %14060 = vst [vmem:[#allocation29_spill] sm:$0xff] %v12344_v23  ;;  %v4991_v58 = vpack.c.bf16 %v12344_v23, %v12341_v42 }
0x1953   :  { %5004 = vmatprep.subr.bf16.mxu1 %v4991_v58  ;;  %v8758_v58 = vld [vmem:[#allocation2 + $0xa8] sm:$0xff] }
0x1954   :  { %5005 = vmatpush1.bf16.msra.mxu1 %v4990_v17  ;;  %v8759_v17 = vld [vmem:[#allocation2 + $0xb0] sm:$0xff] }
0x1955   :  { %5006 = vmatprep.subr.bf16.mxu1 %v4989_v38 }
0x1958   :  { %5007 = vmatpush1.bf16.msra.mxu1 %v4988_v62 }
0x195b   :  { %7110 = vmatmul.mubr.msk.bf16.vlgmr.msra.gmra.mxu1 %vm349_vm1, %v8745_v60 }
0x195c   :  { %5034 = vmatprep.mubr.bf16.mxu1 %v14052_v30 }
0x1963   :  { %7111 = vmatmul.mubr.msk.bf16.gmra.mxu1 %vm349_vm1, %v8746_v52  ;;  %v8761_v52 = vld [vmem:[#allocation2 + $0x88] sm:$0xff] }
0x1964   :  { %5154 = vmatprep.mubr.bf16.mxu1 %v14052_v30 }
0x1a1b   :  { %v5026_v47 = vpop.f32.mrf.mxu1 }
0x1a1c   :  { %v5027_v19 = vadd.f32 %v8754_v12, %v5026_v47  ;;  %v8769_v12 = vld [vmem:[%s13624_s3 + $0x30] sm:$0xff] }
0x1a1d   :  { %v5028_v6 = vpop.f32.mrf.mxu1 }
0x1a1e   :  { %v5029_v51 = vadd.f32 %v8751_v54, %v5028_v6  ;;  %v5045_v0 = vmax.f32 %v5027_v19, 0.0  ;;  %v8762_v6 = vld [vmem:[#allocation2 + $0xb8] sm:$0xff] }
0x1a1f   :  { %v5030_v3 = vpop.f32.mrf.mxu1  ;;  %v8770_v19 = vld [vmem:[%s13624_s3 + $0x38] sm:$0xff] }
0x1a20   :  { %v5031_v45 = vadd.f32 %v8753_v55, %v5030_v3  ;;  %v5046_v41 = vmax.f32 %v5029_v51, 0.0  ;;  %v8766_v55 = vld [vmem:[%s13623_s2 + $0x28] sm:$0xff]  }
0x1a21   :  { %v5032_v39 = vpop.f32.mrf.mxu1 }
0x1a22   :  { %v5033_v7 = vadd.f32 %v8747_v37, %v5032_v39  ;;  %v5047_v4 = vmax.f32 %v5031_v45, 0.0  ;;  %v8763_v39 = vld [vmem:[#allocation2 + $0x90] sm:$0xff]  ;;  %v14069_v45 = vmov 0.0  }
0x1a23   :  { %v5036_v35 = vpop.f32.mrf.mxu1 }
0x1a24   :  { %v5037_v2 = vadd.f32 %v8750_v1, %v5036_v35  ;;  %v5048_v44 = vmax.f32 %v5033_v7, 0.0  ;;  %v5053_v33 = vpack.c.bf16 %v5047_v4, %v5045_v0  ;;  %v8774_v4 = vld [vmem:[%s13624_s3 + $0x58] sm:$0xff]  ;;  %v8777_v0 = vld [vmem:[%s13624_s3 + $0x70] sm:$0xff] }
0x1a25   :  { %v5038_v32 = vpop.f32.mrf.mxu1 }
0x1a26   :  { %v5039_v16 = vadd.f32 %v8748_v10, %v5038_v32  ;;  %v5049_v29 = vmax.f32 %v5037_v2, 0.0  ;;  %v5054_v15 = vpack.c.bf16 %v5048_v44, %v5046_v41  ;;  %v8764_v10 = vld [vmem:[#allocation2 + $0x80] sm:$0xff]  ;;  %v4986_v44 = vld [vmem:[%s13622_s1 + $0x50] sm:$0xff]  ;;  %v8772_v41 = vld [vmem:[%s13624_s3 + $0x48] sm:$0xff] }
0x1a27   :  { %v5040_v46 = vpop.f32.mrf.mxu1 }
0x1a28   :  { %v5041_v24 = vadd.f32 %v8749_v31, %v5040_v46  ;;  %v5050_v56 = vmax.f32 %v5039_v16, 0.0 }
0x1a29   :  { %v5042_v48 = vpop.f32.mrf.mxu1 }
0x1a2a   :  { %v5043_v9 = vadd.f32 %v8752_v40, %v5042_v48  ;;  %v5051_v59 = vmax.f32 %v5041_v24, 0.0 }
0x1a2c   :  { %v5052_v34 = vmax.f32 %v5043_v9, 0.0  ;;  %v5055_v61 = vpack.c.bf16 %v5051_v59, %v5049_v29  ;;  %v8765_v9 = vld [vmem:[%s13623_s2 + $0x20] sm:$0xff]   ;;  %v4987_v59 = vld [vmem:[%s13622_s1 + $0x58] sm:$0xff] }
0x1a2d   :  { %v8771_v29 = vld [vmem:[%s13624_s3 + $0x40] sm:$0xff] }
0x1a2e   :  { %v5056_v11 = vpack.c.bf16 %v5052_v34, %v5050_v56  ;;  %v8767_v56 = vld [vmem:[%s13624_s3 + $0x20] sm:$0xff]  ;;  %v8768_v34 = vld [vmem:[%s13624_s3 + $0x28] sm:$0xff] }
0x1a30   :  { %5069 = vmatprep.subr.bf16.mxu0 %v5056_v11  ;;  %v8773_v11 = vld [vmem:[%s13624_s3 + $0x50] sm:$0xff] }
0x1a31   :  { %5070 = vmatpush1.bf16.msra.mxu0 %v5055_v61  ;;  %v8775_v61 = vld [vmem:[%s13624_s3 + $0x60] sm:$0xff] }
0x1a32   :  { %5071 = vmatprep.subr.bf16.mxu0 %v5054_v15  ;;  %v8776_v15 = vld [vmem:[%s13624_s3 + $0x68] sm:$0xff] }
0x1a35   :  { %5072 = vmatpush1.bf16.msra.mxu0 %v5053_v33  ;;  %v8778_v33 = vld [vmem:[%s13624_s3 + $0x78] sm:$0xff] }
0x1a38   :  { %7112 = vmatmul.mubr.msk.bf16.vlgmr.msra.gmra.mxu0 %vm349_vm1, %v8755_v21  ;;  %v8779_v21 = vld [vmem:[%s13624_s3 + $0x80] sm:$0xff] }
0x1a39   :  { %5099 = vmatprep.mubr.bf16.mxu0 %v14052_v30 }
0x1a40   :  { %7113 = vmatmul.mubr.msk.bf16.gmra.mxu0 %vm349_vm1, %v8756_v36  ;;  %v8780_v36 = vld [vmem:[%s13624_s3 + $0x88] sm:$0xff] }
0x1a41   :  { %5219 = vmatprep.mubr.bf16.mxu0 %v14052_v30 }
0x1af8   :  { %v5091_v63 = vpop.f32.mrf.mxu0 }
0x1af9   :  { %v5092_v16 = vadd.f32 %v8764_v10, %v5091_v63  ;;  %v8781_v63 = vld [vmem:[%s13624_s3 + $0x90] sm:$0xff] }
0x1afa   :  { %v5093_v5 = vpop.f32.mrf.mxu0 }
0x1afb   :  { %v5094_v47 = vadd.f32 %v8761_v52, %v5093_v5  ;;  %v5110_v51 = vmax.f32 %v5092_v16, 0.0  ;;  %v8782_v5 = vld [vmem:[%s13624_s3 + $0x98] sm:$0xff] }
0x1afc   :  { %v5095_v43 = vpop.f32.mrf.mxu0 }
0x1afd   :  { %v5096_v35 = vadd.f32 %v8763_v39, %v5095_v43  ;;  %v5111_v24 = vmax.f32 %v5094_v47, 0.0  ;;  %v8783_v43 = vld [vmem:[%s13624_s3 + $0xa0] sm:$0xff] }
0x1afe   :  { %v5097_v27 = vpop.f32.mrf.mxu0 }
0x1aff   :  { %v5098_v28 = vadd.f32 %v8757_v20, %v5097_v27  ;;  %v5112_v2 = vmax.f32 %v5096_v35, 0.0  ;;  %v8784_v27 = vld [vmem:[%s13624_s3 + $0xa8] sm:$0xff] }
0x1b00   :  { %v5101_v53 = vpop.f32.mrf.mxu0  ;;  %v8788_v20 = vld [vmem:[%s13624_s3 + $0xc8] sm:$0xff] }
0x1b01   :  { %v5102_v62 = vadd.f32 %v8760_v25, %v5101_v53  ;;  %v5113_v46 = vmax.f32 %v5098_v28, 0.0  ;;  %v5118_v40 = vpack.c.bf16 %v5112_v2, %v5110_v51  ;;  %v8785_v53 = vld [vmem:[%s13624_s3 + $0xb0] sm:$0xff]  ;;  %v8794_v35 = vld [vmem:[#allocation2 + $0xe8] sm:$0xff] }
0x1b02   :  { %v5103_v26 = vpop.f32.mrf.mxu0 }
0x1b03   :  { %v5104_v50 = vadd.f32 %v8758_v58, %v5103_v26  ;;  %v5114_v31 = vmax.f32 %v5102_v62, 0.0  ;;  %v5119_v54 = vpack.c.bf16 %v5113_v46, %v5111_v24  ;;  %v8786_v26 = vld [vmem:[%s13624_s3 + $0xb8] sm:$0xff]  ;;  %v8789_v58 = vld [vmem:[%s13624_s3 + $0xd0] sm:$0xff] }
0x1b04   :  { %v5105_v14 = vpop.f32.mrf.mxu0  ;;  %v8795_v46 = vld [vmem:[#allocation2 + $0xf0] sm:$0xff] }
0x1b05   :  { %v5106_v38 = vadd.f32 %v8759_v17, %v5105_v14  ;;  %v5115_v37 = vmax.f32 %v5104_v50, 0.0  ;;  %v8787_v14 = vld [vmem:[%s13624_s3 + $0xc0] sm:$0xff] }
0x1b06   :  { %v5107_v60 = vpop.f32.mrf.mxu0 }
0x1b07   :  { %v5108_v3 = vadd.f32 %v8762_v6, %v5107_v60  ;;  %v5116_v32 = vmax.f32 %v5106_v38, 0.0  ;;  %v8790_v38 = vld [vmem:[%s13624_s3 + $0xd8] sm:$0xff]  ;;  %v8791_v60 = vld [vmem:[%s13624_s3 + $0xe0] sm:$0xff]  ;;  %v8792_v6 = vld [vmem:[%s13624_s3 + $0xe8] sm:$0xff] }
0x1b09   :  { %v5117_v7 = vmax.f32 %v5108_v3, 0.0  ;;  %v5120_v48 = vpack.c.bf16 %v5116_v32, %v5114_v31  ;;  %v8793_v3 = vld [vmem:[#allocation2 + $0xd8] sm:$0xff]  ;;  %v8797_v31 = vld [vmem:[#allocation2 + $0xc8] sm:$0xff] }
0x1b0b   :  { %v5121_v1 = vpack.c.bf16 %v5117_v7, %v5115_v37  ;;  %v8796_v7 = vld [vmem:[#allocation2 + $0xe0] sm:$0xff] }
0x1b0d   :  { %5134 = vmatprep.subr.bf16.mxu1 %v5121_v1  ;;  %v8798_v1 = vld [vmem:[#allocation2 + $0xf8] sm:$0xff] }
0x1b0e   :  { %5135 = vmatpush1.bf16.msra.mxu1 %v5120_v48  ;;  %v8799_v48 = vld [vmem:[#allocation2 + $0xd0] sm:$0xff] }
0x1b0f   :  { %5136 = vmatprep.subr.bf16.mxu1 %v5119_v54 }
0x1b12   :  { %5137 = vmatpush1.bf16.msra.mxu1 %v5118_v40  ;;  %v8800_v40 = vld [vmem:[%s13624_s3 + $0xf0] sm:$0xff] }
0x1b13   :  { %5474 = vmatprep.subr.mxu1 %v4987_v59 }
0x1b15   :  { %7114 = vmatmul.mubr.msk.bf16.vlgmr.msra.gmra.mxu1 %vm349_vm1, %v8765_v9 }
0x1b16   :  { %5164 = vmatprep.mubr.bf16.mxu1 %v14052_v30  ;;  %5475 = vmatpush1.msra.mxu1 %v4986_v44  ;;  %v8801_v44 = vld [vmem:[#allocation2 + $0xc0] sm:$0xff] }
0x1b1d   :  { %7115 = vmatmul.mubr.msk.bf16.gmra.mxu1 %vm349_vm1, %v8766_v55 }
0x1b1e   :  { %5508 = vmatprep.mubr.f32.mxu1 %v14069_v45 }
0x1b25   :  { %7132 = vmatmul.mubr.msk.f32.vlgmr.msra.gmra.mxu1 %vm231_vm0, %v8767_v56 }
0x1b26   :  { %5514 = vmatprep.mubr.f32.mxu1 %v14069_v45 }
0x1b29   :  { %7133 = vmatmul.mubr.msk.f32.gmra.mxu1 %vm231_vm0, %v8768_v34 }
0x1b2a   :  { %5520 = vmatprep.mubr.f32.mxu1 %v14069_v45 }
0x1b2d   :  { %7134 = vmatmul.mubr.msk.f32.gmra.mxu1 %vm231_vm0, %v8769_v12 }
0x1b2e   :  { %5526 = vmatprep.mubr.f32.mxu1 %v14069_v45 }
0x1b31   :  { %7135 = vmatmul.mubr.msk.f32.gmra.mxu1 %vm231_vm0, %v8770_v19 }
0x1b32   :  { %5532 = vmatprep.mubr.f32.mxu1 %v14069_v45 }
0x1b35   :  { %7136 = vmatmul.mubr.msk.f32.gmra.mxu1 %vm231_vm0, %v8771_v29 }
0x1b36   :  { %5538 = vmatprep.mubr.f32.mxu1 %v14069_v45 }
0x1b39   :  { %7137 = vmatmul.mubr.msk.f32.gmra.mxu1 %vm231_vm0, %v8772_v41 }
0x1b3a   :  { %5544 = vmatprep.mubr.f32.mxu1 %v14069_v45 }
0x1b3d   :  { %7138 = vmatmul.mubr.msk.f32.gmra.mxu1 %vm231_vm0, %v8773_v11  ;;  %v8802_v11 = vld [vmem:[%s13624_s3 + $0xf8] sm:$0xff] }
0x1b3e   :  { %5550 = vmatprep.mubr.f32.mxu1 %v14069_v45 }
0x1b41   :  { %7139 = vmatmul.mubr.msk.f32.gmra.mxu1 %vm231_vm0, %v8774_v4 }
0x1b42   :  { %5556 = vmatprep.mubr.f32.mxu1 %v14069_v45 }
0x1b45   :  { %7140 = vmatmul.mubr.msk.f32.gmra.mxu1 %vm231_vm0, %v8775_v61 }
0x1b46   :  { %5562 = vmatprep.mubr.f32.mxu1 %v14069_v45 }
0x1b49   :  { %7141 = vmatmul.mubr.msk.f32.gmra.mxu1 %vm231_vm0, %v8776_v15 }
0x1b4a   :  { %5568 = vmatprep.mubr.f32.mxu1 %v14069_v45 }
0x1b4d   :  { %7142 = vmatmul.mubr.msk.f32.gmra.mxu1 %vm231_vm0, %v8777_v0  ;;  %v8803_v0 = vld [vmem:[%s13624_s3 + $0x100] sm:$0xff] }
0x1b4e   :  { %5574 = vmatprep.mubr.f32.mxu1 %v14069_v45 }
0x1b51   :  { %7143 = vmatmul.mubr.msk.f32.gmra.mxu1 %vm231_vm0, %v8778_v33  ;;  %v8804_v33 = vld [vmem:[%s13624_s3 + $0x108] sm:$0xff] }
0x1b52   :  { %5580 = vmatprep.mubr.f32.mxu1 %v14069_v45 }
0x1b55   :  { %7144 = vmatmul.mubr.msk.f32.gmra.mxu1 %vm231_vm0, %v8779_v21  ;;  %v8805_v21 = vld [vmem:[%s13623_s2 + $0x30] sm:$0xff]  }
0x1b56   :  { %5586 = vmatprep.mubr.f32.mxu1 %v14069_v45 }
0x1b59   :  { %7145 = vmatmul.mubr.msk.f32.gmra.mxu1 %vm231_vm0, %v8780_v36  ;;  %v8806_v36 = vld [vmem:[%s13624_s3 + $0x110] sm:$0xff] }
0x1b5a   :  { %5592 = vmatprep.mubr.f32.mxu1 %v14069_v45 }
0x1b5d   :  { %7146 = vmatmul.mubr.msk.f32.gmra.mxu1 %vm231_vm0, %v8781_v63  ;;  %v8807_v63 = vld [vmem:[%s13624_s3 + $0x118] sm:$0xff] }
0x1b5e   :  { %5598 = vmatprep.mubr.f32.mxu1 %v14069_v45 }
0x1b61   :  { %7147 = vmatmul.mubr.msk.f32.gmra.mxu1 %vm231_vm0, %v8782_v5  ;;  %v8808_v5 = vld [vmem:[%s13623_s2 + $0x38] sm:$0xff]  }
0x1b62   :  { %5604 = vmatprep.mubr.f32.mxu1 %v14069_v45 }
0x1b65   :  { %7148 = vmatmul.mubr.msk.f32.gmra.mxu1 %vm231_vm0, %v8783_v43  ;;  %v8809_v43 = vld [vmem:[%s13623_s2 + $0x40] sm:$0xff]  }
0x1b66   :  { %5610 = vmatprep.mubr.f32.mxu1 %v14069_v45 }
0x1b69   :  { %7149 = vmatmul.mubr.msk.f32.gmra.mxu1 %vm231_vm0, %v8784_v27  ;;  %v8810_v27 = vld [vmem:[%s13623_s2 + $0x48] sm:$0xff]  }
0x1b6a   :  { %5616 = vmatprep.mubr.f32.mxu1 %v14069_v45 }
0x1b6d   :  { %7150 = vmatmul.mubr.msk.f32.gmra.mxu1 %vm231_vm0, %v8785_v53  ;;  %v8811_v53 = vld [vmem:[%s13623_s2 + $0x50] sm:$0xff]  }
0x1b6e   :  { %5622 = vmatprep.mubr.f32.mxu1 %v14069_v45 }
0x1b71   :  { %7151 = vmatmul.mubr.msk.f32.gmra.mxu1 %vm231_vm0, %v8786_v26  ;;  %v8812_v26 = vld [vmem:[%s13623_s2 + $0x58] sm:$0xff]  }
0x1b72   :  { %5628 = vmatprep.mubr.f32.mxu1 %v14069_v45 }
0x1b75   :  { %7152 = vmatmul.mubr.msk.f32.gmra.mxu1 %vm231_vm0, %v8787_v14  ;;  %v8813_v14 = vld [vmem:[%s13623_s2 + $0x60] sm:$0xff]  }
0x1b76   :  { %5634 = vmatprep.mubr.f32.mxu1 %v14069_v45 }
0x1b79   :  { %7153 = vmatmul.mubr.msk.f32.gmra.mxu1 %vm231_vm0, %v8788_v20  ;;  %v8814_v20 = vld [vmem:[%s13623_s2 + $0x68] sm:$0xff]  }
0x1b7a   :  { %5640 = vmatprep.mubr.f32.mxu1 %v14069_v45 }
0x1b7d   :  { %7154 = vmatmul.mubr.msk.f32.gmra.mxu1 %vm231_vm0, %v8789_v58  ;;  %v8816_v58 = vld [vmem:[%s13623_s2 + $0x78] sm:$0xff]  }
0x1b7e   :  { %5646 = vmatprep.mubr.f32.mxu1 %v14069_v45 }
0x1b81   :  { %7155 = vmatmul.mubr.msk.f32.gmra.mxu1 %vm231_vm0, %v8790_v38 }
0x1b82   :  { %5652 = vmatprep.mubr.f32.mxu1 %v14069_v45 }
0x1b85   :  { %7156 = vmatmul.mubr.msk.f32.gmra.mxu1 %vm231_vm0, %v8791_v60 }
0x1b86   :  { %5658 = vmatprep.mubr.f32.mxu1 %v14069_v45 }
0x1b89   :  { %7157 = vmatmul.mubr.msk.f32.gmra.mxu1 %vm231_vm0, %v8792_v6 }
0x1b8a   :  { %5664 = vmatprep.mubr.f32.mxu1 %v14069_v45 }
0x1b8d   :  { %7158 = vmatmul.mubr.msk.f32.gmra.mxu1 %vm231_vm0, %v8800_v40 }
0x1b8e   :  { %5670 = vmatprep.mubr.f32.mxu1 %v14069_v45 }
0x1b91   :  { %7159 = vmatmul.mubr.msk.f32.gmra.mxu1 %vm231_vm0, %v8802_v11 }
0x1b92   :  { %5676 = vmatprep.mubr.f32.mxu1 %v14069_v45 }
0x1b95   :  { %7160 = vmatmul.mubr.msk.f32.gmra.mxu1 %vm231_vm0, %v8803_v0 }
0x1b96   :  { %5682 = vmatprep.mubr.f32.mxu1 %v14069_v45 }
0x1b99   :  { %7161 = vmatmul.mubr.msk.f32.gmra.mxu1 %vm231_vm0, %v8804_v33 }
0x1b9a   :  { %5688 = vmatprep.mubr.f32.mxu1 %v14069_v45 }
0x1b9d   :  { %7162 = vmatmul.mubr.msk.f32.gmra.mxu1 %vm231_vm0, %v8806_v36 }
0x1b9e   :  { %5694 = vmatprep.mubr.f32.mxu1 %v14069_v45 }
0x1ba1   :  { %7163 = vmatmul.mubr.msk.f32.gmra.mxu1 %vm231_vm0, %v8807_v63 }
0x1ba2   :  { %5900 = vmatprep.mubr.bf16.mxu1 %v14052_v30 }
0x1bd5   :  { %v5156_v28 = vpop.f32.mrf.mxu1 }
0x1bd6   :  { %v5157_v56 = vadd.f32 %v8801_v44, %v5156_v28  ;;  %v8815_v28 = vld [vmem:[%s13623_s2 + $0x70] sm:$0xff]  }
0x1bd7   :  { %v5158_v50 = vpop.f32.mrf.mxu1 }
0x1bd8   :  { %v5159_v24 = vadd.f32 %v8797_v31, %v5158_v50  ;;  %v5175_v61 = vmax.f32 %v5157_v56, 0.0  ;;  %v8817_v50 = vld [vmem:[%s13623_s2 + $0x80] sm:$0xff]  }
0x1bd9   :  { %v5160_v17 = vpop.f32.mrf.mxu1 }
0x1bda   :  { %v5161_v54 = vadd.f32 %v8799_v48, %v5160_v17  ;;  %v5176_v12 = vmax.f32 %v5159_v24, 0.0 }
0x1bdb   :  { %v5162_v25 = vpop.f32.mrf.mxu1 }
0x1bdc   :  { %v5163_v39 = vadd.f32 %v8793_v3, %v5162_v25  ;;  %v5177_v29 = vmax.f32 %v5161_v54, 0.0  ;;  %v8818_v25 = vld [vmem:[%s13623_s2 + $0x88] sm:$0xff]   ;;  %v8820_v3 = vld [vmem:[%s13623_s2 + $0x98] sm:$0xff]  }
0x1bdd   :  { %v5166_v62 = vpop.f32.mrf.mxu1 }
0x1bde   :  { %v5167_v10 = vadd.f32 %v8796_v7, %v5166_v62  ;;  %v5178_v9 = vmax.f32 %v5163_v39, 0.0  ;;  %v5183_v15 = vpack.c.bf16 %v5177_v29, %v5175_v61  ;;  %v8822_v7 = vld [vmem:[%s13623_s2 + $0xa8] sm:$0xff]  }
0x1bdf   :  { %v5168_v52 = vpop.f32.mrf.mxu1 }
0x1be0   :  { %v5169_v32 = vadd.f32 %v8794_v35, %v5168_v52  ;;  %v5179_v34 = vmax.f32 %v5167_v10, 0.0  ;;  %v5184_v4 = vpack.c.bf16 %v5178_v9, %v5176_v12  ;;  %v8819_v52 = vld [vmem:[%s13623_s2 + $0x90] sm:$0xff]   ;;  %v8823_v10 = vld [vmem:[%s13625_s4 + $0x8] sm:$0xff] }
0x1be1   :  { %v5170_v47 = vpop.f32.mrf.mxu1 }
0x1be2   :  { %v5171_v37 = vadd.f32 %v8795_v46, %v5170_v47  ;;  %v5180_v55 = vmax.f32 %v5169_v32, 0.0  ;;  %v8821_v32 = vld [vmem:[%s13623_s2 + $0xa0] sm:$0xff]  }
0x1be3   :  { %v5172_v16 = vpop.f32.mrf.mxu1 }
0x1be4   :  { %v5173_v2 = vadd.f32 %v8798_v1, %v5172_v16  ;;  %v5181_v51 = vmax.f32 %v5171_v37, 0.0 }
0x1be5   :  { %v12617_v17 = vpop.f32.mrf.mxu1 }
0x1be6   :  { %v5182_v59 = vmax.f32 %v5173_v2, 0.0  ;;  %v5185_v41 = vpack.c.bf16 %v5181_v51, %v5179_v34  ;;  %14070 = vst [vmem:[#allocation26_spill] sm:$0xff] %v12617_v17 }
0x1be7   :  { %v12619_v38 = vpop.f32.mrf.mxu1 }
0x1be8   :  { %v5186_v19 = vpack.c.bf16 %v5182_v59, %v5180_v55  ;;  %14071 = vst [vmem:[#allocation25_spill] sm:$0xff] %v12619_v38 }
0x1be9   :  { %v12626_v62 = vpop.f32.mrf.mxu1 }
0x1bea   :  { %5199 = vmatprep.subr.bf16.mxu0 %v5186_v19  ;;  %14072 = vst [vmem:[#allocation24_spill] sm:$0xff] %v12626_v62 }
0x1beb   :  { %5200 = vmatpush1.bf16.msra.mxu0 %v5185_v41  ;;  %v12628_v60 = vpop.f32.mrf.mxu1 }
0x1bec   :  { %5201 = vmatprep.subr.bf16.mxu0 %v5184_v4  ;;  %14073 = vst [vmem:[#allocation23_spill] sm:$0xff] %v12628_v60 }
0x1bed   :  { %v12635_v47 = vpop.f32.mrf.mxu1 }
0x1bee   :  { %14074 = vst [vmem:[#allocation22_spill] sm:$0xff] %v12635_v47 }
0x1bef   :  { %5202 = vmatpush1.bf16.msra.mxu0 %v5183_v15  ;;  %v12637_v6 = vpop.f32.mrf.mxu1 }
0x1bf0   :  { %14075 = vst [vmem:[#allocation21_spill] sm:$0xff] %v12637_v6 }
0x1bf1   :  { %v12644_v39 = vpop.f32.mrf.mxu1 }
0x1bf2   :  { %7116 = vmatmul.mubr.msk.bf16.vlgmr.msra.gmra.mxu0 %vm349_vm1, %v8805_v21  ;;  %14076 = vst [vmem:[#allocation20_spill] sm:$0xff] %v12644_v39 }
0x1bf3   :  { %5229 = vmatprep.mubr.bf16.mxu0 %v14052_v30  ;;  %v12646_v35 = vpop.f32.mrf.mxu1 }
0x1bf4   :  { %14077 = vst [vmem:[#allocation19_spill] sm:$0xff] %v12646_v35  ;;  %v8826_v35 = vld [vmem:[#allocation2 + $0x1e0] sm:$0xff] }
0x1bf5   :  { %v12653_v46 = vpop.f32.mrf.mxu1 }
0x1bf6   :  { %14078 = vst [vmem:[#allocation18_spill] sm:$0xff] %v12653_v46 }
0x1bf7   :  { %v12655_v37 = vpop.f32.mrf.mxu1 }
0x1bf8   :  { %14079 = vst [vmem:[#allocation17_spill] sm:$0xff] %v12655_v37 }
0x1bf9   :  { %v12664_v16 = vpop.f32.mrf.mxu1 }
0x1bfa   :  { %7117 = vmatmul.mubr.msk.bf16.gmra.mxu0 %vm349_vm1, %v8808_v5  ;;  %14080 = vst [vmem:[#allocation16_spill] sm:$0xff] %v12664_v16  ;;  %v8827_v16 = vld [vmem:[#allocation2 + $0x1d8] sm:$0xff] }
0x1bfb   :  { %5239 = vmatprep.mubr.bf16.mxu0 %v14052_v30  ;;  %v12666_v31 = vpop.f32.mrf.mxu1 }
0x1bfc   :  { %14081 = vst [vmem:[#allocation48_spill] sm:$0xff] %v12666_v31  ;;  %v8828_v31 = vld [vmem:[#allocation2 + $0x1f8] sm:$0xff] }
0x1bfd   :  { %v12668_v24 = vpop.f32.mrf.mxu1 }
0x1bfe   :  { %14082 = vst [vmem:[#allocation47_spill] sm:$0xff] %v12668_v24 }
0x1bff   :  { %v12670_v1 = vpop.f32.mrf.mxu1 }
0x1c00   :  { %14083 = vst [vmem:[#allocation46_spill] sm:$0xff] %v12670_v1 }
0x1c01   :  { %v12672_v2 = vpop.f32.mrf.mxu1 }
0x1c02   :  { %7118 = vmatmul.mubr.msk.bf16.gmra.mxu0 %vm349_vm1, %v8809_v43  ;;  %14084 = vst [vmem:[#allocation33_spill] sm:$0xff] %v12672_v2 }
0x1c03   :  { %5249 = vmatprep.mubr.bf16.mxu0 %v14052_v30  ;;  %v12674_v48 = vpop.f32.mrf.mxu1 }
0x1c05   :  { %v12676_v54 = vpop.f32.mrf.mxu1 }
0x1c07   :  { %v12678_v51 = vpop.f32.mrf.mxu1 }
0x1c09   :  { %v12680_v40 = vpop.f32.mrf.mxu1 }
0x1c0a   :  { %7119 = vmatmul.mubr.msk.bf16.gmra.mxu0 %vm349_vm1, %v8810_v27 }
0x1c0b   :  { %5259 = vmatprep.mubr.bf16.mxu0 %v14052_v30  ;;  %v12682_v9 = vpop.f32.mrf.mxu1 }
0x1c0d   :  { %v12684_v55 = vpop.f32.mrf.mxu1 }
0x1c0f   :  { %v12686_v59 = vpop.f32.mrf.mxu1 }
0x1c11   :  { %v12688_v44 = vpop.f32.mrf.mxu1 }
0x1c12   :  { %7120 = vmatmul.mubr.msk.bf16.gmra.mxu0 %vm349_vm1, %v8811_v53 }
0x1c13   :  { %5269 = vmatprep.mubr.bf16.mxu0 %v14052_v30  ;;  %v12690_v56 = vpop.f32.mrf.mxu1 }
0x1c15   :  { %v12692_v34 = vpop.f32.mrf.mxu1 }
0x1c17   :  { %v12694_v12 = vpop.f32.mrf.mxu1 }
0x1c19   :  { %v12696_v19 = vpop.f32.mrf.mxu1 }
0x1c1a   :  { %7121 = vmatmul.mubr.msk.bf16.gmra.mxu0 %vm349_vm1, %v8812_v26 }
0x1c1b   :  { %5279 = vmatprep.mubr.bf16.mxu0 %v14052_v30  ;;  %v12698_v29 = vpop.f32.mrf.mxu1 }
0x1c1d   :  { %v12704_v4 = vpop.f32.mrf.mxu1 }
0x1c1f   :  { %v12710_v0 = vpop.f32.mrf.mxu1 }
0x1c21   :  { %v12716_v36 = vpop.f32.mrf.mxu1 }
0x1c22   :  { %7122 = vmatmul.mubr.msk.bf16.gmra.mxu0 %vm349_vm1, %v8813_v14 }
0x1c23   :  { %5289 = vmatprep.mubr.bf16.mxu0 %v14052_v30  ;;  %v12722_v43 = vpop.f32.mrf.mxu1 }
0x1c25   :  { %v12728_v26 = vpop.f32.mrf.mxu1 }
0x1c26   :  { %14085 = vst [vmem:[#allocation44_spill] sm:$0xff] %v12728_v26 }
0x1c2a   :  { %7123 = vmatmul.mubr.msk.bf16.gmra.mxu0 %vm349_vm1, %v8814_v20 }
0x1c2b   :  { %5299 = vmatprep.mubr.bf16.mxu0 %v14052_v30 }
0x1c32   :  { %7124 = vmatmul.mubr.msk.bf16.gmra.mxu0 %vm349_vm1, %v8815_v28  ;;  %v12734_v28 = vpop.f32.mrf.mxu1 }
0x1c33   :  { %5309 = vmatprep.mubr.bf16.mxu0 %v14052_v30  ;;  %14086 = vst [vmem:[#allocation43_spill] sm:$0xff] %v12734_v28 }
0x1c3a   :  { %7125 = vmatmul.mubr.msk.bf16.gmra.mxu0 %vm349_vm1, %v8816_v58 }
0x1c3b   :  { %5319 = vmatprep.mubr.bf16.mxu0 %v14052_v30 }
0x1c42   :  { %7126 = vmatmul.mubr.msk.bf16.gmra.mxu0 %vm349_vm1, %v8817_v50 }
0x1c43   :  { %5329 = vmatprep.mubr.bf16.mxu0 %v14052_v30 }
0x1c4a   :  { %7127 = vmatmul.mubr.msk.bf16.gmra.mxu0 %vm349_vm1, %v8818_v25  ;;  %v12740_v25 = vpop.f32.mrf.mxu1 }
0x1c4b   :  { %5339 = vmatprep.mubr.bf16.mxu0 %v14052_v30  ;;  %14087 = vst [vmem:[#allocation42_spill] sm:$0xff] %v12740_v25 }
0x1c52   :  { %7128 = vmatmul.mubr.msk.bf16.gmra.mxu0 %vm349_vm1, %v8819_v52 }
0x1c53   :  { %5349 = vmatprep.mubr.bf16.mxu0 %v14052_v30 }
0x1c5a   :  { %7129 = vmatmul.mubr.msk.bf16.gmra.mxu0 %vm349_vm1, %v8820_v3 }
0x1c5b   :  { %5359 = vmatprep.mubr.bf16.mxu0 %v14052_v30 }
0x1c62   :  { %7130 = vmatmul.mubr.msk.bf16.gmra.mxu0 %vm349_vm1, %v8821_v32  ;;  %v12746_v32 = vpop.f32.mrf.mxu1 }
0x1c63   :  { %5369 = vmatprep.mubr.bf16.mxu0 %v14052_v30  ;;  %14088 = vst [vmem:[#allocation41_spill] sm:$0xff] %v12746_v32 }
0x1c64   :  { %v12752_v45 = vpop.f32.mrf.mxu1 }
0x1c65   :  { %14089 = vst [vmem:[#allocation40_spill] sm:$0xff] %v12752_v45 }
0x1c66   :  { %v12756_v49 = vpop.f32.mrf.mxu1 }
0x1c67   :  { %14090 = vst [vmem:[#allocation39_spill] sm:$0xff] %v12756_v49  ;;  %v8824_v49 = vld [vmem:[#allocation2 + $0x1e8] sm:$0xff] }
0x1c68   :  { %v12758_v42 = vpop.f32.mrf.mxu1 }
0x1c69   :  { %14091 = vst [vmem:[#allocation38_spill] sm:$0xff] %v12758_v42  ;;  %v8825_v42 = vld [vmem:[#allocation2 + $0x1f0] sm:$0xff] }
0x1c6a   :  { %7131 = vmatmul.mubr.msk.bf16.gmra.mxu0 %vm349_vm1, %v8822_v7  ;;  %v12760_v30 = vpop.f32.mrf.mxu1 }
0x1c6b   :  { %5829 = vmatprep.mubr.f32.mxu0 %v8823_v10  ;;  %14092 = vst [vmem:[#allocation37_spill] sm:$0xff] %v12760_v30 }
0x1c6c   :  { %v12762_v25 = vpop.f32.mrf.mxu1 }
0x1c6d   :  { %14093 = vst [vmem:[#allocation36_spill] sm:$0xff] %v12762_v25 }
0x1c6e   :  { %v12764_v45 = vpop.f32.mrf.mxu1 }
0x1c6f   :  { %14094 = vst [vmem:[#allocation35_spill] sm:$0xff] %v12764_v45  ;;  %v8829_v45 = vld [vmem:[#allocation2 + $0x1d0] sm:$0xff] }
0x1c70   :  { %v12766_v60 = vpop.f32.mrf.mxu1 }
0x1c71   :  { %14095 = vst [vmem:[#allocation10_spill] sm:$0xff] %v12766_v60  ;;  %v8830_v60 = vld [vmem:[#allocation2 + $0x1c8] sm:$0xff] }
0x1c72   :  { %v12768_v37 = vpop.f32.mrf.mxu1 }
0x1cb2   :  { %v12700_v41 = vpop.f32.mrf.mxu0 }
0x1cb4   :  { %v12702_v11 = vpop.f32.mrf.mxu0 }
0x1cb6   :  { %v12706_v61 = vpop.f32.mrf.mxu0 }
0x1cb8   :  { %v12708_v15 = vpop.f32.mrf.mxu0 }
0x1cba   :  { %v12712_v33 = vpop.f32.mrf.mxu0 }
0x1cbc   :  { %v12714_v21 = vpop.f32.mrf.mxu0 }
0x1cbe   :  { %v12718_v63 = vpop.f32.mrf.mxu0 }
0x1cc0   :  { %v12720_v5 = vpop.f32.mrf.mxu0 }
0x1cc2   :  { %v12724_v27 = vpop.f32.mrf.mxu0 }
0x1cc4   :  { %v12726_v53 = vpop.f32.mrf.mxu0 }
0x1cc6   :  { %v12730_v14 = vpop.f32.mrf.mxu0 }
0x1cc8   :  { %v12732_v20 = vpop.f32.mrf.mxu0 }
0x1cca   :  { %v12736_v58 = vpop.f32.mrf.mxu0 }
0x1ccc   :  { %v12738_v50 = vpop.f32.mrf.mxu0 }
0x1cce   :  { %v12742_v52 = vpop.f32.mrf.mxu0 }
0x1cd0   :  { %v12744_v3 = vpop.f32.mrf.mxu0 }
0x1cd2   :  { %v12748_v7 = vpop.f32.mrf.mxu0 }
0x1cd4   :  { %v12750_v10 = vpop.f32.mrf.mxu0 }
0x1cd6   :  { %v12754_v57 = vpop.f32.mrf.mxu0 }
0x1cd8   :  { %v5267_v18 = vpop.f32.mrf.mxu0 }
0x1cda   :  { %v5271_v22 = vpop.f32.mrf.mxu0 }
0x1cdc   :  { %v5273_v23 = vpop.f32.mrf.mxu0 }
0x1cde   :  { %v5275_v8 = vpop.f32.mrf.mxu0 }
0x1ce0   :  { %v5277_v13 = vpop.f32.mrf.mxu0 }
0x1ce2   :  { %v5281_v26 = vpop.f32.mrf.mxu0 }
0x1ce4   :  { %v5283_v28 = vpop.f32.mrf.mxu0 }
0x1ce6   :  { %v5285_v32 = vpop.f32.mrf.mxu0 }
0x1ce7   :  { %v5286_v1 = vadd.f32 %v8829_v45, %v5285_v32  ;;  %v8839_v32 = vld [vmem:[#allocation2 + $0x180] sm:$0xff] }
0x1ce8   :  { %v5287_v17 = vpop.f32.mrf.mxu0 }
0x1ce9   :  { %v5288_v25 = vadd.f32 %v8827_v16, %v5287_v17 }
0x1cea   :  { %v5291_v38 = vpop.f32.mrf.mxu0 }
0x1ceb   :  { %v5292_v46 = vadd.f32 %v8826_v35, %v5291_v38  ;;  %v8832_v35 = vld [vmem:[#allocation2 + $0x1b8] sm:$0xff] }
0x1cec   :  { %v5293_v62 = vpop.f32.mrf.mxu0  ;;  %v5278_v17 = vadd.f32 %v8832_v35, %v5277_v13  ;;  %v8837_v13 = vld [vmem:[#allocation2 + $0x190] sm:$0xff] }
0x1ced   :  { %v5294_v47 = vadd.f32 %v8824_v49, %v5293_v62  ;;  %v5284_v49 = vadd.f32 %v8830_v60, %v5283_v28  ;;  %v8831_v62 = vld [vmem:[#allocation2 + $0x1c0] sm:$0xff]  ;;  %v8841_v35 = vld [vmem:[#allocation2 + $0x170] sm:$0xff] }
0x1cee   :  { %v5295_v6 = vpop.f32.mrf.mxu0  ;;  %v8835_v60 = vld [vmem:[#allocation2 + $0x1a0] sm:$0xff] }
0x1cef   :  { %v5296_v39 = vadd.f32 %v8825_v42, %v5295_v6  ;;  %7889 = vtanh.f32 %v5294_v47  ;;  %v5282_v42 = vadd.f32 %v8831_v62, %v5281_v26  ;;  %v12774_v6 = vpop.f32.mrf.mxu1  ;;  %v8833_v47 = vld [vmem:[#allocation2 + $0x1b0] sm:$0xff]  ;;  %v8836_v26 = vld [vmem:[#allocation2 + $0x198] sm:$0xff] }
0x1cf0   :  { %v5297_v30 = vpop.f32.mrf.mxu0  ;;  %v5268_v28 = vadd.f32 %v8836_v26, %v5267_v18  ;;  %v8840_v18 = vld [vmem:[#allocation2 + $0x178] sm:$0xff] }
0x1cf1   :  { %v5298_v24 = vadd.f32 %v8828_v31, %v5297_v30  ;;  %7891 = vtanh.f32 %v5296_v39  ;;  %v5276_v30 = vadd.f32 %v8833_v47, %v5275_v8  ;;  %v8834_v39 = vld [vmem:[#allocation2 + $0x1a8] sm:$0xff]  ;;  %v5272_v31 = vadd.f32 %v8835_v60, %v5271_v22 }
0x1cf2   :  { %v12770_v2 = vpop.f32.mrf.mxu0  ;;  %v5274_v16 = vadd.f32 %v8834_v39, %v5273_v23  ;;  %v5262_v22 = vadd.f32 %v8839_v32, %v12748_v7 }
0x1cf3   :  { %7893 = vtanh.f32 %v5298_v24 }
0x1cf4   :  { %7895 = vtanh.f32 %v5292_v46  ;;  %v12772_v38 = vpop.f32.mrf.mxu0  ;;  %v12780_v46 = vpop.f32.mrf.mxu1 }
0x1cf5   :  { %7897 = vtanh.f32 %v5288_v25  ;;  %v5266_v25 = vadd.f32 %v8837_v13, %v12754_v57 }
0x1cf6   :  { %7899 = vtanh.f32 %v5286_v1  ;;  %v12776_v45 = vpop.f32.mrf.mxu0  ;;  %v8838_v1 = vld [vmem:[#allocation2 + $0x188] sm:$0xff]  ;;  %v12789_v62 = vpop.f32.mrf.mxu1 }
0x1cf7   :  { %7901 = vtanh.f32 %v5284_v49  ;;  %v5264_v23 = vadd.f32 %v8838_v1, %v12750_v10  ;;  %v8845_v1 = vld [vmem:[#allocation2 + $0x150] sm:$0xff] }
0x1cf8   :  { %7903 = vtanh.f32 %v5282_v42  ;;  %v12778_v24 = vpop.f32.mrf.mxu0  ;;  %v5258_v42 = vadd.f32 %v8840_v18, %v12744_v3  ;;  %v12799_v3 = vpop.f32.mrf.mxu1 }
0x1cf9   :  { %7905 = vtanh.f32 %v5278_v17  ;;  %v5256_v17 = vadd.f32 %v8841_v35, %v12742_v52 }
0x1cfa   :  { %7907 = vtanh.f32 %v5276_v30  ;;  %v12783_v8 = vpop.f32.mrf.mxu0  ;;  %v8842_v30 = vld [vmem:[#allocation2 + $0x168] sm:$0xff] }
0x1cfb   :  { %7909 = vtanh.f32 %v5274_v16  ;;  %v5254_v7 = vadd.f32 %v8842_v30, %v12738_v50  ;;  %v8843_v16 = vld [vmem:[#allocation2 + $0x160] sm:$0xff]  ;;  %v5246_v50 = vadd.f32 %v8845_v1, %v12730_v14  ;;  %v8848_v30 = vld [vmem:[#allocation2 + $0x138] sm:$0xff] }
0x1cfc   :  { %7911 = vtanh.f32 %v5272_v31  ;;  %v12787_v49 = vpop.f32.mrf.mxu0  ;;  %v7890_v57 = vpop.eup %7889  ;;  %v5252_v60 = vadd.f32 %v8843_v16, %v12736_v58  ;;  %v8852_v1 = vld [vmem:[#allocation2 + $0x118] sm:$0xff] }
0x1cfd   :  { %7913 = vtanh.f32 %v5268_v28  ;;  %v8844_v28 = vld [vmem:[#allocation2 + $0x158] sm:$0xff]  ;;  %v5730_v35 = vmul.f32 %v7890_v57, %v12710_v0 }
0x1cfe   :  { %7915 = vtanh.f32 %v5266_v25  ;;  %v12793_v47 = vpop.f32.mrf.mxu0  ;;  %v7892_v10 = vpop.eup %7891  ;;  %v5248_v52 = vadd.f32 %v8844_v28, %v12732_v20  ;;  %v8851_v28 = vld [vmem:[#allocation2 + $0x120] sm:$0xff] }
0x1cff   :  { %7917 = vtanh.f32 %v5264_v23  ;;  %v5731_v23 = vmul.f32 %v7892_v10, %v12716_v36  ;;  %v12813_v36 = vpop.f32.mrf.mxu1 }
0x1d00   :  { %v7894_v39 = vpop.eup %7893  ;;  %7919 = vtanh.f32 %v5262_v22  ;;  %v12797_v31 = vpop.f32.mrf.mxu0  ;;  %v8846_v22 = vld [vmem:[#allocation2 + $0x148] sm:$0xff] }
0x1d01   :  { %v7896_v26 = vpop.eup %7895  ;;  %7921 = vtanh.f32 %v5258_v42  ;;  %v5732_v13 = vmul.f32 %v7894_v39, %v12722_v43  ;;  %v5244_v18 = vadd.f32 %v8846_v22, %v12726_v53  ;;  %v8847_v42 = vld [vmem:[#allocation2 + $0x140] sm:$0xff]  ;;  %v5238_v53 = vadd.f32 %v8848_v30, %v12720_v5 }
0x1d02   :  { %v7898_v25 = vpop.eup %7897  ;;  %7923 = vtanh.f32 %v5256_v17  ;;  %v12805_v58 = vpop.f32.mrf.mxu0  ;;  %v5242_v43 = vadd.f32 %v8847_v42, %v12724_v27  ;;  %v5729_v14 = vmul.f32 %v7896_v26, %v12704_v4 }
0x1d03   :  { %v7900_v32 = vpop.eup %7899  ;;  %7925 = vtanh.f32 %v5254_v7  ;;  %5765 = vmatprep.subr.mxu0 %v5732_v13  ;;  %v5728_v0 = vmul.f32 %v7898_v25, %v12698_v29  ;;  %v8849_v7 = vld [vmem:[#allocation2 + $0x130] sm:$0xff] }
0x1d04   :  { %v7902_v20 = vpop.eup %7901  ;;  %7927 = vtanh.f32 %v5252_v60  ;;  %v12811_v17 = vpop.f32.mrf.mxu0  ;;  %5766 = vmatpush1.msra.mxu0 %v5731_v23  ;;  %v5236_v27 = vadd.f32 %v8849_v7, %v12718_v63  ;;  %v5727_v4 = vmul.f32 %v7900_v32, %v12696_v19  ;;  %v8850_v60 = vld [vmem:[#allocation2 + $0x128] sm:$0xff]  ;;  %v8853_v23 = vld [vmem:[#allocation2 + $0x110] sm:$0xff] }
0x1d05   :  { %v7904_v10 = vpop.eup %7903  ;;  %7929 = vtanh.f32 %v5248_v52  ;;  %5767 = vmatprep.subr.mxu0 %v5730_v35  ;;  %v5234_v26 = vadd.f32 %v8850_v60, %v12714_v21  ;;  %v5726_v5 = vmul.f32 %v7902_v20, %v12694_v12  ;;  %v5232_v52 = vadd.f32 %v8851_v28, %v12712_v33  ;;  %v12827_v19 = vpop.f32.mrf.mxu1  ;;  %v8855_v20 = vld [vmem:[#allocation2 + $0x100] sm:$0xff] }
0x1d06   :  { %v7906_v57 = vpop.eup %7905  ;;  %7931 = vtanh.f32 %v5246_v50  ;;  %v12819_v39 = vpop.f32.mrf.mxu0  ;;  %5768 = vmatpush1.msra.mxu0 %v5729_v14  ;;  %v5725_v63 = vmul.f32 %v7904_v10, %v12692_v34  ;;  %v5228_v21 = vadd.f32 %v8852_v1, %v12708_v15  ;;  %v5226_v33 = vadd.f32 %v8853_v23, %v12706_v61 }
0x1d07   :  { %v7908_v16 = vpop.eup %7907  ;;  %7933 = vtanh.f32 %v5244_v18  ;;  %5769 = vmatprep.subr.mxu0 %v5728_v0  ;;  %v5724_v12 = vmul.f32 %v7906_v57, %v12690_v56  ;;  %v8854_v18 = vld [vmem:[#allocation2 + $0x108] sm:$0xff]  ;;  %v5222_v42 = vadd.f32 %v8855_v20, %v12700_v41 }
0x1d08   :  { %v7910_v29 = vpop.eup %7909  ;;  %7935 = vtanh.f32 %v5242_v43  ;;  %v12825_v13 = vpop.f32.mrf.mxu0  ;;  %5770 = vmatpush1.msra.mxu0 %v5727_v4  ;;  %v5723_v34 = vmul.f32 %v7908_v16, %v12688_v44  ;;  %v5224_v35 = vadd.f32 %v8854_v18, %v12702_v11  ;;  %v14096_v4 = vld [vmem:[#allocation33_spill] sm:$0xff] }
0x1d09   :  { %v7912_v25 = vpop.eup %7911  ;;  %7937 = vtanh.f32 %v5238_v53  ;;  %5771 = vmatprep.subr.mxu0 %v5726_v5  ;;  %v5722_v15 = vmul.f32 %v7910_v29, %v12686_v59  ;;  %v12841_v44 = vpop.f32.mrf.mxu1  ;;  %v14098_v29 = vld [vmem:[#allocation47_spill] sm:$0xff] }
0x1d0a   :  { %v7914_v50 = vpop.eup %7913  ;;  %7939 = vtanh.f32 %v5236_v27  ;;  %v12833_v32 = vpop.f32.mrf.mxu0  ;;  %5772 = vmatpush1.msra.mxu0 %v5725_v63  ;;  %v5721_v61 = vmul.f32 %v7912_v25, %v12684_v55  ;;  %v14099_v25 = vld [vmem:[#allocation48_spill] sm:$0xff] }
0x1d0b   :  { %v7916_v22 = vpop.eup %7915  ;;  %7941 = vtanh.f32 %v5234_v26  ;;  %5773 = vmatprep.subr.mxu0 %v5724_v12  ;;  %v5720_v11 = vmul.f32 %v7914_v50, %v12682_v9  ;;  %v12851_v9 = vpop.f32.mrf.mxu1  ;;  %v14097_v26 = vld [vmem:[#allocation46_spill] sm:$0xff]  ;;  %v14100_v12 = vld [vmem:[#allocation16_spill] sm:$0xff] }
0x1d0c   :  { %v7918_v56 = vpop.eup %7917  ;;  %7943 = vtanh.f32 %v5232_v52  ;;  %v12839_v43 = vpop.f32.mrf.mxu0  ;;  %5774 = vmatpush1.msra.mxu0 %v5723_v34  ;;  %v5719_v59 = vmul.f32 %v7916_v22, %v12680_v40  ;;  %v14101_v34 = vld [vmem:[#allocation17_spill] sm:$0xff] }
0x1d0d   :  { %v7920_v14 = vpop.eup %7919  ;;  %7945 = vtanh.f32 %v5228_v21  ;;  %5775 = vmatprep.subr.mxu0 %v5722_v15  ;;  %v5718_v55 = vmul.f32 %v7918_v56, %v12678_v51  ;;  %v12861_v63 = vpop.f32.mrf.mxu1 }
0x1d0e   :  { %v7922_v10 = vpop.eup %7921  ;;  %7947 = vtanh.f32 %v5226_v33  ;;  %v12845_v30 = vpop.f32.mrf.mxu0  ;;  %5776 = vmatpush1.msra.mxu0 %v5721_v61  ;;  %v5717_v0 = vmul.f32 %v7920_v14, %v12676_v54  ;;  %v14103_v61 = vld [vmem:[#allocation19_spill] sm:$0xff] }
0x1d0f   :  { %v7924_v41 = vpop.eup %7923  ;;  %7949 = vtanh.f32 %v5224_v35  ;;  %5777 = vmatprep.subr.mxu0 %v5720_v11  ;;  %v5716_v40 = vmul.f32 %v7922_v10, %v12674_v48  ;;  %v14102_v35 = vld [vmem:[#allocation18_spill] sm:$0xff]  ;;  %v12871_v20 = vpop.f32.mrf.mxu1  ;;  %v14104_v10 = vld [vmem:[#allocation20_spill] sm:$0xff] }
0x1d10   :  { %v7926_v53 = vpop.eup %7925  ;;  %7951 = vtanh.f32 %v5222_v42  ;;  %v12849_v57 = vpop.f32.mrf.mxu0  ;;  %5778 = vmatpush1.msra.mxu0 %v5719_v59  ;;  %v5715_v16 = vmul.f32 %v7924_v41, %v14096_v4 }
0x1d11   :  { %v7928_v7 = vpop.eup %7927  ;;  %5779 = vmatprep.subr.mxu0 %v5718_v55  ;;  %v5714_v5 = vmul.f32 %v7926_v53, %v14097_v26  ;;  %v14105_v53 = vld [vmem:[#allocation21_spill] sm:$0xff]  ;;  %v14107_v26 = vld [vmem:[#allocation23_spill] sm:$0xff] }
0x1d12   :  { %v7930_v27 = vpop.eup %7929  ;;  %v12855_v60 = vpop.f32.mrf.mxu0  ;;  %5780 = vmatpush1.msra.mxu0 %v5717_v0  ;;  %v5713_v28 = vmul.f32 %v7928_v7, %v14098_v29 }
0x1d13   :  { %v7932_v51 = vpop.eup %7931  ;;  %5781 = vmatprep.subr.mxu0 %v5716_v40  ;;  %v5712_v1 = vmul.f32 %v7930_v27, %v14099_v25  ;;  %v14106_v40 = vld [vmem:[#allocation22_spill] sm:$0xff] }
0x1d14   :  { %v7934_v54 = vpop.eup %7933  ;;  %v12859_v52 = vpop.f32.mrf.mxu0  ;;  %5782 = vmatpush1.msra.mxu0 %v5715_v16  ;;  %v5711_v50 = vmul.f32 %v7932_v51, %v14100_v12 }
0x1d15   :  { %v7936_v48 = vpop.eup %7935  ;;  %5783 = vmatprep.subr.mxu0 %v5714_v5  ;;  %v5710_v22 = vmul.f32 %v7934_v54, %v14101_v34  ;;  %v12879_v16 = vpop.f32.mrf.mxu1  ;;  %v14108_v54 = vld [vmem:[#allocation24_spill] sm:$0xff] }
0x1d16   :  { %v7938_v21 = vpop.eup %7937  ;;  %v12865_v23 = vpop.f32.mrf.mxu0  ;;  %5784 = vmatpush1.msra.mxu0 %v5713_v28  ;;  %v5709_v15 = vmul.f32 %v7936_v48, %v14102_v35  ;;  %v14109_v48 = vld [vmem:[#allocation25_spill] sm:$0xff] }
0x1d17   :  { %v7940_v33 = vpop.eup %7939  ;;  %5785 = vmatprep.subr.mxu0 %v5712_v1  ;;  %v5708_v14 = vmul.f32 %v7938_v21, %v14103_v61  ;;  %v14110_v1 = vld [vmem:[#allocation26_spill] sm:$0xff] }
0x1d18   :  { %v7942_v18 = vpop.eup %7941  ;;  %v12869_v56 = vpop.f32.mrf.mxu0  ;;  %5786 = vmatpush1.msra.mxu0 %v5711_v50  ;;  %v5707_v59 = vmul.f32 %v7940_v33, %v14104_v10 }
0x1d19   :  { %v7944_v42 = vpop.eup %7943  ;;  %5787 = vmatprep.subr.mxu0 %v5710_v22  ;;  %v5706_v0 = vmul.f32 %v7942_v18, %v14105_v53  ;;  %v12885_v50 = vpop.f32.mrf.mxu1 }
0x1d1a   :  { %v7946_v11 = vpop.eup %7945  ;;  %v12875_v41 = vpop.f32.mrf.mxu0  ;;  %5788 = vmatpush1.msra.mxu0 %v5709_v15  ;;  %v5705_v27 = vmul.f32 %v7944_v42, %v14106_v40 }
0x1d1b   :  { %v7948_v55 = vpop.eup %7947  ;;  %5789 = vmatprep.subr.mxu0 %v5708_v14  ;;  %v5704_v5 = vmul.f32 %v7946_v11, %v14107_v26  ;;  %v12887_v22 = vpop.f32.mrf.mxu1  ;;  %v8856_v11 = vld [vmem:[#allocation2 + $0x2e8] sm:$0xff] }
0x1d1c   :  { %v7950_v7 = vpop.eup %7949  ;;  %v5353_v4 = vpop.f32.mrf.mxu0  ;;  %5790 = vmatpush1.msra.mxu0 %v5707_v59  ;;  %v5703_v29 = vmul.f32 %v7948_v55, %v14108_v54  ;;  %v8857_v55 = vld [vmem:[#allocation2 + $0x2f0] sm:$0xff] }
0x1d1d   :  { %v7952_v51 = vpop.eup %7951  ;;  %5791 = vmatprep.subr.mxu0 %v5706_v0  ;;  %v5702_v25 = vmul.f32 %v7950_v7, %v14109_v48  ;;  %v12889_v15 = vpop.f32.mrf.mxu1  ;;  %v8858_v0 = vld [vmem:[#allocation2 + $0x2e0] sm:$0xff] }
0x1d1e   :  { %v5355_v28 = vpop.f32.mrf.mxu0  ;;  %5792 = vmatpush1.msra.mxu0 %v5705_v27  ;;  %v5701_v21 = vmul.f32 %v7952_v51, %v14110_v1  ;;  %v8859_v51 = vld [vmem:[#allocation2 + $0x2d8] sm:$0xff] }
0x1d1f   :  { %5793 = vmatprep.subr.mxu0 %v5704_v5  ;;  %v12891_v14 = vpop.f32.mrf.mxu1  ;;  %v8860_v5 = vld [vmem:[#allocation2 + $0x2f8] sm:$0xff] }
0x1d20   :  { %v5357_v12 = vpop.f32.mrf.mxu0  ;;  %5794 = vmatpush1.msra.mxu0 %v5703_v29  ;;  %v8861_v29 = vld [vmem:[#allocation2 + $0x2d0] sm:$0xff] }
0x1d21   :  { %5795 = vmatprep.subr.mxu0 %v5702_v25  ;;  %v12893_v27 = vpop.f32.mrf.mxu1  ;;  %v8862_v25 = vld [vmem:[#allocation2 + $0x2c8] sm:$0xff] }
0x1d22   :  { %v5361_v33 = vpop.f32.mrf.mxu0  ;;  %5796 = vmatpush1.msra.mxu0 %v5701_v21  ;;  %v8863_v21 = vld [vmem:[#allocation2 + $0x2c0] sm:$0xff] }
0x1d24   :  { %v5363_v34 = vpop.f32.mrf.mxu0 }
0x1d25   :  { %v5364_v1 = vadd.f32 %v8862_v25, %v5363_v34  ;;  %v8874_v25 = vld [vmem:[#allocation2 + $0x268] sm:$0xff] }
0x1d26   :  { %v5365_v18 = vpop.f32.mrf.mxu0 }
0x1d27   :  { %v5366_v48 = vadd.f32 %v8861_v29, %v5365_v18 }
0x1d28   :  { %v5367_v35 = vpop.f32.mrf.mxu0 }
0x1d29   :  { %v5368_v26 = vadd.f32 %v8859_v51, %v5367_v35  ;;  %v8866_v35 = vld [vmem:[#allocation2 + $0x2a8] sm:$0xff] }
0x1d2a   :  { %v5371_v42 = vpop.f32.mrf.mxu0 }
0x1d2b   :  { %v5372_v7 = vadd.f32 %v8858_v0, %v5371_v42  ;;  %v8864_v42 = vld [vmem:[#allocation2 + $0x2b8] sm:$0xff] }
0x1d2c   :  { %v5373_v61 = vpop.f32.mrf.mxu0 }
0x1d2d   :  { %v5374_v10 = vadd.f32 %v8856_v11, %v5373_v61  ;;  %v5362_v61 = vadd.f32 %v8863_v21, %v5361_v33  ;;  %v12895_v11 = vpop.f32.mrf.mxu1  ;;  %v8875_v21 = vld [vmem:[#allocation2 + $0x260] sm:$0xff] }
0x1d2e   :  { %v5375_v59 = vpop.f32.mrf.mxu0 }
0x1d2f   :  { %v5376_v53 = vadd.f32 %v8857_v55, %v5375_v59  ;;  %7953 = vtanh.f32 %v5374_v10  ;;  %v5358_v59 = vadd.f32 %v8864_v42, %v5357_v12  ;;  %v8865_v55 = vld [vmem:[#allocation2 + $0x2b0] sm:$0xff]  ;;  %v5354_v10 = vadd.f32 %v8866_v35, %v5353_v4  ;;  %v5692_v34 = vpop.f32.mrf.mxu1  ;;  %v8870_v12 = vld [vmem:[#allocation2 + $0x288] sm:$0xff] }
0x1d30   :  { %v5377_v40 = vpop.f32.mrf.mxu0  ;;  %v5356_v0 = vadd.f32 %v8865_v55, %v5355_v28  ;;  %v5344_v28 = vadd.f32 %v8870_v12, %v12859_v52  ;;  %v8880_v12 = vld [vmem:[#allocation2 + $0x238] sm:$0xff] }
0x1d31   :  { %v5378_v54 = vadd.f32 %v8860_v5, %v5377_v40  ;;  %7955 = vtanh.f32 %v5376_v53  ;;  %v8867_v40 = vld [vmem:[#allocation2 + $0x2a0] sm:$0xff]  ;;  %v8868_v53 = vld [vmem:[#allocation2 + $0x298] sm:$0xff]  ;;  %v5696_v5 = vpop.f32.mrf.mxu1 }
0x1d32   :  { %v5352_v18 = vadd.f32 %v8867_v40, %v12875_v41  ;;  %v5348_v33 = vadd.f32 %v8868_v53, %v12869_v56  ;;  %v8872_v41 = vld [vmem:[#allocation2 + $0x278] sm:$0xff]  ;;  %v8873_v56 = vld [vmem:[#allocation2 + $0x270] sm:$0xff]  ;;  %v8878_v40 = vld [vmem:[#allocation2 + $0x248] sm:$0xff] }
0x1d33   :  { %7957 = vtanh.f32 %v5378_v54  ;;  %v5338_v54 = vadd.f32 %v8872_v41, %v12849_v57 }
0x1d34   :  { %7959 = vtanh.f32 %v5372_v7  ;;  %v8869_v7 = vld [vmem:[#allocation2 + $0x290] sm:$0xff] }
0x1d35   :  { %7961 = vtanh.f32 %v5368_v26  ;;  %v5346_v51 = vadd.f32 %v8869_v7, %v12865_v23  ;;  %v8871_v26 = vld [vmem:[#allocation2 + $0x280] sm:$0xff] }
0x1d36   :  { %7963 = vtanh.f32 %v5366_v48  ;;  %v5342_v4 = vadd.f32 %v8871_v26, %v12855_v60  ;;  %v5336_v48 = vadd.f32 %v8873_v56, %v12845_v30  ;;  %v5332_v60 = vadd.f32 %v8875_v21, %v12833_v32  ;;  %v8877_v30 = vld [vmem:[#allocation2 + $0x250] sm:$0xff]  ;;  %v8884_v56 = vld [vmem:[#allocation2 + $0x218] sm:$0xff]  ;;  %v8887_v21 = vld [vmem:[#allocation2 + $0x200] sm:$0xff] }
0x1d37   :  { %7965 = vtanh.f32 %v5364_v1  ;;  %v5334_v1 = vadd.f32 %v8874_v25, %v12839_v43  ;;  %v5326_v35 = vadd.f32 %v8877_v30, %v12819_v39  ;;  %v5318_v39 = vadd.f32 %v8880_v12, %v12797_v31  ;;  %v8881_v26 = vld [vmem:[#allocation2 + $0x230] sm:$0xff] }
0x1d38   :  { %7967 = vtanh.f32 %v5362_v61  ;;  %v5698_v61 = vpop.f32.mrf.mxu1 }
0x1d39   :  { %7969 = vtanh.f32 %v5358_v59  ;;  %v8876_v59 = vld [vmem:[#allocation2 + $0x258] sm:$0xff] }
0x1d3a   :  { %7971 = vtanh.f32 %v5356_v0  ;;  %v5328_v57 = vadd.f32 %v8876_v59, %v12825_v13 }
0x1d3b   :  { %7973 = vtanh.f32 %v5354_v10 }
0x1d3c   :  { %7975 = vtanh.f32 %v5352_v18  ;;  %v7954_v29 = vpop.eup %7953  ;;  %v5324_v18 = vadd.f32 %v8878_v40, %v12811_v17 }
0x1d3d   :  { %7977 = vtanh.f32 %v5348_v33  ;;  %v5762_v32 = vmul.f32 %v7954_v29, %v5692_v34  ;;  %v8879_v33 = vld [vmem:[#allocation2 + $0x240] sm:$0xff]  ;;  %v5316_v34 = vadd.f32 %v8881_v26, %v12793_v47 }
0x1d3e   :  { %7979 = vtanh.f32 %v5346_v51  ;;  %v7956_v23 = vpop.eup %7955  ;;  %v5322_v7 = vadd.f32 %v8879_v33, %v12805_v58  ;;  %v14117_v26 = vld [vmem:[#allocation40_spill] sm:$0xff] }
0x1d3f   :  { %7981 = vtanh.f32 %v5344_v28  ;;  %v5763_v10 = vmul.f32 %v7956_v23, %v5696_v5  ;;  %v8882_v5 = vld [vmem:[#allocation2 + $0x228] sm:$0xff]  ;;  %v8885_v23 = vld [vmem:[#allocation2 + $0x210] sm:$0xff] }
0x1d40   :  { %v7958_v52 = vpop.eup %7957  ;;  %7983 = vtanh.f32 %v5342_v4 }
0x1d41   :  { %v7960_v42 = vpop.eup %7959  ;;  %7985 = vtanh.f32 %v5338_v54  ;;  %v5764_v55 = vmul.f32 %v7958_v52, %v5698_v61  ;;  %v8883_v54 = vld [vmem:[#allocation2 + $0x220] sm:$0xff] }
0x1d42   :  { %v7962_v0 = vpop.eup %7961  ;;  %7987 = vtanh.f32 %v5336_v48  ;;  %v5761_v13 = vmul.f32 %v7960_v42, %v12895_v11  ;;  %v5314_v11 = vadd.f32 %v8882_v5, %v12787_v49 }
0x1d43   :  { %v7964_v43 = vpop.eup %7963  ;;  %7989 = vtanh.f32 %v5334_v1  ;;  %5797 = vmatprep.subr.mxu0 %v5764_v55  ;;  %v5760_v28 = vmul.f32 %v7962_v0, %v12893_v27  ;;  %v5312_v27 = vadd.f32 %v8883_v54, %v12783_v8  ;;  %v8886_v1 = vld [vmem:[#allocation2 + $0x208] sm:$0xff] }
0x1d44   :  { %v7966_v53 = vpop.eup %7965  ;;  %7991 = vtanh.f32 %v5332_v60  ;;  %5798 = vmatpush2.msra.mxu0 %v5763_v10  ;;  %v5759_v4 = vmul.f32 %v7964_v43, %v12891_v14  ;;  %v5308_v14 = vadd.f32 %v8884_v56, %v12778_v24  ;;  %v14111_v43 = vld [vmem:[#allocation10_spill] sm:$0xff]  ;;  %v8889_v56 = vld [vmem:[%s13625_s4 + $0x18] sm:$0xff] }
0x1d45   :  { %v7968_v51 = vpop.eup %7967  ;;  %7993 = vtanh.f32 %v5328_v57  ;;  %5799 = vmatprep.subr.mxu0 %v5762_v32  ;;  %v5758_v41 = vmul.f32 %v7966_v53, %v12889_v15  ;;  %v5306_v15 = vadd.f32 %v8885_v23, %v12776_v45  ;;  %v14113_v53 = vld [vmem:[#allocation36_spill] sm:$0xff]  ;;  %v8893_v23 = vld [vmem:[%s13625_s4 + $0x38] sm:$0xff] }
0x1d46   :  { %v7970_v17 = vpop.eup %7969  ;;  %7995 = vtanh.f32 %v5326_v35  ;;  %5800 = vmatpush2.msra.mxu0 %v5761_v13  ;;  %v5757_v29 = vmul.f32 %v7968_v51, %v12887_v22  ;;  %v5304_v22 = vadd.f32 %v8886_v1, %v12772_v38  ;;  %v14115_v51 = vld [vmem:[#allocation38_spill] sm:$0xff] }
0x1d47   :  { %v7972_v58 = vpop.eup %7971  ;;  %7997 = vtanh.f32 %v5324_v18  ;;  %5801 = vmatprep.subr.mxu0 %v5760_v28  ;;  %v5756_v48 = vmul.f32 %v7970_v17, %v12885_v50  ;;  %v5302_v50 = vadd.f32 %v8887_v21, %v12770_v2  ;;  %v14112_v18 = vld [vmem:[#allocation35_spill] sm:$0xff] }
0x1d48   :  { %v7974_v31 = vpop.eup %7973  ;;  %7999 = vtanh.f32 %v5322_v7  ;;  %5802 = vmatpush2.msra.mxu0 %v5759_v4  ;;  %v5755_v25 = vmul.f32 %v7972_v58, %v12879_v16  ;;  %v14114_v7 = vld [vmem:[#allocation37_spill] sm:$0xff] }
0x1d49   :  { %v7976_v47 = vpop.eup %7975  ;;  %8001 = vtanh.f32 %v5318_v39  ;;  %5803 = vmatprep.subr.mxu0 %v5758_v41  ;;  %v5754_v52 = vmul.f32 %v7974_v31, %v12871_v20  ;;  %v14116_v39 = vld [vmem:[#allocation39_spill] sm:$0xff]  ;;  %v14118_v58 = vld [vmem:[#allocation41_spill] sm:$0xff] }
0x1d4a   :  { %v7978_v49 = vpop.eup %7977  ;;  %8003 = vtanh.f32 %v5316_v34  ;;  %5804 = vmatpush2.msra.mxu0 %v5757_v29  ;;  %v5753_v60 = vmul.f32 %v7976_v47, %v12861_v63  ;;  %v14120_v31 = vld [vmem:[#allocation43_spill] sm:$0xff]  ;;  %v8888_v47 = vld [vmem:[%s13625_s4] sm:$0xff] }
0x1d4b   :  { %v7980_v8 = vpop.eup %7979  ;;  %8005 = vtanh.f32 %v5314_v11  ;;  %5805 = vmatprep.subr.mxu0 %v5756_v48  ;;  %v5752_v16 = vmul.f32 %v7978_v49, %v12851_v9  ;;  %v14119_v11 = vld [vmem:[#allocation42_spill] sm:$0xff]  ;;  %v8891_v48 = vld [vmem:[%s13625_s4 + $0x28] sm:$0xff]  ;;  %v8892_v49 = vld [vmem:[%s13625_s4 + $0x20] sm:$0xff] }
0x1d4c   :  { %v7982_v24 = vpop.eup %7981  ;;  %8007 = vtanh.f32 %v5312_v27  ;;  %5806 = vmatpush2.msra.mxu0 %v5755_v25  ;;  %v5751_v38 = vmul.f32 %v7980_v8, %v12841_v44  ;;  %v14121_v27 = vld [vmem:[#allocation44_spill] sm:$0xff]  ;;  %v14122_v25 = vmov 0  }
0x1d4d   :  { %v7984_v45 = vpop.eup %7983  ;;  %8009 = vtanh.f32 %v5308_v14  ;;  %5807 = vmatprep.subr.mxu0 %v5754_v52  ;;  %v5750_v42 = vmul.f32 %v7982_v24, %v12827_v19  ;;  %v8890_v14 = vld [vmem:[%s13625_s4 + $0x10] sm:$0xff] }
0x1d4e   :  { %v7986_v61 = vpop.eup %7985  ;;  %8011 = vtanh.f32 %v5306_v15  ;;  %5808 = vmatpush2.msra.mxu0 %v5753_v60  ;;  %v5749_v63 = vmul.f32 %v7984_v45, %v12813_v36  ;;  %v8894_v15 = vld [vmem:[%s13625_s4 + $0x30] sm:$0xff]  ;;  %v14123_v60 = vld [vmem:[#allocation32_spill] sm:$0xff] }
0x1d4f   :  { %v7988_v20 = vpop.eup %7987  ;;  %8013 = vtanh.f32 %v5304_v22  ;;  %5809 = vmatprep.subr.mxu0 %v5752_v16  ;;  %v5748_v57 = vmul.f32 %v7986_v61, %v12799_v3  ;;  %v14125_v61 = vld [vmem:[#allocation31_spill] sm:$0xff] }
0x1d50   :  { %v7990_v2 = vpop.eup %7989  ;;  %8015 = vtanh.f32 %v5302_v50  ;;  %5810 = vmatpush2.msra.mxu0 %v5751_v38  ;;  %v5747_v55 = vmul.f32 %v7988_v20, %v12789_v62  ;;  %v14127_v20 = vld [vmem:[#allocation30_spill] sm:$0xff] }
0x1d51   :  { %v7992_v59 = vpop.eup %7991  ;;  %5811 = vmatprep.subr.mxu0 %v5750_v42  ;;  %v5746_v0 = vmul.f32 %v7990_v2, %v12780_v46  ;;  %v14129_v2 = vld [vmem:[#allocation29_spill] sm:$0xff] }
0x1d52   :  { %v7994_v9 = vpop.eup %7993  ;;  %5812 = vmatpush2.msra.mxu0 %v5749_v63  ;;  %v5745_v19 = vmul.f32 %v7992_v59, %v12774_v6  ;;  %v14131_v59 = vld [vmem:[#allocation28_spill] sm:$0xff] }
0x1d53   :  { %v7996_v44 = vpop.eup %7995  ;;  %5813 = vmatprep.subr.mxu0 %v5748_v57  ;;  %v5744_v36 = vmul.f32 %v7994_v9, %v12768_v37  ;;  %v14133_v9 = vld [vmem:[#allocation27_spill] sm:$0xff] }
0x1d54   :  { %v7998_v30 = vpop.eup %7997  ;;  %5814 = vmatpush2.msra.mxu0 %v5747_v55  ;;  %v5743_v3 = vmul.f32 %v7996_v44, %v14111_v43 }
0x1d55   :  { %v8000_v35 = vpop.eup %7999  ;;  %5815 = vmatprep.subr.mxu0 %v5746_v0  ;;  %v5742_v62 = vmul.f32 %v7998_v30, %v14112_v18  ;;  %v14135_v0 = vld [vmem:[#allocation8_spill] sm:$0xff] }
0x1d56   :  { %v8002_v10 = vpop.eup %8001  ;;  %5816 = vmatpush2.msra.mxu0 %v5745_v19  ;;  %v5741_v46 = vmul.f32 %v8000_v35, %v14113_v53 }
0x1d57   :  { %v8004_v40 = vpop.eup %8003  ;;  %5817 = vmatprep.subr.mxu0 %v5744_v36  ;;  %v5740_v6 = vmul.f32 %v8002_v10, %v14114_v7  ;;  %v14137_v36 = vld [vmem:[#allocation9_spill] sm:$0xff] }
0x1d58   :  { %v8006_v32 = vpop.eup %8005  ;;  %5818 = vmatpush2.msra.mxu0 %v5743_v3  ;;  %v5739_v37 = vmul.f32 %v8004_v40, %v14115_v51  ;;  %v8895_v3 = vld [vmem:[%s13623_s2] sm:$0xff]   ;;  %v8896_v40 = vld [vmem:[%s13623_s2 + $0x8] sm:$0xff]  }
0x1d59   :  { %v8008_v33 = vpop.eup %8007  ;;  %5819 = vmatprep.subr.mxu0 %v5742_v62  ;;  %v5738_v28 = vmul.f32 %v8006_v32, %v14116_v39  ;;  %v8898_v51 = vld [vmem:[#allocation2 + $0x68] sm:$0xff] }
0x1d5a   :  { %v8010_v13 = vpop.eup %8009  ;;  %5820 = vmatpush2.msra.mxu0 %v5741_v46  ;;  %v5737_v34 = vmul.f32 %v8008_v33, %v14117_v26 }
0x1d5b   :  { %v8012_v12 = vpop.eup %8011  ;;  %5821 = vmatprep.subr.mxu0 %v5740_v6  ;;  %v5736_v5 = vmul.f32 %v8010_v13, %v14118_v58  ;;  %v8897_v6 = vld [vmem:[#allocation2 + $0x58] sm:$0xff] }
0x1d5c   :  { %v8014_v17 = vpop.eup %8013  ;;  %5822 = vmatpush2.msra.mxu0 %v5739_v37  ;;  %v5735_v41 = vmul.f32 %v8012_v12, %v14119_v11  ;;  %v8899_v12 = vld [vmem:[#allocation2 + $0x70] sm:$0xff]  ;;  %v8902_v58 = vld [vmem:[#allocation2 + $0x78] sm:$0xff] }
0x1d5d   :  { %v8016_v4 = vpop.eup %8015  ;;  %5823 = vmatprep.subr.mxu0 %v5738_v28  ;;  %v5734_v54 = vmul.f32 %v8014_v17, %v14120_v31  ;;  %v8900_v28 = vld [vmem:[#allocation2 + $0x60] sm:$0xff]  ;;  %v8903_v11 = vld [vmem:[#allocation2 + $0x50] sm:$0xff] }
0x1d5e   :  { %5824 = vmatpush2.msra.mxu0 %v5737_v34  ;;  %v5733_v29 = vmul.f32 %v8016_v4, %v14121_v27  ;;  %v8901_v34 = vld [vmem:[#allocation2 + $0x48] sm:$0xff] }
0x1d5f   :  { %5825 = vmatprep.subr.mxu0 %v5736_v5 }
0x1d60   :  { %5826 = vmatpush2.msra.mxu0 %v5735_v41 }
0x1d61   :  { %5827 = vmatprep.subr.mxu0 %v5734_v54 }
0x1d62   :  { %5828 = vmatpush2.msra.mxu0 %v5733_v29 }
0x1d63   :  { %5830 = vmatmul.mubr.f32.vlgmr.msra.gmra.mxu0 %v8888_v47  ;;  %v8904_v47 = vld [vmem:[#allocation2 + $0x40] sm:$0xff] }
0x1d64   :  { %5835 = vmatprep.mubr.f32.mxu0 %v8889_v56 }
0x1d67   :  { %5836 = vmatmul.mubr.f32.gmra.mxu0 %v8890_v14 }
0x1d68   :  { %5841 = vmatprep.mubr.f32.mxu0 %v8891_v48 }
0x1d6b   :  { %5842 = vmatmul.mubr.f32.gmra.mxu0 %v8892_v49 }
0x1d6c   :  { %5847 = vmatprep.mubr.f32.mxu0 %v8893_v23 }
0x1d6f   :  { %5848 = vmatmul.mubr.f32.gmra.mxu0 %v8894_v15 }
0x1d70   :  { %5965 = vmatprep.mubr.bf16.mxu0 %v14122_v25 }
0x1e23   :  { %v5831_v8 = vpop.f32.mrf.mxu0 }
0x1e24   :  { %v12997_v10 = vadd.f32 %v5831_v8, %v14137_v36  ;;  %v8910_v36 = vld [vmem:[#allocation2 + $0xa0] sm:$0xff] }
0x1e25   :  { %v5833_v1 = vpop.f32.mrf.mxu0 }
0x1e26   :  { %v12985_v55 = vadd.f32 %v5833_v1, %v14133_v9  ;;  %14138 = vst [vmem:[#allocation33_spill] sm:$0xff] %v12997_v10 }
0x1e27   :  { %v5837_v22 = vpop.f32.mrf.mxu0 }
0x1e28   :  { %14134 = vst [vmem:[#allocation45_spill] sm:$0xff] %v12985_v55  ;;  %v12990_v30 = vadd.f32 %v5837_v22, %v14135_v0 }
0x1e29   :  { %v5839_v52 = vpop.f32.mrf.mxu0 }
0x1e2a   :  { %v12973_v38 = vadd.f32 %v5839_v52, %v14125_v61  ;;  %14136 = vst [vmem:[#allocation34_spill] sm:$0xff] %v12990_v30  ;;  %v5864_v43 = vpack.c.bf16 %v12990_v30, %v12997_v10  ;;  %v8905_v52 = vld [vmem:[%s13623_s2 + $0x10] sm:$0xff]  }
0x1e2b   :  { %v5843_v24 = vpop.f32.mrf.mxu0 }
0x1e2c   :  { %14126 = vst [vmem:[#allocation12_spill] sm:$0xff] %v12973_v38  ;;  %v12982_v57 = vadd.f32 %v5843_v24, %v14131_v59  ;;  %v5865_v35 = vpack.c.bf16 %v12973_v38, %v12985_v55  ;;  %v8906_v24 = vld [vmem:[%s13623_s2 + $0x18] sm:$0xff]  }
0x1e2d   :  { %v5845_v21 = vpop.f32.mrf.mxu0  ;;  %v8907_v59 = vld [vmem:[#allocation2 + $0x98] sm:$0xff] }
0x1e2e   :  { %v12976_v42 = vadd.f32 %v5845_v21, %v14127_v20  ;;  %14132 = vst [vmem:[#allocation15_spill] sm:$0xff] %v12982_v57 }
0x1e2f   :  { %v5849_v50 = vpop.f32.mrf.mxu0 }
0x1e30   :  { %v12970_v45 = vadd.f32 %v5849_v50, %v14123_v60  ;;  %14128 = vst [vmem:[#allocation13_spill] sm:$0xff] %v12976_v42 }
0x1e31   :  { %v5851_v16 = vpop.f32.mrf.mxu0 }
0x1e32   :  { %14124 = vst [vmem:[#allocation11_spill] sm:$0xff] %v12970_v45  ;;  %v12979_v63 = vadd.f32 %v5851_v16, %v14129_v2  ;;  %v5866_v19 = vpack.c.bf16 %v12970_v45, %v12982_v57 }
0x1e34   :  { %14130 = vst [vmem:[#allocation14_spill] sm:$0xff] %v12979_v63  ;;  %v5867_v44 = vpack.c.bf16 %v12979_v63, %v12976_v42 }
0x1e36   :  { %5880 = vmatprep.subr.bf16.mxu1 %v5867_v44  ;;  %v8908_v44 = vld [vmem:[#allocation2 + $0xa8] sm:$0xff] }
0x1e37   :  { %5881 = vmatpush1.bf16.msra.mxu1 %v5866_v19  ;;  %v8909_v19 = vld [vmem:[#allocation2 + $0xb0] sm:$0xff] }
0x1e38   :  { %5882 = vmatprep.subr.bf16.mxu1 %v5865_v35 }
0x1e3b   :  { %5883 = vmatpush1.bf16.msra.mxu1 %v5864_v43 }
0x1e3e   :  { %7164 = vmatmul.mubr.msk.bf16.vlgmr.msra.gmra.mxu1 %vm349_vm1, %v8895_v3 }
0x1e3f   :  { %5910 = vmatprep.mubr.bf16.mxu1 %v14122_v25 }
0x1e46   :  { %7165 = vmatmul.mubr.msk.bf16.gmra.mxu1 %vm349_vm1, %v8896_v40  ;;  %v8911_v40 = vld [vmem:[#allocation2 + $0x88] sm:$0xff] }
0x1e47   :  { %6030 = vmatprep.mubr.bf16.mxu1 %v14122_v25 }
0x1efe   :  { %v5902_v18 = vpop.f32.mrf.mxu1 }
0x1eff   :  { %v5903_v56 = vadd.f32 %v8904_v47, %v5902_v18  ;;  %v8919_v47 = vld [vmem:[%s13624_s3 + $0x30] sm:$0xff] }
0x1f00   :  { %v5904_v62 = vpop.f32.mrf.mxu1 }
0x1f01   :  { %v5905_v4 = vadd.f32 %v8901_v34, %v5904_v62  ;;  %v5921_v1 = vmax.f32 %v5903_v56, 0.0  ;;  %v8912_v62 = vld [vmem:[#allocation2 + $0xb8] sm:$0xff] }
0x1f02   :  { %v5906_v32 = vpop.f32.mrf.mxu1  ;;  %v8920_v56 = vld [vmem:[%s13624_s3 + $0x38] sm:$0xff] }
0x1f03   :  { %v5907_v41 = vadd.f32 %v8903_v11, %v5906_v32  ;;  %v5922_v48 = vmax.f32 %v5905_v4, 0.0  ;;  %v8916_v11 = vld [vmem:[%s13623_s2 + $0x28] sm:$0xff]  }
0x1f04   :  { %v5908_v53 = vpop.f32.mrf.mxu1 }
0x1f05   :  { %v5909_v13 = vadd.f32 %v8897_v6, %v5908_v53  ;;  %v5923_v23 = vmax.f32 %v5907_v41, 0.0  ;;  %v8913_v53 = vld [vmem:[#allocation2 + $0x90] sm:$0xff]  ;;  %v14139_v41 = vmov 0.0  }
0x1f06   :  { %v5912_v46 = vpop.f32.mrf.mxu1 }
0x1f07   :  { %v5913_v17 = vadd.f32 %v8900_v28, %v5912_v46  ;;  %v5924_v54 = vmax.f32 %v5909_v13, 0.0  ;;  %v5929_v22 = vpack.c.bf16 %v5923_v23, %v5921_v1  ;;  %v8924_v23 = vld [vmem:[%s13624_s3 + $0x58] sm:$0xff]  ;;  %v8927_v1 = vld [vmem:[%s13624_s3 + $0x70] sm:$0xff] }
0x1f08   :  { %v5914_v33 = vpop.f32.mrf.mxu1 }
0x1f09   :  { %v5915_v37 = vadd.f32 %v8898_v51, %v5914_v33  ;;  %v5925_v14 = vmax.f32 %v5913_v17, 0.0  ;;  %v5930_v8 = vpack.c.bf16 %v5924_v54, %v5922_v48  ;;  %v8914_v51 = vld [vmem:[#allocation2 + $0x80] sm:$0xff]  ;;  %v8922_v48 = vld [vmem:[%s13624_s3 + $0x48] sm:$0xff] }
0x1f0a   :  { %v5916_v7 = vpop.f32.mrf.mxu1  ;;  %v5862_v54 = vld [vmem:[%s13622_s1 + $0x60] sm:$0xff] }
0x1f0b   :  { %v5917_v39 = vadd.f32 %v8899_v12, %v5916_v7  ;;  %v5926_v27 = vmax.f32 %v5915_v37, 0.0 }
0x1f0c   :  { %v5918_v26 = vpop.f32.mrf.mxu1 }
0x1f0d   :  { %v5919_v5 = vadd.f32 %v8902_v58, %v5918_v26  ;;  %v5927_v31 = vmax.f32 %v5917_v39, 0.0 }
0x1f0f   :  { %v5928_v29 = vmax.f32 %v5919_v5, 0.0  ;;  %v5931_v15 = vpack.c.bf16 %v5927_v31, %v5925_v14  ;;  %v8915_v5 = vld [vmem:[%s13623_s2 + $0x20] sm:$0xff]   ;;  %v5863_v31 = vld [vmem:[%s13622_s1 + $0x68] sm:$0xff] }
0x1f10   :  { %v8921_v14 = vld [vmem:[%s13624_s3 + $0x40] sm:$0xff] }
0x1f11   :  { %v5932_v49 = vpack.c.bf16 %v5928_v29, %v5926_v27  ;;  %v8917_v27 = vld [vmem:[%s13624_s3 + $0x20] sm:$0xff]  ;;  %v8918_v29 = vld [vmem:[%s13624_s3 + $0x28] sm:$0xff] }
0x1f13   :  { %5945 = vmatprep.subr.bf16.mxu0 %v5932_v49  ;;  %v8923_v49 = vld [vmem:[%s13624_s3 + $0x50] sm:$0xff] }
0x1f14   :  { %5946 = vmatpush1.bf16.msra.mxu0 %v5931_v15  ;;  %v8925_v15 = vld [vmem:[%s13624_s3 + $0x60] sm:$0xff] }
0x1f15   :  { %5947 = vmatprep.subr.bf16.mxu0 %v5930_v8  ;;  %v8926_v8 = vld [vmem:[%s13624_s3 + $0x68] sm:$0xff] }
0x1f18   :  { %5948 = vmatpush1.bf16.msra.mxu0 %v5929_v22  ;;  %v8928_v22 = vld [vmem:[%s13624_s3 + $0x78] sm:$0xff] }
0x1f1b   :  { %7166 = vmatmul.mubr.msk.bf16.vlgmr.msra.gmra.mxu0 %vm349_vm1, %v8905_v52  ;;  %v8929_v52 = vld [vmem:[%s13624_s3 + $0x80] sm:$0xff] }
0x1f1c   :  { %5975 = vmatprep.mubr.bf16.mxu0 %v14122_v25 }
0x1f23   :  { %7167 = vmatmul.mubr.msk.bf16.gmra.mxu0 %vm349_vm1, %v8906_v24  ;;  %v8930_v24 = vld [vmem:[%s13624_s3 + $0x88] sm:$0xff] }
0x1f24   :  { %6095 = vmatprep.mubr.bf16.mxu0 %v14122_v25 }
0x1fdb   :  { %v5967_v21 = vpop.f32.mrf.mxu0 }
0x1fdc   :  { %v5968_v37 = vadd.f32 %v8914_v51, %v5967_v21  ;;  %v8931_v21 = vld [vmem:[%s13624_s3 + $0x90] sm:$0xff] }
0x1fdd   :  { %v5969_v50 = vpop.f32.mrf.mxu0 }
0x1fde   :  { %v5970_v18 = vadd.f32 %v8911_v40, %v5969_v50  ;;  %v5986_v4 = vmax.f32 %v5968_v37, 0.0  ;;  %v8932_v50 = vld [vmem:[%s13624_s3 + $0x98] sm:$0xff] }
0x1fdf   :  { %v5971_v60 = vpop.f32.mrf.mxu0 }
0x1fe0   :  { %v5972_v46 = vadd.f32 %v8913_v53, %v5971_v60  ;;  %v5987_v39 = vmax.f32 %v5970_v18, 0.0  ;;  %v8933_v60 = vld [vmem:[%s13624_s3 + $0xa0] sm:$0xff] }
0x1fe1   :  { %v5973_v16 = vpop.f32.mrf.mxu0 }
0x1fe2   :  { %v5974_v9 = vadd.f32 %v8907_v59, %v5973_v16  ;;  %v5988_v17 = vmax.f32 %v5972_v46, 0.0  ;;  %v8934_v16 = vld [vmem:[%s13624_s3 + $0xa8] sm:$0xff] }
0x1fe3   :  { %v5977_v61 = vpop.f32.mrf.mxu0  ;;  %v8938_v59 = vld [vmem:[%s13624_s3 + $0xc8] sm:$0xff] }
0x1fe4   :  { %v5978_v43 = vadd.f32 %v8910_v36, %v5977_v61  ;;  %v5989_v7 = vmax.f32 %v5974_v9, 0.0  ;;  %v5994_v58 = vpack.c.bf16 %v5988_v17, %v5986_v4  ;;  %v8935_v61 = vld [vmem:[%s13624_s3 + $0xb0] sm:$0xff]  ;;  %v8944_v46 = vld [vmem:[#allocation2 + $0xe8] sm:$0xff] }
0x1fe5   :  { %v5979_v20 = vpop.f32.mrf.mxu0 }
0x1fe6   :  { %v5980_v0 = vadd.f32 %v8908_v44, %v5979_v20  ;;  %v5990_v12 = vmax.f32 %v5978_v43, 0.0  ;;  %v5995_v34 = vpack.c.bf16 %v5989_v7, %v5987_v39  ;;  %v8936_v20 = vld [vmem:[%s13624_s3 + $0xb8] sm:$0xff]  ;;  %v8939_v44 = vld [vmem:[%s13624_s3 + $0xd0] sm:$0xff] }
0x1fe7   :  { %v5981_v2 = vpop.f32.mrf.mxu0  ;;  %v8945_v7 = vld [vmem:[#allocation2 + $0xf0] sm:$0xff] }
0x1fe8   :  { %v5982_v35 = vadd.f32 %v8909_v19, %v5981_v2  ;;  %v5991_v6 = vmax.f32 %v5980_v0, 0.0  ;;  %v8937_v2 = vld [vmem:[%s13624_s3 + $0xc0] sm:$0xff] }
0x1fe9   :  { %v5983_v3 = vpop.f32.mrf.mxu0 }
0x1fea   :  { %v5984_v32 = vadd.f32 %v8912_v62, %v5983_v3  ;;  %v5992_v33 = vmax.f32 %v5982_v35, 0.0  ;;  %v8940_v35 = vld [vmem:[%s13624_s3 + $0xd8] sm:$0xff]  ;;  %v8941_v3 = vld [vmem:[%s13624_s3 + $0xe0] sm:$0xff]  ;;  %v8942_v62 = vld [vmem:[%s13624_s3 + $0xe8] sm:$0xff] }
0x1fec   :  { %v5993_v13 = vmax.f32 %v5984_v32, 0.0  ;;  %v5996_v26 = vpack.c.bf16 %v5992_v33, %v5990_v12  ;;  %v8943_v32 = vld [vmem:[#allocation2 + $0xd8] sm:$0xff]  ;;  %v8947_v12 = vld [vmem:[#allocation2 + $0xc8] sm:$0xff] }
0x1fee   :  { %v5997_v28 = vpack.c.bf16 %v5993_v13, %v5991_v6  ;;  %v8946_v13 = vld [vmem:[#allocation2 + $0xe0] sm:$0xff] }
0x1ff0   :  { %6010 = vmatprep.subr.bf16.mxu1 %v5997_v28  ;;  %v8948_v28 = vld [vmem:[#allocation2 + $0xf8] sm:$0xff] }
0x1ff1   :  { %6011 = vmatpush1.bf16.msra.mxu1 %v5996_v26  ;;  %v8949_v26 = vld [vmem:[#allocation2 + $0xd0] sm:$0xff] }
0x1ff2   :  { %6012 = vmatprep.subr.bf16.mxu1 %v5995_v34 }
0x1ff5   :  { %6013 = vmatpush1.bf16.msra.mxu1 %v5994_v58  ;;  %v8950_v58 = vld [vmem:[%s13624_s3 + $0xf0] sm:$0xff] }
0x1ff6   :  { %6350 = vmatprep.subr.mxu1 %v5863_v31 }
0x1ff8   :  { %7168 = vmatmul.mubr.msk.bf16.vlgmr.msra.gmra.mxu1 %vm349_vm1, %v8915_v5 }
0x1ff9   :  { %6040 = vmatprep.mubr.bf16.mxu1 %v14122_v25  ;;  %6351 = vmatpush1.msra.mxu1 %v5862_v54  ;;  %v8951_v54 = vld [vmem:[#allocation2 + $0xc0] sm:$0xff] }
0x2000   :  { %7169 = vmatmul.mubr.msk.bf16.gmra.mxu1 %vm349_vm1, %v8916_v11 }
0x2001   :  { %6384 = vmatprep.mubr.f32.mxu1 %v14139_v41 }
0x2008   :  { %7186 = vmatmul.mubr.msk.f32.vlgmr.msra.gmra.mxu1 %vm231_vm0, %v8917_v27 }
0x2009   :  { %6390 = vmatprep.mubr.f32.mxu1 %v14139_v41 }
0x200c   :  { %7187 = vmatmul.mubr.msk.f32.gmra.mxu1 %vm231_vm0, %v8918_v29 }
0x200d   :  { %6396 = vmatprep.mubr.f32.mxu1 %v14139_v41 }
0x2010   :  { %7188 = vmatmul.mubr.msk.f32.gmra.mxu1 %vm231_vm0, %v8919_v47 }
0x2011   :  { %6402 = vmatprep.mubr.f32.mxu1 %v14139_v41 }
0x2014   :  { %7189 = vmatmul.mubr.msk.f32.gmra.mxu1 %vm231_vm0, %v8920_v56 }
0x2015   :  { %6408 = vmatprep.mubr.f32.mxu1 %v14139_v41 }
0x2018   :  { %7190 = vmatmul.mubr.msk.f32.gmra.mxu1 %vm231_vm0, %v8921_v14 }
0x2019   :  { %6414 = vmatprep.mubr.f32.mxu1 %v14139_v41 }
0x201c   :  { %7191 = vmatmul.mubr.msk.f32.gmra.mxu1 %vm231_vm0, %v8922_v48 }
0x201d   :  { %6420 = vmatprep.mubr.f32.mxu1 %v14139_v41 }
0x2020   :  { %7192 = vmatmul.mubr.msk.f32.gmra.mxu1 %vm231_vm0, %v8923_v49  ;;  %v8952_v49 = vld [vmem:[%s13624_s3 + $0xf8] sm:$0xff] }
0x2021   :  { %6426 = vmatprep.mubr.f32.mxu1 %v14139_v41 }
0x2024   :  { %7193 = vmatmul.mubr.msk.f32.gmra.mxu1 %vm231_vm0, %v8924_v23 }
0x2025   :  { %6432 = vmatprep.mubr.f32.mxu1 %v14139_v41 }
0x2028   :  { %7194 = vmatmul.mubr.msk.f32.gmra.mxu1 %vm231_vm0, %v8925_v15 }
0x2029   :  { %6438 = vmatprep.mubr.f32.mxu1 %v14139_v41 }
0x202c   :  { %7195 = vmatmul.mubr.msk.f32.gmra.mxu1 %vm231_vm0, %v8926_v8 }
0x202d   :  { %6444 = vmatprep.mubr.f32.mxu1 %v14139_v41 }
0x2030   :  { %7196 = vmatmul.mubr.msk.f32.gmra.mxu1 %vm231_vm0, %v8927_v1  ;;  %v8953_v1 = vld [vmem:[%s13624_s3 + $0x100] sm:$0xff] }
0x2031   :  { %6450 = vmatprep.mubr.f32.mxu1 %v14139_v41 }
0x2034   :  { %7197 = vmatmul.mubr.msk.f32.gmra.mxu1 %vm231_vm0, %v8928_v22  ;;  %v8954_v22 = vld [vmem:[%s13624_s3 + $0x108] sm:$0xff] }
0x2035   :  { %6456 = vmatprep.mubr.f32.mxu1 %v14139_v41 }
0x2038   :  { %7198 = vmatmul.mubr.msk.f32.gmra.mxu1 %vm231_vm0, %v8929_v52  ;;  %v8955_v52 = vld [vmem:[%s13623_s2 + $0x30] sm:$0xff]  }
0x2039   :  { %6462 = vmatprep.mubr.f32.mxu1 %v14139_v41 }
0x203c   :  { %7199 = vmatmul.mubr.msk.f32.gmra.mxu1 %vm231_vm0, %v8930_v24  ;;  %v8956_v24 = vld [vmem:[%s13624_s3 + $0x110] sm:$0xff] }
0x203d   :  { %6468 = vmatprep.mubr.f32.mxu1 %v14139_v41 }
0x2040   :  { %7200 = vmatmul.mubr.msk.f32.gmra.mxu1 %vm231_vm0, %v8931_v21  ;;  %v8957_v21 = vld [vmem:[%s13624_s3 + $0x118] sm:$0xff] }
0x2041   :  { %6474 = vmatprep.mubr.f32.mxu1 %v14139_v41 }
0x2044   :  { %7201 = vmatmul.mubr.msk.f32.gmra.mxu1 %vm231_vm0, %v8932_v50  ;;  %v8958_v50 = vld [vmem:[%s13623_s2 + $0x38] sm:$0xff]  }
0x2045   :  { %6480 = vmatprep.mubr.f32.mxu1 %v14139_v41 }
0x2048   :  { %7202 = vmatmul.mubr.msk.f32.gmra.mxu1 %vm231_vm0, %v8933_v60  ;;  %v8960_v60 = vld [vmem:[%s13623_s2 + $0x48] sm:$0xff]  }
0x2049   :  { %6486 = vmatprep.mubr.f32.mxu1 %v14139_v41 }
0x204c   :  { %7203 = vmatmul.mubr.msk.f32.gmra.mxu1 %vm231_vm0, %v8934_v16  ;;  %v8961_v16 = vld [vmem:[%s13623_s2 + $0x50] sm:$0xff]  }
0x204d   :  { %6492 = vmatprep.mubr.f32.mxu1 %v14139_v41 }
0x2050   :  { %7204 = vmatmul.mubr.msk.f32.gmra.mxu1 %vm231_vm0, %v8935_v61  ;;  %v8962_v61 = vld [vmem:[%s13623_s2 + $0x58] sm:$0xff]  }
0x2051   :  { %6498 = vmatprep.mubr.f32.mxu1 %v14139_v41 }
0x2054   :  { %7205 = vmatmul.mubr.msk.f32.gmra.mxu1 %vm231_vm0, %v8936_v20  ;;  %v8963_v20 = vld [vmem:[%s13623_s2 + $0x60] sm:$0xff]  }
0x2055   :  { %6504 = vmatprep.mubr.f32.mxu1 %v14139_v41 }
0x2058   :  { %7206 = vmatmul.mubr.msk.f32.gmra.mxu1 %vm231_vm0, %v8937_v2  ;;  %v8964_v2 = vld [vmem:[%s13623_s2 + $0x68] sm:$0xff]  }
0x2059   :  { %6510 = vmatprep.mubr.f32.mxu1 %v14139_v41 }
0x205c   :  { %7207 = vmatmul.mubr.msk.f32.gmra.mxu1 %vm231_vm0, %v8938_v59  ;;  %v8965_v59 = vld [vmem:[%s13623_s2 + $0x70] sm:$0xff]  }
0x205d   :  { %6516 = vmatprep.mubr.f32.mxu1 %v14139_v41 }
0x2060   :  { %7208 = vmatmul.mubr.msk.f32.gmra.mxu1 %vm231_vm0, %v8939_v44  ;;  %v8967_v44 = vld [vmem:[%s13623_s2 + $0x80] sm:$0xff]  }
0x2061   :  { %6522 = vmatprep.mubr.f32.mxu1 %v14139_v41 }
0x2064   :  { %7209 = vmatmul.mubr.msk.f32.gmra.mxu1 %vm231_vm0, %v8940_v35  ;;  %v8968_v35 = vld [vmem:[%s13623_s2 + $0x88] sm:$0xff]  }
0x2065   :  { %6528 = vmatprep.mubr.f32.mxu1 %v14139_v41 }
0x2068   :  { %7210 = vmatmul.mubr.msk.f32.gmra.mxu1 %vm231_vm0, %v8941_v3  ;;  %v8969_v3 = vld [vmem:[%s13623_s2 + $0x90] sm:$0xff]  }
0x2069   :  { %6534 = vmatprep.mubr.f32.mxu1 %v14139_v41 }
0x206c   :  { %7211 = vmatmul.mubr.msk.f32.gmra.mxu1 %vm231_vm0, %v8942_v62  ;;  %v8970_v62 = vld [vmem:[%s13623_s2 + $0x98] sm:$0xff]  }
0x206d   :  { %6540 = vmatprep.mubr.f32.mxu1 %v14139_v41 }
0x2070   :  { %7212 = vmatmul.mubr.msk.f32.gmra.mxu1 %vm231_vm0, %v8950_v58 }
0x2071   :  { %6546 = vmatprep.mubr.f32.mxu1 %v14139_v41 }
0x2074   :  { %7213 = vmatmul.mubr.msk.f32.gmra.mxu1 %vm231_vm0, %v8952_v49 }
0x2075   :  { %6552 = vmatprep.mubr.f32.mxu1 %v14139_v41 }
0x2078   :  { %7214 = vmatmul.mubr.msk.f32.gmra.mxu1 %vm231_vm0, %v8953_v1 }
0x2079   :  { %6558 = vmatprep.mubr.f32.mxu1 %v14139_v41 }
0x207c   :  { %7215 = vmatmul.mubr.msk.f32.gmra.mxu1 %vm231_vm0, %v8954_v22 }
0x207d   :  { %6564 = vmatprep.mubr.f32.mxu1 %v14139_v41 }
0x2080   :  { %7216 = vmatmul.mubr.msk.f32.gmra.mxu1 %vm231_vm0, %v8956_v24 }
0x2081   :  { %6570 = vmatprep.mubr.f32.mxu1 %v14139_v41  ;;  %v8959_v41 = vld [vmem:[%s13623_s2 + $0x40] sm:$0xff]  }
0x2084   :  { %7217 = vmatmul.mubr.msk.f32.gmra.mxu1 %vm231_vm0, %v8957_v21 }
0x2085   :  { %6782 = vmatprep.mubr.bf16.mxu1 %v14122_v25 }
0x20b8   :  { %v6032_v9 = vpop.f32.mrf.mxu1 }
0x20b9   :  { %v6033_v27 = vadd.f32 %v8951_v54, %v6032_v9  ;;  %v8966_v9 = vld [vmem:[%s13623_s2 + $0x78] sm:$0xff]  }
0x20ba   :  { %v6034_v0 = vpop.f32.mrf.mxu1 }
0x20bb   :  { %v6035_v39 = vadd.f32 %v8947_v12, %v6034_v0  ;;  %v6051_v15 = vmax.f32 %v6033_v27, 0.0 }
0x20bc   :  { %v6036_v19 = vpop.f32.mrf.mxu1 }
0x20bd   :  { %v6037_v34 = vadd.f32 %v8949_v26, %v6036_v19  ;;  %v6052_v47 = vmax.f32 %v6035_v39, 0.0 }
0x20be   :  { %v6038_v36 = vpop.f32.mrf.mxu1 }
0x20bf   :  { %v6039_v53 = vadd.f32 %v8943_v32, %v6038_v36  ;;  %v6053_v14 = vmax.f32 %v6037_v34, 0.0 }
0x20c0   :  { %v6042_v43 = vpop.f32.mrf.mxu1 }
0x20c1   :  { %v6043_v51 = vadd.f32 %v8946_v13, %v6042_v43  ;;  %v6054_v5 = vmax.f32 %v6039_v53, 0.0  ;;  %v6059_v8 = vpack.c.bf16 %v6053_v14, %v6051_v15  ;;  %v8973_v13 = vld [vmem:[%s13625_s4 + $0x8] sm:$0xff] }
0x20c2   :  { %v6044_v40 = vpop.f32.mrf.mxu1 }
0x20c3   :  { %v6045_v33 = vadd.f32 %v8944_v46, %v6044_v40  ;;  %v6055_v29 = vmax.f32 %v6043_v51, 0.0  ;;  %v6060_v23 = vpack.c.bf16 %v6054_v5, %v6052_v47  ;;  %v8971_v46 = vld [vmem:[%s13623_s2 + $0xa0] sm:$0xff]  }
0x20c4   :  { %v6046_v18 = vpop.f32.mrf.mxu1 }
0x20c5   :  { %v6047_v6 = vadd.f32 %v8945_v7, %v6046_v18  ;;  %v6056_v11 = vmax.f32 %v6045_v33, 0.0 }
0x20c6   :  { %v6048_v37 = vpop.f32.mrf.mxu1 }
0x20c7   :  { %v6049_v17 = vadd.f32 %v8948_v28, %v6048_v37  ;;  %v6057_v4 = vmax.f32 %v6047_v6, 0.0  ;;  %v8972_v6 = vld [vmem:[%s13623_s2 + $0xa8] sm:$0xff]  }
0x20c8   :  { %v13252_v0 = vpop.f32.mrf.mxu1 }
0x20c9   :  { %v6058_v31 = vmax.f32 %v6049_v17, 0.0  ;;  %v6061_v48 = vpack.c.bf16 %v6057_v4, %v6055_v29  ;;  %14140 = vst [vmem:[#allocation46_spill] sm:$0xff] %v13252_v0 }
0x20ca   :  { %v13254_v19 = vpop.f32.mrf.mxu1 }
0x20cb   :  { %v6062_v56 = vpack.c.bf16 %v6058_v31, %v6056_v11  ;;  %14141 = vst [vmem:[#allocation47_spill] sm:$0xff] %v13254_v19 }
0x20cc   :  { %v13261_v36 = vpop.f32.mrf.mxu1 }
0x20cd   :  { %6075 = vmatprep.subr.bf16.mxu0 %v6062_v56  ;;  %14142 = vst [vmem:[#allocation48_spill] sm:$0xff] %v13261_v36 }
0x20ce   :  { %6076 = vmatpush1.bf16.msra.mxu0 %v6061_v48  ;;  %v13263_v43 = vpop.f32.mrf.mxu1 }
0x20cf   :  { %6077 = vmatprep.subr.bf16.mxu0 %v6060_v23  ;;  %14143 = vst [vmem:[#allocation16_spill] sm:$0xff] %v13263_v43 }
0x20d0   :  { %v13270_v40 = vpop.f32.mrf.mxu1 }
0x20d1   :  { %14144 = vst [vmem:[#allocation17_spill] sm:$0xff] %v13270_v40 }
0x20d2   :  { %6078 = vmatpush1.bf16.msra.mxu0 %v6059_v8  ;;  %v13272_v18 = vpop.f32.mrf.mxu1 }
0x20d3   :  { %14145 = vst [vmem:[#allocation18_spill] sm:$0xff] %v13272_v18 }
0x20d4   :  { %v13279_v32 = vpop.f32.mrf.mxu1 }
0x20d5   :  { %7170 = vmatmul.mubr.msk.bf16.vlgmr.msra.gmra.mxu0 %vm349_vm1, %v8955_v52  ;;  %14146 = vst [vmem:[#allocation19_spill] sm:$0xff] %v13279_v32 }
0x20d6   :  { %6105 = vmatprep.mubr.bf16.mxu0 %v14122_v25  ;;  %v13281_v53 = vpop.f32.mrf.mxu1 }
0x20d7   :  { %14147 = vst [vmem:[#allocation20_spill] sm:$0xff] %v13281_v53  ;;  %v8976_v53 = vld [vmem:[#allocation2 + $0x1e0] sm:$0xff] }
0x20d8   :  { %v13288_v33 = vpop.f32.mrf.mxu1 }
0x20d9   :  { %14148 = vst [vmem:[#allocation21_spill] sm:$0xff] %v13288_v33 }
0x20da   :  { %v13290_v7 = vpop.f32.mrf.mxu1 }
0x20db   :  { %14149 = vst [vmem:[#allocation22_spill] sm:$0xff] %v13290_v7 }
0x20dc   :  { %v13299_v51 = vpop.f32.mrf.mxu1 }
0x20dd   :  { %7171 = vmatmul.mubr.msk.bf16.gmra.mxu0 %vm349_vm1, %v8958_v50  ;;  %14150 = vst [vmem:[#allocation23_spill] sm:$0xff] %v13299_v51  ;;  %v8977_v51 = vld [vmem:[#allocation2 + $0x1d8] sm:$0xff] }
0x20de   :  { %6115 = vmatprep.mubr.bf16.mxu0 %v14122_v25  ;;  %v13301_v37 = vpop.f32.mrf.mxu1 }
0x20df   :  { %14151 = vst [vmem:[#allocation24_spill] sm:$0xff] %v13301_v37  ;;  %v8978_v37 = vld [vmem:[#allocation2 + $0x1f8] sm:$0xff] }
0x20e5   :  { %7172 = vmatmul.mubr.msk.bf16.gmra.mxu0 %vm349_vm1, %v8959_v41 }
0x20e6   :  { %6125 = vmatprep.mubr.bf16.mxu0 %v14122_v25 }
0x20ed   :  { %7173 = vmatmul.mubr.msk.bf16.gmra.mxu0 %vm349_vm1, %v8960_v60 }
0x20ee   :  { %6135 = vmatprep.mubr.bf16.mxu0 %v14122_v25 }
0x20f5   :  { %7174 = vmatmul.mubr.msk.bf16.gmra.mxu0 %vm349_vm1, %v8961_v16 }
0x20f6   :  { %6145 = vmatprep.mubr.bf16.mxu0 %v14122_v25 }
0x20fd   :  { %7175 = vmatmul.mubr.msk.bf16.gmra.mxu0 %vm349_vm1, %v8962_v61 }
0x20fe   :  { %6155 = vmatprep.mubr.bf16.mxu0 %v14122_v25 }
0x2105   :  { %7176 = vmatmul.mubr.msk.bf16.gmra.mxu0 %vm349_vm1, %v8963_v20 }
0x2106   :  { %6165 = vmatprep.mubr.bf16.mxu0 %v14122_v25 }
0x210d   :  { %7177 = vmatmul.mubr.msk.bf16.gmra.mxu0 %vm349_vm1, %v8964_v2 }
0x210e   :  { %6175 = vmatprep.mubr.bf16.mxu0 %v14122_v25 }
0x2115   :  { %7178 = vmatmul.mubr.msk.bf16.gmra.mxu0 %vm349_vm1, %v8965_v59 }
0x2116   :  { %6185 = vmatprep.mubr.bf16.mxu0 %v14122_v25 }
0x211d   :  { %7179 = vmatmul.mubr.msk.bf16.gmra.mxu0 %vm349_vm1, %v8966_v9 }
0x211e   :  { %6195 = vmatprep.mubr.bf16.mxu0 %v14122_v25 }
0x2125   :  { %7180 = vmatmul.mubr.msk.bf16.gmra.mxu0 %vm349_vm1, %v8967_v44 }
0x2126   :  { %6205 = vmatprep.mubr.bf16.mxu0 %v14122_v25 }
0x212d   :  { %7181 = vmatmul.mubr.msk.bf16.gmra.mxu0 %vm349_vm1, %v8968_v35 }
0x212e   :  { %6215 = vmatprep.mubr.bf16.mxu0 %v14122_v25 }
0x2135   :  { %7182 = vmatmul.mubr.msk.bf16.gmra.mxu0 %vm349_vm1, %v8969_v3 }
0x2136   :  { %6225 = vmatprep.mubr.bf16.mxu0 %v14122_v25 }
0x213d   :  { %7183 = vmatmul.mubr.msk.bf16.gmra.mxu0 %vm349_vm1, %v8970_v62 }
0x213e   :  { %6235 = vmatprep.mubr.bf16.mxu0 %v14122_v25 }
0x2145   :  { %7184 = vmatmul.mubr.msk.bf16.gmra.mxu0 %vm349_vm1, %v8971_v46 }
0x2146   :  { %6245 = vmatprep.mubr.bf16.mxu0 %v14122_v25  ;;  %v13303_v25 = vpop.f32.mrf.mxu1 }
0x2147   :  { %14152 = vst [vmem:[#allocation25_spill] sm:$0xff] %v13303_v25 }
0x2148   :  { %v13305_v12 = vpop.f32.mrf.mxu1 }
0x2149   :  { %14153 = vst [vmem:[#allocation26_spill] sm:$0xff] %v13305_v12 }
0x214a   :  { %v13307_v39 = vpop.f32.mrf.mxu1 }
0x214b   :  { %14154 = vst [vmem:[#allocation10_spill] sm:$0xff] %v13307_v39 }
0x214c   :  { %v13309_v28 = vpop.f32.mrf.mxu1 }
0x214d   :  { %7185 = vmatmul.mubr.msk.bf16.gmra.mxu0 %vm349_vm1, %v8972_v6 }
0x214e   :  { %6705 = vmatprep.mubr.f32.mxu0 %v8973_v13  ;;  %v13311_v17 = vpop.f32.mrf.mxu1 }
0x2150   :  { %v13313_v26 = vpop.f32.mrf.mxu1 }
0x2152   :  { %v13315_v34 = vpop.f32.mrf.mxu1 }
0x2154   :  { %v13317_v4 = vpop.f32.mrf.mxu1 }
0x2156   :  { %v13319_v58 = vpop.f32.mrf.mxu1 }
0x2158   :  { %v13321_v5 = vpop.f32.mrf.mxu1 }
0x215a   :  { %v13323_v11 = vpop.f32.mrf.mxu1 }
0x215c   :  { %v13325_v31 = vpop.f32.mrf.mxu1 }
0x215e   :  { %v13327_v54 = vpop.f32.mrf.mxu1 }
0x2160   :  { %v13329_v27 = vpop.f32.mrf.mxu1 }
0x2162   :  { %v13331_v29 = vpop.f32.mrf.mxu1 }
0x2164   :  { %v13333_v47 = vpop.f32.mrf.mxu1 }
0x2166   :  { %v13339_v48 = vpop.f32.mrf.mxu1 }
0x2168   :  { %v13345_v15 = vpop.f32.mrf.mxu1 }
0x216a   :  { %v13351_v22 = vpop.f32.mrf.mxu1 }
0x216c   :  { %v13357_v21 = vpop.f32.mrf.mxu1 }
0x216e   :  { %v13363_v60 = vpop.f32.mrf.mxu1 }
0x216f   :  { %14155 = vst [vmem:[#allocation35_spill] sm:$0xff] %v13363_v60 }
0x2170   :  { %v13369_v20 = vpop.f32.mrf.mxu1 }
0x2171   :  { %14156 = vst [vmem:[#allocation36_spill] sm:$0xff] %v13369_v20 }
0x2172   :  { %v13375_v9 = vpop.f32.mrf.mxu1 }
0x2173   :  { %14157 = vst [vmem:[#allocation37_spill] sm:$0xff] %v13375_v9 }
0x2174   :  { %v13381_v3 = vpop.f32.mrf.mxu1 }
0x2175   :  { %14158 = vst [vmem:[#allocation38_spill] sm:$0xff] %v13381_v3 }
0x2176   :  { %v13387_v6 = vpop.f32.mrf.mxu1 }
0x2177   :  { %14159 = vst [vmem:[#allocation39_spill] sm:$0xff] %v13387_v6 }
0x2178   :  { %v13391_v30 = vpop.f32.mrf.mxu1 }
0x2179   :  { %14160 = vst [vmem:[#allocation40_spill] sm:$0xff] %v13391_v30  ;;  %v8974_v30 = vld [vmem:[#allocation2 + $0x1e8] sm:$0xff] }
0x217a   :  { %v13393_v63 = vpop.f32.mrf.mxu1 }
0x217b   :  { %14161 = vst [vmem:[#allocation41_spill] sm:$0xff] %v13393_v63  ;;  %v8975_v63 = vld [vmem:[#allocation2 + $0x1f0] sm:$0xff] }
0x217c   :  { %v13395_v45 = vpop.f32.mrf.mxu1 }
0x217d   :  { %14162 = vst [vmem:[#allocation42_spill] sm:$0xff] %v13395_v45 }
0x217e   :  { %v13397_v9 = vpop.f32.mrf.mxu1 }
0x217f   :  { %14163 = vst [vmem:[#allocation43_spill] sm:$0xff] %v13397_v9 }
0x2180   :  { %v13399_v6 = vpop.f32.mrf.mxu1 }
0x2181   :  { %14164 = vst [vmem:[#allocation44_spill] sm:$0xff] %v13399_v6  ;;  %v8979_v6 = vld [vmem:[#allocation2 + $0x1d0] sm:$0xff] }
0x2182   :  { %v13401_v43 = vpop.f32.mrf.mxu1 }
0x2183   :  { %14165 = vst [vmem:[#allocation32_spill] sm:$0xff] %v13401_v43  ;;  %v8980_v43 = vld [vmem:[#allocation2 + $0x1c8] sm:$0xff] }
0x2184   :  { %v13403_v7 = vpop.f32.mrf.mxu1 }
0x2195   :  { %v13335_v56 = vpop.f32.mrf.mxu0 }
0x2197   :  { %v13337_v14 = vpop.f32.mrf.mxu0 }
0x2199   :  { %v13341_v49 = vpop.f32.mrf.mxu0 }
0x219b   :  { %v13343_v23 = vpop.f32.mrf.mxu0 }
0x219d   :  { %v13347_v8 = vpop.f32.mrf.mxu0 }
0x219f   :  { %v13349_v1 = vpop.f32.mrf.mxu0 }
0x21a1   :  { %v13353_v52 = vpop.f32.mrf.mxu0 }
0x21a3   :  { %v13355_v24 = vpop.f32.mrf.mxu0 }
0x21a5   :  { %v13359_v50 = vpop.f32.mrf.mxu0 }
0x21a7   :  { %v13361_v41 = vpop.f32.mrf.mxu0 }
0x21a9   :  { %v13365_v16 = vpop.f32.mrf.mxu0 }
0x21ab   :  { %v13367_v61 = vpop.f32.mrf.mxu0 }
0x21ad   :  { %v13371_v2 = vpop.f32.mrf.mxu0 }
0x21af   :  { %v13373_v59 = vpop.f32.mrf.mxu0 }
0x21b1   :  { %v13377_v44 = vpop.f32.mrf.mxu0 }
0x21b3   :  { %v13379_v35 = vpop.f32.mrf.mxu0 }
0x21b5   :  { %v13383_v62 = vpop.f32.mrf.mxu0 }
0x21b7   :  { %v13385_v46 = vpop.f32.mrf.mxu0 }
0x21b9   :  { %v13389_v13 = vpop.f32.mrf.mxu0 }
0x21bb   :  { %v6143_v10 = vpop.f32.mrf.mxu0 }
0x21bd   :  { %v6147_v55 = vpop.f32.mrf.mxu0 }
0x21bf   :  { %v6149_v57 = vpop.f32.mrf.mxu0 }
0x21c1   :  { %v6151_v42 = vpop.f32.mrf.mxu0 }
0x21c3   :  { %v6153_v38 = vpop.f32.mrf.mxu0 }
0x21c5   :  { %v6157_v60 = vpop.f32.mrf.mxu0 }
0x21c7   :  { %v6159_v20 = vpop.f32.mrf.mxu0 }
0x21c9   :  { %v6161_v3 = vpop.f32.mrf.mxu0 }
0x21ca   :  { %v6162_v12 = vadd.f32 %v8979_v6, %v6161_v3  ;;  %v8989_v6 = vld [vmem:[#allocation2 + $0x180] sm:$0xff] }
0x21cb   :  { %v6163_v0 = vpop.f32.mrf.mxu0 }
0x21cc   :  { %v6164_v9 = vadd.f32 %v8977_v51, %v6163_v0 }
0x21cd   :  { %v6167_v19 = vpop.f32.mrf.mxu0 }
0x21ce   :  { %v6168_v33 = vadd.f32 %v8976_v53, %v6167_v19  ;;  %v8982_v53 = vld [vmem:[#allocation2 + $0x1b8] sm:$0xff] }
0x21cf   :  { %v6169_v36 = vpop.f32.mrf.mxu0  ;;  %v6154_v0 = vadd.f32 %v8982_v53, %v6153_v38  ;;  %v8987_v38 = vld [vmem:[#allocation2 + $0x190] sm:$0xff] }
0x21d0   :  { %v6170_v40 = vadd.f32 %v8974_v30, %v6169_v36  ;;  %v6160_v30 = vadd.f32 %v8980_v43, %v6159_v20  ;;  %v8981_v36 = vld [vmem:[#allocation2 + $0x1c0] sm:$0xff]  ;;  %v8986_v20 = vld [vmem:[#allocation2 + $0x198] sm:$0xff]  ;;  %v8991_v53 = vld [vmem:[#allocation2 + $0x170] sm:$0xff] }
0x21d1   :  { %v6171_v18 = vpop.f32.mrf.mxu0  ;;  %v8985_v43 = vld [vmem:[#allocation2 + $0x1a0] sm:$0xff]  ;;  %v6144_v3 = vadd.f32 %v8986_v20, %v6143_v10  ;;  %v8990_v10 = vld [vmem:[#allocation2 + $0x178] sm:$0xff] }
0x21d2   :  { %v6172_v32 = vadd.f32 %v8975_v63, %v6171_v18  ;;  %8017 = vtanh.f32 %v6170_v40  ;;  %v6158_v63 = vadd.f32 %v8981_v36, %v6157_v60  ;;  %v13409_v18 = vpop.f32.mrf.mxu1  ;;  %v8983_v40 = vld [vmem:[#allocation2 + $0x1b0] sm:$0xff] }
0x21d3   :  { %v6173_v45 = vpop.f32.mrf.mxu0 }
0x21d4   :  { %v6174_v25 = vadd.f32 %v8978_v37, %v6173_v45  ;;  %8019 = vtanh.f32 %v6172_v32  ;;  %v6152_v45 = vadd.f32 %v8983_v40, %v6151_v42  ;;  %v8984_v32 = vld [vmem:[#allocation2 + $0x1a8] sm:$0xff] }
0x21d5   :  { %v13405_v39 = vpop.f32.mrf.mxu0  ;;  %v6150_v37 = vadd.f32 %v8984_v32, %v6149_v57 }
0x21d6   :  { %8021 = vtanh.f32 %v6174_v25  ;;  %v6148_v25 = vadd.f32 %v8985_v43, %v6147_v55  ;;  %v6138_v55 = vadd.f32 %v8989_v6, %v13383_v62 }
0x21d7   :  { %8023 = vtanh.f32 %v6168_v33  ;;  %v13407_v19 = vpop.f32.mrf.mxu0  ;;  %v13415_v33 = vpop.f32.mrf.mxu1 }
0x21d8   :  { %8025 = vtanh.f32 %v6164_v9  ;;  %v6142_v9 = vadd.f32 %v8987_v38, %v13389_v13 }
0x21d9   :  { %8027 = vtanh.f32 %v6162_v12  ;;  %v13411_v51 = vpop.f32.mrf.mxu0  ;;  %v8988_v12 = vld [vmem:[#allocation2 + $0x188] sm:$0xff]  ;;  %v13424_v36 = vpop.f32.mrf.mxu1 }
0x21da   :  { %8029 = vtanh.f32 %v6160_v30  ;;  %v6140_v57 = vadd.f32 %v8988_v12, %v13385_v46  ;;  %v8995_v12 = vld [vmem:[#allocation2 + $0x150] sm:$0xff] }
0x21db   :  { %8031 = vtanh.f32 %v6158_v63  ;;  %v13413_v60 = vpop.f32.mrf.mxu0  ;;  %v6134_v63 = vadd.f32 %v8990_v10, %v13379_v35  ;;  %v13434_v35 = vpop.f32.mrf.mxu1 }
0x21dc   :  { %8033 = vtanh.f32 %v6154_v0  ;;  %v6132_v0 = vadd.f32 %v8991_v53, %v13377_v44 }
0x21dd   :  { %8035 = vtanh.f32 %v6152_v45  ;;  %v13418_v42 = vpop.f32.mrf.mxu0  ;;  %v8992_v45 = vld [vmem:[#allocation2 + $0x168] sm:$0xff] }
0x21de   :  { %8037 = vtanh.f32 %v6150_v37  ;;  %v6130_v62 = vadd.f32 %v8992_v45, %v13373_v59  ;;  %v8993_v37 = vld [vmem:[#allocation2 + $0x160] sm:$0xff]  ;;  %v6122_v59 = vadd.f32 %v8995_v12, %v13365_v16  ;;  %v8998_v45 = vld [vmem:[#allocation2 + $0x138] sm:$0xff] }
0x21df   :  { %8039 = vtanh.f32 %v6148_v25  ;;  %v13422_v30 = vpop.f32.mrf.mxu0  ;;  %v8018_v13 = vpop.eup %8017  ;;  %v6128_v43 = vadd.f32 %v8993_v37, %v13371_v2  ;;  %v9002_v12 = vld [vmem:[#allocation2 + $0x118] sm:$0xff] }
0x21e0   :  { %8041 = vtanh.f32 %v6144_v3  ;;  %v8994_v3 = vld [vmem:[#allocation2 + $0x158] sm:$0xff]  ;;  %v6606_v53 = vmul.f32 %v8018_v13, %v13345_v15 }
0x21e1   :  { %8043 = vtanh.f32 %v6142_v9  ;;  %v13428_v40 = vpop.f32.mrf.mxu0  ;;  %v8020_v46 = vpop.eup %8019  ;;  %v6124_v44 = vadd.f32 %v8994_v3, %v13367_v61  ;;  %v9001_v3 = vld [vmem:[#allocation2 + $0x120] sm:$0xff] }
0x21e2   :  { %8045 = vtanh.f32 %v6140_v57  ;;  %v6607_v57 = vmul.f32 %v8020_v46, %v13351_v22  ;;  %v13448_v22 = vpop.f32.mrf.mxu1 }
0x21e3   :  { %v8022_v32 = vpop.eup %8021  ;;  %8047 = vtanh.f32 %v6138_v55  ;;  %v13432_v25 = vpop.f32.mrf.mxu0  ;;  %v8996_v55 = vld [vmem:[#allocation2 + $0x148] sm:$0xff] }
0x21e4   :  { %v8024_v20 = vpop.eup %8023  ;;  %8049 = vtanh.f32 %v6134_v63  ;;  %v6608_v38 = vmul.f32 %v8022_v32, %v13357_v21  ;;  %v6120_v10 = vadd.f32 %v8996_v55, %v13361_v41  ;;  %v8997_v63 = vld [vmem:[#allocation2 + $0x140] sm:$0xff]  ;;  %v6114_v41 = vadd.f32 %v8998_v45, %v13355_v24 }
0x21e5   :  { %v8026_v9 = vpop.eup %8025  ;;  %8051 = vtanh.f32 %v6132_v0  ;;  %v13440_v2 = vpop.f32.mrf.mxu0  ;;  %v6118_v21 = vadd.f32 %v8997_v63, %v13359_v50  ;;  %v6605_v16 = vmul.f32 %v8024_v20, %v13339_v48 }
0x21e6   :  { %v8028_v6 = vpop.eup %8027  ;;  %8053 = vtanh.f32 %v6130_v62  ;;  %6641 = vmatprep.subr.mxu0 %v6608_v38  ;;  %v6604_v15 = vmul.f32 %v8026_v9, %v13333_v47  ;;  %v8999_v62 = vld [vmem:[#allocation2 + $0x130] sm:$0xff] }
0x21e7   :  { %v8030_v61 = vpop.eup %8029  ;;  %8055 = vtanh.f32 %v6128_v43  ;;  %v13446_v0 = vpop.f32.mrf.mxu0  ;;  %6642 = vmatpush1.msra.mxu0 %v6607_v57  ;;  %v6112_v50 = vadd.f32 %v8999_v62, %v13353_v52  ;;  %v6603_v48 = vmul.f32 %v8028_v6, %v13331_v29  ;;  %v9000_v43 = vld [vmem:[#allocation2 + $0x128] sm:$0xff]  ;;  %v9003_v57 = vld [vmem:[#allocation2 + $0x110] sm:$0xff] }
0x21e8   :  { %v8032_v46 = vpop.eup %8031  ;;  %8057 = vtanh.f32 %v6124_v44  ;;  %6643 = vmatprep.subr.mxu0 %v6606_v53  ;;  %v6110_v20 = vadd.f32 %v9000_v43, %v13349_v1  ;;  %v6602_v24 = vmul.f32 %v8030_v61, %v13329_v27  ;;  %v6108_v44 = vadd.f32 %v9001_v3, %v13347_v8  ;;  %v13462_v29 = vpop.f32.mrf.mxu1  ;;  %v9005_v61 = vld [vmem:[#allocation2 + $0x100] sm:$0xff] }
0x21e9   :  { %v8034_v13 = vpop.eup %8033  ;;  %8059 = vtanh.f32 %v6122_v59  ;;  %v13454_v32 = vpop.f32.mrf.mxu0  ;;  %6644 = vmatpush1.msra.mxu0 %v6605_v16  ;;  %v6601_v52 = vmul.f32 %v8032_v46, %v13327_v54  ;;  %v6104_v1 = vadd.f32 %v9002_v12, %v13343_v23  ;;  %v6102_v8 = vadd.f32 %v9003_v57, %v13341_v49 }
0x21ea   :  { %v8036_v37 = vpop.eup %8035  ;;  %8061 = vtanh.f32 %v6120_v10  ;;  %6645 = vmatprep.subr.mxu0 %v6604_v15  ;;  %v6600_v27 = vmul.f32 %v8034_v13, %v13325_v31  ;;  %v9004_v10 = vld [vmem:[#allocation2 + $0x108] sm:$0xff]  ;;  %v6098_v63 = vadd.f32 %v9005_v61, %v13335_v56 }
0x21eb   :  { %v8038_v47 = vpop.eup %8037  ;;  %8063 = vtanh.f32 %v6118_v21  ;;  %v13460_v38 = vpop.f32.mrf.mxu0  ;;  %6646 = vmatpush1.msra.mxu0 %v6603_v48  ;;  %v6599_v54 = vmul.f32 %v8036_v37, %v13323_v11  ;;  %v6100_v53 = vadd.f32 %v9004_v10, %v13337_v14  ;;  %v14166_v48 = vld [vmem:[#allocation10_spill] sm:$0xff] }
0x21ec   :  { %v8040_v9 = vpop.eup %8039  ;;  %8065 = vtanh.f32 %v6114_v41  ;;  %6647 = vmatprep.subr.mxu0 %v6602_v24  ;;  %v6598_v23 = vmul.f32 %v8038_v47, %v13321_v5  ;;  %v13476_v11 = vpop.f32.mrf.mxu1  ;;  %v14168_v47 = vld [vmem:[#allocation25_spill] sm:$0xff] }
0x21ed   :  { %v8042_v59 = vpop.eup %8041  ;;  %8067 = vtanh.f32 %v6112_v50  ;;  %v13468_v6 = vpop.f32.mrf.mxu0  ;;  %6648 = vmatpush1.msra.mxu0 %v6601_v52  ;;  %v6597_v49 = vmul.f32 %v8040_v9, %v13319_v58  ;;  %v14169_v9 = vld [vmem:[#allocation24_spill] sm:$0xff] }
0x21ee   :  { %v8044_v55 = vpop.eup %8043  ;;  %8069 = vtanh.f32 %v6110_v20  ;;  %6649 = vmatprep.subr.mxu0 %v6600_v27  ;;  %v6596_v14 = vmul.f32 %v8042_v59, %v13317_v4  ;;  %v13486_v4 = vpop.f32.mrf.mxu1  ;;  %v14167_v20 = vld [vmem:[#allocation26_spill] sm:$0xff]  ;;  %v14170_v27 = vld [vmem:[#allocation23_spill] sm:$0xff] }
0x21ef   :  { %v8046_v31 = vpop.eup %8045  ;;  %8071 = vtanh.f32 %v6108_v44  ;;  %v13474_v21 = vpop.f32.mrf.mxu0  ;;  %6650 = vmatpush1.msra.mxu0 %v6599_v54  ;;  %v6595_v5 = vmul.f32 %v8044_v55, %v13315_v34  ;;  %v14171_v54 = vld [vmem:[#allocation22_spill] sm:$0xff] }
0x21f0   :  { %v8048_v16 = vpop.eup %8047  ;;  %8073 = vtanh.f32 %v6104_v1  ;;  %6651 = vmatprep.subr.mxu0 %v6598_v23  ;;  %v6594_v58 = vmul.f32 %v8046_v31, %v13313_v26  ;;  %v13496_v52 = vpop.f32.mrf.mxu1 }
0x21f1   :  { %v8050_v46 = vpop.eup %8049  ;;  %8075 = vtanh.f32 %v6102_v8  ;;  %v13480_v45 = vpop.f32.mrf.mxu0  ;;  %6652 = vmatpush1.msra.mxu0 %v6597_v49  ;;  %v6593_v15 = vmul.f32 %v8048_v16, %v13311_v17  ;;  %v14173_v49 = vld [vmem:[#allocation20_spill] sm:$0xff] }
0x21f2   :  { %v8052_v56 = vpop.eup %8051  ;;  %8077 = vtanh.f32 %v6100_v53  ;;  %6653 = vmatprep.subr.mxu0 %v6596_v14  ;;  %v6592_v34 = vmul.f32 %v8050_v46, %v13309_v28  ;;  %v14172_v53 = vld [vmem:[#allocation21_spill] sm:$0xff]  ;;  %v13506_v61 = vpop.f32.mrf.mxu1  ;;  %v14174_v46 = vld [vmem:[#allocation19_spill] sm:$0xff] }
0x21f3   :  { %v8054_v41 = vpop.eup %8053  ;;  %8079 = vtanh.f32 %v6098_v63  ;;  %v13484_v13 = vpop.f32.mrf.mxu0  ;;  %6654 = vmatpush1.msra.mxu0 %v6595_v5  ;;  %v6591_v37 = vmul.f32 %v8052_v56, %v14166_v48 }
0x21f4   :  { %v8056_v62 = vpop.eup %8055  ;;  %6655 = vmatprep.subr.mxu0 %v6594_v58  ;;  %v6590_v24 = vmul.f32 %v8054_v41, %v14167_v20  ;;  %v14175_v41 = vld [vmem:[#allocation18_spill] sm:$0xff]  ;;  %v14177_v20 = vld [vmem:[#allocation16_spill] sm:$0xff] }
0x21f5   :  { %v8058_v50 = vpop.eup %8057  ;;  %v13490_v43 = vpop.f32.mrf.mxu0  ;;  %6656 = vmatpush1.msra.mxu0 %v6593_v15  ;;  %v6589_v3 = vmul.f32 %v8056_v62, %v14168_v47 }
0x21f6   :  { %v8060_v26 = vpop.eup %8059  ;;  %6657 = vmatprep.subr.mxu0 %v6592_v34  ;;  %v6588_v12 = vmul.f32 %v8058_v50, %v14169_v9  ;;  %v14176_v34 = vld [vmem:[#allocation17_spill] sm:$0xff] }
0x21f7   :  { %v8062_v17 = vpop.eup %8061  ;;  %v13494_v44 = vpop.f32.mrf.mxu0  ;;  %6658 = vmatpush1.msra.mxu0 %v6591_v37  ;;  %v6587_v59 = vmul.f32 %v8060_v26, %v14170_v27 }
0x21f8   :  { %v8064_v28 = vpop.eup %8063  ;;  %6659 = vmatprep.subr.mxu0 %v6590_v24  ;;  %v6586_v55 = vmul.f32 %v8062_v17, %v14171_v54  ;;  %v13514_v37 = vpop.f32.mrf.mxu1  ;;  %v14178_v17 = vld [vmem:[#allocation48_spill] sm:$0xff] }
0x21f9   :  { %v8066_v1 = vpop.eup %8065  ;;  %v13500_v57 = vpop.f32.mrf.mxu0  ;;  %6660 = vmatpush1.msra.mxu0 %v6589_v3  ;;  %v6585_v23 = vmul.f32 %v8064_v28, %v14172_v53  ;;  %v14179_v28 = vld [vmem:[#allocation47_spill] sm:$0xff] }
0x21fa   :  { %v8068_v8 = vpop.eup %8067  ;;  %6661 = vmatprep.subr.mxu0 %v6588_v12  ;;  %v6584_v16 = vmul.f32 %v8066_v1, %v14173_v49  ;;  %v14180_v12 = vld [vmem:[#allocation46_spill] sm:$0xff] }
0x21fb   :  { %v8070_v10 = vpop.eup %8069  ;;  %v13504_v31 = vpop.f32.mrf.mxu0  ;;  %6662 = vmatpush1.msra.mxu0 %v6587_v59  ;;  %v6583_v5 = vmul.f32 %v8068_v8, %v14174_v46 }
0x21fc   :  { %v8072_v63 = vpop.eup %8071  ;;  %6663 = vmatprep.subr.mxu0 %v6586_v55  ;;  %v6582_v15 = vmul.f32 %v8070_v10, %v14175_v41  ;;  %v13520_v59 = vpop.f32.mrf.mxu1 }
0x21fd   :  { %v8074_v14 = vpop.eup %8073  ;;  %v13510_v56 = vpop.f32.mrf.mxu0  ;;  %6664 = vmatpush1.msra.mxu0 %v6585_v23  ;;  %v6581_v50 = vmul.f32 %v8072_v63, %v14176_v34 }
0x21fe   :  { %v8076_v58 = vpop.eup %8075  ;;  %6665 = vmatprep.subr.mxu0 %v6584_v16  ;;  %v6580_v24 = vmul.f32 %v8074_v14, %v14177_v20  ;;  %v13522_v55 = vpop.f32.mrf.mxu1  ;;  %v9006_v14 = vld [vmem:[#allocation2 + $0x2e8] sm:$0xff] }
0x21ff   :  { %v8078_v62 = vpop.eup %8077  ;;  %v6229_v48 = vpop.f32.mrf.mxu0  ;;  %6666 = vmatpush1.msra.mxu0 %v6583_v5  ;;  %v6579_v47 = vmul.f32 %v8076_v58, %v14178_v17  ;;  %v9007_v58 = vld [vmem:[#allocation2 + $0x2f0] sm:$0xff] }
0x2200   :  { %v8080_v26 = vpop.eup %8079  ;;  %6667 = vmatprep.subr.mxu0 %v6582_v15  ;;  %v6578_v9 = vmul.f32 %v8078_v62, %v14179_v28  ;;  %v13524_v23 = vpop.f32.mrf.mxu1  ;;  %v9008_v15 = vld [vmem:[#allocation2 + $0x2e0] sm:$0xff] }
0x2201   :  { %v6231_v3 = vpop.f32.mrf.mxu0  ;;  %6668 = vmatpush1.msra.mxu0 %v6581_v50  ;;  %v6577_v1 = vmul.f32 %v8080_v26, %v14180_v12  ;;  %v9009_v26 = vld [vmem:[#allocation2 + $0x2d8] sm:$0xff] }
0x2202   :  { %6669 = vmatprep.subr.mxu0 %v6580_v24  ;;  %v13526_v16 = vpop.f32.mrf.mxu1  ;;  %v9010_v24 = vld [vmem:[#allocation2 + $0x2f8] sm:$0xff] }
0x2203   :  { %v6233_v27 = vpop.f32.mrf.mxu0  ;;  %6670 = vmatpush1.msra.mxu0 %v6579_v47  ;;  %v9011_v47 = vld [vmem:[#allocation2 + $0x2d0] sm:$0xff] }
0x2204   :  { %6671 = vmatprep.subr.mxu0 %v6578_v9  ;;  %v13528_v50 = vpop.f32.mrf.mxu1  ;;  %v9012_v9 = vld [vmem:[#allocation2 + $0x2c8] sm:$0xff] }
0x2205   :  { %v6237_v8 = vpop.f32.mrf.mxu0  ;;  %6672 = vmatpush1.msra.mxu0 %v6577_v1  ;;  %v9013_v1 = vld [vmem:[#allocation2 + $0x2c0] sm:$0xff] }
0x2207   :  { %v6239_v54 = vpop.f32.mrf.mxu0 }
0x2208   :  { %v6240_v12 = vadd.f32 %v9012_v9, %v6239_v54  ;;  %v9024_v9 = vld [vmem:[#allocation2 + $0x268] sm:$0xff] }
0x2209   :  { %v6241_v10 = vpop.f32.mrf.mxu0 }
0x220a   :  { %v6242_v28 = vadd.f32 %v9011_v47, %v6241_v10 }
0x220b   :  { %v6243_v53 = vpop.f32.mrf.mxu0 }
0x220c   :  { %v6244_v20 = vadd.f32 %v9009_v26, %v6243_v53  ;;  %v9016_v53 = vld [vmem:[#allocation2 + $0x2a8] sm:$0xff] }
0x220d   :  { %v6247_v63 = vpop.f32.mrf.mxu0 }
0x220e   :  { %v6248_v62 = vadd.f32 %v9008_v15, %v6247_v63  ;;  %v9014_v63 = vld [vmem:[#allocation2 + $0x2b8] sm:$0xff] }
0x220f   :  { %v6249_v49 = vpop.f32.mrf.mxu0 }
0x2210   :  { %v6250_v46 = vadd.f32 %v9006_v14, %v6249_v49  ;;  %v6238_v49 = vadd.f32 %v9013_v1, %v6237_v8  ;;  %v13530_v14 = vpop.f32.mrf.mxu1  ;;  %v9025_v1 = vld [vmem:[#allocation2 + $0x260] sm:$0xff] }
0x2211   :  { %v6251_v5 = vpop.f32.mrf.mxu0 }
0x2212   :  { %v6252_v41 = vadd.f32 %v9007_v58, %v6251_v5  ;;  %8081 = vtanh.f32 %v6250_v46  ;;  %v6234_v5 = vadd.f32 %v9014_v63, %v6233_v27  ;;  %v9015_v58 = vld [vmem:[#allocation2 + $0x2b0] sm:$0xff]  ;;  %v6230_v46 = vadd.f32 %v9016_v53, %v6229_v48  ;;  %v6568_v54 = vpop.f32.mrf.mxu1  ;;  %v9020_v27 = vld [vmem:[#allocation2 + $0x288] sm:$0xff] }
0x2213   :  { %v6253_v34 = vpop.f32.mrf.mxu0  ;;  %v6232_v15 = vadd.f32 %v9015_v58, %v6231_v3  ;;  %v6220_v3 = vadd.f32 %v9020_v27, %v13494_v44  ;;  %v9030_v27 = vld [vmem:[#allocation2 + $0x238] sm:$0xff] }
0x2214   :  { %v6254_v17 = vadd.f32 %v9010_v24, %v6253_v34  ;;  %8083 = vtanh.f32 %v6252_v41  ;;  %v9017_v34 = vld [vmem:[#allocation2 + $0x2a0] sm:$0xff]  ;;  %v9018_v41 = vld [vmem:[#allocation2 + $0x298] sm:$0xff]  ;;  %v6572_v24 = vpop.f32.mrf.mxu1 }
0x2215   :  { %v6228_v10 = vadd.f32 %v9017_v34, %v13510_v56  ;;  %v6224_v8 = vadd.f32 %v9018_v41, %v13504_v31  ;;  %v9022_v56 = vld [vmem:[#allocation2 + $0x278] sm:$0xff]  ;;  %v9023_v31 = vld [vmem:[#allocation2 + $0x270] sm:$0xff]  ;;  %v9028_v34 = vld [vmem:[#allocation2 + $0x248] sm:$0xff] }
0x2216   :  { %8085 = vtanh.f32 %v6254_v17  ;;  %v6214_v17 = vadd.f32 %v9022_v56, %v13484_v13 }
0x2217   :  { %8087 = vtanh.f32 %v6248_v62  ;;  %v9019_v62 = vld [vmem:[#allocation2 + $0x290] sm:$0xff] }
0x2218   :  { %8089 = vtanh.f32 %v6244_v20  ;;  %v6222_v26 = vadd.f32 %v9019_v62, %v13500_v57  ;;  %v9021_v20 = vld [vmem:[#allocation2 + $0x280] sm:$0xff] }
0x2219   :  { %8091 = vtanh.f32 %v6242_v28  ;;  %v6218_v48 = vadd.f32 %v9021_v20, %v13490_v43  ;;  %v6212_v28 = vadd.f32 %v9023_v31, %v13480_v45  ;;  %v6208_v43 = vadd.f32 %v9025_v1, %v13468_v6  ;;  %v9027_v45 = vld [vmem:[#allocation2 + $0x250] sm:$0xff]  ;;  %v9034_v31 = vld [vmem:[#allocation2 + $0x218] sm:$0xff]  ;;  %v9037_v1 = vld [vmem:[#allocation2 + $0x200] sm:$0xff] }
0x221a   :  { %8093 = vtanh.f32 %v6240_v12  ;;  %v6210_v12 = vadd.f32 %v9024_v9, %v13474_v21  ;;  %v6202_v53 = vadd.f32 %v9027_v45, %v13454_v32  ;;  %v6194_v32 = vadd.f32 %v9030_v27, %v13432_v25  ;;  %v9031_v20 = vld [vmem:[#allocation2 + $0x230] sm:$0xff] }
0x221b   :  { %8095 = vtanh.f32 %v6238_v49  ;;  %v6574_v49 = vpop.f32.mrf.mxu1 }
0x221c   :  { %8097 = vtanh.f32 %v6234_v5  ;;  %v9026_v5 = vld [vmem:[#allocation2 + $0x258] sm:$0xff] }
0x221d   :  { %8099 = vtanh.f32 %v6232_v15  ;;  %v6204_v13 = vadd.f32 %v9026_v5, %v13460_v38 }
0x221e   :  { %8101 = vtanh.f32 %v6230_v46 }
0x221f   :  { %8103 = vtanh.f32 %v6228_v10  ;;  %v8082_v47 = vpop.eup %8081  ;;  %v6200_v10 = vadd.f32 %v9028_v34, %v13446_v0 }
0x2220   :  { %8105 = vtanh.f32 %v6224_v8  ;;  %v6638_v6 = vmul.f32 %v8082_v47, %v6568_v54  ;;  %v9029_v8 = vld [vmem:[#allocation2 + $0x240] sm:$0xff]  ;;  %v6192_v54 = vadd.f32 %v9031_v20, %v13428_v40  ;;  %v14187_v20 = vld [vmem:[#allocation39_spill] sm:$0xff] }
0x2221   :  { %8107 = vtanh.f32 %v6222_v26  ;;  %v8084_v57 = vpop.eup %8083  ;;  %v6198_v62 = vadd.f32 %v9029_v8, %v13440_v2 }
0x2222   :  { %8109 = vtanh.f32 %v6220_v3  ;;  %v6639_v46 = vmul.f32 %v8084_v57, %v6572_v24  ;;  %v9032_v24 = vld [vmem:[#allocation2 + $0x228] sm:$0xff]  ;;  %v9035_v57 = vld [vmem:[#allocation2 + $0x210] sm:$0xff] }
0x2223   :  { %v8086_v44 = vpop.eup %8085  ;;  %8111 = vtanh.f32 %v6218_v48 }
0x2224   :  { %v8088_v63 = vpop.eup %8087  ;;  %8113 = vtanh.f32 %v6214_v17  ;;  %v6640_v58 = vmul.f32 %v8086_v44, %v6574_v49  ;;  %v9033_v17 = vld [vmem:[#allocation2 + $0x220] sm:$0xff] }
0x2225   :  { %v8090_v15 = vpop.eup %8089  ;;  %8115 = vtanh.f32 %v6212_v28  ;;  %v6637_v38 = vmul.f32 %v8088_v63, %v13530_v14  ;;  %v6190_v14 = vadd.f32 %v9032_v24, %v13422_v30 }
0x2226   :  { %v8092_v21 = vpop.eup %8091  ;;  %8117 = vtanh.f32 %v6210_v12  ;;  %6673 = vmatprep.subr.mxu0 %v6640_v58  ;;  %v6636_v3 = vmul.f32 %v8090_v15, %v13528_v50  ;;  %v6188_v50 = vadd.f32 %v9033_v17, %v13418_v42  ;;  %v9036_v12 = vld [vmem:[#allocation2 + $0x208] sm:$0xff] }
0x2227   :  { %v8094_v41 = vpop.eup %8093  ;;  %8119 = vtanh.f32 %v6208_v43  ;;  %6674 = vmatpush2.msra.mxu0 %v6639_v46  ;;  %v6635_v48 = vmul.f32 %v8092_v21, %v13526_v16  ;;  %v6184_v16 = vadd.f32 %v9034_v31, %v13413_v60  ;;  %v14181_v21 = vld [vmem:[#allocation32_spill] sm:$0xff]  ;;  %v9039_v31 = vld [vmem:[%s13625_s4 + $0x18] sm:$0xff] }
0x2228   :  { %v8096_v26 = vpop.eup %8095  ;;  %8121 = vtanh.f32 %v6204_v13  ;;  %6675 = vmatprep.subr.mxu0 %v6638_v6  ;;  %v6634_v56 = vmul.f32 %v8094_v41, %v13524_v23  ;;  %v6182_v23 = vadd.f32 %v9035_v57, %v13411_v51  ;;  %v14183_v41 = vld [vmem:[#allocation43_spill] sm:$0xff] }
0x2229   :  { %v8098_v0 = vpop.eup %8097  ;;  %8123 = vtanh.f32 %v6202_v53  ;;  %6676 = vmatpush2.msra.mxu0 %v6637_v38  ;;  %v6633_v47 = vmul.f32 %v8096_v26, %v13522_v55  ;;  %v6180_v55 = vadd.f32 %v9036_v12, %v13407_v19  ;;  %v14185_v26 = vld [vmem:[#allocation41_spill] sm:$0xff]  ;;  %v9043_v57 = vld [vmem:[%s13625_s4 + $0x38] sm:$0xff] }
0x222a   :  { %v8100_v2 = vpop.eup %8099  ;;  %8125 = vtanh.f32 %v6200_v10  ;;  %6677 = vmatprep.subr.mxu0 %v6636_v3  ;;  %v6632_v28 = vmul.f32 %v8098_v0, %v13520_v59  ;;  %v6178_v59 = vadd.f32 %v9037_v1, %v13405_v39  ;;  %v14182_v10 = vld [vmem:[#allocation44_spill] sm:$0xff] }
0x222b   :  { %v8102_v25 = vpop.eup %8101  ;;  %8127 = vtanh.f32 %v6198_v62  ;;  %6678 = vmatpush2.msra.mxu0 %v6635_v48  ;;  %v6631_v9 = vmul.f32 %v8100_v2, %v13514_v37  ;;  %v14184_v62 = vld [vmem:[#allocation42_spill] sm:$0xff] }
0x222c   :  { %v8104_v40 = vpop.eup %8103  ;;  %8129 = vtanh.f32 %v6194_v32  ;;  %6679 = vmatprep.subr.mxu0 %v6634_v56  ;;  %v6630_v44 = vmul.f32 %v8102_v25, %v13506_v61  ;;  %v14186_v32 = vld [vmem:[#allocation40_spill] sm:$0xff]  ;;  %v14188_v2 = vld [vmem:[#allocation38_spill] sm:$0xff] }
0x222d   :  { %v8106_v30 = vpop.eup %8105  ;;  %8131 = vtanh.f32 %v6192_v54  ;;  %6680 = vmatpush2.msra.mxu0 %v6633_v47  ;;  %v6629_v43 = vmul.f32 %v8104_v40, %v13496_v52  ;;  %v14190_v25 = vld [vmem:[#allocation36_spill] sm:$0xff] }
0x222e   :  { %v8108_v42 = vpop.eup %8107  ;;  %8133 = vtanh.f32 %v6190_v14  ;;  %6681 = vmatprep.subr.mxu0 %v6632_v28  ;;  %v6628_v37 = vmul.f32 %v8106_v30, %v13486_v4  ;;  %v14189_v14 = vld [vmem:[#allocation37_spill] sm:$0xff]  ;;  %v9038_v40 = vld [vmem:[%s13625_s4] sm:$0xff] }
0x222f   :  { %v8110_v60 = vpop.eup %8109  ;;  %8135 = vtanh.f32 %v6188_v50  ;;  %6682 = vmatpush2.msra.mxu0 %v6631_v9  ;;  %v6627_v19 = vmul.f32 %v8108_v42, %v13476_v11  ;;  %v14191_v50 = vld [vmem:[#allocation35_spill] sm:$0xff]  ;;  %v9041_v28 = vld [vmem:[%s13625_s4 + $0x28] sm:$0xff]  ;;  %v9042_v30 = vld [vmem:[%s13625_s4 + $0x20] sm:$0xff] }
0x2230   :  { %v8112_v51 = vpop.eup %8111  ;;  %8137 = vtanh.f32 %v6184_v16  ;;  %6683 = vmatprep.subr.mxu0 %v6630_v44  ;;  %v6626_v63 = vmul.f32 %v8110_v60, %v13462_v29  ;;  %v9040_v16 = vld [vmem:[%s13625_s4 + $0x10] sm:$0xff] }
0x2231   :  { %v8114_v49 = vpop.eup %8113  ;;  %8139 = vtanh.f32 %v6182_v23  ;;  %6684 = vmatpush2.msra.mxu0 %v6629_v43  ;;  %v6625_v52 = vmul.f32 %v8112_v51, %v13448_v22  ;;  %v9044_v23 = vld [vmem:[%s13625_s4 + $0x30] sm:$0xff] }
0x2232   :  { %v8116_v61 = vpop.eup %8115  ;;  %8141 = vtanh.f32 %v6180_v55  ;;  %6685 = vmatprep.subr.mxu0 %v6628_v37  ;;  %v6624_v13 = vmul.f32 %v8114_v49, %v13434_v35  ;;  %v14193_v37 = vld [vmem:[#allocation12_spill] sm:$0xff] }
0x2233   :  { %v8118_v39 = vpop.eup %8117  ;;  %8143 = vtanh.f32 %v6178_v59  ;;  %6686 = vmatpush2.msra.mxu0 %v6627_v19  ;;  %v6623_v58 = vmul.f32 %v8116_v61, %v13424_v36  ;;  %v14192_v59 = vld [vmem:[#allocation11_spill] sm:$0xff]  ;;  %v14194_v19 = vld [vmem:[#allocation13_spill] sm:$0xff] }
0x2234   :  { %v8120_v5 = vpop.eup %8119  ;;  %6687 = vmatprep.subr.mxu0 %v6626_v63  ;;  %v6622_v15 = vmul.f32 %v8118_v39, %v13415_v33  ;;  %v14195_v63 = vld [vmem:[#allocation14_spill] sm:$0xff] }
0x2235   :  { %v8122_v4 = vpop.eup %8121  ;;  %6688 = vmatpush2.msra.mxu0 %v6625_v52  ;;  %v6621_v29 = vmul.f32 %v8120_v5, %v13409_v18  ;;  %v14196_v52 = vld [vmem:[#allocation15_spill] sm:$0xff] }
0x2236   :  { %v8124_v11 = vpop.eup %8123  ;;  %6689 = vmatprep.subr.mxu0 %v6624_v13  ;;  %v6620_v22 = vmul.f32 %v8122_v4, %v13403_v7  ;;  %v14197_v13 = vld [vmem:[#allocation45_spill] sm:$0xff] }
0x2237   :  { %v8126_v45 = vpop.eup %8125  ;;  %6690 = vmatpush2.msra.mxu0 %v6623_v58  ;;  %v6619_v35 = vmul.f32 %v8124_v11, %v14181_v21  ;;  %v14198_v11 = vld [vmem:[#allocation34_spill] sm:$0xff] }
0x2238   :  { %v8128_v53 = vpop.eup %8127  ;;  %6691 = vmatprep.subr.mxu0 %v6622_v15  ;;  %v6618_v36 = vmul.f32 %v8126_v45, %v14182_v10  ;;  %v7248_v21 = vld [vmem:[%s13623_s2 + $0xb0] sm:$0xff]   ;;  %v226_v10 = vld [vmem:[#allocation2 + $0x308] sm:$0xff]  ;;  %s9065_s2 = scalar_lea.vmem %s6803_s17, 512 }
0x2239   :  { %v8130_v46 = vpop.eup %8129  ;;  %6692 = vmatpush2.msra.mxu0 %v6621_v29  ;;  %v6617_v33 = vmul.f32 %v8128_v53, %v14183_v41  ;;  %v14199_v53 = vld [vmem:[#allocation33_spill] sm:$0xff]  ;;  %v227_v41 = vld [vmem:[#allocation2 + $0x310] sm:$0xff]  ;;  %p9066_p5 = scmp.ne.s32.totalorder %s6803_s17, %s9065_s2  ;;  %p9071_p7 = scmp.lt.s32.totalorder %s9065_s2, %s9065_s2 }
0x223a   :  { %v8132_v34 = vpop.eup %8131  ;;  %6693 = vmatprep.subr.mxu0 %v6620_v22  ;;  %v6616_v18 = vmul.f32 %v8130_v46, %v14184_v62  ;;  %v228_v62 = vld [vmem:[#allocation2 + $0x318] sm:$0xff] }
0x223b   :  { %v8134_v6 = vpop.eup %8133  ;;  %6694 = vmatpush2.msra.mxu0 %v6619_v35  ;;  %v6615_v7 = vmul.f32 %v8132_v34, %v14185_v26  ;;  %v225_v35 = vld [vmem:[#allocation2 + $0x300] sm:$0xff]  ;;  %p9072_p8 = por %p9071_p7, %p9070_p6 }
0x223c   :  { %v8136_v8 = vpop.eup %8135  ;;  %6695 = vmatprep.subr.mxu0 %v6618_v36  ;;  %v6614_v3 = vmul.f32 %v8134_v6, %v14186_v32 }
0x223d   :  { %v8138_v38 = vpop.eup %8137  ;;  %6696 = vmatpush2.msra.mxu0 %v6617_v33  ;;  %v6613_v54 = vmul.f32 %v8136_v8, %v14187_v20  ;;  %p9073_p9 = pnand %p9072_p8, %p9066_p5 }
0x223e   :  { %v8140_v27 = vpop.eup %8139  ;;  %6697 = vmatprep.subr.mxu0 %v6616_v18  ;;  %v6612_v24 = vmul.f32 %v8138_v38, %v14188_v2 }
0x223f   :  { %v8142_v0 = vpop.eup %8141  ;;  %6698 = vmatpush2.msra.mxu0 %v6615_v7  ;;  %v6611_v56 = vmul.f32 %v8140_v27, %v14189_v14 }
0x2240   :  { %v8144_v48 = vpop.eup %8143  ;;  %6699 = vmatprep.subr.mxu0 %v6614_v3  ;;  %v6610_v17 = vmul.f32 %v8142_v0, %v14190_v25 }
0x2241   :  { %6700 = vmatpush2.msra.mxu0 %v6613_v54  ;;  %v6609_v47 = vmul.f32 %v8144_v48, %v14191_v50 }
0x2242   :  { %6701 = vmatprep.subr.mxu0 %v6612_v24 }
0x2243   :  { %6702 = vmatpush2.msra.mxu0 %v6611_v56 }
0x2244   :  { %6703 = vmatprep.subr.mxu0 %v6610_v17 }
0x2245   :  { %6704 = vmatpush2.msra.mxu0 %v6609_v47 }
0x2246   :  { %6706 = vmatmul.mubr.f32.vlgmr.msra.gmra.mxu0 %v9038_v40 }
0x2247   :  { %6711 = vmatprep.mubr.f32.mxu0 %v9039_v31 }
0x224a   :  { %6712 = vmatmul.mubr.f32.gmra.mxu0 %v9040_v16 }
0x224b   :  { %6717 = vmatprep.mubr.f32.mxu0 %v9041_v28 }
0x224e   :  { %6718 = vmatmul.mubr.f32.gmra.mxu0 %v9042_v30 }
0x224f   :  { %6723 = vmatprep.mubr.f32.mxu0 %v9043_v57 }
0x2252   :  { %6724 = vmatmul.mubr.f32.gmra.mxu0 %v9044_v23 }
0x2306   :  { %v6707_v9 = vpop.f32.mrf.mxu0 }
0x2307   :  { %v6730_v22 = vadd.f32 %v6707_v9, %v14199_v53 }
0x2308   :  { %v6709_v42 = vpop.f32.mrf.mxu0 }
0x2309   :  { %v6731_v4 = vadd.f32 %v6709_v42, %v14197_v13 }
0x230a   :  { %v6713_v12 = vpop.f32.mrf.mxu0 }
0x230b   :  { %v6732_v15 = vadd.f32 %v6713_v12, %v14198_v11 }
0x230c   :  { %v6715_v55 = vpop.f32.mrf.mxu0 }
0x230d   :  { %v6733_v49 = vadd.f32 %v6715_v55, %v14193_v37  ;;  %v6738_v46 = vpack.c.bf16 %v6732_v15, %v6730_v22 }
0x230e   :  { %v6719_v44 = vpop.f32.mrf.mxu0 }
0x230f   :  { %v6734_v5 = vadd.f32 %v6719_v44, %v14196_v52  ;;  %v6739_v29 = vpack.c.bf16 %v6733_v49, %v6731_v4 }
0x2310   :  { %v6721_v60 = vpop.f32.mrf.mxu0 }
0x2311   :  { %v6735_v61 = vadd.f32 %v6721_v60, %v14194_v19 }
0x2312   :  { %v6725_v1 = vpop.f32.mrf.mxu0 }
0x2313   :  { %v6736_v43 = vadd.f32 %v6725_v1, %v14192_v59 }
0x2314   :  { %v6727_v51 = vpop.f32.mrf.mxu0 }
0x2315   :  { %v6737_v39 = vadd.f32 %v6727_v51, %v14195_v63  ;;  %v6740_v45 = vpack.c.bf16 %v6736_v43, %v6734_v5 }
0x2317   :  { %v6741_v58 = vpack.c.bf16 %v6737_v39, %v6735_v61 }
0x2319   :  { %6762 = vmatprep.subr.bf16.mxu1 %v6741_v58 }
0x231a   :  { %6763 = vmatpush1.bf16.msra.mxu1 %v6740_v45 }
0x231b   :  { %6764 = vmatprep.subr.bf16.mxu1 %v6739_v29 }
0x231e   :  { %6765 = vmatpush1.bf16.msra.mxu1 %v6738_v46 }
0x2321   :  { %7219 = vmatmul.mubr.msk.bf16.vlgmr.msra.gmra.mxu1 %vm349_vm1, %v7248_v21 }
0x23e1   :  { %v6784_v34 = vpop.f32.mrf.mxu1 }
0x23e2   :  { %v6785_v36 = vadd.f32 %v6784_v34, %v225_v35 }
0x23e3   :  { %v6786_v6 = vpop.f32.mrf.mxu1 }
0x23e4   :  { %6793 = vst [vmem:[#allocation5] sm:$0xff] %v6785_v36  ;;  %v6787_v33 = vadd.f32 %v6786_v6, %v226_v10 }
0x23e5   :  { %v6788_v8 = vpop.f32.mrf.mxu1 }
0x23e6   :  { %6794 = vst [vmem:[#allocation5 + $0x8] sm:$0xff] %v6787_v33  ;;  %v6789_v18 = vadd.f32 %v6788_v8, %v227_v41 }
0x23e7   :  { %v6790_v38 = vpop.f32.mrf.mxu1 }
0x23e8   :  { %6795 = vst [vmem:[#allocation5 + $0x10] sm:$0xff] %v6789_v18  ;;  %v6791_v26 = vadd.f32 %v6790_v38, %v228_v62 }
0x23ea   :  { %6796 = vst [vmem:[#allocation5 + $0x18] sm:$0xff] %v6791_v26 }
0x23eb   :  { %9076 = shalt.err (!%p9073_p9)
}
0x23ec   :  { %6808 = dma.vmem_to_hbm [thread:$0]  %s6803_s17, 512, %s13627_s6, [#allocation4], %s9090_s24, %s9090_s24, %s9091_s25  }
0x23ed   :  { %9087 = dma.done.wait [#allocation4], 512  }
0x23ee   :  { %9088 = vsyncadd [#allocation4], 4294966784 }
0x23ef   :  { %6812 = vsyncpa [#allocation3], 1 }
0x23f0   :  { %6813 = vsyncpa [#allocation4], 1 }

</bundles_post_ra>
